<compile_context>
chip_gen: v5e
topology: v5e:2x2
jax: 0.10.0
libtpu: 0.0.40
codegen_flags: <defaults>
</compile_context>

<pallas_src>
import math

import jax
import jax.numpy as jnp
from jax import lax
from jax.experimental import pallas as pl
from jax.experimental.pallas import tpu as pltpu


def salad_kernel(x_ref, w1_ref, w2_ref, b2_ref, alpha_ref, out_ref):
    # x_ref   : [Caug, Bt*N] bf16   (channels-leading, last row(s) = ones/zeros bias pad)
    # w1_ref  : [2H, Caug]   bf16   (fused cluster|score first layer, bias folded in)
    # w2_ref  : [L+M, 2H]    bf16   (block-diagonal fused second layers)
    # b2_ref  : [L+M, 1]     f32
    # alpha   : SMEM scalar (dust_bin)
    # out_ref : [Bt, L, M]   f32    (per-column L2-normalized aggregated descriptors)
    Bt, L, Mc = out_ref.shape
    n_all = x_ref.shape[1]
    N = n_all // Bt

    # --- fused first layer (bias folded): [2H, Caug] @ [Caug, Bt*N] ---
    h = jnp.dot(w1_ref[...], x_ref[...], preferred_element_type=jnp.float32)   # [2H, Bt*N]
    h = jnp.maximum(h, 0.0).astype(jnp.bfloat16)

    # --- block-diagonal second layers: one MXU pass for cluster + score heads ---
    fs = jnp.dot(w2_ref[...], h, preferred_element_type=jnp.float32) + b2_ref[...]  # [L+M, Bt*N]
    fT_all = fs[:L]            # [L, Bt*N]  (cluster features, transposed)
    sT_all = fs[L:L + Mc]      # [M, Bt*N]  (scores, transposed)

    alpha = alpha_ref[0]                       # scalar from SMEM
    norm = -math.log(Mc + N)
    log_nm = math.log(N - Mc) + norm           # requires N > M (asserted in wrapper)

    def lse(a, axis):
        mx = jnp.max(a, axis=axis, keepdims=True)
        return mx + jnp.log(jnp.sum(jnp.exp(a - mx), axis=axis, keepdims=True))

    # --- per-batch Sinkhorn + aggregation (static unrolled loop, lane-aligned slices) ---
    for b in range(Bt):
        sT = sT_all[:, b * N:(b + 1) * N]      # [M, N]  f32
        fT = fT_all[:, b * N:(b + 1) * N]      # [L, N]  f32

        # log_optimal_transport (3 iterations); dust-bin row folded analytically —
        # couplings = [sT ; alpha*ones(1,N)] is never materialized.
        v = jnp.zeros((1, N), jnp.float32)
        u = jnp.zeros((Mc, 1), jnp.float32)
        for _ in range(3):
            u = norm - lse(sT + v, axis=1)                     # [M, 1]
            ub = log_nm - (alpha + lse(v, axis=1))             # [1, 1] (bin row is constant alpha)
            col = lse(sT + u, axis=0)                          # [1, N] reduce over M main rows
            bin_col = alpha + ub                               # [1, 1]
            mx = jnp.maximum(col, bin_col)
            v = norm - (mx + jnp.log(jnp.exp(col - mx) + jnp.exp(bin_col - mx)))

        P = jnp.exp(sT + u + v - norm)                         # [M, N]; dust-bin row dropped

        # agg[l, m] = sum_n fT[l, n] * P[m, n]  — contract over N, f32, no transpose
        agg = lax.dot_general(fT, P,
                              dimension_numbers=(((1,), (1,)), ((), ())),
                              preferred_element_type=jnp.float32)   # [L, M]

        # per-column L2 normalization (matches normalize(..., dim=1)); rsqrt -> EUP slot
        inv = lax.rsqrt(jnp.maximum(jnp.sum(agg * agg, axis=0, keepdims=True), 1e-24))
        out_ref[b] = agg * inv


def _cores_per_chip():
    # Heuristic: v7x has 2 TensorCores per chip; keep the grid length a multiple of 2 there.
    try:
        kind = jax.devices()[0].device_kind.lower()
        return 2 if "v7" in kind else 1
    except Exception:  # pragma: no cover
        return 1


def salad_forward(x_nchw, t, params, batch_tile=None):
    (wc1, bc1, wc2, bc2, ws1, bs1, ws2, bs2, wt1, bt1, wt2, bt2, alpha) = params
    B, C, H, W = x_nchw.shape
    N = H * W
    HID = wc1.shape[1]
    L = wc2.shape[1]
    M = ws2.shape[1]
    assert N > M, "Sinkhorn dust-bin needs H*W > num_clusters (log(N-M))"
    assert L % 8 == 0, "cluster_dim must be a multiple of 8 for relayout-free row slices"

    cores = _cores_per_chip()
    # pad the bias row so the contraction dim is a multiple of 8 (lane/sublane friendly)
    Caug = ((C + 1 + 7) // 8) * 8
    pad = Caug - (C + 1)

    # --- pick batch tile Bt: fill VMEM (amortize per-step overhead) but keep grid even on v7x ---
    if batch_tile is None:
        per_b = (2 * Caug * N * 2          # x block (bf16, double-buffered)
                 + 2 * HID * N * (4 + 2)   # h in f32 + bf16 copy
                 + 4 * (L + M) * N * 4)    # fs / fT / sT / P working set
        budget = 32 * 1024 * 1024
        cap = max(1, budget // per_b)
        cands = [d for d in range(1, B + 1)
                 if B % d == 0 and d <= cap and ((d * N) % 128 == 0 or d == B)]
        pref = [d for d in cands if (B // d) % cores == 0]
        batch_tile = max(pref) if pref else (max(cands) if cands else 1)
    Bt = batch_tile
    assert B % Bt == 0
    assert (Bt * N) % 128 == 0 or Bt == B

    # --- wrapper-side layout: NCHW -> channels-leading [Caug, B*N] with bias row folded in ---
    x2 = jnp.transpose(x_nchw, (1, 0, 2, 3)).reshape(C, B * N)
    aug = jnp.concatenate(
        [jnp.ones((1, B * N), x2.dtype), jnp.zeros((pad, B * N), x2.dtype)], axis=0)
    x_aug = jnp.concatenate([x2, aug], axis=0).astype(jnp.bfloat16)          # [Caug, B*N]

    # fused first-layer weight with bias column (+ zero pad columns)
    w1t = jnp.concatenate([wc1.T, ws1.T], axis=0)                             # [2H, C]
    b1c = jnp.concatenate([bc1, bs1], axis=1).T                               # [2H, 1]
    w1_aug = jnp.concatenate(
        [w1t, b1c, jnp.zeros((2 * HID, pad), w1t.dtype)], axis=1).astype(jnp.bfloat16)  # [2H, Caug]

    # block-diagonal fused second layer: [wc2^T 0 ; 0 ws2^T]
    w2bd = jnp.concatenate([
        jnp.concatenate([wc2.T, jnp.zeros((L, HID), wc2.dtype)], axis=1),
        jnp.concatenate([jnp.zeros((M, HID), ws2.dtype), ws2.T], axis=1)],
        axis=0).astype(jnp.bfloat16)                                          # [L+M, 2H]
    b2c = jnp.concatenate([bc2, bs2], axis=1).T.astype(jnp.float32)           # [L+M, 1]

    alpha1 = alpha.reshape(1).astype(jnp.float32)                             # (1,) scalar in SMEM

    def const_spec(shape):   # constant weight blocks: same block every grid step
        return pl.BlockSpec(shape, lambda i: (0, 0))

    agg_n = pl.pallas_call(
        salad_kernel,
        out_shape=jax.ShapeDtypeStruct((B, L, M), jnp.float32),
        grid=(B // Bt,),
        in_specs=[
            pl.BlockSpec((Caug, Bt * N), lambda i: (0, i)),
            const_spec(w1_aug.shape),
            const_spec(w2bd.shape),
            const_spec(b2c.shape),
            pl.BlockSpec(memory_space=pltpu.MemorySpace.SMEM),   # alpha scalar
        ],
        out_specs=pl.BlockSpec((Bt, L, M), lambda i: (i, 0, 0)),
        compiler_params=pltpu.CompilerParams(
            dimension_semantics=("parallel",),
            # v7x has 64 MiB physical VMEM; leave headroom there, be generous elsewhere
            vmem_limit_bytes=(48 if cores == 2 else 64) * 1024 * 1024),
    )(x_aug, w1_aug, w2bd, b2c, alpha1)

    # --- token MLP + final joint L2 norm in plain XLA (tiny, m=1 matmuls would waste the MXU) ---
    tk = jnp.maximum(t.astype(jnp.float32) @ wt1 + bt1, 0.0) @ wt2 + bt2      # [B, G]
    tk_n = tk / jnp.maximum(jnp.linalg.norm(tk, axis=-1, keepdims=True), 1e-12)
    out = jnp.concatenate([tk_n, agg_n.reshape(B, L * M)], axis=-1)
    return out / jnp.maximum(jnp.linalg.norm(out, axis=-1, keepdims=True), 1e-12)


def salad_reference(x_nchw, t, params):
    """Pure-JAX f32 reference mirroring the PyTorch forward exactly."""
    (wc1, bc1, wc2, bc2, ws1, bs1, ws2, bs2, wt1, bt1, wt2, bt2, alpha) = params
    B, C, H, W = x_nchw.shape
    xf = jnp.transpose(x_nchw, (0, 2, 3, 1)).reshape(B, H * W, C)

    f = jnp.maximum(xf @ wc1 + bc1, 0.0) @ wc2 + bc2          # [B, N, L]
    f = jnp.transpose(f, (0, 2, 1))                           # [B, L, N]
    s = jnp.maximum(xf @ ws1 + bs1, 0.0) @ ws2 + bs2          # [B, N, M]
    s = jnp.transpose(s, (0, 2, 1))                           # [B, M, N]
    tk = jnp.maximum(t @ wt1 + bt1, 0.0) @ wt2 + bt2          # [B, G]

    b, m, n = s.shape
    a = alpha[0, 0]
    couplings = jnp.concatenate([s, jnp.full((b, 1, n), a)], axis=1)
    norm = -jnp.log(jnp.float32(m + n))
    log_mu = jnp.concatenate([jnp.full((m,), norm),
                              (jnp.log(jnp.float32(n - m)) + norm)[None]])
    log_nu = jnp.full((n,), norm)
    log_mu = jnp.broadcast_to(log_mu, (b, m + 1))
    log_nu = jnp.broadcast_to(log_nu, (b, n))
    u = jnp.zeros_like(log_mu)
    v = jnp.zeros_like(log_nu)
    for _ in range(3):
        u = log_mu - jax.scipy.special.logsumexp(couplings + v[:, None, :], axis=2)
        v = log_nu - jax.scipy.special.logsumexp(couplings + u[:, :, None], axis=1)
    Z = couplings + u[:, :, None] + v[:, None, :] - norm
    p = jnp.exp(Z)[:, :-1, :]                                 # [B, M, N]

    agg = jnp.einsum('bln,bmn->blm', f, p)                    # [B, L, M]
    agg = agg / jnp.maximum(jnp.linalg.norm(agg, axis=1, keepdims=True), 1e-12)
    tkn = tk / jnp.maximum(jnp.linalg.norm(tk, axis=-1, keepdims=True), 1e-12)
    out = jnp.concatenate([tkn, agg.reshape(b, -1)], axis=-1)
    return out / jnp.maximum(jnp.linalg.norm(out, axis=-1, keepdims=True), 1e-12)


def init_params(key, num_channels, num_clusters, cluster_dim, token_dim, hidden=512):
    ks = jax.random.split(key, 12)
    scale = 0.05

    def w(k, shape):
        return (scale * jax.random.normal(k, shape)).astype(jnp.float32)

    wc1 = w(ks[0], (num_channels, hidden));  bc1 = w(ks[1], (1, hidden))
    wc2 = w(ks[2], (hidden, cluster_dim));   bc2 = w(ks[3], (1, cluster_dim))
    ws1 = w(ks[4], (num_channels, hidden));  bs1 = w(ks[5], (1, hidden))
    ws2 = w(ks[6], (hidden, num_clusters));  bs2 = w(ks[7], (1, num_clusters))
    wt1 = w(ks[8], (num_channels, hidden));  bt1 = w(ks[9], (1, hidden))
    wt2 = w(ks[10], (hidden, token_dim));    bt2 = w(ks[11], (1, token_dim))
    alpha = jnp.ones((1, 1), jnp.float32)    # dust_bin = 1.0
    return (wc1, bc1, wc2, bc2, ws1, bs1, ws2, bs2, wt1, bt1, wt2, bt2, alpha)


if __name__ == "__main__":
    # Small shapes consistent with the module; N = H*W = 256 (lane-dense, > num_clusters).
    B, C, H, W = 2, 128, 16, 16
    num_clusters, cluster_dim, token_dim = 16, 32, 64

    key = jax.random.PRNGKey(0)
    kx, kt, kp = jax.random.split(key, 3)
    x = jax.random.normal(kx, (B, C, H, W), dtype=jnp.float32)   # NCHW like PyTorch
    t = jax.random.normal(kt, (B, C), dtype=jnp.float32)
    params = init_params(kp, C, num_clusters, cluster_dim, token_dim)

    out = jax.block_until_ready(salad_forward(x, t, params))
    ref = jax.block_until_ready(salad_reference(x, t, params))

    assert out.shape == (B, token_dim + num_clusters * cluster_dim), out.shape
    # bf16 MXU inputs with f32 accumulation -> loosened tolerance vs. the f32 reference.
    max_err = float(jnp.max(jnp.abs(out - ref)))
    assert jnp.allclose(out, ref, rtol=2e-2, atol=2e-2), max_err
    print("KERNEL_OK")
</pallas_src>

<mosaic_0001>
module attributes {stable_mosaic.version = 11 : i64} {
  func.func @salad_kernel(%arg0: i32, %arg1: memref<136x512xbf16, #tpu.memory_space<vmem>>, %arg2: memref<1024x136xbf16, #tpu.memory_space<vmem>>, %arg3: memref<48x1024xbf16, #tpu.memory_space<vmem>>, %arg4: memref<48x1xf32, #tpu.memory_space<vmem>>, %arg5: memref<1xf32, #tpu.memory_space<smem>>, %arg6: memref<2x32x16xf32, #tpu.memory_space<vmem>>) attributes {dimension_semantics = [#tpu.dimension_semantics<parallel>], iteration_bounds = array<i64: 1>, scalar_prefetch = 0 : i64, scratch_operands = 0 : i64, tpu.core_type = #tpu.core_type<tc>, window_params = [{transform_indices = @transform_0, window_bounds = array<i64: 136, 512>}, {pipeline_mode = #tpu.pipeline_mode<synchronous>, transform_indices = @transform_1, window_bounds = array<i64: 1024, 136>}, {pipeline_mode = #tpu.pipeline_mode<synchronous>, transform_indices = @transform_2, window_bounds = array<i64: 48, 1024>}, {pipeline_mode = #tpu.pipeline_mode<synchronous>, transform_indices = @transform_3, window_bounds = array<i64: 48, 1>}, {transform_indices = @transform_4, window_bounds = array<i64: 1>}, {transform_indices = @transform_5, window_bounds = array<i64: 2, 32, 16>}]} {
    %c0 = arith.constant 0 : index
    %c0_0 = arith.constant 0 : index
    %0 = vector.load %arg2[%c0, %c0_0] : memref<1024x136xbf16, #tpu.memory_space<vmem>>, vector<1024x136xbf16>
    %c0_1 = arith.constant 0 : index
    %c0_2 = arith.constant 0 : index
    %1 = vector.load %arg1[%c0_1, %c0_2] : memref<136x512xbf16, #tpu.memory_space<vmem>>, vector<136x512xbf16>
    %cst = arith.constant dense<0.000000e+00> : vector<1024x512xf32>
    %2 = tpu.matmul %0, %1, %cst {dimension_numbers = #tpu.dot_dimension_numbers<[1], [0], [0], [1], [0, 0, 1, 1], [], []>} : vector<1024x136xbf16>, vector<136x512xbf16>, vector<1024x512xf32> -> vector<1024x512xf32>
    %cst_3 = arith.constant 0.000000e+00 : f32
    %3 = vector.broadcast %cst_3 : f32 to vector<1024x512xf32>
    %4 = arith.maximumf %2, %3 : vector<1024x512xf32>
    %5 = arith.truncf %4 : vector<1024x512xf32> to vector<1024x512xbf16>
    %c0_4 = arith.constant 0 : index
    %c0_5 = arith.constant 0 : index
    %6 = vector.load %arg3[%c0_4, %c0_5] : memref<48x1024xbf16, #tpu.memory_space<vmem>>, vector<48x1024xbf16>
    %cst_6 = arith.constant dense<0.000000e+00> : vector<48x512xf32>
    %7 = tpu.matmul %6, %5, %cst_6 {dimension_numbers = #tpu.dot_dimension_numbers<[1], [0], [0], [1], [0, 0, 1, 1], [], []>} : vector<48x1024xbf16>, vector<1024x512xbf16>, vector<48x512xf32> -> vector<48x512xf32>
    %c0_7 = arith.constant 0 : index
    %c0_8 = arith.constant 0 : index
    %8 = vector.load %arg4[%c0_7, %c0_8] : memref<48x1xf32, #tpu.memory_space<vmem>>, vector<48x1xf32>
    %9 = vector.broadcast %8 : vector<48x1xf32> to vector<48x512xf32>
    %10 = arith.addf %7, %9 : vector<48x512xf32>
    %11 = vector.extract_strided_slice %10 {offsets = [0, 0], sizes = [32, 512], strides = [1, 1]} : vector<48x512xf32> to vector<32x512xf32>
    %12 = vector.extract_strided_slice %10 {offsets = [32, 0], sizes = [16, 512], strides = [1, 1]} : vector<48x512xf32> to vector<16x512xf32>
    %c0_9 = arith.constant 0 : index
    %13 = memref.load %arg5[%c0_9] : memref<1xf32, #tpu.memory_space<smem>>
    %14 = vector.extract_strided_slice %12 {offsets = [0, 0], sizes = [16, 256], strides = [1, 1]} : vector<16x512xf32> to vector<16x256xf32>
    %15 = vector.extract_strided_slice %11 {offsets = [0, 0], sizes = [32, 256], strides = [1, 1]} : vector<32x512xf32> to vector<32x256xf32>
    %cst_10 = arith.constant 0.000000e+00 : f32
    %16 = vector.broadcast %cst_10 : f32 to vector<1x256xf32>
    %17 = vector.broadcast %16 : vector<1x256xf32> to vector<16x256xf32>
    %18 = arith.addf %14, %17 : vector<16x256xf32>
    %cst_11 = arith.constant dense<0xFF800000> : vector<16xf32>
    %19 = vector.multi_reduction <maximumf>, %18, %cst_11 [1] : vector<16x256xf32> to vector<16xf32>
    %20 = vector.shape_cast %19 : vector<16xf32> to vector<16x1xf32>
    %21 = vector.broadcast %20 : vector<16x1xf32> to vector<16x256xf32>
    %22 = arith.subf %18, %21 : vector<16x256xf32>
    %23 = math.exp %22 : vector<16x256xf32>
    %cst_12 = arith.constant dense<0.000000e+00> : vector<16xf32>
    %24 = vector.multi_reduction <add>, %23, %cst_12 [1] : vector<16x256xf32> to vector<16xf32>
    %25 = vector.shape_cast %24 : vector<16xf32> to vector<16x1xf32>
    %26 = math.log %25 : vector<16x1xf32>
    %27 = arith.addf %20, %26 : vector<16x1xf32>
    %cst_13 = arith.constant -5.60580206 : f32
    %28 = vector.broadcast %cst_13 : f32 to vector<16x1xf32>
    %29 = arith.subf %28, %27 : vector<16x1xf32>
    %cst_14 = arith.constant dense<0xFF800000> : vector<1xf32>
    %30 = vector.multi_reduction <maximumf>, %16, %cst_14 [1] : vector<1x256xf32> to vector<1xf32>
    %31 = vector.shape_cast %30 : vector<1xf32> to vector<1x1xf32>
    %32 = vector.broadcast %31 : vector<1x1xf32> to vector<1x256xf32>
    %33 = arith.subf %16, %32 : vector<1x256xf32>
    %34 = math.exp %33 : vector<1x256xf32>
    %cst_15 = arith.constant dense<0.000000e+00> : vector<1xf32>
    %35 = vector.multi_reduction <add>, %34, %cst_15 [1] : vector<1x256xf32> to vector<1xf32>
    %36 = vector.shape_cast %35 : vector<1xf32> to vector<1x1xf32>
    %37 = math.log %36 : vector<1x1xf32>
    %38 = arith.addf %31, %37 : vector<1x1xf32>
    %39 = vector.broadcast %13 : f32 to vector<1x1xf32>
    %40 = arith.addf %39, %38 : vector<1x1xf32>
    %cst_16 = arith.constant -0.125163138 : f32
    %41 = vector.broadcast %cst_16 : f32 to vector<1x1xf32>
    %42 = arith.subf %41, %40 : vector<1x1xf32>
    %43 = vector.broadcast %29 : vector<16x1xf32> to vector<16x256xf32>
    %44 = arith.addf %14, %43 : vector<16x256xf32>
    %cst_17 = arith.constant dense<0xFF800000> : vector<256xf32>
    %45 = vector.multi_reduction <maximumf>, %44, %cst_17 [0] : vector<16x256xf32> to vector<256xf32>
    %46 = vector.shape_cast %45 : vector<256xf32> to vector<1x256xf32>
    %47 = vector.broadcast %46 : vector<1x256xf32> to vector<16x256xf32>
    %48 = arith.subf %44, %47 : vector<16x256xf32>
    %49 = math.exp %48 : vector<16x256xf32>
    %cst_18 = arith.constant dense<0.000000e+00> : vector<256xf32>
    %50 = vector.multi_reduction <add>, %49, %cst_18 [0] : vector<16x256xf32> to vector<256xf32>
    %51 = vector.shape_cast %50 : vector<256xf32> to vector<1x256xf32>
    %52 = math.log %51 : vector<1x256xf32>
    %53 = arith.addf %46, %52 : vector<1x256xf32>
    %54 = vector.broadcast %13 : f32 to vector<1x1xf32>
    %55 = arith.addf %54, %42 : vector<1x1xf32>
    %56 = vector.broadcast %55 : vector<1x1xf32> to vector<1x256xf32>
    %57 = arith.maximumf %53, %56 : vector<1x256xf32>
    %58 = arith.subf %53, %57 : vector<1x256xf32>
    %59 = math.exp %58 : vector<1x256xf32>
    %60 = vector.broadcast %55 : vector<1x1xf32> to vector<1x256xf32>
    %61 = arith.subf %60, %57 : vector<1x256xf32>
    %62 = math.exp %61 : vector<1x256xf32>
    %63 = arith.addf %59, %62 : vector<1x256xf32>
    %64 = math.log %63 : vector<1x256xf32>
    %65 = arith.addf %57, %64 : vector<1x256xf32>
    %cst_19 = arith.constant -5.60580206 : f32
    %66 = vector.broadcast %cst_19 : f32 to vector<1x256xf32>
    %67 = arith.subf %66, %65 : vector<1x256xf32>
    %68 = vector.broadcast %67 : vector<1x256xf32> to vector<16x256xf32>
    %69 = arith.addf %14, %68 : vector<16x256xf32>
    %cst_20 = arith.constant dense<0xFF800000> : vector<16xf32>
    %70 = vector.multi_reduction <maximumf>, %69, %cst_20 [1] : vector<16x256xf32> to vector<16xf32>
    %71 = vector.shape_cast %70 : vector<16xf32> to vector<16x1xf32>
    %72 = vector.broadcast %71 : vector<16x1xf32> to vector<16x256xf32>
    %73 = arith.subf %69, %72 : vector<16x256xf32>
    %74 = math.exp %73 : vector<16x256xf32>
    %cst_21 = arith.constant dense<0.000000e+00> : vector<16xf32>
    %75 = vector.multi_reduction <add>, %74, %cst_21 [1] : vector<16x256xf32> to vector<16xf32>
    %76 = vector.shape_cast %75 : vector<16xf32> to vector<16x1xf32>
    %77 = math.log %76 : vector<16x1xf32>
    %78 = arith.addf %71, %77 : vector<16x1xf32>
    %cst_22 = arith.constant -5.60580206 : f32
    %79 = vector.broadcast %cst_22 : f32 to vector<16x1xf32>
    %80 = arith.subf %79, %78 : vector<16x1xf32>
    %cst_23 = arith.constant dense<0xFF800000> : vector<1xf32>
    %81 = vector.multi_reduction <maximumf>, %67, %cst_23 [1] : vector<1x256xf32> to vector<1xf32>
    %82 = vector.shape_cast %81 : vector<1xf32> to vector<1x1xf32>
    %83 = vector.broadcast %82 : vector<1x1xf32> to vector<1x256xf32>
    %84 = arith.subf %67, %83 : vector<1x256xf32>
    %85 = math.exp %84 : vector<1x256xf32>
    %cst_24 = arith.constant dense<0.000000e+00> : vector<1xf32>
    %86 = vector.multi_reduction <add>, %85, %cst_24 [1] : vector<1x256xf32> to vector<1xf32>
    %87 = vector.shape_cast %86 : vector<1xf32> to vector<1x1xf32>
    %88 = math.log %87 : vector<1x1xf32>
    %89 = arith.addf %82, %88 : vector<1x1xf32>
    %90 = vector.broadcast %13 : f32 to vector<1x1xf32>
    %91 = arith.addf %90, %89 : vector<1x1xf32>
    %cst_25 = arith.constant -0.125163138 : f32
    %92 = vector.broadcast %cst_25 : f32 to vector<1x1xf32>
    %93 = arith.subf %92, %91 : vector<1x1xf32>
    %94 = vector.broadcast %80 : vector<16x1xf32> to vector<16x256xf32>
    %95 = arith.addf %14, %94 : vector<16x256xf32>
    %cst_26 = arith.constant dense<0xFF800000> : vector<256xf32>
    %96 = vector.multi_reduction <maximumf>, %95, %cst_26 [0] : vector<16x256xf32> to vector<256xf32>
    %97 = vector.shape_cast %96 : vector<256xf32> to vector<1x256xf32>
    %98 = vector.broadcast %97 : vector<1x256xf32> to vector<16x256xf32>
    %99 = arith.subf %95, %98 : vector<16x256xf32>
    %100 = math.exp %99 : vector<16x256xf32>
    %cst_27 = arith.constant dense<0.000000e+00> : vector<256xf32>
    %101 = vector.multi_reduction <add>, %100, %cst_27 [0] : vector<16x256xf32> to vector<256xf32>
    %102 = vector.shape_cast %101 : vector<256xf32> to vector<1x256xf32>
    %103 = math.log %102 : vector<1x256xf32>
    %104 = arith.addf %97, %103 : vector<1x256xf32>
    %105 = vector.broadcast %13 : f32 to vector<1x1xf32>
    %106 = arith.addf %105, %93 : vector<1x1xf32>
    %107 = vector.broadcast %106 : vector<1x1xf32> to vector<1x256xf32>
    %108 = arith.maximumf %104, %107 : vector<1x256xf32>
    %109 = arith.subf %104, %108 : vector<1x256xf32>
    %110 = math.exp %109 : vector<1x256xf32>
    %111 = vector.broadcast %106 : vector<1x1xf32> to vector<1x256xf32>
    %112 = arith.subf %111, %108 : vector<1x256xf32>
    %113 = math.exp %112 : vector<1x256xf32>
    %114 = arith.addf %110, %113 : vector<1x256xf32>
    %115 = math.log %114 : vector<1x256xf32>
    %116 = arith.addf %108, %115 : vector<1x256xf32>
    %cst_28 = arith.constant -5.60580206 : f32
    %117 = vector.broadcast %cst_28 : f32 to vector<1x256xf32>
    %118 = arith.subf %117, %116 : vector<1x256xf32>
    %119 = vector.broadcast %118 : vector<1x256xf32> to vector<16x256xf32>
    %120 = arith.addf %14, %119 : vector<16x256xf32>
    %cst_29 = arith.constant dense<0xFF800000> : vector<16xf32>
    %121 = vector.multi_reduction <maximumf>, %120, %cst_29 [1] : vector<16x256xf32> to vector<16xf32>
    %122 = vector.shape_cast %121 : vector<16xf32> to vector<16x1xf32>
    %123 = vector.broadcast %122 : vector<16x1xf32> to vector<16x256xf32>
    %124 = arith.subf %120, %123 : vector<16x256xf32>
    %125 = math.exp %124 : vector<16x256xf32>
    %cst_30 = arith.constant dense<0.000000e+00> : vector<16xf32>
    %126 = vector.multi_reduction <add>, %125, %cst_30 [1] : vector<16x256xf32> to vector<16xf32>
    %127 = vector.shape_cast %126 : vector<16xf32> to vector<16x1xf32>
    %128 = math.log %127 : vector<16x1xf32>
    %129 = arith.addf %122, %128 : vector<16x1xf32>
    %cst_31 = arith.constant -5.60580206 : f32
    %130 = vector.broadcast %cst_31 : f32 to vector<16x1xf32>
    %131 = arith.subf %130, %129 : vector<16x1xf32>
    %cst_32 = arith.constant dense<0xFF800000> : vector<1xf32>
    %132 = vector.multi_reduction <maximumf>, %118, %cst_32 [1] : vector<1x256xf32> to vector<1xf32>
    %133 = vector.shape_cast %132 : vector<1xf32> to vector<1x1xf32>
    %134 = vector.broadcast %133 : vector<1x1xf32> to vector<1x256xf32>
    %135 = arith.subf %118, %134 : vector<1x256xf32>
    %136 = math.exp %135 : vector<1x256xf32>
    %cst_33 = arith.constant dense<0.000000e+00> : vector<1xf32>
    %137 = vector.multi_reduction <add>, %136, %cst_33 [1] : vector<1x256xf32> to vector<1xf32>
    %138 = vector.shape_cast %137 : vector<1xf32> to vector<1x1xf32>
    %139 = math.log %138 : vector<1x1xf32>
    %140 = arith.addf %133, %139 : vector<1x1xf32>
    %141 = vector.broadcast %13 : f32 to vector<1x1xf32>
    %142 = arith.addf %141, %140 : vector<1x1xf32>
    %cst_34 = arith.constant -0.125163138 : f32
    %143 = vector.broadcast %cst_34 : f32 to vector<1x1xf32>
    %144 = arith.subf %143, %142 : vector<1x1xf32>
    %145 = vector.broadcast %131 : vector<16x1xf32> to vector<16x256xf32>
    %146 = arith.addf %14, %145 : vector<16x256xf32>
    %cst_35 = arith.constant dense<0xFF800000> : vector<256xf32>
    %147 = vector.multi_reduction <maximumf>, %146, %cst_35 [0] : vector<16x256xf32> to vector<256xf32>
    %148 = vector.shape_cast %147 : vector<256xf32> to vector<1x256xf32>
    %149 = vector.broadcast %148 : vector<1x256xf32> to vector<16x256xf32>
    %150 = arith.subf %146, %149 : vector<16x256xf32>
    %151 = math.exp %150 : vector<16x256xf32>
    %cst_36 = arith.constant dense<0.000000e+00> : vector<256xf32>
    %152 = vector.multi_reduction <add>, %151, %cst_36 [0] : vector<16x256xf32> to vector<256xf32>
    %153 = vector.shape_cast %152 : vector<256xf32> to vector<1x256xf32>
    %154 = math.log %153 : vector<1x256xf32>
    %155 = arith.addf %148, %154 : vector<1x256xf32>
    %156 = vector.broadcast %13 : f32 to vector<1x1xf32>
    %157 = arith.addf %156, %144 : vector<1x1xf32>
    %158 = vector.broadcast %157 : vector<1x1xf32> to vector<1x256xf32>
    %159 = arith.maximumf %155, %158 : vector<1x256xf32>
    %160 = arith.subf %155, %159 : vector<1x256xf32>
    %161 = math.exp %160 : vector<1x256xf32>
    %162 = vector.broadcast %157 : vector<1x1xf32> to vector<1x256xf32>
    %163 = arith.subf %162, %159 : vector<1x256xf32>
    %164 = math.exp %163 : vector<1x256xf32>
    %165 = arith.addf %161, %164 : vector<1x256xf32>
    %166 = math.log %165 : vector<1x256xf32>
    %167 = arith.addf %159, %166 : vector<1x256xf32>
    %cst_37 = arith.constant -5.60580206 : f32
    %168 = vector.broadcast %cst_37 : f32 to vector<1x256xf32>
    %169 = arith.subf %168, %167 : vector<1x256xf32>
    %170 = vector.broadcast %131 : vector<16x1xf32> to vector<16x256xf32>
    %171 = arith.addf %14, %170 : vector<16x256xf32>
    %172 = vector.broadcast %169 : vector<1x256xf32> to vector<16x256xf32>
    %173 = arith.addf %171, %172 : vector<16x256xf32>
    %cst_38 = arith.constant -5.60580206 : f32
    %174 = vector.broadcast %cst_38 : f32 to vector<16x256xf32>
    %175 = arith.subf %173, %174 : vector<16x256xf32>
    %176 = math.exp %175 : vector<16x256xf32>
    %cst_39 = arith.constant dense<0.000000e+00> : vector<32x16xf32>
    %177 = tpu.matmul %15, %176, %cst_39 {dimension_numbers = #tpu.dot_dimension_numbers<[1], [1], [0], [0], [0, 0, 1, 0], [], []>} : vector<32x256xf32>, vector<16x256xf32>, vector<32x16xf32> -> vector<32x16xf32>
    %178 = arith.mulf %177, %177 : vector<32x16xf32>
    %cst_40 = arith.constant dense<0.000000e+00> : vector<16xf32>
    %179 = vector.multi_reduction <add>, %178, %cst_40 [0] : vector<32x16xf32> to vector<16xf32>
    %180 = vector.shape_cast %179 : vector<16xf32> to vector<1x16xf32>
    %cst_41 = arith.constant 1.000000e-24 : f32
    %181 = vector.broadcast %cst_41 : f32 to vector<1x16xf32>
    %182 = arith.maximumf %180, %181 : vector<1x16xf32>
    %183 = math.rsqrt %182 : vector<1x16xf32>
    %184 = vector.broadcast %183 : vector<1x16xf32> to vector<32x16xf32>
    %185 = arith.mulf %177, %184 : vector<32x16xf32>
    %c0_42 = arith.constant 0 : index
    %c0_43 = arith.constant 0 : index
    %c0_44 = arith.constant 0 : index
    %186 = vector.load %arg6[%c0_42, %c0_43, %c0_44] : memref<2x32x16xf32, #tpu.memory_space<vmem>>, vector<1x32x16xf32>
    %187 = vector.shape_cast %186 : vector<1x32x16xf32> to vector<32x16xf32>
    %188 = vector.shape_cast %185 : vector<32x16xf32> to vector<1x32x16xf32>
    tpu.vector_store %arg6[%c0_42, %c0_43, %c0_44], %188 {strides = array<i32>} : memref<2x32x16xf32, #tpu.memory_space<vmem>>, vector<1x32x16xf32>,
    %189 = vector.extract_strided_slice %12 {offsets = [0, 256], sizes = [16, 256], strides = [1, 1]} : vector<16x512xf32> to vector<16x256xf32>
    %190 = vector.extract_strided_slice %11 {offsets = [0, 256], sizes = [32, 256], strides = [1, 1]} : vector<32x512xf32> to vector<32x256xf32>
    %cst_45 = arith.constant 0.000000e+00 : f32
    %191 = vector.broadcast %cst_45 : f32 to vector<1x256xf32>
    %192 = vector.broadcast %191 : vector<1x256xf32> to vector<16x256xf32>
    %193 = arith.addf %189, %192 : vector<16x256xf32>
    %cst_46 = arith.constant dense<0xFF800000> : vector<16xf32>
    %194 = vector.multi_reduction <maximumf>, %193, %cst_46 [1] : vector<16x256xf32> to vector<16xf32>
    %195 = vector.shape_cast %194 : vector<16xf32> to vector<16x1xf32>
    %196 = vector.broadcast %195 : vector<16x1xf32> to vector<16x256xf32>
    %197 = arith.subf %193, %196 : vector<16x256xf32>
    %198 = math.exp %197 : vector<16x256xf32>
    %cst_47 = arith.constant dense<0.000000e+00> : vector<16xf32>
    %199 = vector.multi_reduction <add>, %198, %cst_47 [1] : vector<16x256xf32> to vector<16xf32>
    %200 = vector.shape_cast %199 : vector<16xf32> to vector<16x1xf32>
    %201 = math.log %200 : vector<16x1xf32>
    %202 = arith.addf %195, %201 : vector<16x1xf32>
    %cst_48 = arith.constant -5.60580206 : f32
    %203 = vector.broadcast %cst_48 : f32 to vector<16x1xf32>
    %204 = arith.subf %203, %202 : vector<16x1xf32>
    %cst_49 = arith.constant dense<0xFF800000> : vector<1xf32>
    %205 = vector.multi_reduction <maximumf>, %191, %cst_49 [1] : vector<1x256xf32> to vector<1xf32>
    %206 = vector.shape_cast %205 : vector<1xf32> to vector<1x1xf32>
    %207 = vector.broadcast %206 : vector<1x1xf32> to vector<1x256xf32>
    %208 = arith.subf %191, %207 : vector<1x256xf32>
    %209 = math.exp %208 : vector<1x256xf32>
    %cst_50 = arith.constant dense<0.000000e+00> : vector<1xf32>
    %210 = vector.multi_reduction <add>, %209, %cst_50 [1] : vector<1x256xf32> to vector<1xf32>
    %211 = vector.shape_cast %210 : vector<1xf32> to vector<1x1xf32>
    %212 = math.log %211 : vector<1x1xf32>
    %213 = arith.addf %206, %212 : vector<1x1xf32>
    %214 = vector.broadcast %13 : f32 to vector<1x1xf32>
    %215 = arith.addf %214, %213 : vector<1x1xf32>
    %cst_51 = arith.constant -0.125163138 : f32
    %216 = vector.broadcast %cst_51 : f32 to vector<1x1xf32>
    %217 = arith.subf %216, %215 : vector<1x1xf32>
    %218 = vector.broadcast %204 : vector<16x1xf32> to vector<16x256xf32>
    %219 = arith.addf %189, %218 : vector<16x256xf32>
    %cst_52 = arith.constant dense<0xFF800000> : vector<256xf32>
    %220 = vector.multi_reduction <maximumf>, %219, %cst_52 [0] : vector<16x256xf32> to vector<256xf32>
    %221 = vector.shape_cast %220 : vector<256xf32> to vector<1x256xf32>
    %222 = vector.broadcast %221 : vector<1x256xf32> to vector<16x256xf32>
    %223 = arith.subf %219, %222 : vector<16x256xf32>
    %224 = math.exp %223 : vector<16x256xf32>
    %cst_53 = arith.constant dense<0.000000e+00> : vector<256xf32>
    %225 = vector.multi_reduction <add>, %224, %cst_53 [0] : vector<16x256xf32> to vector<256xf32>
    %226 = vector.shape_cast %225 : vector<256xf32> to vector<1x256xf32>
    %227 = math.log %226 : vector<1x256xf32>
    %228 = arith.addf %221, %227 : vector<1x256xf32>
    %229 = vector.broadcast %13 : f32 to vector<1x1xf32>
    %230 = arith.addf %229, %217 : vector<1x1xf32>
    %231 = vector.broadcast %230 : vector<1x1xf32> to vector<1x256xf32>
    %232 = arith.maximumf %228, %231 : vector<1x256xf32>
    %233 = arith.subf %228, %232 : vector<1x256xf32>
    %234 = math.exp %233 : vector<1x256xf32>
    %235 = vector.broadcast %230 : vector<1x1xf32> to vector<1x256xf32>
    %236 = arith.subf %235, %232 : vector<1x256xf32>
    %237 = math.exp %236 : vector<1x256xf32>
    %238 = arith.addf %234, %237 : vector<1x256xf32>
    %239 = math.log %238 : vector<1x256xf32>
    %240 = arith.addf %232, %239 : vector<1x256xf32>
    %cst_54 = arith.constant -5.60580206 : f32
    %241 = vector.broadcast %cst_54 : f32 to vector<1x256xf32>
    %242 = arith.subf %241, %240 : vector<1x256xf32>
    %243 = vector.broadcast %242 : vector<1x256xf32> to vector<16x256xf32>
    %244 = arith.addf %189, %243 : vector<16x256xf32>
    %cst_55 = arith.constant dense<0xFF800000> : vector<16xf32>
    %245 = vector.multi_reduction <maximumf>, %244, %cst_55 [1] : vector<16x256xf32> to vector<16xf32>
    %246 = vector.shape_cast %245 : vector<16xf32> to vector<16x1xf32>
    %247 = vector.broadcast %246 : vector<16x1xf32> to vector<16x256xf32>
    %248 = arith.subf %244, %247 : vector<16x256xf32>
    %249 = math.exp %248 : vector<16x256xf32>
    %cst_56 = arith.constant dense<0.000000e+00> : vector<16xf32>
    %250 = vector.multi_reduction <add>, %249, %cst_56 [1] : vector<16x256xf32> to vector<16xf32>
    %251 = vector.shape_cast %250 : vector<16xf32> to vector<16x1xf32>
    %252 = math.log %251 : vector<16x1xf32>
    %253 = arith.addf %246, %252 : vector<16x1xf32>
    %cst_57 = arith.constant -5.60580206 : f32
    %254 = vector.broadcast %cst_57 : f32 to vector<16x1xf32>
    %255 = arith.subf %254, %253 : vector<16x1xf32>
    %cst_58 = arith.constant dense<0xFF800000> : vector<1xf32>
    %256 = vector.multi_reduction <maximumf>, %242, %cst_58 [1] : vector<1x256xf32> to vector<1xf32>
    %257 = vector.shape_cast %256 : vector<1xf32> to vector<1x1xf32>
    %258 = vector.broadcast %257 : vector<1x1xf32> to vector<1x256xf32>
    %259 = arith.subf %242, %258 : vector<1x256xf32>
    %260 = math.exp %259 : vector<1x256xf32>
    %cst_59 = arith.constant dense<0.000000e+00> : vector<1xf32>
    %261 = vector.multi_reduction <add>, %260, %cst_59 [1] : vector<1x256xf32> to vector<1xf32>
    %262 = vector.shape_cast %261 : vector<1xf32> to vector<1x1xf32>
    %263 = math.log %262 : vector<1x1xf32>
    %264 = arith.addf %257, %263 : vector<1x1xf32>
    %265 = vector.broadcast %13 : f32 to vector<1x1xf32>
    %266 = arith.addf %265, %264 : vector<1x1xf32>
    %cst_60 = arith.constant -0.125163138 : f32
    %267 = vector.broadcast %cst_60 : f32 to vector<1x1xf32>
    %268 = arith.subf %267, %266 : vector<1x1xf32>
    %269 = vector.broadcast %255 : vector<16x1xf32> to vector<16x256xf32>
    %270 = arith.addf %189, %269 : vector<16x256xf32>
    %cst_61 = arith.constant dense<0xFF800000> : vector<256xf32>
    %271 = vector.multi_reduction <maximumf>, %270, %cst_61 [0] : vector<16x256xf32> to vector<256xf32>
    %272 = vector.shape_cast %271 : vector<256xf32> to vector<1x256xf32>
    %273 = vector.broadcast %272 : vector<1x256xf32> to vector<16x256xf32>
    %274 = arith.subf %270, %273 : vector<16x256xf32>
    %275 = math.exp %274 : vector<16x256xf32>
    %cst_62 = arith.constant dense<0.000000e+00> : vector<256xf32>
    %276 = vector.multi_reduction <add>, %275, %cst_62 [0] : vector<16x256xf32> to vector<256xf32>
    %277 = vector.shape_cast %276 : vector<256xf32> to vector<1x256xf32>
    %278 = math.log %277 : vector<1x256xf32>
    %279 = arith.addf %272, %278 : vector<1x256xf32>
    %280 = vector.broadcast %13 : f32 to vector<1x1xf32>
    %281 = arith.addf %280, %268 : vector<1x1xf32>
    %282 = vector.broadcast %281 : vector<1x1xf32> to vector<1x256xf32>
    %283 = arith.maximumf %279, %282 : vector<1x256xf32>
    %284 = arith.subf %279, %283 : vector<1x256xf32>
    %285 = math.exp %284 : vector<1x256xf32>
    %286 = vector.broadcast %281 : vector<1x1xf32> to vector<1x256xf32>
    %287 = arith.subf %286, %283 : vector<1x256xf32>
    %288 = math.exp %287 : vector<1x256xf32>
    %289 = arith.addf %285, %288 : vector<1x256xf32>
    %290 = math.log %289 : vector<1x256xf32>
    %291 = arith.addf %283, %290 : vector<1x256xf32>
    %cst_63 = arith.constant -5.60580206 : f32
    %292 = vector.broadcast %cst_63 : f32 to vector<1x256xf32>
    %293 = arith.subf %292, %291 : vector<1x256xf32>
    %294 = vector.broadcast %293 : vector<1x256xf32> to vector<16x256xf32>
    %295 = arith.addf %189, %294 : vector<16x256xf32>
    %cst_64 = arith.constant dense<0xFF800000> : vector<16xf32>
    %296 = vector.multi_reduction <maximumf>, %295, %cst_64 [1] : vector<16x256xf32> to vector<16xf32>
    %297 = vector.shape_cast %296 : vector<16xf32> to vector<16x1xf32>
    %298 = vector.broadcast %297 : vector<16x1xf32> to vector<16x256xf32>
    %299 = arith.subf %295, %298 : vector<16x256xf32>
    %300 = math.exp %299 : vector<16x256xf32>
    %cst_65 = arith.constant dense<0.000000e+00> : vector<16xf32>
    %301 = vector.multi_reduction <add>, %300, %cst_65 [1] : vector<16x256xf32> to vector<16xf32>
    %302 = vector.shape_cast %301 : vector<16xf32> to vector<16x1xf32>
    %303 = math.log %302 : vector<16x1xf32>
    %304 = arith.addf %297, %303 : vector<16x1xf32>
    %cst_66 = arith.constant -5.60580206 : f32
    %305 = vector.broadcast %cst_66 : f32 to vector<16x1xf32>
    %306 = arith.subf %305, %304 : vector<16x1xf32>
    %cst_67 = arith.constant dense<0xFF800000> : vector<1xf32>
    %307 = vector.multi_reduction <maximumf>, %293, %cst_67 [1] : vector<1x256xf32> to vector<1xf32>
    %308 = vector.shape_cast %307 : vector<1xf32> to vector<1x1xf32>
    %309 = vector.broadcast %308 : vector<1x1xf32> to vector<1x256xf32>
    %310 = arith.subf %293, %309 : vector<1x256xf32>
    %311 = math.exp %310 : vector<1x256xf32>
    %cst_68 = arith.constant dense<0.000000e+00> : vector<1xf32>
    %312 = vector.multi_reduction <add>, %311, %cst_68 [1] : vector<1x256xf32> to vector<1xf32>
    %313 = vector.shape_cast %312 : vector<1xf32> to vector<1x1xf32>
    %314 = math.log %313 : vector<1x1xf32>
    %315 = arith.addf %308, %314 : vector<1x1xf32>
    %316 = vector.broadcast %13 : f32 to vector<1x1xf32>
    %317 = arith.addf %316, %315 : vector<1x1xf32>
    %cst_69 = arith.constant -0.125163138 : f32
    %318 = vector.broadcast %cst_69 : f32 to vector<1x1xf32>
    %319 = arith.subf %318, %317 : vector<1x1xf32>
    %320 = vector.broadcast %306 : vector<16x1xf32> to vector<16x256xf32>
    %321 = arith.addf %189, %320 : vector<16x256xf32>
    %cst_70 = arith.constant dense<0xFF800000> : vector<256xf32>
    %322 = vector.multi_reduction <maximumf>, %321, %cst_70 [0] : vector<16x256xf32> to vector<256xf32>
    %323 = vector.shape_cast %322 : vector<256xf32> to vector<1x256xf32>
    %324 = vector.broadcast %323 : vector<1x256xf32> to vector<16x256xf32>
    %325 = arith.subf %321, %324 : vector<16x256xf32>
    %326 = math.exp %325 : vector<16x256xf32>
    %cst_71 = arith.constant dense<0.000000e+00> : vector<256xf32>
    %327 = vector.multi_reduction <add>, %326, %cst_71 [0] : vector<16x256xf32> to vector<256xf32>
    %328 = vector.shape_cast %327 : vector<256xf32> to vector<1x256xf32>
    %329 = math.log %328 : vector<1x256xf32>
    %330 = arith.addf %323, %329 : vector<1x256xf32>
    %331 = vector.broadcast %13 : f32 to vector<1x1xf32>
    %332 = arith.addf %331, %319 : vector<1x1xf32>
    %333 = vector.broadcast %332 : vector<1x1xf32> to vector<1x256xf32>
    %334 = arith.maximumf %330, %333 : vector<1x256xf32>
    %335 = arith.subf %330, %334 : vector<1x256xf32>
    %336 = math.exp %335 : vector<1x256xf32>
    %337 = vector.broadcast %332 : vector<1x1xf32> to vector<1x256xf32>
    %338 = arith.subf %337, %334 : vector<1x256xf32>
    %339 = math.exp %338 : vector<1x256xf32>
    %340 = arith.addf %336, %339 : vector<1x256xf32>
    %341 = math.log %340 : vector<1x256xf32>
    %342 = arith.addf %334, %341 : vector<1x256xf32>
    %cst_72 = arith.constant -5.60580206 : f32
    %343 = vector.broadcast %cst_72 : f32 to vector<1x256xf32>
    %344 = arith.subf %343, %342 : vector<1x256xf32>
    %345 = vector.broadcast %306 : vector<16x1xf32> to vector<16x256xf32>
    %346 = arith.addf %189, %345 : vector<16x256xf32>
    %347 = vector.broadcast %344 : vector<1x256xf32> to vector<16x256xf32>
    %348 = arith.addf %346, %347 : vector<16x256xf32>
    %cst_73 = arith.constant -5.60580206 : f32
    %349 = vector.broadcast %cst_73 : f32 to vector<16x256xf32>
    %350 = arith.subf %348, %349 : vector<16x256xf32>
    %351 = math.exp %350 : vector<16x256xf32>
    %cst_74 = arith.constant dense<0.000000e+00> : vector<32x16xf32>
    %352 = tpu.matmul %190, %351, %cst_74 {dimension_numbers = #tpu.dot_dimension_numbers<[1], [1], [0], [0], [0, 0, 1, 0], [], []>} : vector<32x256xf32>, vector<16x256xf32>, vector<32x16xf32> -> vector<32x16xf32>
    %353 = arith.mulf %352, %352 : vector<32x16xf32>
    %cst_75 = arith.constant dense<0.000000e+00> : vector<16xf32>
    %354 = vector.multi_reduction <add>, %353, %cst_75 [0] : vector<32x16xf32> to vector<16xf32>
    %355 = vector.shape_cast %354 : vector<16xf32> to vector<1x16xf32>
    %cst_76 = arith.constant 1.000000e-24 : f32
    %356 = vector.broadcast %cst_76 : f32 to vector<1x16xf32>
    %357 = arith.maximumf %355, %356 : vector<1x16xf32>
    %358 = math.rsqrt %357 : vector<1x16xf32>
    %359 = vector.broadcast %358 : vector<1x16xf32> to vector<32x16xf32>
    %360 = arith.mulf %352, %359 : vector<32x16xf32>
    %c1 = arith.constant 1 : index
    %c0_77 = arith.constant 0 : index
    %c0_78 = arith.constant 0 : index
    %361 = vector.load %arg6[%c1, %c0_77, %c0_78] : memref<2x32x16xf32, #tpu.memory_space<vmem>>, vector<1x32x16xf32>
    %362 = vector.shape_cast %361 : vector<1x32x16xf32> to vector<32x16xf32>
    %363 = vector.shape_cast %360 : vector<32x16xf32> to vector<1x32x16xf32>
    tpu.vector_store %arg6[%c1, %c0_77, %c0_78], %363 {strides = array<i32>} : memref<2x32x16xf32, #tpu.memory_space<vmem>>, vector<1x32x16xf32>,
    return
  }
  func.func @transform_0(%arg0: i32) -> (i32, i32) {
    %c0_i32 = arith.constant 0 : i32
    %c0_i32_0 = arith.constant 0 : i32
    return %c0_i32, %arg0 : i32, i32
  }
  func.func @transform_1(%arg0: i32) -> (i32, i32) {
    %c0_i32 = arith.constant 0 : i32
    %c0_i32_0 = arith.constant 0 : i32
    %c0_i32_1 = arith.constant 0 : i32
    return %c0_i32, %c0_i32_0 : i32, i32
  }
  func.func @transform_2(%arg0: i32) -> (i32, i32) {
    %c0_i32 = arith.constant 0 : i32
    %c0_i32_0 = arith.constant 0 : i32
    %c0_i32_1 = arith.constant 0 : i32
    return %c0_i32, %c0_i32_0 : i32, i32
  }
  func.func @transform_3(%arg0: i32) -> (i32, i32) {
    %c0_i32 = arith.constant 0 : i32
    %c0_i32_0 = arith.constant 0 : i32
    %c0_i32_1 = arith.constant 0 : i32
    return %c0_i32, %c0_i32_0 : i32, i32
  }
  func.func @transform_4(%arg0: i32) -> i32 {
    %c0_i32 = arith.constant 0 : i32
    %c0_i32_0 = arith.constant 0 : i32
    return %c0_i32 : i32
  }
  func.func @transform_5(%arg0: i32) -> (i32, i32, i32) {
    %c0_i32 = arith.constant 0 : i32
    %c0_i32_0 = arith.constant 0 : i32
    %c0_i32_1 = arith.constant 0 : i32
    return %arg0, %c0_i32, %c0_i32_0 : i32, i32, i32
  }
}

</mosaic_0001>

<bundles_post_ra>
// kernel: tpu_custom_call.1
= control target key start
LH: loop header
LB: loop body
LE: loop exit
PB: predicated region body
PF: predicated region fallthrough
CT: control target
= control target key end

     0   :  { %vm1123_vm0 = vcmask 1043456   ;;  %vm930_vm1 = vcmask 64512   ;;  %vm5938_vm2 = vcmask 130048   ;;  %s11945_s0 = inlined_call_operand.vmem [shape: bf16[136,512], index: 0, kind: input, shape index: {}]   ;;  %s11946_s1 = inlined_call_operand.vmem [shape: bf16[1024,136], index: 1, kind: input, shape index: {}]   ;;  %s11947_s2 = inlined_call_operand.vmem [shape: bf16[48,1024], index: 2, kind: input, shape index: {}]   ;;  %s11948_s3 = inlined_call_operand.vmem [shape: f32[48,1], index: 3, kind: input, shape index: {}]   ;;  %s11949_s4 = inlined_call_operand.<no memory space> [shape: f32[1], index: 4, kind: input, shape index: {}]   ;;  %s11950_s5 = inlined_call_operand.vmem [shape: f32[2,32,16], index: 5, kind: output, shape index: {}]  }
   0x1   :  { %v7078_v0 = vld [vmem:[%s11945_s0 + $0xe0] sm:$0xf]  ;;  %v7614_v1 = vld [vmem:[%s11945_s0 + $0xec] sm:$0xf0]  ;;  %v7612_v2 = vld [vmem:[%s11945_s0 + $0xe4] sm:$0xf] }
   0x2   :  { %v7079_v3 = vor.u32 %v7614_v1, %v7078_v0  ;;  %v7080_v4 = vld [vmem:[%s11945_s0 + $0xf0] sm:$0xf0]  ;;  %v182_v5 = vld [vmem:[%s11945_s0 + $0x100] sm:$0xff]  ;;  %v7610_v10 = vld [vmem:[%s11945_s0 + $0xcc] sm:$0xf0] }
   0x3   :  { %v7062_v6 = vld [vmem:[%s11945_s0 + $0xc0] sm:$0xf]  ;;  %v7083_v7 = vor.u32 %v7612_v2, %v7080_v4  ;;  %v858_v8 = vunpack.c.l.b16 %v182_v5  ;;  %v859_v9 = vunpack.c.h.b16 %v182_v5  ;;  %v7608_v11 = vld [vmem:[%s11945_s0 + $0xc4] sm:$0xf]  ;;  %v7064_v12 = vld [vmem:[%s11945_s0 + $0xd0] sm:$0xf0] }
   0x4   :  { %1136 = vmatpush.bf16.msra.mxu0 %v7079_v3  ;;  %v7456_v13 = vld [vmem:[%s11946_s1 + $0x4] sm:$0xf]  ;;  %v6456_v14 = vld [vmem:[%s11946_s1 + $0x8] sm:$0xf0]  ;;  %v7063_v17 = vor.u32 %v7610_v10, %v7062_v6  ;;  %v7067_v18 = vor.u32 %v7608_v11, %v7064_v12  ;;  %v7046_v19 = vld [vmem:[%s11945_s0 + $0xa0] sm:$0xf] }
   0x5   :  { %1794 = vmatpush.bf16.msra.mxu2 %v7083_v7  ;;  %v894_v15 = vpack.c.b16 %v858_v8, %v858_v8  ;;  %v895_v16 = vpack.c.b16 %v859_v9, %v859_v9  ;;  %v7606_v20 = vld [vmem:[%s11945_s0 + $0xac] sm:$0xf0]  ;;  %v7604_v21 = vld [vmem:[%s11945_s0 + $0xa4] sm:$0xf]  ;;  %v7048_v22 = vld [vmem:[%s11945_s0 + $0xb0] sm:$0xf0]  ;;  %v7990_v25 = vor.u32 %v7456_v13, %v6456_v14 }
   0x6   :  { %v7047_v26 = vor.u32 %v7606_v20, %v7046_v19  ;;  %v7051_v27 = vor.u32 %v7604_v21, %v7048_v22  ;;  %v7030_v28 = vld [vmem:[%s11945_s0 + $0x80] sm:$0xf]  ;;  %v7602_v29 = vld [vmem:[%s11945_s0 + $0x8c] sm:$0xf0]  ;;  %v7600_v30 = vld [vmem:[%s11945_s0 + $0x84] sm:$0xf] }
   0x7   :  { %v1125_v23 = vsel %vm1123_vm0, %v894_v15, 0  ;;  %v1128_v24 = vsel %vm1123_vm0, %v895_v16, 0  ;;  %v7032_v31 = vld [vmem:[%s11945_s0 + $0x90] sm:$0xf0]  ;;  %v7031_v32 = vor.u32 %v7602_v29, %v7030_v28  ;;  %v7014_v34 = vld [vmem:[%s11945_s0 + $0x60] sm:$0xf] }
   0x8   :  { %1472 = vmatpush.bf16.msra.mxu1 %v1125_v23  ;;  %2130 = vmatpush.bf16.msra.mxu3 %v1128_v24  ;;  %v7035_v33 = vor.u32 %v7600_v30, %v7032_v31  ;;  %v7598_v35 = vld [vmem:[%s11945_s0 + $0x6c] sm:$0xf0]  ;;  %v7596_v36 = vld [vmem:[%s11945_s0 + $0x64] sm:$0xf]  ;;  %v7016_v37 = vld [vmem:[%s11945_s0 + $0x70] sm:$0xf0] }
   0x9   :  { %1137 = vmatpush.bf16.msra.mxu0 %v7063_v17  ;;  %1795 = vmatpush.bf16.msra.mxu2 %v7067_v18  ;;  %v7015_v38 = vor.u32 %v7598_v35, %v7014_v34  ;;  %v7019_v39 = vor.u32 %v7596_v36, %v7016_v37  ;;  %v6998_v40 = vld [vmem:[%s11945_s0 + $0x40] sm:$0xf]  ;;  %v7594_v41 = vld [vmem:[%s11945_s0 + $0x4c] sm:$0xf0]  ;;  %v7592_v42 = vld [vmem:[%s11945_s0 + $0x44] sm:$0xf] }
   0xa   :  { %v7000_v43 = vld [vmem:[%s11945_s0 + $0x50] sm:$0xf0]  ;;  %v6464_v45 = vld [vmem:[%s11946_s1 + $0x18] sm:$0xf0]  ;;  %v6999_v46 = vor.u32 %v7594_v41, %v6998_v40  ;;  %v6982_v48 = vld [vmem:[%s11945_s0 + $0x20] sm:$0xf] }
   0xb   :  { %7092 = vmatmul.msk.bf16.vlgmr.msra.gmra.mxu1 %vm930_vm1, %v7990_v25  ;;  %7156 = vmatmul.msk.bf16.vlgmr.msra.gmra.mxu3 %vm930_vm1, %v7990_v25  ;;  %v7458_v44 = vld [vmem:[%s11946_s1 + $0x14] sm:$0xf]  ;;  %v7003_v47 = vor.u32 %v7592_v42, %v7000_v43  ;;  %v7590_v49 = vld [vmem:[%s11945_s0 + $0x2c] sm:$0xf0]  ;;  %v7588_v50 = vld [vmem:[%s11945_s0 + $0x24] sm:$0xf] }
   0xc   :  { %v6984_v51 = vld [vmem:[%s11945_s0 + $0x30] sm:$0xf0]  ;;  %v8050_v52 = vor.u32 %v7458_v44, %v6464_v45  ;;  %v6983_v53 = vor.u32 %v7590_v49, %v6982_v48  ;;  %v6966_v55 = vld [vmem:[%s11945_s0] sm:$0xf]  ;;  %v7586_v56 = vld [vmem:[%s11945_s0 + $0xc] sm:$0xf0] }
   0xd   :  { %1138 = vmatpush.bf16.msra.mxu0 %v7047_v26  ;;  %1796 = vmatpush.bf16.msra.mxu2 %v7051_v27  ;;  %v6987_v54 = vor.u32 %v7588_v50, %v6984_v51  ;;  %v7584_v57 = vld [vmem:[%s11945_s0 + $0x4] sm:$0xf]  ;;  %v6968_v58 = vld [vmem:[%s11945_s0 + $0x10] sm:$0xf0]  ;;  %v6967_v59 = vor.u32 %v7586_v56, %v6966_v55  ;;  %v6454_v61 = vld [vmem:[%s11946_s1] sm:$0xf] }
   0xe   :  { %v6971_v60 = vor.u32 %v7584_v57, %v6968_v58  ;;  %v7457_v62 = vld [vmem:[%s11946_s1 + $0x4] sm:$0xf0]  ;;  %v7460_v0 = vld [vmem:[%s11946_s1 + $0x24] sm:$0xf]  ;;  %v6472_v1 = vld [vmem:[%s11946_s1 + $0x28] sm:$0xf0] }
   0xf   :  { %v8074_v63 = vor.u32 %v7457_v62, %v6454_v61  ;;  %v183_v2 = vld [vmem:[%s11945_s0 + $0x108] sm:$0xff]  ;;  %v8087_v4 = vor.u32 %v7460_v0, %v6472_v1  ;;  %v7615_v8 = vld [vmem:[%s11945_s0 + $0xf4] sm:$0xf0]  ;;  %v7088_v12 = vld [vmem:[%s11945_s0 + $0xf8] sm:$0xf0] }
  0x10   :  { %v860_v3 = vunpack.c.l.b16 %v183_v2  ;;  %v7086_v7 = vld [vmem:[%s11945_s0 + $0xe8] sm:$0xf]  ;;  %v861_v9 = vunpack.c.h.b16 %v183_v2  ;;  %v7613_v10 = vld [vmem:[%s11945_s0 + $0xec] sm:$0xf]  ;;  %v6462_v13 = vld [vmem:[%s11946_s1 + $0x10] sm:$0xf] }
  0x11   :  { %1139 = vmatpush.bf16.msra.mxu0 %v7031_v32  ;;  %1797 = vmatpush.bf16.msra.mxu2 %v7035_v33  ;;  %v7087_v11 = vor.u32 %v7615_v8, %v7086_v7  ;;  %v7459_v14 = vld [vmem:[%s11946_s1 + $0x14] sm:$0xf0]  ;;  %v7091_v16 = vor.u32 %v7613_v10, %v7088_v12  ;;  %v7462_v19 = vld [vmem:[%s11946_s1 + $0x34] sm:$0xf]  ;;  %v6480_v20 = vld [vmem:[%s11946_s1 + $0x38] sm:$0xf0] }
  0x12   :  { %v896_v5 = vpack.c.b16 %v860_v3, %v860_v3  ;;  %v897_v15 = vpack.c.b16 %v861_v9, %v861_v9  ;;  %v8113_v18 = vor.u32 %v7459_v14, %v6462_v13  ;;  %v8123_v21 = vor.u32 %v7462_v19, %v6480_v20  ;;  %v6470_v22 = vld [vmem:[%s11946_s1 + $0x20] sm:$0xf]  ;;  %v7461_v23 = vld [vmem:[%s11946_s1 + $0x24] sm:$0xf0]  ;;  %v7464_v26 = vld [vmem:[%s11946_s1 + $0x44] sm:$0xf] }
  0x13   :  { %2452 = vmatpush.bf16.msrb.mxu1 %v7087_v11  ;;  %v8135_v24 = vor.u32 %v7461_v23, %v6470_v22  ;;  %v6488_v27 = vld [vmem:[%s11946_s1 + $0x48] sm:$0xf0]  ;;  %v6478_v29 = vld [vmem:[%s11946_s1 + $0x30] sm:$0xf]  ;;  %v7463_v30 = vld [vmem:[%s11946_s1 + $0x34] sm:$0xf0] }
  0x14   :  { %v1131_v6 = vsel %vm1123_vm0, %v896_v5, 0  ;;  %v1134_v17 = vsel %vm1123_vm0, %v897_v15, 0  ;;  %v8145_v28 = vor.u32 %v7464_v26, %v6488_v27  ;;  %v8157_v31 = vor.u32 %v7463_v30, %v6478_v29  ;;  %v7466_v32 = vld [vmem:[%s11946_s1 + $0x54] sm:$0xf]  ;;  %v6496_v33 = vld [vmem:[%s11946_s1 + $0x58] sm:$0xf0] }
  0x15   :  { %1140 = vmatpush.bf16.msra.mxu0 %v7015_v38  ;;  %1798 = vmatpush.bf16.msra.mxu2 %v7019_v39  ;;  %v8167_v34 = vor.u32 %v7466_v32, %v6496_v33  ;;  %v6486_v35 = vld [vmem:[%s11946_s1 + $0x40] sm:$0xf]  ;;  %v7465_v36 = vld [vmem:[%s11946_s1 + $0x44] sm:$0xf0]  ;;  %v7468_v38 = vld [vmem:[%s11946_s1 + $0x64] sm:$0xf] }
  0x16   :  { %2788 = vmatpush.bf16.msrb.mxu3 %v1131_v6  ;;  %v8179_v37 = vor.u32 %v7465_v36, %v6486_v35  ;;  %v6504_v39 = vld [vmem:[%s11946_s1 + $0x68] sm:$0xf0]  ;;  %v6494_v41 = vld [vmem:[%s11946_s1 + $0x50] sm:$0xf]  ;;  %v7467_v42 = vld [vmem:[%s11946_s1 + $0x54] sm:$0xf0] }
  0x17   :  { %v8189_v40 = vor.u32 %v7468_v38, %v6504_v39  ;;  %v8201_v43 = vor.u32 %v7467_v42, %v6494_v41  ;;  %v7470_v44 = vld [vmem:[%s11946_s1 + $0x74] sm:$0xf]  ;;  %v6512_v45 = vld [vmem:[%s11946_s1 + $0x78] sm:$0xf0]  ;;  %v7469_v48 = vld [vmem:[%s11946_s1 + $0x64] sm:$0xf0] }
  0x18   :  { %v7472_v50 = vld [vmem:[%s11946_s1 + $0x84] sm:$0xf]  ;;  %v6520_v51 = vld [vmem:[%s11946_s1 + $0x88] sm:$0xf0]  ;;  %v6510_v55 = vld [vmem:[%s11946_s1 + $0x70] sm:$0xf] }
  0x19   :  { %1141 = vmatpush.bf16.msra.mxu0 %v6999_v46  ;;  %1799 = vmatpush.bf16.msra.mxu2 %v7003_v47  ;;  %v8211_v46 = vor.u32 %v7470_v44, %v6512_v45  ;;  %v6502_v47 = vld [vmem:[%s11946_s1 + $0x60] sm:$0xf]  ;;  %v7471_v56 = vld [vmem:[%s11946_s1 + $0x74] sm:$0xf0]  ;;  %v6528_v61 = vld [vmem:[%s11946_s1 + $0x98] sm:$0xf0] }
  0x1a   :  { %v8223_v49 = vor.u32 %v7469_v48, %v6502_v47  ;;  %v6518_v2 = vld [vmem:[%s11946_s1 + $0x80] sm:$0xf]  ;;  %v7473_v3 = vld [vmem:[%s11946_s1 + $0x84] sm:$0xf0]  ;;  %v7476_v10 = vld [vmem:[%s11946_s1 + $0xa4] sm:$0xf] }
  0x1b   :  { %7093 = vmatmul.msk.bf16.gmra.mxu1 %vm930_vm1, %v8050_v52  ;;  %7157 = vmatmul.msk.bf16.gmra.mxu3 %vm930_vm1, %v8050_v52  ;;  %v8267_v7 = vor.u32 %v7473_v3, %v6518_v2  ;;  %v6536_v11 = vld [vmem:[%s11946_s1 + $0xa8] sm:$0xf0]  ;;  %v7070_v23 = vld [vmem:[%s11945_s0 + $0xc8] sm:$0xf]  ;;  %v7611_v26 = vld [vmem:[%s11945_s0 + $0xd4] sm:$0xf0] }
  0x1c   :  { %v8277_v14 = vor.u32 %v7476_v10, %v6536_v11  ;;  %v6526_v27 = vld [vmem:[%s11946_s1 + $0x90] sm:$0xf]  ;;  %v7475_v29 = vld [vmem:[%s11946_s1 + $0x94] sm:$0xf0]  ;;  %v7071_v30 = vor.u32 %v7611_v26, %v7070_v23  ;;  %v7478_v47 = vld [vmem:[%s11946_s1 + $0xb4] sm:$0xf] }
  0x1d   :  { %1142 = vmatpush.bf16.msra.mxu0 %v6983_v53  ;;  %1800 = vmatpush.bf16.msra.mxu2 %v6987_v54  ;;  %v8233_v53 = vor.u32 %v7472_v50, %v6520_v51  ;;  %12187 = vst [vmem:[#allocation5_spill] sm:$0xff] %v8267_v7  ;;  %v8297_v39 = vor.u32 %v7475_v29, %v6526_v27  ;;  %v6544_v48 = vld [vmem:[%s11946_s1 + $0xb8] sm:$0xf0]  ;;  %v7609_v50 = vld [vmem:[%s11945_s0 + $0xcc] sm:$0xf] }
  0x1e   :  { %12188 = vst [vmem:[#allocation6_spill] sm:$0xff] %v8277_v14  ;;  %2453 = vmatpush.bf16.msrb.mxu1 %v7071_v30  ;;  %v7072_v51 = vld [vmem:[%s11945_s0 + $0xd8] sm:$0xf0]  ;;  %v7480_v23 = vld [vmem:[%s11946_s1 + $0xc4] sm:$0xf] }
  0x1f   :  { %12185 = vst [vmem:[#allocation3_spill] sm:$0xff] %v8233_v53  ;;  %v6552_v26 = vld [vmem:[%s11946_s1 + $0xc8] sm:$0xf0] }
  0x20   :  { %12189 = vst [vmem:[#allocation7_spill] sm:$0xff] %v8297_v39  ;;  %v8341_v30 = vor.u32 %v7480_v23, %v6552_v26  ;;  %v6550_v23 = vld [vmem:[%s11946_s1 + $0xc0] sm:$0xf] }
  0x21   :  { %1143 = vmatpush.bf16.msra.mxu0 %v6967_v59  ;;  %1801 = vmatpush.bf16.msra.mxu2 %v6971_v60  ;;  %v8245_v59 = vor.u32 %v7471_v56, %v6510_v55  ;;  %v7474_v60 = vld [vmem:[%s11946_s1 + $0x94] sm:$0xf]  ;;  %v7075_v55 = vor.u32 %v7609_v50, %v7072_v51 }
  0x22   :  { %v8255_v0 = vor.u32 %v7474_v60, %v6528_v61  ;;  %12194 = vst [vmem:[#allocation12_spill] sm:$0xff] %v8341_v30 }
  0x24   :  { %1144 = vmatmul.bf16.vlgmr.msra.gmra.mxu0 %v8074_v63  ;;  %1802 = vmatmul.bf16.vlgmr.msra.gmra.mxu2 %v8074_v63  ;;  %12186 = vst [vmem:[#allocation4_spill] sm:$0xff] %v8255_v0 }
  0x25   :  { %3110 = vmatpush.bf16.msrb.mxu0 %v7091_v16  ;;  %3446 = vmatpush.bf16.msrb.mxu2 %v1134_v17 }
  0x29   :  { %3111 = vmatpush.bf16.msrb.mxu0 %v7075_v55 }
  0x2b   :  { %7094 = vmatmul.msk.bf16.gmra.mxu1 %vm930_vm1, %v8087_v4  ;;  %7158 = vmatmul.msk.bf16.gmra.mxu3 %vm930_vm1, %v8087_v4 }
  0x34   :  { %1149 = vmatmul.bf16.gmra.mxu0 %v8113_v18  ;;  %1807 = vmatmul.bf16.gmra.mxu2 %v8113_v18 }
  0x3b   :  { %7095 = vmatmul.msk.bf16.gmra.mxu1 %vm930_vm1, %v8123_v21  ;;  %7159 = vmatmul.msk.bf16.gmra.mxu3 %vm930_vm1, %v8123_v21 }
  0x44   :  { %1154 = vmatmul.bf16.gmra.mxu0 %v8135_v24  ;;  %1812 = vmatmul.bf16.gmra.mxu2 %v8135_v24 }
  0x4b   :  { %7096 = vmatmul.msk.bf16.gmra.mxu1 %vm930_vm1, %v8145_v28  ;;  %7160 = vmatmul.msk.bf16.gmra.mxu3 %vm930_vm1, %v8145_v28 }
  0x54   :  { %1159 = vmatmul.bf16.gmra.mxu0 %v8157_v31  ;;  %1817 = vmatmul.bf16.gmra.mxu2 %v8157_v31 }
  0x5b   :  { %7097 = vmatmul.msk.bf16.gmra.mxu1 %vm930_vm1, %v8167_v34  ;;  %7161 = vmatmul.msk.bf16.gmra.mxu3 %vm930_vm1, %v8167_v34 }
  0x64   :  { %1164 = vmatmul.bf16.gmra.mxu0 %v8179_v37  ;;  %1822 = vmatmul.bf16.gmra.mxu2 %v8179_v37 }
  0x6b   :  { %7098 = vmatmul.msk.bf16.gmra.mxu1 %vm930_vm1, %v8189_v40  ;;  %7162 = vmatmul.msk.bf16.gmra.mxu3 %vm930_vm1, %v8189_v40 }
  0x74   :  { %1169 = vmatmul.bf16.gmra.mxu0 %v8201_v43  ;;  %1827 = vmatmul.bf16.gmra.mxu2 %v8201_v43 }
  0x7b   :  { %7099 = vmatmul.msk.bf16.gmra.mxu1 %vm930_vm1, %v8211_v46  ;;  %7163 = vmatmul.msk.bf16.gmra.mxu3 %vm930_vm1, %v8211_v46 }
  0x84   :  { %1174 = vmatmul.bf16.gmra.mxu0 %v8223_v49  ;;  %1832 = vmatmul.bf16.gmra.mxu2 %v8223_v49 }
  0x88   :  { %v1474_v54 = vpop.f32.mrf.mxu1 }
  0x8b   :  { %7100 = vmatmul.msk.bf16.gmra.mxu1 %vm930_vm1, %v8233_v53  ;;  %7164 = vmatmul.msk.bf16.gmra.mxu3 %vm930_vm1, %v8233_v53 }
  0x8e   :  { %v2132_v57 = vpop.f32.mrf.mxu3 }
  0x90   :  { %v1476_v58 = vpop.f32.mrf.mxu1 }
  0x94   :  { %1179 = vmatmul.bf16.gmra.mxu0 %v8245_v59  ;;  %1837 = vmatmul.bf16.gmra.mxu2 %v8245_v59 }
  0x96   :  { %v2134_v62 = vpop.f32.mrf.mxu3 }
  0x98   :  { %v1479_v1 = vpop.f32.mrf.mxu1 }
  0x9b   :  { %7101 = vmatmul.msk.bf16.gmra.mxu1 %vm930_vm1, %v8255_v0  ;;  %7165 = vmatmul.msk.bf16.gmra.mxu3 %vm930_vm1, %v8255_v0 }
  0x9e   :  { %v2137_v5 = vpop.f32.mrf.mxu3 }
  0xa0   :  { %v1481_v6 = vpop.f32.mrf.mxu1 }
  0xa1   :  { %v1145_v8 = vpop.f32.mrf.mxu0 }
  0xa2   :  { %v1475_v9 = vadd.f32 %v1474_v54, %v1145_v8  ;;  %v6534_v8 = vld [vmem:[%s11946_s1 + $0xa0] sm:$0xf] }
  0xa4   :  { %1184 = vmatmul.bf16.gmra.mxu0 %v8267_v7  ;;  %1842 = vmatmul.bf16.gmra.mxu2 %v8267_v7  ;;  %v3768_v20 = vmax.f32 %v1475_v9, 0.0  ;;  %v7477_v9 = vld [vmem:[%s11946_s1 + $0xa4] sm:$0xf0] }
  0xa6   :  { %v2139_v12 = vpop.f32.mrf.mxu3 }
  0xa7   :  { %v1803_v13 = vpop.f32.mrf.mxu2 }
  0xa8   :  { %v2133_v15 = vadd.f32 %v2132_v57, %v1803_v13  ;;  %v1484_v16 = vpop.f32.mrf.mxu1 }
  0xa9   :  { %v1147_v17 = vpop.f32.mrf.mxu0 }
  0xaa   :  { %v1477_v19 = vadd.f32 %v1476_v58, %v1147_v17  ;;  %v3769_v42 = vmax.f32 %v2133_v15, 0.0  ;;  %v8315_v58 = vor.u32 %v7478_v47, %v6544_v48  ;;  %v8329_v15 = vor.u32 %v7477_v9, %v6534_v8  ;;  %v7479_v47 = vld [vmem:[%s11946_s1 + $0xb4] sm:$0xf0] }
  0xab   :  { %7102 = vmatmul.msk.bf16.gmra.mxu1 %vm930_vm1, %v8277_v14  ;;  %7166 = vmatmul.msk.bf16.gmra.mxu3 %vm930_vm1, %v8277_v14 }
  0xac   :  { %v3772_v22 = vmax.f32 %v1477_v19, 0.0  ;;  %12191 = vst [vmem:[#allocation9_spill] sm:$0xff] %v8315_v58 }
  0xad   :  { %12192 = vst [vmem:[#allocation10_spill] sm:$0xff] %v8329_v15 }
  0xae   :  { %v2142_v32 = vpop.f32.mrf.mxu3  ;;  %v8295_v33 = vpack.c.bf16 %v3772_v22, %v3768_v20 }
  0xaf   :  { %v1805_v35 = vpop.f32.mrf.mxu2 }
  0xb0   :  { %v2135_v36 = vadd.f32 %v2134_v62, %v1805_v35  ;;  %v1486_v38 = vpop.f32.mrf.mxu1 }
  0xb1   :  { %v1150_v41 = vpop.f32.mrf.mxu0 }
  0xb2   :  { %v3773_v44 = vmax.f32 %v2135_v36, 0.0  ;;  %v1480_v45 = vadd.f32 %v1479_v1, %v1150_v41 }
  0xb4   :  { %1189 = vmatmul.bf16.gmra.mxu0 %v8297_v39  ;;  %1847 = vmatmul.bf16.gmra.mxu2 %v8297_v39  ;;  %v8313_v54 = vpack.c.bf16 %v3773_v44, %v3769_v42  ;;  %v3776_v2 = vmax.f32 %v1480_v45, 0.0  ;;  %v6542_v45 = vld [vmem:[%s11946_s1 + $0xb0] sm:$0xf] }
  0xb5   :  { %v8357_v55 = vor.u32 %v7479_v47, %v6542_v45 }
  0xb6   :  { %12190 = vst [vmem:[#allocation8_spill] sm:$0xff] %v8313_v54  ;;  %v2144_v56 = vpop.f32.mrf.mxu3 }
  0xb7   :  { %v1808_v57 = vpop.f32.mrf.mxu2  ;;  %12195 = vst [vmem:[#allocation13_spill] sm:$0xff] %v8357_v55 }
  0xb8   :  { %v2138_v60 = vadd.f32 %v2137_v5, %v1808_v57  ;;  %v1489_v61 = vpop.f32.mrf.mxu1 }
  0xb9   :  { %v1152_v62 = vpop.f32.mrf.mxu0 }
  0xba   :  { %v1482_v1 = vadd.f32 %v1481_v6, %v1152_v62  ;;  %v3777_v19 = vmax.f32 %v2138_v60, 0.0 }
  0xbb   :  { %7103 = vmatmul.msk.bf16.gmra.mxu1 %vm930_vm1, %v8315_v58  ;;  %7167 = vmatmul.msk.bf16.gmra.mxu3 %vm930_vm1, %v8315_v58  ;;  %v7580_v58 = vld [vmem:[%s11946_s1 + $0x3e4] sm:$0xf] }
  0xbc   :  { %v3780_v3 = vmax.f32 %v1482_v1, 0.0 }
  0xbe   :  { %v2147_v5 = vpop.f32.mrf.mxu3  ;;  %v8327_v10 = vpack.c.bf16 %v3780_v3, %v3776_v2  ;;  %v7482_v2 = vld [vmem:[%s11946_s1 + $0xd4] sm:$0xf] }
  0xbf   :  { %v1810_v6 = vpop.f32.mrf.mxu2 }
  0xc0   :  { %v2140_v11 = vadd.f32 %v2139_v12, %v1810_v6  ;;  %v1491_v13 = vpop.f32.mrf.mxu1 }
  0xc1   :  { %v1155_v17 = vpop.f32.mrf.mxu0 }
  0xc2   :  { %v3781_v20 = vmax.f32 %v2140_v11, 0.0  ;;  %v1485_v22 = vadd.f32 %v1484_v16, %v1155_v17 }
  0xc4   :  { %1194 = vmatmul.bf16.gmra.mxu0 %v8329_v15  ;;  %1852 = vmatmul.bf16.gmra.mxu2 %v8329_v15  ;;  %v8339_v12 = vpack.c.bf16 %v3781_v20, %v3777_v19  ;;  %v3784_v42 = vmax.f32 %v1485_v22, 0.0 }
  0xc6   :  { %12193 = vst [vmem:[#allocation11_spill] sm:$0xff] %v8339_v12  ;;  %v2149_v27 = vpop.f32.mrf.mxu3 }
  0xc7   :  { %v1813_v29 = vpop.f32.mrf.mxu2 }
  0xc8   :  { %v2143_v35 = vadd.f32 %v2142_v32, %v1813_v29  ;;  %v1494_v16 = vpop.f32.mrf.mxu1 }
  0xc9   :  { %v1157_v36 = vpop.f32.mrf.mxu0 }
  0xca   :  { %v1487_v41 = vadd.f32 %v1486_v38, %v1157_v36  ;;  %v3785_v60 = vmax.f32 %v2143_v35, 0.0 }
  0xcb   :  { %7104 = vmatmul.msk.bf16.gmra.mxu1 %vm930_vm1, %v8341_v30  ;;  %7168 = vmatmul.msk.bf16.gmra.mxu3 %vm930_vm1, %v8341_v30  ;;  %v7576_v30 = vld [vmem:[%s11946_s1 + $0x3c4] sm:$0xf] }
  0xcc   :  { %v3788_v44 = vmax.f32 %v1487_v41, 0.0 }
  0xce   :  { %v2152_v32 = vpop.f32.mrf.mxu3  ;;  %v8353_v48 = vpack.c.bf16 %v3788_v44, %v3784_v42 }
  0xcf   :  { %v1815_v38 = vpop.f32.mrf.mxu2 }
  0xd0   :  { %v2145_v50 = vadd.f32 %v2144_v56, %v1815_v38  ;;  %v8355_v51 = vpop.f32.mrf.mxu1  ;;  %v6560_v56 = vld [vmem:[%s11946_s1 + $0xd8] sm:$0xf0]  ;;  %v7484_v38 = vld [vmem:[%s11946_s1 + $0xe4] sm:$0xf] }
  0xd1   :  { %v1160_v57 = vpop.f32.mrf.mxu0  ;;  %v8369_v6 = vor.u32 %v7482_v2, %v6560_v56  ;;  %v7054_v2 = vld [vmem:[%s11945_s0 + $0xa8] sm:$0xf] }
  0xd2   :  { %v3789_v62 = vmax.f32 %v2145_v50, 0.0  ;;  %v1490_v1 = vadd.f32 %v1489_v61, %v1160_v57 }
  0xd3   :  { %12197 = vst [vmem:[#allocation15_spill] sm:$0xff] %v8369_v6 }
  0xd4   :  { %1199 = vmatmul.bf16.gmra.mxu0 %v8357_v55  ;;  %1857 = vmatmul.bf16.gmra.mxu2 %v8357_v55  ;;  %v8367_v3 = vpack.c.bf16 %v3789_v62, %v3785_v60  ;;  %v3792_v20 = vmax.f32 %v1490_v1, 0.0 }
  0xd6   :  { %12196 = vst [vmem:[#allocation14_spill] sm:$0xff] %v8367_v3  ;;  %v2154_v8 = vpop.f32.mrf.mxu3 }
  0xd7   :  { %v1818_v9 = vpop.f32.mrf.mxu2 }
  0xd8   :  { %v2148_v11 = vadd.f32 %v2147_v5, %v1818_v9  ;;  %v8371_v61 = vpop.f32.mrf.mxu1  ;;  %v7481_v5 = vld [vmem:[%s11946_s1 + $0xc4] sm:$0xf0]  ;;  %v7607_v9 = vld [vmem:[%s11945_s0 + $0xb4] sm:$0xf0] }
  0xd9   :  { %v1162_v17 = vpop.f32.mrf.mxu0  ;;  %v8387_v41 = vor.u32 %v7481_v5, %v6550_v23 }
  0xda   :  { %v1492_v19 = vadd.f32 %v1491_v13, %v1162_v17  ;;  %v3793_v44 = vmax.f32 %v2148_v11, 0.0  ;;  %v7055_v11 = vor.u32 %v7607_v9, %v7054_v2  ;;  %v7603_v17 = vld [vmem:[%s11945_s0 + $0x94] sm:$0xf0]  ;;  %v6576_v9 = vld [vmem:[%s11946_s1 + $0xf8] sm:$0xf0] }
  0xdb   :  { %7105 = vmatmul.msk.bf16.gmra.mxu1 %vm930_vm1, %v8369_v6  ;;  %7169 = vmatmul.msk.bf16.gmra.mxu3 %vm930_vm1, %v8369_v6  ;;  %12198 = vst [vmem:[#allocation16_spill] sm:$0xff] %v8387_v41 }
  0xdc   :  { %v3796_v22 = vmax.f32 %v1492_v19, 0.0  ;;  %2454 = vmatpush.bf16.msrb.mxu1 %v7055_v11  ;;  %v6558_v19 = vld [vmem:[%s11946_s1 + $0xd0] sm:$0xf]  ;;  %v7006_v11 = vld [vmem:[%s11945_s0 + $0x48] sm:$0xf] }
  0xde   :  { %v2157_v26 = vpop.f32.mrf.mxu3  ;;  %v8383_v29 = vpack.c.bf16 %v3796_v22, %v3792_v20  ;;  %v7483_v20 = vld [vmem:[%s11946_s1 + $0xd4] sm:$0xf0] }
  0xdf   :  { %v1820_v13 = vpop.f32.mrf.mxu2 }
  0xe0   :  { %v2150_v35 = vadd.f32 %v2149_v27, %v1820_v13  ;;  %v8385_v36 = vpop.f32.mrf.mxu1  ;;  %v6568_v27 = vld [vmem:[%s11946_s1 + $0xe8] sm:$0xf0] }
  0xe1   :  { %v1165_v42 = vpop.f32.mrf.mxu0  ;;  %v8401_v62 = vor.u32 %v7484_v38, %v6568_v27 }
  0xe2   :  { %v3797_v45 = vmax.f32 %v2150_v35, 0.0  ;;  %v8389_v47 = vadd.f32 %v1494_v16, %v1165_v42  ;;  %v8431_v42 = vor.u32 %v7483_v20, %v6558_v19 }
  0xe3   :  { %12200 = vst [vmem:[#allocation18_spill] sm:$0xff] %v8401_v62 }
  0xe4   :  { %1204 = vmatmul.bf16.gmra.mxu0 %v8387_v41  ;;  %1862 = vmatmul.bf16.gmra.mxu2 %v8387_v41  ;;  %v8399_v50 = vpack.c.bf16 %v3797_v45, %v3793_v44  ;;  %12201 = vst [vmem:[#allocation19_spill] sm:$0xff] %v8431_v42  ;;  %v7022_v44 = vld [vmem:[%s11945_s0 + $0x68] sm:$0xf]  ;;  %v7599_v45 = vld [vmem:[%s11945_s0 + $0x74] sm:$0xf0] }
  0xe5   :  { %v7023_v27 = vor.u32 %v7599_v45, %v7022_v44  ;;  %v6990_v44 = vld [vmem:[%s11945_s0 + $0x28] sm:$0xf]  ;;  %v7578_v41 = vld [vmem:[%s11946_s1 + $0x3d4] sm:$0xf] }
  0xe6   :  { %12199 = vst [vmem:[#allocation17_spill] sm:$0xff] %v8399_v50  ;;  %v2159_v57 = vpop.f32.mrf.mxu3  ;;  %v7488_v50 = vld [vmem:[%s11946_s1 + $0x104] sm:$0xf] }
  0xe7   :  { %v1823_v60 = vpop.f32.mrf.mxu2 }
  0xe8   :  { %v2153_v16 = vadd.f32 %v2152_v32, %v1823_v60  ;;  %v8403_v1 = vpop.f32.mrf.mxu1  ;;  %v7038_v32 = vld [vmem:[%s11945_s0 + $0x88] sm:$0xf] }
  0xe9   :  { %v8408_v56 = vpop.f32.mrf.mxu0  ;;  %v7039_v22 = vor.u32 %v7603_v17, %v7038_v32 }
  0xea   :  { %v3801_v60 = vmax.f32 %v2153_v16, 0.0  ;;  %v7595_v16 = vld [vmem:[%s11945_s0 + $0x54] sm:$0xf0] }
  0xeb   :  { %7106 = vmatmul.msk.bf16.gmra.mxu1 %vm930_vm1, %v8401_v62  ;;  %7170 = vmatmul.msk.bf16.gmra.mxu3 %vm930_vm1, %v8401_v62  ;;  %v7007_v17 = vor.u32 %v7595_v16, %v7006_v11 }
  0xec   :  { %2455 = vmatpush.bf16.msrb.mxu1 %v7039_v22 }
  0xee   :  { %v2162_v23 = vpop.f32.mrf.mxu3 }
  0xef   :  { %v1825_v5 = vpop.f32.mrf.mxu2 }
  0xf0   :  { %v2155_v13 = vadd.f32 %v2154_v8, %v1825_v5  ;;  %v8429_v35 = vpop.f32.mrf.mxu1  ;;  %v7486_v8 = vld [vmem:[%s11946_s1 + $0xf4] sm:$0xf]  ;;  %2456 = vmatpush.bf16.msrb.mxu1 %v7023_v27  ;;  %v7587_v27 = vld [vmem:[%s11945_s0 + $0x14] sm:$0xf0] }
  0xf1   :  { %v8439_v38 = vpop.f32.mrf.mxu0  ;;  %v8457_v22 = vor.u32 %v7486_v8, %v6576_v9  ;;  %v6566_v8 = vld [vmem:[%s11946_s1 + $0xe0] sm:$0xf]  ;;  %v7485_v9 = vld [vmem:[%s11946_s1 + $0xe4] sm:$0xf0] }
  0xf2   :  { %v3805_v2 = vmax.f32 %v2155_v13, 0.0 }
  0xf3   :  { %12203 = vst [vmem:[#allocation21_spill] sm:$0xff] %v8457_v22 }
  0xf4   :  { %1209 = vmatmul.bf16.gmra.mxu0 %v8431_v42  ;;  %1867 = vmatmul.bf16.gmra.mxu2 %v8431_v42  ;;  %v8455_v32 = vpack.c.bf16 %v3805_v2, %v3801_v60  ;;  %v7591_v60 = vld [vmem:[%s11945_s0 + $0x34] sm:$0xf0] }
  0xf5   :  { %2457 = vmatpush.bf16.msrb.mxu1 %v7007_v17  ;;  %v6991_v2 = vor.u32 %v7591_v60, %v6990_v44  ;;  %v8483_v60 = vor.u32 %v7485_v9, %v6566_v8 }
  0xf6   :  { %12202 = vst [vmem:[#allocation20_spill] sm:$0xff] %v8455_v32  ;;  %v2164_v19 = vpop.f32.mrf.mxu3 }
  0xf7   :  { %v1828_v20 = vpop.f32.mrf.mxu2  ;;  %12204 = vst [vmem:[#allocation22_spill] sm:$0xff] %v8483_v60 }
  0xf8   :  { %v2158_v5 = vadd.f32 %v2157_v26, %v1828_v20  ;;  %v1509_v13 = vpop.f32.mrf.mxu1  ;;  %v6974_v26 = vld [vmem:[%s11945_s0 + $0x8] sm:$0xf] }
  0xf9   :  { %v8462_v45 = vpop.f32.mrf.mxu0  ;;  %2458 = vmatpush.bf16.msrb.mxu1 %v6991_v2  ;;  %v6975_v11 = vor.u32 %v7587_v27, %v6974_v26  ;;  %v6584_v2 = vld [vmem:[%s11946_s1 + $0x108] sm:$0xf0] }
  0xfa   :  { %v3809_v12 = vmax.f32 %v2158_v5, 0.0  ;;  %v8495_v8 = vor.u32 %v7488_v50, %v6584_v2 }
  0xfb   :  { %7107 = vmatmul.msk.bf16.gmra.mxu1 %vm930_vm1, %v8457_v22  ;;  %7171 = vmatmul.msk.bf16.gmra.mxu3 %vm930_vm1, %v8457_v22  ;;  %v6592_v22 = vld [vmem:[%s11946_s1 + $0x118] sm:$0xf0] }
  0xfc   :  { %12206 = vst [vmem:[#allocation24_spill] sm:$0xff] %v8495_v8 }
  0xfd   :  { %2459 = vmatpush.bf16.msrb.mxu1 %v6975_v11 }
  0xfe   :  { %v2167_v16 = vpop.f32.mrf.mxu3 }
  0xff   :  { %v1830_v17 = vpop.f32.mrf.mxu2 }
 0x100   :  { %v2160_v20 = vadd.f32 %v2159_v57, %v1830_v17  ;;  %v1511_v44 = vpop.f32.mrf.mxu1  ;;  %v6574_v17 = vld [vmem:[%s11946_s1 + $0xf0] sm:$0xf] }
 0x101   :  { %v1175_v54 = vpop.f32.mrf.mxu0 }
 0x102   :  { %v3813_v3 = vmax.f32 %v2160_v20, 0.0 }
 0x104   :  { %1214 = vmatmul.bf16.gmra.mxu0 %v8483_v60  ;;  %1872 = vmatmul.bf16.gmra.mxu2 %v8483_v60  ;;  %v8493_v57 = vpack.c.bf16 %v3813_v3, %v3809_v12  ;;  %v7487_v12 = vld [vmem:[%s11946_s1 + $0xf4] sm:$0xf0] }
 0x105   :  { %v8507_v2 = vor.u32 %v7487_v12, %v6574_v17 }
 0x106   :  { %12205 = vst [vmem:[#allocation23_spill] sm:$0xff] %v8493_v57  ;;  %v2169_v26 = vpop.f32.mrf.mxu3 }
 0x107   :  { %v1833_v27 = vpop.f32.mrf.mxu2  ;;  %12207 = vst [vmem:[#allocation25_spill] sm:$0xff] %v8507_v2 }
 0x108   :  { %v2163_v5 = vadd.f32 %v2162_v23, %v1833_v27  ;;  %v1514_v9 = vpop.f32.mrf.mxu1 }
 0x109   :  { %v1177_v11 = vpop.f32.mrf.mxu0 }
 0x10a   :  { %v3817_v32 = vmax.f32 %v2163_v5, 0.0  ;;  %v1507_v6 = vadd.f32 %v8429_v35, %v1177_v11 }
 0x10b   :  { %7108 = vmatmul.msk.bf16.gmra.mxu1 %vm930_vm1, %v8495_v8  ;;  %7172 = vmatmul.msk.bf16.gmra.mxu3 %vm930_vm1, %v8495_v8  ;;  %v7490_v8 = vld [vmem:[%s11946_s1 + $0x114] sm:$0xf] }
 0x10c   :  { %v8521_v12 = vor.u32 %v7490_v8, %v6592_v22  ;;  %v6582_v22 = vld [vmem:[%s11946_s1 + $0x100] sm:$0xf]  ;;  %v3820_v8 = vmax.f32 %v1507_v6, 0.0 }
 0x10e   :  { %v2172_v3 = vpop.f32.mrf.mxu3  ;;  %12209 = vst [vmem:[#allocation27_spill] sm:$0xff] %v8521_v12 }
 0x10f   :  { %v1835_v50 = vpop.f32.mrf.mxu2 }
 0x110   :  { %v2165_v20 = vadd.f32 %v2164_v19, %v1835_v50  ;;  %v1516_v23 = vpop.f32.mrf.mxu1 }
 0x111   :  { %v1180_v27 = vpop.f32.mrf.mxu0 }
 0x112   :  { %v3821_v57 = vmax.f32 %v2165_v20, 0.0  ;;  %v1510_v5 = vadd.f32 %v1509_v13, %v1180_v27  ;;  %v7489_v13 = vld [vmem:[%s11946_s1 + $0x104] sm:$0xf0] }
 0x114   :  { %1219 = vmatmul.bf16.gmra.mxu0 %v8507_v2  ;;  %1877 = vmatmul.bf16.gmra.mxu2 %v8507_v2  ;;  %v8517_v62 = vpack.c.bf16 %v3821_v57, %v3817_v32  ;;  %v3824_v32 = vmax.f32 %v1510_v5, 0.0 }
 0x116   :  { %12208 = vst [vmem:[#allocation26_spill] sm:$0xff] %v8517_v62  ;;  %v8519_v19 = vpop.f32.mrf.mxu3  ;;  %v1505_v62 = vadd.f32 %v8403_v1, %v1175_v54  ;;  %v8543_v54 = vor.u32 %v7489_v13, %v6582_v22  ;;  %v1500_v1 = vadd.f32 %v8371_v61, %v8439_v38  ;;  %v7492_v61 = vld [vmem:[%s11946_s1 + $0x124] sm:$0xf] }
 0x117   :  { %v1838_v17 = vpop.f32.mrf.mxu2 }
 0x118   :  { %v2168_v50 = vadd.f32 %v2167_v16, %v1838_v17  ;;  %v8523_v20 = vpop.f32.mrf.mxu1  ;;  %12210 = vst [vmem:[#allocation28_spill] sm:$0xff] %v8543_v54  ;;  %v3816_v27 = vmax.f32 %v1505_v62, 0.0  ;;  %v6600_v62 = vld [vmem:[%s11946_s1 + $0x128] sm:$0xf0]  ;;  %v3808_v38 = vmax.f32 %v1500_v1, 0.0 }
 0x119   :  { %v1182_v2 = vpop.f32.mrf.mxu0 }
 0x11a   :  { %v1512_v60 = vadd.f32 %v1511_v44, %v1182_v2  ;;  %v1502_v44 = vadd.f32 %v8385_v36, %v8462_v45  ;;  %v3825_v5 = vmax.f32 %v2168_v50, 0.0  ;;  %v4304_v6 = vpack.c.bf16 %v3820_v8, %v3816_v27 }
 0x11b   :  { %7109 = vmatmul.msk.bf16.gmra.mxu1 %vm930_vm1, %v8521_v12  ;;  %7173 = vmatmul.msk.bf16.gmra.mxu3 %vm930_vm1, %v8521_v12  ;;  %v1497_v12 = vadd.f32 %v8355_v51, %v8408_v56  ;;  %v8559_v50 = vor.u32 %v7492_v61, %v6600_v62  ;;  %v7494_v62 = vld [vmem:[%s11946_s1 + $0x134] sm:$0xf] }
 0x11c   :  { %v3828_v57 = vmax.f32 %v1512_v60, 0.0  ;;  %v3812_v36 = vmax.f32 %v1502_v44, 0.0 }
 0x11d   :  { %v3804_v51 = vmax.f32 %v1497_v12, 0.0  ;;  %12212 = vst [vmem:[#allocation30_spill] sm:$0xff] %v8559_v50 }
 0x11e   :  { %v4308_v16 = vpack.c.bf16 %v3828_v57, %v3824_v32  ;;  %v8537_v35 = vpop.f32.mrf.mxu3 }
 0x11f   :  { %v1840_v11 = vpop.f32.mrf.mxu2 }
 0x120   :  { %v2170_v2 = vadd.f32 %v2169_v26, %v1840_v11  ;;  %v8541_v60 = vpop.f32.mrf.mxu1  ;;  %4716 = vmatpush.bf16.msra.mxu1 %v4308_v16  ;;  %v3800_v16 = vmax.f32 %v8389_v47, 0.0  ;;  %v7491_v47 = vld [vmem:[%s11946_s1 + $0x114] sm:$0xf0] }
 0x121   :  { %v1185_v17 = vpop.f32.mrf.mxu0 }
 0x122   :  { %v3829_v32 = vmax.f32 %v2170_v2, 0.0  ;;  %v1515_v57 = vadd.f32 %v1514_v9, %v1185_v17  ;;  %v4300_v9 = vpack.c.bf16 %v3812_v36, %v3808_v38  ;;  %v4296_v11 = vpack.c.bf16 %v3804_v51, %v3800_v16 }
 0x124   :  { %v8549_v45 = vpack.c.bf16 %v3829_v32, %v3825_v5  ;;  %1224 = vmatmul.bf16.gmra.mxu0 %v8543_v54  ;;  %1882 = vmatmul.bf16.gmra.mxu2 %v8543_v54  ;;  %v3832_v2 = vmax.f32 %v1515_v57, 0.0 }
 0x125   :  { %4717 = vmatpush.bf16.msra.mxu1 %v4304_v6 }
 0x126   :  { %12211 = vst [vmem:[#allocation29_spill] sm:$0xff] %v8549_v45  ;;  %v2179_v26 = vpop.f32.mrf.mxu3 }
 0x127   :  { %v1843_v56 = vpop.f32.mrf.mxu2 }
 0x128   :  { %v2173_v22 = vadd.f32 %v2172_v3, %v1843_v56  ;;  %v1524_v13 = vpop.f32.mrf.mxu1  ;;  %v6590_v3 = vld [vmem:[%s11946_s1 + $0x110] sm:$0xf] }
 0x129   :  { %4718 = vmatpush.bf16.msra.mxu1 %v4300_v9  ;;  %v1187_v44 = vpop.f32.mrf.mxu0  ;;  %v8575_v32 = vor.u32 %v7491_v47, %v6590_v3 }
 0x12a   :  { %v1517_v8 = vadd.f32 %v1516_v23, %v1187_v44  ;;  %v3833_v36 = vmax.f32 %v2173_v22, 0.0 }
 0x12b   :  { %7110 = vmatmul.msk.bf16.gmra.mxu1 %vm930_vm1, %v8559_v50  ;;  %7174 = vmatmul.msk.bf16.gmra.mxu3 %vm930_vm1, %v8559_v50  ;;  %12213 = vst [vmem:[#allocation31_spill] sm:$0xff] %v8575_v32  ;;  %v6656_v50 = vld [vmem:[%s11946_s1 + $0x198] sm:$0xf0] }
 0x12c   :  { %v3836_v12 = vmax.f32 %v1517_v8, 0.0 }
 0x12d   :  { %4719 = vmatpush.bf16.msra.mxu1 %v4296_v11 }
 0x12e   :  { %v2182_v1 = vpop.f32.mrf.mxu3  ;;  %v8572_v23 = vpack.c.bf16 %v3836_v12, %v3832_v2 }
 0x12f   :  { %v1845_v27 = vpop.f32.mrf.mxu2 }
 0x130   :  { %v2175_v17 = vadd.f32 %v8519_v19, %v1845_v27  ;;  %v1526_v5 = vpop.f32.mrf.mxu1  ;;  %v6608_v19 = vld [vmem:[%s11946_s1 + $0x138] sm:$0xf0] }
 0x131   :  { %4720 = vmatpush.bf16.msra.mxu1 %v8383_v29  ;;  %v1190_v57 = vpop.f32.mrf.mxu0  ;;  %v7605_v29 = vld [vmem:[%s11945_s0 + $0xac] sm:$0xf]  ;;  %v8596_v22 = vor.u32 %v7494_v62, %v6608_v19 }
 0x132   :  { %v3837_v6 = vmax.f32 %v2175_v17, 0.0  ;;  %v1520_v61 = vadd.f32 %v8523_v20, %v1190_v57  ;;  %v7056_v20 = vld [vmem:[%s11945_s0 + $0xb8] sm:$0xf0]  ;;  %v6616_v62 = vld [vmem:[%s11946_s1 + $0x148] sm:$0xf0] }
 0x133   :  { %v7059_v51 = vor.u32 %v7605_v29, %v7056_v20  ;;  %12215 = vst [vmem:[#allocation33_spill] sm:$0xff] %v8596_v22 }
 0x134   :  { %1229 = vmatmul.bf16.gmra.mxu0 %v8575_v32  ;;  %1887 = vmatmul.bf16.gmra.mxu2 %v8575_v32  ;;  %v8593_v38 = vpack.c.bf16 %v3837_v6, %v3833_v36 }
 0x135   :  { %4721 = vmatpush.bf16.msra.mxu1 %v8353_v48  ;;  %3112 = vmatpush.bf16.msrb.mxu0 %v7059_v51  ;;  %v3840_v48 = vmax.f32 %v1520_v61, 0.0  ;;  %v7496_v61 = vld [vmem:[%s11946_s1 + $0x144] sm:$0xf] }
 0x136   :  { %12214 = vst [vmem:[#allocation32_spill] sm:$0xff] %v8593_v38  ;;  %v2184_v56 = vpop.f32.mrf.mxu3  ;;  %v8626_v20 = vor.u32 %v7496_v61, %v6616_v62  ;;  %v7498_v61 = vld [vmem:[%s11946_s1 + $0x154] sm:$0xf] }
 0x137   :  { %v1848_v9 = vpop.f32.mrf.mxu2 }
 0x138   :  { %v2178_v16 = vadd.f32 %v8537_v35, %v1848_v9  ;;  %v1529_v44 = vpop.f32.mrf.mxu1  ;;  %v6598_v35 = vld [vmem:[%s11946_s1 + $0x120] sm:$0xf]  ;;  %12218 = vst [vmem:[#allocation36_spill] sm:$0xff] %v8626_v20 }
 0x139   :  { %4722 = vmatpush.bf16.msra.mxu1 %v8327_v10  ;;  %v1192_v8 = vpop.f32.mrf.mxu0  ;;  %v7493_v10 = vld [vmem:[%s11946_s1 + $0x124] sm:$0xf0] }
 0x13a   :  { %v1522_v11 = vadd.f32 %v8541_v60, %v1192_v8  ;;  %v8614_v17 = vor.u32 %v7493_v10, %v6598_v35  ;;  %v3841_v36 = vmax.f32 %v2178_v16, 0.0 }
 0x13b   :  { %7111 = vmatmul.msk.bf16.gmra.mxu1 %vm930_vm1, %v8596_v22  ;;  %7175 = vmatmul.msk.bf16.gmra.mxu3 %vm930_vm1, %v8596_v22 }
 0x13c   :  { %v3844_v2 = vmax.f32 %v1522_v11, 0.0  ;;  %12216 = vst [vmem:[#allocation34_spill] sm:$0xff] %v8614_v17 }
 0x13d   :  { %4723 = vmatpush.bf16.msra.mxu1 %v8295_v33 }
 0x13e   :  { %v2187_v12 = vpop.f32.mrf.mxu3  ;;  %v8612_v60 = vpack.c.bf16 %v3844_v2, %v3840_v48  ;;  %v6606_v48 = vld [vmem:[%s11946_s1 + $0x130] sm:$0xf]  ;;  %v7495_v2 = vld [vmem:[%s11946_s1 + $0x134] sm:$0xf0] }
 0x13f   :  { %v1850_v3 = vpop.f32.mrf.mxu2 }
 0x140   :  { %v2180_v47 = vadd.f32 %v2179_v26, %v1850_v3  ;;  %v1531_v27 = vpop.f32.mrf.mxu1 }
 0x141   :  { %v1195_v57 = vpop.f32.mrf.mxu0 }
 0x142   :  { %v3845_v6 = vmax.f32 %v2180_v47, 0.0  ;;  %v1525_v33 = vadd.f32 %v1524_v13, %v1195_v57  ;;  %v8642_v47 = vor.u32 %v7495_v2, %v6606_v48 }
 0x144   :  { %1234 = vmatmul.bf16.gmra.mxu0 %v8614_v17  ;;  %1892 = vmatmul.bf16.gmra.mxu2 %v8614_v17  ;;  %v8624_v26 = vpack.c.bf16 %v3845_v6, %v3841_v36  ;;  %v3848_v8 = vmax.f32 %v1525_v33, 0.0  ;;  %12219 = vst [vmem:[#allocation37_spill] sm:$0xff] %v8642_v47 }
 0x146   :  { %12217 = vst [vmem:[#allocation35_spill] sm:$0xff] %v8624_v26  ;;  %v2189_v19 = vpop.f32.mrf.mxu3 }
 0x147   :  { %v1853_v29 = vpop.f32.mrf.mxu2 }
 0x148   :  { %v2183_v51 = vadd.f32 %v2182_v1, %v1853_v29  ;;  %v1534_v13 = vpop.f32.mrf.mxu1 }
 0x149   :  { %v1197_v9 = vpop.f32.mrf.mxu0 }
 0x14a   :  { %v1527_v16 = vadd.f32 %v1526_v5, %v1197_v9  ;;  %v3849_v36 = vmax.f32 %v2183_v51, 0.0 }
 0x14b   :  { %7112 = vmatmul.msk.bf16.gmra.mxu1 %vm930_vm1, %v8626_v20  ;;  %7176 = vmatmul.msk.bf16.gmra.mxu3 %vm930_vm1, %v8626_v20  ;;  %v6648_v20 = vld [vmem:[%s11946_s1 + $0x188] sm:$0xf0] }
 0x14c   :  { %v3852_v11 = vmax.f32 %v1527_v16, 0.0 }
 0x14e   :  { %v2192_v1 = vpop.f32.mrf.mxu3  ;;  %v8638_v35 = vpack.c.bf16 %v3852_v11, %v3848_v8 }
 0x14f   :  { %v1855_v5 = vpop.f32.mrf.mxu2 }
 0x150   :  { %v2185_v10 = vadd.f32 %v2184_v56, %v1855_v5  ;;  %v8640_v3 = vpop.f32.mrf.mxu1  ;;  %v6624_v56 = vld [vmem:[%s11946_s1 + $0x158] sm:$0xf0]  ;;  %v6614_v5 = vld [vmem:[%s11946_s1 + $0x140] sm:$0xf] }
 0x151   :  { %v1200_v57 = vpop.f32.mrf.mxu0  ;;  %v8654_v16 = vor.u32 %v7498_v61, %v6624_v56 }
 0x152   :  { %v3853_v6 = vmax.f32 %v2185_v10, 0.0  ;;  %v1530_v33 = vadd.f32 %v1529_v44, %v1200_v57 }
 0x153   :  { %12221 = vst [vmem:[#allocation39_spill] sm:$0xff] %v8654_v16 }
 0x154   :  { %1239 = vmatmul.bf16.gmra.mxu0 %v8642_v47  ;;  %1897 = vmatmul.bf16.gmra.mxu2 %v8642_v47  ;;  %v8652_v62 = vpack.c.bf16 %v3853_v6, %v3849_v36  ;;  %v3856_v48 = vmax.f32 %v1530_v33, 0.0 }
 0x156   :  { %12220 = vst [vmem:[#allocation38_spill] sm:$0xff] %v8652_v62  ;;  %v2194_v29 = vpop.f32.mrf.mxu3  ;;  %v7502_v62 = vld [vmem:[%s11946_s1 + $0x174] sm:$0xf] }
 0x157   :  { %v1858_v9 = vpop.f32.mrf.mxu2 }
 0x158   :  { %v2188_v51 = vadd.f32 %v2187_v12, %v1858_v9  ;;  %v8656_v44 = vpop.f32.mrf.mxu1  ;;  %v7497_v12 = vld [vmem:[%s11946_s1 + $0x144] sm:$0xf0] }
 0x159   :  { %v1202_v8 = vpop.f32.mrf.mxu0  ;;  %v8672_v61 = vor.u32 %v7497_v12, %v6614_v5 }
 0x15a   :  { %v1532_v11 = vadd.f32 %v1531_v27, %v1202_v8  ;;  %v3857_v33 = vmax.f32 %v2188_v51, 0.0 }
 0x15b   :  { %7113 = vmatmul.msk.bf16.gmra.mxu1 %vm930_vm1, %v8654_v16  ;;  %7177 = vmatmul.msk.bf16.gmra.mxu3 %vm930_vm1, %v8654_v16  ;;  %12222 = vst [vmem:[#allocation40_spill] sm:$0xff] %v8672_v61 }
 0x15c   :  { %v3860_v2 = vmax.f32 %v1532_v11, 0.0  ;;  %v7500_v11 = vld [vmem:[%s11946_s1 + $0x164] sm:$0xf] }
 0x15e   :  { %v2197_v10 = vpop.f32.mrf.mxu3  ;;  %v8668_v57 = vpack.c.bf16 %v3860_v2, %v3856_v48 }
 0x15f   :  { %v1860_v27 = vpop.f32.mrf.mxu2 }
 0x160   :  { %v2190_v36 = vadd.f32 %v2189_v19, %v1860_v27  ;;  %v8670_v6 = vpop.f32.mrf.mxu1  ;;  %v6632_v19 = vld [vmem:[%s11946_s1 + $0x168] sm:$0xf0] }
 0x161   :  { %v1205_v56 = vpop.f32.mrf.mxu0  ;;  %v8686_v51 = vor.u32 %v7500_v11, %v6632_v19 }
 0x162   :  { %v3861_v9 = vmax.f32 %v2190_v36, 0.0  ;;  %v8674_v8 = vadd.f32 %v1534_v13, %v1205_v56  ;;  %v6622_v36 = vld [vmem:[%s11946_s1 + $0x150] sm:$0xf]  ;;  %v7499_v56 = vld [vmem:[%s11946_s1 + $0x154] sm:$0xf0] }
 0x163   :  { %12224 = vst [vmem:[#allocation42_spill] sm:$0xff] %v8686_v51  ;;  %v8704_v19 = vor.u32 %v7499_v56, %v6622_v36 }
 0x164   :  { %1244 = vmatmul.bf16.gmra.mxu0 %v8672_v61  ;;  %1902 = vmatmul.bf16.gmra.mxu2 %v8672_v61  ;;  %v8684_v48 = vpack.c.bf16 %v3861_v9, %v3857_v33 }
 0x165   :  { %12225 = vst [vmem:[#allocation43_spill] sm:$0xff] %v8704_v19 }
 0x166   :  { %12223 = vst [vmem:[#allocation41_spill] sm:$0xff] %v8684_v48  ;;  %v2199_v2 = vpop.f32.mrf.mxu3 }
 0x167   :  { %v1863_v5 = vpop.f32.mrf.mxu2 }
 0x168   :  { %v2193_v13 = vadd.f32 %v2192_v1, %v1863_v5  ;;  %v8688_v12 = vpop.f32.mrf.mxu1 }
 0x169   :  { %v8690_v27 = vpop.f32.mrf.mxu0 }
 0x16a   :  { %v3865_v38 = vmax.f32 %v2193_v13, 0.0 }
 0x16b   :  { %7114 = vmatmul.msk.bf16.gmra.mxu1 %vm930_vm1, %v8686_v51  ;;  %7178 = vmatmul.msk.bf16.gmra.mxu3 %vm930_vm1, %v8686_v51  ;;  %v6630_v51 = vld [vmem:[%s11946_s1 + $0x160] sm:$0xf] }
 0x16e   :  { %v2202_v33 = vpop.f32.mrf.mxu3 }
 0x16f   :  { %v1865_v1 = vpop.f32.mrf.mxu2 }
 0x170   :  { %v2195_v9 = vadd.f32 %v2194_v29, %v1865_v1  ;;  %v8702_v11 = vpop.f32.mrf.mxu1  ;;  %v6640_v29 = vld [vmem:[%s11946_s1 + $0x178] sm:$0xf0] }
 0x171   :  { %v8706_v5 = vpop.f32.mrf.mxu0  ;;  %v8718_v48 = vor.u32 %v7502_v62, %v6640_v29 }
 0x172   :  { %v3869_v26 = vmax.f32 %v2195_v9, 0.0 }
 0x173   :  { %12227 = vst [vmem:[#allocation45_spill] sm:$0xff] %v8718_v48 }
 0x174   :  { %1249 = vmatmul.bf16.gmra.mxu0 %v8704_v19  ;;  %1907 = vmatmul.bf16.gmra.mxu2 %v8704_v19  ;;  %v8716_v1 = vpack.c.bf16 %v3869_v26, %v3865_v38  ;;  %v7501_v38 = vld [vmem:[%s11946_s1 + $0x164] sm:$0xf0] }
 0x176   :  { %12226 = vst [vmem:[#allocation44_spill] sm:$0xff] %v8716_v1  ;;  %v2204_v36 = vpop.f32.mrf.mxu3 }
 0x177   :  { %v1868_v56 = vpop.f32.mrf.mxu2 }
 0x178   :  { %v2198_v13 = vadd.f32 %v2197_v10, %v1868_v56  ;;  %v1549_v9 = vpop.f32.mrf.mxu1  ;;  %v8730_v56 = vor.u32 %v7501_v38, %v6630_v51 }
 0x179   :  { %v1212_v45 = vpop.f32.mrf.mxu0 }
 0x17a   :  { %12228 = vst [vmem:[#allocation46_spill] sm:$0xff] %v8730_v56  ;;  %v3873_v16 = vmax.f32 %v2198_v13, 0.0 }
 0x17b   :  { %7115 = vmatmul.msk.bf16.gmra.mxu1 %vm930_vm1, %v8718_v48  ;;  %7179 = vmatmul.msk.bf16.gmra.mxu3 %vm930_vm1, %v8718_v48  ;;  %v7504_v48 = vld [vmem:[%s11946_s1 + $0x184] sm:$0xf] }
 0x17c   :  { %v8742_v38 = vor.u32 %v7504_v48, %v6648_v20 }
 0x17e   :  { %v2207_v26 = vpop.f32.mrf.mxu3  ;;  %12230 = vst [vmem:[#allocation48_spill] sm:$0xff] %v8742_v38 }
 0x17f   :  { %v1870_v62 = vpop.f32.mrf.mxu2 }
 0x180   :  { %v2200_v29 = vadd.f32 %v2199_v2, %v1870_v62  ;;  %v1551_v10 = vpop.f32.mrf.mxu1 }
 0x181   :  { %v1215_v1 = vpop.f32.mrf.mxu0 }
 0x182   :  { %v3877_v19 = vmax.f32 %v2200_v29, 0.0 }
 0x184   :  { %1254 = vmatmul.bf16.gmra.mxu0 %v8730_v56  ;;  %1912 = vmatmul.bf16.gmra.mxu2 %v8730_v56  ;;  %v8740_v61 = vpack.c.bf16 %v3877_v19, %v3873_v16  ;;  %v6638_v56 = vld [vmem:[%s11946_s1 + $0x170] sm:$0xf]  ;;  %v7503_v16 = vld [vmem:[%s11946_s1 + $0x174] sm:$0xf0] }
 0x186   :  { %12229 = vst [vmem:[#allocation47_spill] sm:$0xff] %v8740_v61  ;;  %v2209_v2 = vpop.f32.mrf.mxu3 }
 0x187   :  { %v1873_v51 = vpop.f32.mrf.mxu2 }
 0x188   :  { %v2203_v13 = vadd.f32 %v2202_v33, %v1873_v51  ;;  %v1554_v62 = vpop.f32.mrf.mxu1  ;;  %v8754_v51 = vor.u32 %v7503_v16, %v6638_v56 }
 0x189   :  { %v1217_v29 = vpop.f32.mrf.mxu0 }
 0x18a   :  { %12231 = vst [vmem:[#allocation49_spill] sm:$0xff] %v8754_v51  ;;  %v3881_v22 = vmax.f32 %v2203_v13, 0.0  ;;  %v1547_v54 = vadd.f32 %v8702_v11, %v1217_v29 }
 0x18b   :  { %7116 = vmatmul.msk.bf16.gmra.mxu1 %vm930_vm1, %v8742_v38  ;;  %7180 = vmatmul.msk.bf16.gmra.mxu3 %vm930_vm1, %v8742_v38  ;;  %v7506_v38 = vld [vmem:[%s11946_s1 + $0x194] sm:$0xf] }
 0x18c   :  { %v8768_v16 = vor.u32 %v7506_v38, %v6656_v50  ;;  %v6646_v50 = vld [vmem:[%s11946_s1 + $0x180] sm:$0xf] }
 0x18e   :  { %v2212_v19 = vpop.f32.mrf.mxu3  ;;  %12233 = vst [vmem:[#allocation51_spill] sm:$0xff] %v8768_v16 }
 0x18f   :  { %v1875_v20 = vpop.f32.mrf.mxu2 }
 0x190   :  { %v2205_v48 = vadd.f32 %v2204_v36, %v1875_v20  ;;  %v1556_v33 = vpop.f32.mrf.mxu1 }
 0x191   :  { %v1220_v61 = vpop.f32.mrf.mxu0 }
 0x192   :  { %v3885_v47 = vmax.f32 %v2205_v48, 0.0  ;;  %v1550_v13 = vadd.f32 %v1549_v9, %v1220_v61  ;;  %v7505_v61 = vld [vmem:[%s11946_s1 + $0x184] sm:$0xf0] }
 0x194   :  { %1259 = vmatmul.bf16.gmra.mxu0 %v8754_v51  ;;  %1917 = vmatmul.bf16.gmra.mxu2 %v8754_v51  ;;  %v8764_v17 = vpack.c.bf16 %v3885_v47, %v3881_v22  ;;  %v3888_v22 = vmax.f32 %v1550_v13, 0.0 }
 0x196   :  { %12232 = vst [vmem:[#allocation50_spill] sm:$0xff] %v8764_v17  ;;  %v8766_v36 = vpop.f32.mrf.mxu3  ;;  %v1545_v17 = vadd.f32 %v8688_v12, %v1215_v1  ;;  %v1540_v12 = vadd.f32 %v8656_v44, %v8706_v5  ;;  %v7508_v44 = vld [vmem:[%s11946_s1 + $0x1a4] sm:$0xf] }
 0x197   :  { %v1878_v56 = vpop.f32.mrf.mxu2 }
 0x198   :  { %v2208_v20 = vadd.f32 %v2207_v26, %v1878_v56  ;;  %v8770_v48 = vpop.f32.mrf.mxu1  ;;  %v1542_v26 = vadd.f32 %v8670_v6, %v1212_v45  ;;  %v3880_v1 = vmax.f32 %v1545_v17, 0.0  ;;  %v6664_v17 = vld [vmem:[%s11946_s1 + $0x1a8] sm:$0xf0]  ;;  %v3872_v5 = vmax.f32 %v1540_v12, 0.0 }
 0x199   :  { %v1222_v51 = vpop.f32.mrf.mxu0 }
 0x19a   :  { %v1552_v32 = vadd.f32 %v1551_v10, %v1222_v51  ;;  %v3884_v10 = vmax.f32 %v1547_v54, 0.0  ;;  %v3889_v13 = vmax.f32 %v2208_v20, 0.0  ;;  %v3876_v45 = vmax.f32 %v1542_v26, 0.0 }
 0x19b   :  { %7117 = vmatmul.msk.bf16.gmra.mxu1 %vm930_vm1, %v8768_v16  ;;  %7181 = vmatmul.msk.bf16.gmra.mxu3 %vm930_vm1, %v8768_v16 }
 0x19c   :  { %v3892_v47 = vmax.f32 %v1552_v32, 0.0  ;;  %v8789_v32 = vor.u32 %v7505_v61, %v6646_v50  ;;  %v4336_v54 = vpack.c.bf16 %v3884_v10, %v3880_v1  ;;  %v3864_v61 = vmax.f32 %v8674_v8, 0.0  ;;  %v7507_v8 = vld [vmem:[%s11946_s1 + $0x194] sm:$0xf0] }
 0x19e   :  { %v4340_v9 = vpack.c.bf16 %v3892_v47, %v3888_v22  ;;  %v8784_v11 = vpop.f32.mrf.mxu3  ;;  %12234 = vst [vmem:[#allocation52_spill] sm:$0xff] %v8789_v32  ;;  %v1537_v47 = vadd.f32 %v8640_v3, %v8690_v27 }
 0x19f   :  { %v1880_v38 = vpop.f32.mrf.mxu2 }
 0x1a0   :  { %v2210_v29 = vadd.f32 %v2209_v2, %v1880_v38  ;;  %v8787_v51 = vpop.f32.mrf.mxu1  ;;  %4740 = vmatpush.bf16.msra.mxu3 %v4340_v9  ;;  %v3868_v3 = vmax.f32 %v1537_v47, 0.0 }
 0x1a1   :  { %v1225_v56 = vpop.f32.mrf.mxu0 }
 0x1a2   :  { %v3893_v16 = vmax.f32 %v2210_v29, 0.0  ;;  %v1555_v22 = vadd.f32 %v1554_v62, %v1225_v56  ;;  %v4332_v62 = vpack.c.bf16 %v3876_v45, %v3872_v5  ;;  %v4328_v10 = vpack.c.bf16 %v3868_v3, %v3864_v61 }
 0x1a4   :  { %v8795_v6 = vpack.c.bf16 %v3893_v16, %v3889_v13  ;;  %1264 = vmatmul.bf16.gmra.mxu0 %v8789_v32  ;;  %1922 = vmatmul.bf16.gmra.mxu2 %v8789_v32  ;;  %v8805_v16 = vor.u32 %v7508_v44, %v6664_v17  ;;  %v3896_v38 = vmax.f32 %v1555_v22, 0.0  ;;  %v7510_v17 = vld [vmem:[%s11946_s1 + $0x1b4] sm:$0xf] }
 0x1a5   :  { %4741 = vmatpush.bf16.msra.mxu3 %v4336_v54 }
 0x1a6   :  { %12235 = vst [vmem:[#allocation53_spill] sm:$0xff] %v8795_v6  ;;  %v2219_v2 = vpop.f32.mrf.mxu3 }
 0x1a7   :  { %v1883_v27 = vpop.f32.mrf.mxu2  ;;  %12236 = vst [vmem:[#allocation54_spill] sm:$0xff] %v8805_v16 }
 0x1a8   :  { %v2213_v20 = vadd.f32 %v2212_v19, %v1883_v27  ;;  %v1564_v50 = vpop.f32.mrf.mxu1  ;;  %v6654_v19 = vld [vmem:[%s11946_s1 + $0x190] sm:$0xf] }
 0x1a9   :  { %4742 = vmatpush.bf16.msra.mxu3 %v4332_v62  ;;  %v1227_v9 = vpop.f32.mrf.mxu0  ;;  %v8821_v47 = vor.u32 %v7507_v8, %v6654_v19 }
 0x1aa   :  { %v1557_v26 = vadd.f32 %v1556_v33, %v1227_v9  ;;  %v3897_v45 = vmax.f32 %v2213_v20, 0.0 }
 0x1ab   :  { %7118 = vmatmul.msk.bf16.gmra.mxu1 %vm930_vm1, %v8805_v16  ;;  %7182 = vmatmul.msk.bf16.gmra.mxu3 %vm930_vm1, %v8805_v16  ;;  %12237 = vst [vmem:[#allocation55_spill] sm:$0xff] %v8821_v47  ;;  %v6720_v16 = vld [vmem:[%s11946_s1 + $0x218] sm:$0xf0] }
 0x1ac   :  { %v3900_v29 = vmax.f32 %v1557_v26, 0.0 }
 0x1ad   :  { %4743 = vmatpush.bf16.msra.mxu3 %v4328_v10 }
 0x1ae   :  { %v2222_v12 = vpop.f32.mrf.mxu3  ;;  %v8818_v33 = vpack.c.bf16 %v3900_v29, %v3896_v38 }
 0x1af   :  { %v1885_v1 = vpop.f32.mrf.mxu2 }
 0x1b0   :  { %v2215_v56 = vadd.f32 %v8766_v36, %v1885_v1  ;;  %v1566_v13 = vpop.f32.mrf.mxu1  ;;  %v6672_v36 = vld [vmem:[%s11946_s1 + $0x1b8] sm:$0xf0] }
 0x1b1   :  { %4744 = vmatpush.bf16.msra.mxu3 %v8668_v57  ;;  %v1230_v22 = vpop.f32.mrf.mxu0  ;;  %v7601_v57 = vld [vmem:[%s11945_s0 + $0x8c] sm:$0xf]  ;;  %v8842_v20 = vor.u32 %v7510_v17, %v6672_v36 }
 0x1b2   :  { %v3901_v54 = vmax.f32 %v2215_v56, 0.0  ;;  %v1560_v44 = vadd.f32 %v8770_v48, %v1230_v22  ;;  %v7040_v48 = vld [vmem:[%s11945_s0 + $0x98] sm:$0xf0]  ;;  %v6680_v17 = vld [vmem:[%s11946_s1 + $0x1c8] sm:$0xf0] }
 0x1b3   :  { %v7043_v3 = vor.u32 %v7601_v57, %v7040_v48  ;;  %12239 = vst [vmem:[#allocation57_spill] sm:$0xff] %v8842_v20 }
 0x1b4   :  { %1269 = vmatmul.bf16.gmra.mxu0 %v8821_v47  ;;  %1927 = vmatmul.bf16.gmra.mxu2 %v8821_v47  ;;  %v8839_v5 = vpack.c.bf16 %v3901_v54, %v3897_v45 }
 0x1b5   :  { %4745 = vmatpush.bf16.msra.mxu3 %v8638_v35  ;;  %3113 = vmatpush.bf16.msrb.mxu0 %v7043_v3  ;;  %v3904_v35 = vmax.f32 %v1560_v44, 0.0  ;;  %v7512_v44 = vld [vmem:[%s11946_s1 + $0x1c4] sm:$0xf] }
 0x1b6   :  { %12238 = vst [vmem:[#allocation56_spill] sm:$0xff] %v8839_v5  ;;  %v2224_v27 = vpop.f32.mrf.mxu3  ;;  %v8872_v48 = vor.u32 %v7512_v44, %v6680_v17  ;;  %v7514_v44 = vld [vmem:[%s11946_s1 + $0x1d4] sm:$0xf]  ;;  %v7597_v5 = vld [vmem:[%s11945_s0 + $0x6c] sm:$0xf] }
 0x1b7   :  { %v1888_v62 = vpop.f32.mrf.mxu2 }
 0x1b8   :  { %v2218_v61 = vadd.f32 %v8784_v11, %v1888_v62  ;;  %v1569_v9 = vpop.f32.mrf.mxu1  ;;  %v6662_v11 = vld [vmem:[%s11946_s1 + $0x1a0] sm:$0xf]  ;;  %12242 = vst [vmem:[#allocation60_spill] sm:$0xff] %v8872_v48 }
 0x1b9   :  { %4746 = vmatpush.bf16.msra.mxu3 %v8612_v60  ;;  %v1232_v26 = vpop.f32.mrf.mxu0  ;;  %v7509_v60 = vld [vmem:[%s11946_s1 + $0x1a4] sm:$0xf0] }
 0x1ba   :  { %v1562_v10 = vadd.f32 %v8787_v51, %v1232_v26  ;;  %v8860_v56 = vor.u32 %v7509_v60, %v6662_v11  ;;  %v3905_v45 = vmax.f32 %v2218_v61, 0.0 }
 0x1bb   :  { %7119 = vmatmul.msk.bf16.gmra.mxu1 %vm930_vm1, %v8842_v20  ;;  %7183 = vmatmul.msk.bf16.gmra.mxu3 %vm930_vm1, %v8842_v20 }
 0x1bc   :  { %v3908_v38 = vmax.f32 %v1562_v10, 0.0  ;;  %12240 = vst [vmem:[#allocation58_spill] sm:$0xff] %v8860_v56 }
 0x1bd   :  { %4747 = vmatpush.bf16.msra.mxu3 %v8572_v23 }
 0x1be   :  { %v2227_v29 = vpop.f32.mrf.mxu3  ;;  %v8858_v51 = vpack.c.bf16 %v3908_v38, %v3904_v35  ;;  %v6670_v35 = vld [vmem:[%s11946_s1 + $0x1b0] sm:$0xf]  ;;  %v7511_v38 = vld [vmem:[%s11946_s1 + $0x1b4] sm:$0xf0] }
 0x1bf   :  { %v1890_v19 = vpop.f32.mrf.mxu2 }
 0x1c0   :  { %v2220_v8 = vadd.f32 %v2219_v2, %v1890_v19  ;;  %v1571_v1 = vpop.f32.mrf.mxu1 }
 0x1c1   :  { %v1235_v22 = vpop.f32.mrf.mxu0 }
 0x1c2   :  { %v3909_v54 = vmax.f32 %v2220_v8, 0.0  ;;  %v1565_v23 = vadd.f32 %v1564_v50, %v1235_v22  ;;  %v8888_v8 = vor.u32 %v7511_v38, %v6670_v35 }
 0x1c4   :  { %1274 = vmatmul.bf16.gmra.mxu0 %v8860_v56  ;;  %1932 = vmatmul.bf16.gmra.mxu2 %v8860_v56  ;;  %v8870_v2 = vpack.c.bf16 %v3909_v54, %v3905_v45  ;;  %v3912_v26 = vmax.f32 %v1565_v23, 0.0  ;;  %12243 = vst [vmem:[#allocation61_spill] sm:$0xff] %v8888_v8 }
 0x1c6   :  { %12241 = vst [vmem:[#allocation59_spill] sm:$0xff] %v8870_v2  ;;  %v2229_v36 = vpop.f32.mrf.mxu3  ;;  %v7024_v2 = vld [vmem:[%s11945_s0 + $0x78] sm:$0xf0] }
 0x1c7   :  { %v1893_v57 = vpop.f32.mrf.mxu2  ;;  %v7027_v6 = vor.u32 %v7597_v5, %v7024_v2  ;;  %v7008_v5 = vld [vmem:[%s11945_s0 + $0x58] sm:$0xf0] }
 0x1c8   :  { %v2223_v3 = vadd.f32 %v2222_v12, %v1893_v57  ;;  %v1574_v50 = vpop.f32.mrf.mxu1 }
 0x1c9   :  { %v1237_v62 = vpop.f32.mrf.mxu0  ;;  %3114 = vmatpush.bf16.msrb.mxu0 %v7027_v6  ;;  %v7589_v6 = vld [vmem:[%s11945_s0 + $0x2c] sm:$0xf] }
 0x1ca   :  { %v1567_v61 = vadd.f32 %v1566_v13, %v1237_v62  ;;  %v3913_v45 = vmax.f32 %v2223_v3, 0.0 }
 0x1cb   :  { %7120 = vmatmul.msk.bf16.gmra.mxu1 %vm930_vm1, %v8872_v48  ;;  %7184 = vmatmul.msk.bf16.gmra.mxu3 %vm930_vm1, %v8872_v48 }
 0x1cc   :  { %v3916_v10 = vmax.f32 %v1567_v61, 0.0 }
 0x1ce   :  { %v2232_v12 = vpop.f32.mrf.mxu3  ;;  %v8884_v11 = vpack.c.bf16 %v3916_v10, %v3912_v26 }
 0x1cf   :  { %v1895_v13 = vpop.f32.mrf.mxu2 }
 0x1d0   :  { %v2225_v60 = vadd.f32 %v2224_v27, %v1895_v13  ;;  %v8886_v19 = vpop.f32.mrf.mxu1  ;;  %v6688_v27 = vld [vmem:[%s11946_s1 + $0x1d8] sm:$0xf0]  ;;  %v6678_v13 = vld [vmem:[%s11946_s1 + $0x1c0] sm:$0xf] }
 0x1d1   :  { %v1240_v22 = vpop.f32.mrf.mxu0  ;;  %v8900_v61 = vor.u32 %v7514_v44, %v6688_v27 }
 0x1d2   :  { %v3917_v54 = vmax.f32 %v2225_v60, 0.0  ;;  %v1570_v23 = vadd.f32 %v1569_v9, %v1240_v22 }
 0x1d3   :  { %12245 = vst [vmem:[#allocation63_spill] sm:$0xff] %v8900_v61 }
 0x1d4   :  { %1279 = vmatmul.bf16.gmra.mxu0 %v8888_v8  ;;  %1937 = vmatmul.bf16.gmra.mxu2 %v8888_v8  ;;  %v8898_v17 = vpack.c.bf16 %v3917_v54, %v3913_v45  ;;  %v3920_v35 = vmax.f32 %v1570_v23, 0.0 }
 0x1d6   :  { %12244 = vst [vmem:[#allocation62_spill] sm:$0xff] %v8898_v17  ;;  %v2234_v57 = vpop.f32.mrf.mxu3 }
 0x1d7   :  { %v1898_v62 = vpop.f32.mrf.mxu2 }
 0x1d8   :  { %v2228_v3 = vadd.f32 %v2227_v29, %v1898_v62  ;;  %v8902_v9 = vpop.f32.mrf.mxu1  ;;  %v7513_v29 = vld [vmem:[%s11946_s1 + $0x1c4] sm:$0xf0] }
 0x1d9   :  { %v1242_v26 = vpop.f32.mrf.mxu0  ;;  %v8918_v44 = vor.u32 %v7513_v29, %v6678_v13 }
 0x1da   :  { %v1572_v10 = vadd.f32 %v1571_v1, %v1242_v26  ;;  %v3921_v23 = vmax.f32 %v2228_v3, 0.0 }
 0x1db   :  { %7121 = vmatmul.msk.bf16.gmra.mxu1 %vm930_vm1, %v8900_v61  ;;  %7185 = vmatmul.msk.bf16.gmra.mxu3 %vm930_vm1, %v8900_v61  ;;  %12246 = vst [vmem:[#allocation64_spill] sm:$0xff] %v8918_v44 }
 0x1dc   :  { %v3924_v38 = vmax.f32 %v1572_v10, 0.0  ;;  %v7516_v10 = vld [vmem:[%s11946_s1 + $0x1e4] sm:$0xf] }
 0x1de   :  { %v2237_v60 = vpop.f32.mrf.mxu3  ;;  %v8914_v22 = vpack.c.bf16 %v3924_v38, %v3920_v35 }
 0x1df   :  { %v1900_v1 = vpop.f32.mrf.mxu2 }
 0x1e0   :  { %v2230_v45 = vadd.f32 %v2229_v36, %v1900_v1  ;;  %v8916_v54 = vpop.f32.mrf.mxu1  ;;  %v6696_v36 = vld [vmem:[%s11946_s1 + $0x1e8] sm:$0xf0] }
 0x1e1   :  { %v1245_v27 = vpop.f32.mrf.mxu0  ;;  %v8932_v3 = vor.u32 %v7516_v10, %v6696_v36 }
 0x1e2   :  { %v3925_v62 = vmax.f32 %v2230_v45, 0.0  ;;  %v8920_v26 = vadd.f32 %v1574_v50, %v1245_v27  ;;  %v6686_v45 = vld [vmem:[%s11946_s1 + $0x1d0] sm:$0xf]  ;;  %v7515_v27 = vld [vmem:[%s11946_s1 + $0x1d4] sm:$0xf0] }
 0x1e3   :  { %12248 = vst [vmem:[#allocation66_spill] sm:$0xff] %v8932_v3  ;;  %v8950_v36 = vor.u32 %v7515_v27, %v6686_v45  ;;  %v6704_v45 = vld [vmem:[%s11946_s1 + $0x1f8] sm:$0xf0] }
 0x1e4   :  { %1284 = vmatmul.bf16.gmra.mxu0 %v8918_v44  ;;  %1942 = vmatmul.bf16.gmra.mxu2 %v8918_v44  ;;  %v8930_v35 = vpack.c.bf16 %v3925_v62, %v3921_v23 }
 0x1e5   :  { %12249 = vst [vmem:[#allocation67_spill] sm:$0xff] %v8950_v36 }
 0x1e6   :  { %12247 = vst [vmem:[#allocation65_spill] sm:$0xff] %v8930_v35  ;;  %v2239_v38 = vpop.f32.mrf.mxu3 }
 0x1e7   :  { %v1903_v13 = vpop.f32.mrf.mxu2 }
 0x1e8   :  { %v2233_v50 = vadd.f32 %v2232_v12, %v1903_v13  ;;  %v8934_v29 = vpop.f32.mrf.mxu1 }
 0x1e9   :  { %v8936_v1 = vpop.f32.mrf.mxu0 }
 0x1ea   :  { %v3929_v17 = vmax.f32 %v2233_v50, 0.0  ;;  %v7593_v50 = vld [vmem:[%s11945_s0 + $0x4c] sm:$0xf] }
 0x1eb   :  { %7122 = vmatmul.msk.bf16.gmra.mxu1 %vm930_vm1, %v8932_v3  ;;  %7186 = vmatmul.msk.bf16.gmra.mxu3 %vm930_vm1, %v8932_v3 }
 0x1ee   :  { %v2242_v23 = vpop.f32.mrf.mxu3 }
 0x1ef   :  { %v1905_v12 = vpop.f32.mrf.mxu2 }
 0x1f0   :  { %v2235_v62 = vadd.f32 %v2234_v57, %v1905_v12  ;;  %v8948_v10 = vpop.f32.mrf.mxu1  ;;  %v7518_v57 = vld [vmem:[%s11946_s1 + $0x1f4] sm:$0xf]  ;;  %v7011_v12 = vor.u32 %v7593_v50, %v7008_v5  ;;  %v6976_v50 = vld [vmem:[%s11945_s0 + $0x18] sm:$0xf0] }
 0x1f1   :  { %v8952_v13 = vpop.f32.mrf.mxu0  ;;  %v8976_v3 = vor.u32 %v7518_v57, %v6704_v45  ;;  %v7517_v57 = vld [vmem:[%s11946_s1 + $0x1e4] sm:$0xf0]  ;;  %v7585_v45 = vld [vmem:[%s11945_s0 + $0xc] sm:$0xf] }
 0x1f2   :  { %v3933_v35 = vmax.f32 %v2235_v62, 0.0  ;;  %3115 = vmatpush.bf16.msrb.mxu0 %v7011_v12  ;;  %v6979_v12 = vor.u32 %v7585_v45, %v6976_v50  ;;  %v6712_v45 = vld [vmem:[%s11946_s1 + $0x208] sm:$0xf0] }
 0x1f3   :  { %12251 = vst [vmem:[#allocation69_spill] sm:$0xff] %v8976_v3 }
 0x1f4   :  { %1289 = vmatmul.bf16.gmra.mxu0 %v8950_v36  ;;  %1947 = vmatmul.bf16.gmra.mxu2 %v8950_v36  ;;  %v8968_v27 = vpack.c.bf16 %v3933_v35, %v3929_v17  ;;  %v6992_v17 = vld [vmem:[%s11945_s0 + $0x38] sm:$0xf0] }
 0x1f5   :  { %v6995_v35 = vor.u32 %v7589_v6, %v6992_v17 }
 0x1f6   :  { %12250 = vst [vmem:[#allocation68_spill] sm:$0xff] %v8968_v27  ;;  %v2244_v2 = vpop.f32.mrf.mxu3 }
 0x1f7   :  { %v1908_v62 = vpop.f32.mrf.mxu2  ;;  %3116 = vmatpush.bf16.msrb.mxu0 %v6995_v35  ;;  %v7520_v35 = vld [vmem:[%s11946_s1 + $0x204] sm:$0xf] }
 0x1f8   :  { %v2238_v61 = vadd.f32 %v2237_v60, %v1908_v62  ;;  %v1589_v36 = vpop.f32.mrf.mxu1  ;;  %v6694_v60 = vld [vmem:[%s11946_s1 + $0x1e0] sm:$0xf]  ;;  %v9014_v50 = vor.u32 %v7520_v35, %v6712_v45 }
 0x1f9   :  { %v8978_v48 = vpop.f32.mrf.mxu0  ;;  %v9002_v27 = vor.u32 %v7517_v57, %v6694_v60 }
 0x1fa   :  { %v3937_v44 = vmax.f32 %v2238_v61, 0.0  ;;  %12254 = vst [vmem:[#allocation72_spill] sm:$0xff] %v9014_v50 }
 0x1fb   :  { %7123 = vmatmul.msk.bf16.gmra.mxu1 %vm930_vm1, %v8976_v3  ;;  %7187 = vmatmul.msk.bf16.gmra.mxu3 %vm930_vm1, %v8976_v3  ;;  %12252 = vst [vmem:[#allocation70_spill] sm:$0xff] %v9002_v27 }
 0x1fc   :  { %3117 = vmatpush.bf16.msrb.mxu0 %v6979_v12 }
 0x1fe   :  { %v2247_v5 = vpop.f32.mrf.mxu3 }
 0x1ff   :  { %v1910_v62 = vpop.f32.mrf.mxu2 }
 0x200   :  { %v2240_v6 = vadd.f32 %v2239_v38, %v1910_v62  ;;  %v1591_v17 = vpop.f32.mrf.mxu1 }
 0x201   :  { %v1255_v3 = vpop.f32.mrf.mxu0 }
 0x202   :  { %v3941_v20 = vmax.f32 %v2240_v6, 0.0  ;;  %v6702_v6 = vld [vmem:[%s11946_s1 + $0x1f0] sm:$0xf] }
 0x204   :  { %1294 = vmatmul.bf16.gmra.mxu0 %v9002_v27  ;;  %1952 = vmatmul.bf16.gmra.mxu2 %v9002_v27  ;;  %v9012_v38 = vpack.c.bf16 %v3941_v20, %v3937_v44  ;;  %v7519_v20 = vld [vmem:[%s11946_s1 + $0x1f4] sm:$0xf0] }
 0x206   :  { %12253 = vst [vmem:[#allocation71_spill] sm:$0xff] %v9012_v38  ;;  %v2249_v60 = vpop.f32.mrf.mxu3 }
 0x207   :  { %v1913_v57 = vpop.f32.mrf.mxu2 }
 0x208   :  { %v2243_v61 = vadd.f32 %v2242_v23, %v1913_v57  ;;  %v1594_v12 = vpop.f32.mrf.mxu1  ;;  %v9026_v57 = vor.u32 %v7519_v20, %v6702_v6 }
 0x209   :  { %v1257_v62 = vpop.f32.mrf.mxu0 }
 0x20a   :  { %12255 = vst [vmem:[#allocation73_spill] sm:$0xff] %v9026_v57  ;;  %v3945_v27 = vmax.f32 %v2243_v61, 0.0  ;;  %v1587_v32 = vadd.f32 %v8948_v10, %v1257_v62 }
 0x20b   :  { %7124 = vmatmul.msk.bf16.gmra.mxu1 %vm930_vm1, %v9014_v50  ;;  %7188 = vmatmul.msk.bf16.gmra.mxu3 %vm930_vm1, %v9014_v50  ;;  %v7522_v50 = vld [vmem:[%s11946_s1 + $0x214] sm:$0xf] }
 0x20c   :  { %v9040_v20 = vor.u32 %v7522_v50, %v6720_v16  ;;  %v6710_v16 = vld [vmem:[%s11946_s1 + $0x200] sm:$0xf] }
 0x20e   :  { %v2252_v44 = vpop.f32.mrf.mxu3  ;;  %12257 = vst [vmem:[#allocation75_spill] sm:$0xff] %v9040_v20 }
 0x20f   :  { %v1915_v35 = vpop.f32.mrf.mxu2 }
 0x210   :  { %v2245_v45 = vadd.f32 %v2244_v2, %v1915_v35  ;;  %v1596_v23 = vpop.f32.mrf.mxu1 }
 0x211   :  { %v1260_v38 = vpop.f32.mrf.mxu0 }
 0x212   :  { %v3949_v8 = vmax.f32 %v2245_v45, 0.0  ;;  %v1590_v61 = vadd.f32 %v1589_v36, %v1260_v38  ;;  %v7521_v36 = vld [vmem:[%s11946_s1 + $0x204] sm:$0xf0]  ;;  %v3948_v38 = vmax.f32 %v1587_v32, 0.0 }
 0x214   :  { %1299 = vmatmul.bf16.gmra.mxu0 %v9026_v57  ;;  %1957 = vmatmul.bf16.gmra.mxu2 %v9026_v57  ;;  %v9036_v56 = vpack.c.bf16 %v3949_v8, %v3945_v27  ;;  %v3952_v8 = vmax.f32 %v1590_v61, 0.0 }
 0x216   :  { %12256 = vst [vmem:[#allocation74_spill] sm:$0xff] %v9036_v56  ;;  %v9038_v2 = vpop.f32.mrf.mxu3  ;;  %v1585_v56 = vadd.f32 %v8934_v29, %v1255_v3  ;;  %v9060_v3 = vor.u32 %v7521_v36, %v6710_v16  ;;  %v1580_v29 = vadd.f32 %v8902_v9, %v8952_v13  ;;  %v7524_v9 = vld [vmem:[%s11946_s1 + $0x224] sm:$0xf]  ;;  %v3928_v16 = vmax.f32 %v8920_v26, 0.0  ;;  %v7523_v26 = vld [vmem:[%s11946_s1 + $0x214] sm:$0xf0] }
 0x217   :  { %v1918_v6 = vpop.f32.mrf.mxu2 }
 0x218   :  { %v2248_v35 = vadd.f32 %v2247_v5, %v1918_v6  ;;  %v9042_v45 = vpop.f32.mrf.mxu1  ;;  %12258 = vst [vmem:[#allocation76_spill] sm:$0xff] %v9060_v3 }
 0x219   :  { %v1262_v57 = vpop.f32.mrf.mxu0 }
 0x21a   :  { %v1592_v47 = vadd.f32 %v1591_v17, %v1262_v57  ;;  %v1582_v17 = vadd.f32 %v8916_v54, %v8978_v48  ;;  %v3944_v57 = vmax.f32 %v1585_v56, 0.0  ;;  %v3953_v61 = vmax.f32 %v2248_v35, 0.0  ;;  %v6728_v56 = vld [vmem:[%s11946_s1 + $0x228] sm:$0xf0] }
 0x21b   :  { %7125 = vmatmul.msk.bf16.gmra.mxu1 %vm930_vm1, %v9040_v20  ;;  %7189 = vmatmul.msk.bf16.gmra.mxu3 %vm930_vm1, %v9040_v20  ;;  %v3936_v54 = vmax.f32 %v1580_v29, 0.0 }
 0x21c   :  { %v3956_v27 = vmax.f32 %v1592_v47, 0.0  ;;  %v3940_v42 = vmax.f32 %v1582_v17, 0.0  ;;  %v4368_v48 = vpack.c.bf16 %v3948_v38, %v3944_v57 }
 0x21e   :  { %v4372_v5 = vpack.c.bf16 %v3956_v27, %v3952_v8  ;;  %v9056_v10 = vpop.f32.mrf.mxu3  ;;  %v1577_v27 = vadd.f32 %v8886_v19, %v8936_v1 }
 0x21f   :  { %v1920_v50 = vpop.f32.mrf.mxu2 }
 0x220   :  { %v2250_v62 = vadd.f32 %v2249_v60, %v1920_v50  ;;  %v1601_v47 = vpop.f32.mrf.mxu1  ;;  %4764 = vmatpush.bf16.msra.mxu0 %v4372_v5  ;;  %v3932_v19 = vmax.f32 %v1577_v27, 0.0  ;;  %v4364_v60 = vpack.c.bf16 %v3940_v42, %v3936_v54  ;;  %v6718_v42 = vld [vmem:[%s11946_s1 + $0x210] sm:$0xf] }
 0x221   :  { %v1265_v6 = vpop.f32.mrf.mxu0 }
 0x222   :  { %v3957_v20 = vmax.f32 %v2250_v62, 0.0  ;;  %v1595_v8 = vadd.f32 %v1594_v12, %v1265_v6  ;;  %v9076_v12 = vor.u32 %v7524_v9, %v6728_v56  ;;  %v4360_v17 = vpack.c.bf16 %v3932_v19, %v3928_v16  ;;  %v7526_v9 = vld [vmem:[%s11946_s1 + $0x234] sm:$0xf] }
 0x223   :  { %v9092_v6 = vor.u32 %v7523_v26, %v6718_v42 }
 0x224   :  { %v9066_v32 = vpack.c.bf16 %v3957_v20, %v3953_v61  ;;  %1304 = vmatmul.bf16.gmra.mxu0 %v9060_v3  ;;  %1962 = vmatmul.bf16.gmra.mxu2 %v9060_v3  ;;  %12260 = vst [vmem:[#allocation78_spill] sm:$0xff] %v9076_v12  ;;  %v3960_v38 = vmax.f32 %v1595_v8, 0.0 }
 0x225   :  { %4765 = vmatpush.bf16.msra.mxu0 %v4368_v48  ;;  %12261 = vst [vmem:[#allocation79_spill] sm:$0xff] %v9092_v6 }
 0x226   :  { %12259 = vst [vmem:[#allocation77_spill] sm:$0xff] %v9066_v32  ;;  %v2259_v13 = vpop.f32.mrf.mxu3  ;;  %v6758_v32 = vld [vmem:[%s11946_s1 + $0x260] sm:$0xf] }
 0x227   :  { %v1923_v1 = vpop.f32.mrf.mxu2 }
 0x228   :  { %v2253_v20 = vadd.f32 %v2252_v44, %v1923_v1  ;;  %v1604_v35 = vpop.f32.mrf.mxu1 }
 0x229   :  { %4766 = vmatpush.bf16.msra.mxu0 %v4364_v60  ;;  %v1267_v36 = vpop.f32.mrf.mxu0 }
 0x22a   :  { %v1597_v5 = vadd.f32 %v1596_v23, %v1267_v36  ;;  %v3961_v8 = vmax.f32 %v2253_v20, 0.0 }
 0x22b   :  { %7126 = vmatmul.msk.bf16.gmra.mxu1 %vm930_vm1, %v9076_v12  ;;  %7190 = vmatmul.msk.bf16.gmra.mxu3 %vm930_vm1, %v9076_v12 }
 0x22c   :  { %v3964_v50 = vmax.f32 %v1597_v5, 0.0 }
 0x22d   :  { %4767 = vmatpush.bf16.msra.mxu0 %v4360_v17 }
 0x22e   :  { %v2262_v44 = vpop.f32.mrf.mxu3  ;;  %v9089_v23 = vpack.c.bf16 %v3964_v50, %v3960_v38 }
 0x22f   :  { %v1925_v62 = vpop.f32.mrf.mxu2 }
 0x230   :  { %v2255_v29 = vadd.f32 %v9038_v2, %v1925_v62  ;;  %v1606_v57 = vpop.f32.mrf.mxu1  ;;  %v6736_v2 = vld [vmem:[%s11946_s1 + $0x238] sm:$0xf0] }
 0x231   :  { %4768 = vmatpush.bf16.msra.mxu0 %v8914_v22  ;;  %v1270_v61 = vpop.f32.mrf.mxu0  ;;  %v9107_v19 = vor.u32 %v7526_v9, %v6736_v2 }
 0x232   :  { %v3965_v27 = vmax.f32 %v2255_v29, 0.0  ;;  %v1600_v48 = vadd.f32 %v9042_v45, %v1270_v61  ;;  %v7528_v29 = vld [vmem:[%s11946_s1 + $0x244] sm:$0xf]  ;;  %v6744_v61 = vld [vmem:[%s11946_s1 + $0x248] sm:$0xf0] }
 0x233   :  { %12263 = vst [vmem:[#allocation81_spill] sm:$0xff] %v9107_v19 }
 0x234   :  { %1309 = vmatmul.bf16.gmra.mxu0 %v9092_v6  ;;  %1967 = vmatmul.bf16.gmra.mxu2 %v9092_v6  ;;  %v9104_v56 = vpack.c.bf16 %v3965_v27, %v3961_v8  ;;  %v3968_v16 = vmax.f32 %v1600_v48, 0.0  ;;  %v9136_v48 = vor.u32 %v7528_v29, %v6744_v61 }
 0x235   :  { %4769 = vmatpush.bf16.msra.mxu0 %v8884_v11  ;;  %v6726_v11 = vld [vmem:[%s11946_s1 + $0x220] sm:$0xf] }
 0x236   :  { %12262 = vst [vmem:[#allocation80_spill] sm:$0xff] %v9104_v56  ;;  %v2264_v22 = vpop.f32.mrf.mxu3 }
 0x237   :  { %v1928_v54 = vpop.f32.mrf.mxu2  ;;  %12266 = vst [vmem:[#allocation84_spill] sm:$0xff] %v9136_v48 }
 0x238   :  { %v2258_v45 = vadd.f32 %v9056_v10, %v1928_v54  ;;  %v1609_v1 = vpop.f32.mrf.mxu1 }
 0x239   :  { %4770 = vmatpush.bf16.msra.mxu0 %v8858_v51  ;;  %v1272_v60 = vpop.f32.mrf.mxu0  ;;  %v7525_v51 = vld [vmem:[%s11946_s1 + $0x224] sm:$0xf0] }
 0x23a   :  { %v1602_v20 = vadd.f32 %v1601_v47, %v1272_v60  ;;  %v9124_v50 = vor.u32 %v7525_v51, %v6726_v11  ;;  %v3969_v26 = vmax.f32 %v2258_v45, 0.0 }
 0x23b   :  { %7127 = vmatmul.msk.bf16.gmra.mxu1 %vm930_vm1, %v9107_v19  ;;  %7191 = vmatmul.msk.bf16.gmra.mxu3 %vm930_vm1, %v9107_v19 }
 0x23c   :  { %v3972_v36 = vmax.f32 %v1602_v20, 0.0  ;;  %12264 = vst [vmem:[#allocation82_spill] sm:$0xff] %v9124_v50  ;;  %v6734_v20 = vld [vmem:[%s11946_s1 + $0x230] sm:$0xf] }
 0x23d   :  { %4771 = vmatpush.bf16.msra.mxu0 %v8818_v33 }
 0x23e   :  { %v2267_v10 = vpop.f32.mrf.mxu3  ;;  %v9122_v47 = vpack.c.bf16 %v3972_v36, %v3968_v16  ;;  %v7527_v16 = vld [vmem:[%s11946_s1 + $0x234] sm:$0xf0] }
 0x23f   :  { %v1930_v5 = vpop.f32.mrf.mxu2 }
 0x240   :  { %v2260_v17 = vadd.f32 %v2259_v13, %v1930_v5  ;;  %v1611_v38 = vpop.f32.mrf.mxu1  ;;  %v9152_v5 = vor.u32 %v7527_v16, %v6734_v20  ;;  %v6742_v16 = vld [vmem:[%s11946_s1 + $0x240] sm:$0xf] }
 0x241   :  { %v1275_v42 = vpop.f32.mrf.mxu0 }
 0x242   :  { %v3973_v62 = vmax.f32 %v2260_v17, 0.0  ;;  %v1605_v33 = vadd.f32 %v1604_v35, %v1275_v42  ;;  %12267 = vst [vmem:[#allocation85_spill] sm:$0xff] %v9152_v5 }
 0x244   :  { %1314 = vmatmul.bf16.gmra.mxu0 %v9124_v50  ;;  %1972 = vmatmul.bf16.gmra.mxu2 %v9124_v50  ;;  %v9134_v13 = vpack.c.bf16 %v3973_v62, %v3969_v26  ;;  %v3976_v45 = vmax.f32 %v1605_v33, 0.0  ;;  %v7530_v33 = vld [vmem:[%s11946_s1 + $0x254] sm:$0xf] }
 0x246   :  { %12265 = vst [vmem:[#allocation83_spill] sm:$0xff] %v9134_v13  ;;  %v2269_v8 = vpop.f32.mrf.mxu3  ;;  %v7534_v13 = vld [vmem:[%s11946_s1 + $0x274] sm:$0xf] }
 0x247   :  { %v1933_v27 = vpop.f32.mrf.mxu2 }
 0x248   :  { %v2263_v9 = vadd.f32 %v2262_v44, %v1933_v27  ;;  %v1614_v35 = vpop.f32.mrf.mxu1 }
 0x249   :  { %v1277_v2 = vpop.f32.mrf.mxu0 }
 0x24a   :  { %v1607_v54 = vadd.f32 %v1606_v57, %v1277_v2  ;;  %v3977_v42 = vmax.f32 %v2263_v9, 0.0 }
 0x24b   :  { %7128 = vmatmul.msk.bf16.gmra.mxu1 %vm930_vm1, %v9136_v48  ;;  %7192 = vmatmul.msk.bf16.gmra.mxu3 %vm930_vm1, %v9136_v48 }
 0x24c   :  { %v3980_v60 = vmax.f32 %v1607_v54, 0.0 }
 0x24e   :  { %v2272_v44 = vpop.f32.mrf.mxu3  ;;  %v9148_v36 = vpack.c.bf16 %v3980_v60, %v3976_v45 }
 0x24f   :  { %v1935_v57 = vpop.f32.mrf.mxu2 }
 0x250   :  { %v2265_v11 = vadd.f32 %v2264_v22, %v1935_v57  ;;  %v9150_v51 = vpop.f32.mrf.mxu1  ;;  %v6752_v22 = vld [vmem:[%s11946_s1 + $0x258] sm:$0xf0] }
 0x251   :  { %v1280_v17 = vpop.f32.mrf.mxu0  ;;  %v9164_v2 = vor.u32 %v7530_v33, %v6752_v22 }
 0x252   :  { %v3981_v26 = vmax.f32 %v2265_v11, 0.0  ;;  %v1610_v62 = vadd.f32 %v1609_v1, %v1280_v17 }
 0x253   :  { %12269 = vst [vmem:[#allocation87_spill] sm:$0xff] %v9164_v2 }
 0x254   :  { %1319 = vmatmul.bf16.gmra.mxu0 %v9152_v5  ;;  %1977 = vmatmul.bf16.gmra.mxu2 %v9152_v5  ;;  %v9162_v29 = vpack.c.bf16 %v3981_v26, %v3977_v42  ;;  %v3984_v60 = vmax.f32 %v1610_v62, 0.0  ;;  %v6784_v5 = vld [vmem:[%s11946_s1 + $0x298] sm:$0xf0] }
 0x256   :  { %12268 = vst [vmem:[#allocation86_spill] sm:$0xff] %v9162_v29  ;;  %v2274_v61 = vpop.f32.mrf.mxu3 }
 0x257   :  { %v1938_v27 = vpop.f32.mrf.mxu2 }
 0x258   :  { %v2268_v9 = vadd.f32 %v2267_v10, %v1938_v27  ;;  %v9166_v1 = vpop.f32.mrf.mxu1  ;;  %v7529_v10 = vld [vmem:[%s11946_s1 + $0x244] sm:$0xf0] }
 0x259   :  { %v1282_v54 = vpop.f32.mrf.mxu0  ;;  %v9182_v26 = vor.u32 %v7529_v10, %v6742_v16 }
 0x25a   :  { %v1612_v45 = vadd.f32 %v1611_v38, %v1282_v54  ;;  %v3985_v62 = vmax.f32 %v2268_v9, 0.0  ;;  %v7532_v54 = vld [vmem:[%s11946_s1 + $0x264] sm:$0xf] }
 0x25b   :  { %7129 = vmatmul.msk.bf16.gmra.mxu1 %vm930_vm1, %v9164_v2  ;;  %7193 = vmatmul.msk.bf16.gmra.mxu3 %vm930_vm1, %v9164_v2  ;;  %12270 = vst [vmem:[#allocation88_spill] sm:$0xff] %v9182_v26 }
 0x25c   :  { %v3988_v20 = vmax.f32 %v1612_v45, 0.0 }
 0x25e   :  { %v2277_v57 = vpop.f32.mrf.mxu3  ;;  %v9178_v11 = vpack.c.bf16 %v3988_v20, %v3984_v60 }
 0x25f   :  { %v1940_v38 = vpop.f32.mrf.mxu2 }
 0x260   :  { %v2270_v17 = vadd.f32 %v2269_v8, %v1940_v38  ;;  %v9180_v42 = vpop.f32.mrf.mxu1  ;;  %v6760_v8 = vld [vmem:[%s11946_s1 + $0x268] sm:$0xf0]  ;;  %v6750_v38 = vld [vmem:[%s11946_s1 + $0x250] sm:$0xf] }
 0x261   :  { %v1285_v33 = vpop.f32.mrf.mxu0  ;;  %v9196_v9 = vor.u32 %v7532_v54, %v6760_v8 }
 0x262   :  { %v3989_v22 = vmax.f32 %v2270_v17, 0.0  ;;  %v9184_v27 = vadd.f32 %v1614_v35, %v1285_v33  ;;  %v7531_v17 = vld [vmem:[%s11946_s1 + $0x254] sm:$0xf0] }
 0x263   :  { %12272 = vst [vmem:[#allocation90_spill] sm:$0xff] %v9196_v9  ;;  %v9214_v54 = vor.u32 %v7531_v17, %v6750_v38 }
 0x264   :  { %1324 = vmatmul.bf16.gmra.mxu0 %v9182_v26  ;;  %1982 = vmatmul.bf16.gmra.mxu2 %v9182_v26  ;;  %v9194_v45 = vpack.c.bf16 %v3989_v22, %v3985_v62 }
 0x265   :  { %12273 = vst [vmem:[#allocation91_spill] sm:$0xff] %v9214_v54 }
 0x266   :  { %12271 = vst [vmem:[#allocation89_spill] sm:$0xff] %v9194_v45  ;;  %v2279_v60 = vpop.f32.mrf.mxu3 }
 0x267   :  { %v1943_v20 = vpop.f32.mrf.mxu2 }
 0x268   :  { %v2273_v35 = vadd.f32 %v2272_v44, %v1943_v20  ;;  %v9198_v16 = vpop.f32.mrf.mxu1 }
 0x269   :  { %v9200_v10 = vpop.f32.mrf.mxu0 }
 0x26a   :  { %v3993_v20 = vmax.f32 %v2273_v35, 0.0 }
 0x26b   :  { %7130 = vmatmul.msk.bf16.gmra.mxu1 %vm930_vm1, %v9196_v9  ;;  %7194 = vmatmul.msk.bf16.gmra.mxu3 %vm930_vm1, %v9196_v9 }
 0x26e   :  { %v2282_v33 = vpop.f32.mrf.mxu3 }
 0x26f   :  { %v1945_v44 = vpop.f32.mrf.mxu2 }
 0x270   :  { %v2275_v62 = vadd.f32 %v2274_v61, %v1945_v44  ;;  %v9212_v22 = vpop.f32.mrf.mxu1  ;;  %v6768_v61 = vld [vmem:[%s11946_s1 + $0x278] sm:$0xf0] }
 0x271   :  { %v9216_v8 = vpop.f32.mrf.mxu0  ;;  %v9228_v29 = vor.u32 %v7534_v13, %v6768_v61 }
 0x272   :  { %v3997_v56 = vmax.f32 %v2275_v62, 0.0 }
 0x273   :  { %12275 = vst [vmem:[#allocation93_spill] sm:$0xff] %v9228_v29 }
 0x274   :  { %1329 = vmatmul.bf16.gmra.mxu0 %v9214_v54  ;;  %1987 = vmatmul.bf16.gmra.mxu2 %v9214_v54  ;;  %v9226_v44 = vpack.c.bf16 %v3997_v56, %v3993_v20  ;;  %v7533_v56 = vld [vmem:[%s11946_s1 + $0x264] sm:$0xf0]  ;;  %v6776_v54 = vld [vmem:[%s11946_s1 + $0x288] sm:$0xf0] }
 0x276   :  { %12274 = vst [vmem:[#allocation92_spill] sm:$0xff] %v9226_v44  ;;  %v2284_v38 = vpop.f32.mrf.mxu3 }
 0x277   :  { %v1948_v17 = vpop.f32.mrf.mxu2 }
 0x278   :  { %v2278_v35 = vadd.f32 %v2277_v57, %v1948_v17  ;;  %v1629_v62 = vpop.f32.mrf.mxu1  ;;  %v9240_v17 = vor.u32 %v7533_v56, %v6758_v32 }
 0x279   :  { %v1292_v45 = vpop.f32.mrf.mxu0 }
 0x27a   :  { %12276 = vst [vmem:[#allocation94_spill] sm:$0xff] %v9240_v17  ;;  %v4001_v9 = vmax.f32 %v2278_v35, 0.0 }
 0x27b   :  { %7131 = vmatmul.msk.bf16.gmra.mxu1 %vm930_vm1, %v9228_v29  ;;  %7195 = vmatmul.msk.bf16.gmra.mxu3 %vm930_vm1, %v9228_v29  ;;  %v7536_v29 = vld [vmem:[%s11946_s1 + $0x284] sm:$0xf] }
 0x27c   :  { %v9252_v56 = vor.u32 %v7536_v29, %v6776_v54 }
 0x27e   :  { %v2287_v20 = vpop.f32.mrf.mxu3  ;;  %12278 = vst [vmem:[#allocation96_spill] sm:$0xff] %v9252_v56 }
 0x27f   :  { %v1950_v13 = vpop.f32.mrf.mxu2 }
 0x280   :  { %v2280_v61 = vadd.f32 %v2279_v60, %v1950_v13  ;;  %v1631_v57 = vpop.f32.mrf.mxu1 }
 0x281   :  { %v1295_v44 = vpop.f32.mrf.mxu0 }
 0x282   :  { %v4005_v2 = vmax.f32 %v2280_v61, 0.0 }
 0x284   :  { %1334 = vmatmul.bf16.gmra.mxu0 %v9240_v17  ;;  %1992 = vmatmul.bf16.gmra.mxu2 %v9240_v17  ;;  %v9250_v48 = vpack.c.bf16 %v4005_v2, %v4001_v9  ;;  %v6766_v17 = vld [vmem:[%s11946_s1 + $0x270] sm:$0xf]  ;;  %v7535_v2 = vld [vmem:[%s11946_s1 + $0x274] sm:$0xf0] }
 0x286   :  { %12277 = vst [vmem:[#allocation95_spill] sm:$0xff] %v9250_v48  ;;  %v2289_v60 = vpop.f32.mrf.mxu3 }
 0x287   :  { %v1953_v32 = vpop.f32.mrf.mxu2 }
 0x288   :  { %v2283_v35 = vadd.f32 %v2282_v33, %v1953_v32  ;;  %v1634_v13 = vpop.f32.mrf.mxu1  ;;  %v9264_v32 = vor.u32 %v7535_v2, %v6766_v17 }
 0x289   :  { %v1297_v61 = vpop.f32.mrf.mxu0 }
 0x28a   :  { %12279 = vst [vmem:[#allocation97_spill] sm:$0xff] %v9264_v32  ;;  %v4009_v26 = vmax.f32 %v2283_v35, 0.0  ;;  %v1627_v6 = vadd.f32 %v9212_v22, %v1297_v61 }
 0x28b   :  { %7132 = vmatmul.msk.bf16.gmra.mxu1 %vm930_vm1, %v9252_v56  ;;  %7196 = vmatmul.msk.bf16.gmra.mxu3 %vm930_vm1, %v9252_v56  ;;  %v7538_v56 = vld [vmem:[%s11946_s1 + $0x294] sm:$0xf] }
 0x28c   :  { %v9278_v2 = vor.u32 %v7538_v56, %v6784_v5  ;;  %v7537_v5 = vld [vmem:[%s11946_s1 + $0x284] sm:$0xf0] }
 0x28e   :  { %v2292_v9 = vpop.f32.mrf.mxu3  ;;  %12281 = vst [vmem:[#allocation99_spill] sm:$0xff] %v9278_v2 }
 0x28f   :  { %v1955_v29 = vpop.f32.mrf.mxu2 }
 0x290   :  { %v2285_v54 = vadd.f32 %v2284_v38, %v1955_v29  ;;  %v1636_v33 = vpop.f32.mrf.mxu1 }
 0x291   :  { %v1300_v48 = vpop.f32.mrf.mxu0 }
 0x292   :  { %v4013_v19 = vmax.f32 %v2285_v54, 0.0  ;;  %v1630_v35 = vadd.f32 %v1629_v62, %v1300_v48  ;;  %v6774_v48 = vld [vmem:[%s11946_s1 + $0x280] sm:$0xf] }
 0x294   :  { %1339 = vmatmul.bf16.gmra.mxu0 %v9264_v32  ;;  %1997 = vmatmul.bf16.gmra.mxu2 %v9264_v32  ;;  %v9274_v12 = vpack.c.bf16 %v4013_v19, %v4009_v26  ;;  %v4016_v19 = vmax.f32 %v1630_v35, 0.0 }
 0x296   :  { %12280 = vst [vmem:[#allocation98_spill] sm:$0xff] %v9274_v12  ;;  %v9276_v38 = vpop.f32.mrf.mxu3  ;;  %v1625_v12 = vadd.f32 %v9198_v16, %v1295_v44  ;;  %v1620_v16 = vadd.f32 %v9166_v1, %v9216_v8  ;;  %v7540_v1 = vld [vmem:[%s11946_s1 + $0x2a4] sm:$0xf] }
 0x297   :  { %v1958_v17 = vpop.f32.mrf.mxu2 }
 0x298   :  { %v2288_v29 = vadd.f32 %v2287_v20, %v1958_v17  ;;  %v9280_v54 = vpop.f32.mrf.mxu1  ;;  %v1622_v20 = vadd.f32 %v9180_v42, %v1292_v45  ;;  %v4008_v44 = vmax.f32 %v1625_v12, 0.0  ;;  %v6792_v12 = vld [vmem:[%s11946_s1 + $0x2a8] sm:$0xf0]  ;;  %v4000_v45 = vmax.f32 %v1620_v16, 0.0 }
 0x299   :  { %v1302_v32 = vpop.f32.mrf.mxu0 }
 0x29a   :  { %v1632_v50 = vadd.f32 %v1631_v57, %v1302_v32  ;;  %v4012_v57 = vmax.f32 %v1627_v6, 0.0  ;;  %v4017_v35 = vmax.f32 %v2288_v29, 0.0 }
 0x29b   :  { %7133 = vmatmul.msk.bf16.gmra.mxu1 %vm930_vm1, %v9278_v2  ;;  %7197 = vmatmul.msk.bf16.gmra.mxu3 %vm930_vm1, %v9278_v2 }
 0x29c   :  { %v4020_v26 = vmax.f32 %v1632_v50, 0.0  ;;  %v9297_v50 = vor.u32 %v7537_v5, %v6774_v48  ;;  %v4400_v42 = vpack.c.bf16 %v4012_v57, %v4008_v44  ;;  %v3992_v48 = vmax.f32 %v9184_v27, 0.0  ;;  %v7539_v27 = vld [vmem:[%s11946_s1 + $0x294] sm:$0xf0] }
 0x29e   :  { %v4404_v62 = vpack.c.bf16 %v4020_v26, %v4016_v19  ;;  %v9294_v22 = vpop.f32.mrf.mxu3  ;;  %12282 = vst [vmem:[#allocation100_spill] sm:$0xff] %v9297_v50  ;;  %v1617_v19 = vadd.f32 %v9150_v51, %v9200_v10  ;;  %v4004_v26 = vmax.f32 %v1622_v20, 0.0 }
 0x29f   :  { %v1960_v56 = vpop.f32.mrf.mxu2 }
 0x2a0   :  { %v2290_v61 = vadd.f32 %v2289_v60, %v1960_v56  ;;  %v1641_v32 = vpop.f32.mrf.mxu1  ;;  %4788 = vmatpush.bf16.msra.mxu2 %v4404_v62  ;;  %v3996_v51 = vmax.f32 %v1617_v19, 0.0  ;;  %v4396_v60 = vpack.c.bf16 %v4004_v26, %v4000_v45 }
 0x2a1   :  { %v1305_v17 = vpop.f32.mrf.mxu0 }
 0x2a2   :  { %v4021_v2 = vmax.f32 %v2290_v61, 0.0  ;;  %v1635_v3 = vadd.f32 %v1634_v13, %v1305_v17  ;;  %v9313_v13 = vor.u32 %v7540_v1, %v6792_v12  ;;  %v4392_v20 = vpack.c.bf16 %v3996_v51, %v3992_v48  ;;  %v7542_v1 = vld [vmem:[%s11946_s1 + $0x2b4] sm:$0xf] }
 0x2a4   :  { %v9303_v6 = vpack.c.bf16 %v4021_v2, %v4017_v35  ;;  %1344 = vmatmul.bf16.gmra.mxu0 %v9297_v50  ;;  %2002 = vmatmul.bf16.gmra.mxu2 %v9297_v50  ;;  %12284 = vst [vmem:[#allocation102_spill] sm:$0xff] %v9313_v13  ;;  %v4024_v57 = vmax.f32 %v1635_v3, 0.0  ;;  %v7574_v50 = vld [vmem:[%s11946_s1 + $0x3b4] sm:$0xf] }
 0x2a5   :  { %4789 = vmatpush.bf16.msra.mxu2 %v4400_v42 }
 0x2a6   :  { %12283 = vst [vmem:[#allocation101_spill] sm:$0xff] %v9303_v6  ;;  %v2299_v8 = vpop.f32.mrf.mxu3 }
 0x2a7   :  { %v1963_v10 = vpop.f32.mrf.mxu2 }
 0x2a8   :  { %v2293_v2 = vadd.f32 %v2292_v9, %v1963_v10  ;;  %v1644_v29 = vpop.f32.mrf.mxu1  ;;  %v6782_v9 = vld [vmem:[%s11946_s1 + $0x290] sm:$0xf] }
 0x2a9   :  { %4790 = vmatpush.bf16.msra.mxu2 %v4396_v60  ;;  %v1307_v5 = vpop.f32.mrf.mxu0  ;;  %v9329_v35 = vor.u32 %v7539_v27, %v6782_v9 }
 0x2aa   :  { %v1637_v62 = vadd.f32 %v1636_v33, %v1307_v5  ;;  %v4025_v19 = vmax.f32 %v2293_v2, 0.0 }
 0x2ab   :  { %7134 = vmatmul.msk.bf16.gmra.mxu1 %vm930_vm1, %v9313_v13  ;;  %7198 = vmatmul.msk.bf16.gmra.mxu3 %vm930_vm1, %v9313_v13  ;;  %12285 = vst [vmem:[#allocation103_spill] sm:$0xff] %v9329_v35  ;;  %v7568_v13 = vld [vmem:[%s11946_s1 + $0x384] sm:$0xf] }
 0x2ac   :  { %v4028_v56 = vmax.f32 %v1637_v62, 0.0 }
 0x2ad   :  { %4791 = vmatpush.bf16.msra.mxu2 %v4392_v20 }
 0x2ae   :  { %v2302_v61 = vpop.f32.mrf.mxu3  ;;  %v9326_v33 = vpack.c.bf16 %v4028_v56, %v4024_v57 }
 0x2af   :  { %v1965_v16 = vpop.f32.mrf.mxu2 }
 0x2b0   :  { %v2295_v44 = vadd.f32 %v9276_v38, %v1965_v16  ;;  %v1646_v17 = vpop.f32.mrf.mxu1  ;;  %v6800_v38 = vld [vmem:[%s11946_s1 + $0x2b8] sm:$0xf0] }
 0x2b1   :  { %4792 = vmatpush.bf16.msra.mxu2 %v9178_v11  ;;  %v1310_v3 = vpop.f32.mrf.mxu0  ;;  %v9344_v51 = vor.u32 %v7542_v1, %v6800_v38 }
 0x2b2   :  { %v4029_v26 = vmax.f32 %v2295_v44, 0.0  ;;  %v1640_v42 = vadd.f32 %v9280_v54, %v1310_v3  ;;  %v7544_v44 = vld [vmem:[%s11946_s1 + $0x2c4] sm:$0xf]  ;;  %v6808_v3 = vld [vmem:[%s11946_s1 + $0x2c8] sm:$0xf0] }
 0x2b3   :  { %12287 = vst [vmem:[#allocation105_spill] sm:$0xff] %v9344_v51 }
 0x2b4   :  { %1349 = vmatmul.bf16.gmra.mxu0 %v9329_v35  ;;  %2007 = vmatmul.bf16.gmra.mxu2 %v9329_v35  ;;  %v9341_v12 = vpack.c.bf16 %v4029_v26, %v4025_v19  ;;  %v4032_v48 = vmax.f32 %v1640_v42, 0.0  ;;  %v9373_v42 = vor.u32 %v7544_v44, %v6808_v3  ;;  %v6816_v44 = vld [vmem:[%s11946_s1 + $0x2d8] sm:$0xf0] }
 0x2b5   :  { %4793 = vmatpush.bf16.msra.mxu2 %v9148_v36  ;;  %v6790_v36 = vld [vmem:[%s11946_s1 + $0x2a0] sm:$0xf] }
 0x2b6   :  { %12286 = vst [vmem:[#allocation104_spill] sm:$0xff] %v9341_v12  ;;  %v2304_v11 = vpop.f32.mrf.mxu3 }
 0x2b7   :  { %v1968_v45 = vpop.f32.mrf.mxu2  ;;  %12290 = vst [vmem:[#allocation108_spill] sm:$0xff] %v9373_v42 }
 0x2b8   :  { %v2298_v54 = vadd.f32 %v9294_v22, %v1968_v45  ;;  %v1649_v10 = vpop.f32.mrf.mxu1 }
 0x2b9   :  { %4794 = vmatpush.bf16.msra.mxu2 %v9122_v47  ;;  %v1312_v60 = vpop.f32.mrf.mxu0  ;;  %v7541_v47 = vld [vmem:[%s11946_s1 + $0x2a4] sm:$0xf0] }
 0x2ba   :  { %v1642_v2 = vadd.f32 %v1641_v32, %v1312_v60  ;;  %v9361_v56 = vor.u32 %v7541_v47, %v6790_v36  ;;  %v4033_v27 = vmax.f32 %v2298_v54, 0.0 }
 0x2bb   :  { %7135 = vmatmul.msk.bf16.gmra.mxu1 %vm930_vm1, %v9344_v51  ;;  %7199 = vmatmul.msk.bf16.gmra.mxu3 %vm930_vm1, %v9344_v51  ;;  %v7564_v51 = vld [vmem:[%s11946_s1 + $0x364] sm:$0xf] }
 0x2bc   :  { %v4036_v5 = vmax.f32 %v1642_v2, 0.0  ;;  %12288 = vst [vmem:[#allocation106_spill] sm:$0xff] %v9361_v56  ;;  %v6798_v2 = vld [vmem:[%s11946_s1 + $0x2b0] sm:$0xf] }
 0x2bd   :  { %4795 = vmatpush.bf16.msra.mxu2 %v9089_v23 }
 0x2be   :  { %v2307_v22 = vpop.f32.mrf.mxu3  ;;  %v9359_v32 = vpack.c.bf16 %v4036_v5, %v4032_v48  ;;  %v7543_v48 = vld [vmem:[%s11946_s1 + $0x2b4] sm:$0xf0] }
 0x2bf   :  { %v1970_v62 = vpop.f32.mrf.mxu2 }
 0x2c0   :  { %v2300_v20 = vadd.f32 %v2299_v8, %v1970_v62  ;;  %v1651_v57 = vpop.f32.mrf.mxu1  ;;  %v9387_v62 = vor.u32 %v7543_v48, %v6798_v2  ;;  %v6806_v48 = vld [vmem:[%s11946_s1 + $0x2c0] sm:$0xf] }
 0x2c1   :  { %v1315_v9 = vpop.f32.mrf.mxu0 }
 0x2c2   :  { %v4037_v16 = vmax.f32 %v2300_v20, 0.0  ;;  %v1645_v23 = vadd.f32 %v1644_v29, %v1315_v9  ;;  %12291 = vst [vmem:[#allocation109_spill] sm:$0xff] %v9387_v62 }
 0x2c4   :  { %1354 = vmatmul.bf16.gmra.mxu0 %v9361_v56  ;;  %2012 = vmatmul.bf16.gmra.mxu2 %v9361_v56  ;;  %v9371_v8 = vpack.c.bf16 %v4037_v16, %v4033_v27  ;;  %v4040_v54 = vmax.f32 %v1645_v23, 0.0  ;;  %v7546_v23 = vld [vmem:[%s11946_s1 + $0x2d4] sm:$0xf] }
 0x2c5   :  { %v7570_v56 = vld [vmem:[%s11946_s1 + $0x394] sm:$0xf] }
 0x2c6   :  { %12289 = vst [vmem:[#allocation107_spill] sm:$0xff] %v9371_v8  ;;  %v2309_v19 = vpop.f32.mrf.mxu3 }
 0x2c7   :  { %v1973_v26 = vpop.f32.mrf.mxu2 }
 0x2c8   :  { %v2303_v1 = vadd.f32 %v2302_v61, %v1973_v26  ;;  %v1654_v29 = vpop.f32.mrf.mxu1 }
 0x2c9   :  { %v1317_v38 = vpop.f32.mrf.mxu0 }
 0x2ca   :  { %v1647_v45 = vadd.f32 %v1646_v17, %v1317_v38  ;;  %v4041_v9 = vmax.f32 %v2303_v1, 0.0  ;;  %v9399_v38 = vor.u32 %v7546_v23, %v6816_v44 }
 0x2cb   :  { %7136 = vmatmul.msk.bf16.gmra.mxu1 %vm930_vm1, %v9373_v42  ;;  %7200 = vmatmul.msk.bf16.gmra.mxu3 %vm930_vm1, %v9373_v42  ;;  %v7560_v42 = vld [vmem:[%s11946_s1 + $0x344] sm:$0xf] }
 0x2cc   :  { %v4044_v60 = vmax.f32 %v1647_v45, 0.0  ;;  %12293 = vst [vmem:[#allocation111_spill] sm:$0xff] %v9399_v38 }
 0x2ce   :  { %v2312_v61 = vpop.f32.mrf.mxu3  ;;  %v9385_v5 = vpack.c.bf16 %v4044_v60, %v4040_v54 }
 0x2cf   :  { %v1975_v17 = vpop.f32.mrf.mxu2 }
 0x2d0   :  { %v2305_v36 = vadd.f32 %v2304_v11, %v1975_v17  ;;  %v1656_v47 = vpop.f32.mrf.mxu1  ;;  %v7545_v17 = vld [vmem:[%s11946_s1 + $0x2c4] sm:$0xf0] }
 0x2d1   :  { %v1320_v20 = vpop.f32.mrf.mxu0 }
 0x2d2   :  { %v4045_v27 = vmax.f32 %v2305_v36, 0.0  ;;  %v1650_v16 = vadd.f32 %v1649_v10, %v1320_v20 }
 0x2d4   :  { %1359 = vmatmul.bf16.gmra.mxu0 %v9387_v62  ;;  %2017 = vmatmul.bf16.gmra.mxu2 %v9387_v62  ;;  %v9397_v11 = vpack.c.bf16 %v4045_v27, %v4041_v9  ;;  %v4048_v60 = vmax.f32 %v1650_v16, 0.0  ;;  %v9413_v27 = vor.u32 %v7545_v17, %v6806_v48  ;;  %v7566_v62 = vld [vmem:[%s11946_s1 + $0x374] sm:$0xf] }
 0x2d6   :  { %12292 = vst [vmem:[#allocation110_spill] sm:$0xff] %v9397_v11  ;;  %v2314_v3 = vpop.f32.mrf.mxu3  ;;  %v7550_v11 = vld [vmem:[%s11946_s1 + $0x2f4] sm:$0xf] }
 0x2d7   :  { %v1978_v26 = vpop.f32.mrf.mxu2  ;;  %12294 = vst [vmem:[#allocation112_spill] sm:$0xff] %v9413_v27 }
 0x2d8   :  { %v2308_v1 = vadd.f32 %v2307_v22, %v1978_v26  ;;  %v1659_v10 = vpop.f32.mrf.mxu1 }
 0x2d9   :  { %v1322_v45 = vpop.f32.mrf.mxu0 }
 0x2da   :  { %v1652_v54 = vadd.f32 %v1651_v57, %v1322_v45  ;;  %v4049_v44 = vmax.f32 %v2308_v1, 0.0  ;;  %v7548_v45 = vld [vmem:[%s11946_s1 + $0x2e4] sm:$0xf] }
 0x2db   :  { %7137 = vmatmul.msk.bf16.gmra.mxu1 %vm930_vm1, %v9399_v38  ;;  %7201 = vmatmul.msk.bf16.gmra.mxu3 %vm930_vm1, %v9399_v38 }
 0x2dc   :  { %v4052_v2 = vmax.f32 %v1652_v54, 0.0  ;;  %v6824_v54 = vld [vmem:[%s11946_s1 + $0x2e8] sm:$0xf0] }
 0x2dd   :  { %v9425_v48 = vor.u32 %v7548_v45, %v6824_v54 }
 0x2de   :  { %v2317_v22 = vpop.f32.mrf.mxu3  ;;  %v9411_v36 = vpack.c.bf16 %v4052_v2, %v4048_v60 }
 0x2df   :  { %v1980_v57 = vpop.f32.mrf.mxu2  ;;  %12296 = vst [vmem:[#allocation114_spill] sm:$0xff] %v9425_v48 }
 0x2e0   :  { %v2310_v20 = vadd.f32 %v2309_v19, %v1980_v57  ;;  %v1661_v9 = vpop.f32.mrf.mxu1 }
 0x2e1   :  { %v1325_v23 = vpop.f32.mrf.mxu0 }
 0x2e2   :  { %v4053_v16 = vmax.f32 %v2310_v20, 0.0  ;;  %v1655_v26 = vadd.f32 %v1654_v29, %v1325_v23 }
 0x2e4   :  { %1364 = vmatmul.bf16.gmra.mxu0 %v9413_v27  ;;  %2022 = vmatmul.bf16.gmra.mxu2 %v9413_v27  ;;  %v9423_v19 = vpack.c.bf16 %v4053_v16, %v4049_v44  ;;  %v4056_v20 = vmax.f32 %v1655_v26, 0.0  ;;  %v6814_v44 = vld [vmem:[%s11946_s1 + $0x2d0] sm:$0xf]  ;;  %v7547_v16 = vld [vmem:[%s11946_s1 + $0x2d4] sm:$0xf0] }
 0x2e5   :  { %v7562_v27 = vld [vmem:[%s11946_s1 + $0x354] sm:$0xf] }
 0x2e6   :  { %12295 = vst [vmem:[#allocation113_spill] sm:$0xff] %v9423_v19  ;;  %v2319_v60 = vpop.f32.mrf.mxu3 }
 0x2e7   :  { %v1983_v2 = vpop.f32.mrf.mxu2 }
 0x2e8   :  { %v2313_v1 = vadd.f32 %v2312_v61, %v1983_v2  ;;  %v1664_v29 = vpop.f32.mrf.mxu1 }
 0x2e9   :  { %v1327_v17 = vpop.f32.mrf.mxu0 }
 0x2ea   :  { %v1657_v57 = vadd.f32 %v1656_v47, %v1327_v17  ;;  %v9439_v17 = vor.u32 %v7547_v16, %v6814_v44  ;;  %v4057_v8 = vmax.f32 %v2313_v1, 0.0 }
 0x2eb   :  { %7138 = vmatmul.msk.bf16.gmra.mxu1 %vm930_vm1, %v9425_v48  ;;  %7202 = vmatmul.msk.bf16.gmra.mxu3 %vm930_vm1, %v9425_v48 }
 0x2ec   :  { %v4060_v23 = vmax.f32 %v1657_v57, 0.0  ;;  %12297 = vst [vmem:[#allocation115_spill] sm:$0xff] %v9439_v17 }
 0x2ee   :  { %v2322_v61 = vpop.f32.mrf.mxu3  ;;  %v9437_v45 = vpack.c.bf16 %v4060_v23, %v4056_v20  ;;  %v6832_v20 = vld [vmem:[%s11946_s1 + $0x2f8] sm:$0xf0] }
 0x2ef   :  { %v1985_v47 = vpop.f32.mrf.mxu2  ;;  %v9451_v16 = vor.u32 %v7550_v11, %v6832_v20  ;;  %v7549_v11 = vld [vmem:[%s11946_s1 + $0x2e4] sm:$0xf0] }
 0x2f0   :  { %v2315_v54 = vadd.f32 %v2314_v3, %v1985_v47  ;;  %v1666_v2 = vpop.f32.mrf.mxu1 }
 0x2f1   :  { %v1330_v12 = vpop.f32.mrf.mxu0  ;;  %12299 = vst [vmem:[#allocation117_spill] sm:$0xff] %v9451_v16 }
 0x2f2   :  { %v4061_v26 = vmax.f32 %v2315_v54, 0.0  ;;  %v1660_v57 = vadd.f32 %v1659_v10, %v1330_v12 }
 0x2f4   :  { %1369 = vmatmul.bf16.gmra.mxu0 %v9439_v17  ;;  %2027 = vmatmul.bf16.gmra.mxu2 %v9439_v17  ;;  %v9449_v3 = vpack.c.bf16 %v4061_v26, %v4057_v8  ;;  %v4064_v54 = vmax.f32 %v1660_v57, 0.0  ;;  %v6822_v8 = vld [vmem:[%s11946_s1 + $0x2e0] sm:$0xf]  ;;  %v7558_v17 = vld [vmem:[%s11946_s1 + $0x334] sm:$0xf] }
 0x2f6   :  { %12298 = vst [vmem:[#allocation116_spill] sm:$0xff] %v9449_v3  ;;  %v2324_v23 = vpop.f32.mrf.mxu3 }
 0x2f7   :  { %v1988_v44 = vpop.f32.mrf.mxu2 }
 0x2f8   :  { %v2318_v1 = vadd.f32 %v2317_v22, %v1988_v44  ;;  %v1669_v12 = vpop.f32.mrf.mxu1 }
 0x2f9   :  { %v1332_v10 = vpop.f32.mrf.mxu0 }
 0x2fa   :  { %v1662_v47 = vadd.f32 %v1661_v9, %v1332_v10  ;;  %v9465_v10 = vor.u32 %v7549_v11, %v6822_v8  ;;  %v4065_v6 = vmax.f32 %v2318_v1, 0.0 }
 0x2fb   :  { %7139 = vmatmul.msk.bf16.gmra.mxu1 %vm930_vm1, %v9451_v16  ;;  %7203 = vmatmul.msk.bf16.gmra.mxu3 %vm930_vm1, %v9451_v16  ;;  %v7552_v16 = vld [vmem:[%s11946_s1 + $0x304] sm:$0xf] }
 0x2fc   :  { %v4068_v19 = vmax.f32 %v1662_v47, 0.0  ;;  %12300 = vst [vmem:[#allocation118_spill] sm:$0xff] %v9465_v10 }
 0x2fe   :  { %v2327_v22 = vpop.f32.mrf.mxu3  ;;  %v9463_v26 = vpack.c.bf16 %v4068_v19, %v4064_v54  ;;  %v6840_v19 = vld [vmem:[%s11946_s1 + $0x308] sm:$0xf0] }
 0x2ff   :  { %v1990_v9 = vpop.f32.mrf.mxu2  ;;  %v9477_v11 = vor.u32 %v7552_v16, %v6840_v19  ;;  %v7551_v16 = vld [vmem:[%s11946_s1 + $0x2f4] sm:$0xf0] }
 0x300   :  { %v2320_v20 = vadd.f32 %v2319_v60, %v1990_v9  ;;  %v1671_v44 = vpop.f32.mrf.mxu1 }
 0x301   :  { %v1335_v3 = vpop.f32.mrf.mxu0  ;;  %12302 = vst [vmem:[#allocation120_spill] sm:$0xff] %v9477_v11 }
 0x302   :  { %v4069_v57 = vmax.f32 %v2320_v20, 0.0  ;;  %v1665_v47 = vadd.f32 %v1664_v29, %v1335_v3 }
 0x304   :  { %1374 = vmatmul.bf16.gmra.mxu0 %v9465_v10  ;;  %2032 = vmatmul.bf16.gmra.mxu2 %v9465_v10  ;;  %v9475_v60 = vpack.c.bf16 %v4069_v57, %v4065_v6  ;;  %v4072_v20 = vmax.f32 %v1665_v47, 0.0  ;;  %v6830_v6 = vld [vmem:[%s11946_s1 + $0x2f0] sm:$0xf]  ;;  %v7554_v10 = vld [vmem:[%s11946_s1 + $0x314] sm:$0xf] }
 0x306   :  { %12301 = vst [vmem:[#allocation119_spill] sm:$0xff] %v9475_v60  ;;  %v2329_v54 = vpop.f32.mrf.mxu3 }
 0x307   :  { %v1993_v8 = vpop.f32.mrf.mxu2 }
 0x308   :  { %v2323_v1 = vadd.f32 %v2322_v61, %v1993_v8  ;;  %v1674_v29 = vpop.f32.mrf.mxu1 }
 0x309   :  { %v1337_v3 = vpop.f32.mrf.mxu0 }
 0x30a   :  { %v1667_v9 = vadd.f32 %v1666_v2, %v1337_v3  ;;  %v9491_v3 = vor.u32 %v7551_v16, %v6830_v6 }
 0x30b   :  { %7140 = vmatmul.msk.bf16.gmra.mxu1 %vm930_vm1, %v9477_v11  ;;  %7204 = vmatmul.msk.bf16.gmra.mxu3 %vm930_vm1, %v9477_v11  ;;  %v4073_v11 = vmax.f32 %v2323_v1, 0.0 }
 0x30c   :  { %v4076_v48 = vmax.f32 %v1667_v9, 0.0  ;;  %12303 = vst [vmem:[#allocation121_spill] sm:$0xff] %v9491_v3 }
 0x30e   :  { %v2332_v61 = vpop.f32.mrf.mxu3  ;;  %v9489_v57 = vpack.c.bf16 %v4076_v48, %v4072_v20  ;;  %v6848_v48 = vld [vmem:[%s11946_s1 + $0x318] sm:$0xf0] }
 0x30f   :  { %v1995_v2 = vpop.f32.mrf.mxu2  ;;  %v9503_v16 = vor.u32 %v7554_v10, %v6848_v48  ;;  %v7553_v10 = vld [vmem:[%s11946_s1 + $0x304] sm:$0xf0] }
 0x310   :  { %v2325_v19 = vadd.f32 %v2324_v23, %v1995_v2  ;;  %v1676_v8 = vpop.f32.mrf.mxu1 }
 0x311   :  { %v1340_v60 = vpop.f32.mrf.mxu0  ;;  %12305 = vst [vmem:[#allocation123_spill] sm:$0xff] %v9503_v16 }
 0x312   :  { %v4077_v47 = vmax.f32 %v2325_v19, 0.0  ;;  %v1670_v9 = vadd.f32 %v1669_v12, %v1340_v60 }
 0x314   :  { %1379 = vmatmul.bf16.gmra.mxu0 %v9491_v3  ;;  %2037 = vmatmul.bf16.gmra.mxu2 %v9491_v3  ;;  %v9501_v23 = vpack.c.bf16 %v4077_v47, %v4073_v11  ;;  %v4080_v19 = vmax.f32 %v1670_v9, 0.0  ;;  %v6838_v11 = vld [vmem:[%s11946_s1 + $0x300] sm:$0xf] }
 0x316   :  { %12304 = vst [vmem:[#allocation122_spill] sm:$0xff] %v9501_v23  ;;  %v2334_v20 = vpop.f32.mrf.mxu3 }
 0x317   :  { %v1998_v6 = vpop.f32.mrf.mxu2 }
 0x318   :  { %v2328_v1 = vadd.f32 %v2327_v22, %v1998_v6  ;;  %v1679_v12 = vpop.f32.mrf.mxu1 }
 0x319   :  { %v1342_v60 = vpop.f32.mrf.mxu0 }
 0x31a   :  { %v1672_v2 = vadd.f32 %v1671_v44, %v1342_v60  ;;  %v9517_v60 = vor.u32 %v7553_v10, %v6838_v11 }
 0x31b   :  { %7141 = vmatmul.msk.bf16.gmra.mxu1 %vm930_vm1, %v9503_v16  ;;  %7205 = vmatmul.msk.bf16.gmra.mxu3 %vm930_vm1, %v9503_v16  ;;  %v4081_v16 = vmax.f32 %v2328_v1, 0.0 }
 0x31c   :  { %v4084_v3 = vmax.f32 %v1672_v2, 0.0  ;;  %12306 = vst [vmem:[#allocation124_spill] sm:$0xff] %v9517_v60 }
 0x31e   :  { %v9515_v22 = vpack.c.bf16 %v4084_v3, %v4080_v19  ;;  %v2337_v47 = vpop.f32.mrf.mxu3  ;;  %v7556_v3 = vld [vmem:[%s11946_s1 + $0x324] sm:$0xf] }
 0x31f   :  { %v2000_v44 = vpop.f32.mrf.mxu2 }
 0x320   :  { %v2330_v48 = vadd.f32 %v2329_v54, %v2000_v44  ;;  %v1681_v6 = vpop.f32.mrf.mxu1  ;;  %v6856_v54 = vld [vmem:[%s11946_s1 + $0x328] sm:$0xf0] }
 0x321   :  { %v1345_v23 = vpop.f32.mrf.mxu0  ;;  %v9529_v10 = vor.u32 %v7556_v3, %v6856_v54  ;;  %v7555_v3 = vld [vmem:[%s11946_s1 + $0x314] sm:$0xf0] }
 0x322   :  { %v4085_v9 = vmax.f32 %v2330_v48, 0.0  ;;  %v1675_v2 = vadd.f32 %v1674_v29, %v1345_v23 }
 0x323   :  { %12308 = vst [vmem:[#allocation126_spill] sm:$0xff] %v9529_v10 }
 0x324   :  { %v9519_v38 = vpack.c.bf16 %v4085_v9, %v4081_v16  ;;  %1384 = vmatmul.bf16.gmra.mxu0 %v9517_v60  ;;  %2042 = vmatmul.bf16.gmra.mxu2 %v9517_v60  ;;  %v4088_v44 = vmax.f32 %v1675_v2, 0.0  ;;  %v6846_v9 = vld [vmem:[%s11946_s1 + $0x310] sm:$0xf] }
 0x326   :  { %12307 = vst [vmem:[#allocation125_spill] sm:$0xff] %v9519_v38  ;;  %v2339_v19 = vpop.f32.mrf.mxu3  ;;  %v9543_v38 = vor.u32 %v7555_v3, %v6846_v9 }
 0x327   :  { %v2003_v11 = vpop.f32.mrf.mxu2 }
 0x328   :  { %v2333_v1 = vadd.f32 %v2332_v61, %v2003_v11  ;;  %v1684_v29 = vpop.f32.mrf.mxu1  ;;  %12309 = vst [vmem:[#allocation127_spill] sm:$0xff] %v9543_v38 }
 0x329   :  { %v1347_v23 = vpop.f32.mrf.mxu0 }
 0x32a   :  { %v1677_v16 = vadd.f32 %v1676_v8, %v1347_v23 }
 0x32b   :  { %7142 = vmatmul.msk.bf16.gmra.mxu1 %vm930_vm1, %v9529_v10  ;;  %7206 = vmatmul.msk.bf16.gmra.mxu3 %vm930_vm1, %v9529_v10  ;;  %v4089_v10 = vmax.f32 %v2333_v1, 0.0 }
 0x32c   :  { %v4092_v48 = vmax.f32 %v1677_v16, 0.0 }
 0x32e   :  { %v2342_v61 = vpop.f32.mrf.mxu3  ;;  %v9541_v54 = vpack.c.bf16 %v4092_v48, %v4088_v44  ;;  %v6864_v44 = vld [vmem:[%s11946_s1 + $0x338] sm:$0xf0] }
 0x32f   :  { %v2005_v8 = vpop.f32.mrf.mxu2  ;;  %v9555_v3 = vor.u32 %v7558_v17, %v6864_v44  ;;  %v7557_v17 = vld [vmem:[%s11946_s1 + $0x324] sm:$0xf0] }
 0x330   :  { %v2335_v11 = vadd.f32 %v2334_v20, %v2005_v8  ;;  %v1686_v23 = vpop.f32.mrf.mxu1 }
 0x331   :  { %v1350_v60 = vpop.f32.mrf.mxu0  ;;  %12311 = vst [vmem:[#allocation129_spill] sm:$0xff] %v9555_v3 }
 0x332   :  { %v4093_v2 = vmax.f32 %v2335_v11, 0.0  ;;  %v1680_v16 = vadd.f32 %v1679_v12, %v1350_v60 }
 0x334   :  { %1389 = vmatmul.bf16.gmra.mxu0 %v9543_v38  ;;  %2047 = vmatmul.bf16.gmra.mxu2 %v9543_v38  ;;  %v9553_v20 = vpack.c.bf16 %v4093_v2, %v4089_v10  ;;  %v4096_v11 = vmax.f32 %v1680_v16, 0.0  ;;  %v6854_v10 = vld [vmem:[%s11946_s1 + $0x320] sm:$0xf] }
 0x336   :  { %12310 = vst [vmem:[#allocation128_spill] sm:$0xff] %v9553_v20  ;;  %v2344_v48 = vpop.f32.mrf.mxu3 }
 0x337   :  { %v2008_v9 = vpop.f32.mrf.mxu2 }
 0x338   :  { %v2338_v1 = vadd.f32 %v2337_v47, %v2008_v9  ;;  %v1689_v12 = vpop.f32.mrf.mxu1 }
 0x339   :  { %v1352_v60 = vpop.f32.mrf.mxu0 }
 0x33a   :  { %v1682_v8 = vadd.f32 %v1681_v6, %v1352_v60  ;;  %v9569_v60 = vor.u32 %v7557_v17, %v6854_v10 }
 0x33b   :  { %7143 = vmatmul.msk.bf16.gmra.mxu1 %vm930_vm1, %v9555_v3  ;;  %7207 = vmatmul.msk.bf16.gmra.mxu3 %vm930_vm1, %v9555_v3  ;;  %v4097_v3 = vmax.f32 %v2338_v1, 0.0 }
 0x33c   :  { %v4100_v38 = vmax.f32 %v1682_v8, 0.0  ;;  %12312 = vst [vmem:[#allocation130_spill] sm:$0xff] %v9569_v60 }
 0x33e   :  { %v2347_v47 = vpop.f32.mrf.mxu3  ;;  %v9567_v2 = vpack.c.bf16 %v4100_v38, %v4096_v11  ;;  %v6872_v38 = vld [vmem:[%s11946_s1 + $0x348] sm:$0xf0] }
 0x33f   :  { %v2010_v6 = vpop.f32.mrf.mxu2  ;;  %v9581_v17 = vor.u32 %v7560_v42, %v6872_v38  ;;  %v7559_v42 = vld [vmem:[%s11946_s1 + $0x334] sm:$0xf0] }
 0x340   :  { %v2340_v44 = vadd.f32 %v2339_v19, %v2010_v6  ;;  %v1691_v9 = vpop.f32.mrf.mxu1 }
 0x341   :  { %v1355_v20 = vpop.f32.mrf.mxu0  ;;  %12314 = vst [vmem:[#allocation132_spill] sm:$0xff] %v9581_v17 }
 0x342   :  { %v4101_v16 = vmax.f32 %v2340_v44, 0.0  ;;  %v1685_v8 = vadd.f32 %v1684_v29, %v1355_v20 }
 0x344   :  { %1394 = vmatmul.bf16.gmra.mxu0 %v9569_v60  ;;  %2052 = vmatmul.bf16.gmra.mxu2 %v9569_v60  ;;  %v9579_v19 = vpack.c.bf16 %v4101_v16, %v4097_v3  ;;  %v4104_v44 = vmax.f32 %v1685_v8, 0.0  ;;  %v6862_v3 = vld [vmem:[%s11946_s1 + $0x330] sm:$0xf] }
 0x346   :  { %12313 = vst [vmem:[#allocation131_spill] sm:$0xff] %v9579_v19  ;;  %v2349_v11 = vpop.f32.mrf.mxu3 }
 0x347   :  { %v2013_v10 = vpop.f32.mrf.mxu2 }
 0x348   :  { %v2343_v1 = vadd.f32 %v2342_v61, %v2013_v10  ;;  %v1694_v29 = vpop.f32.mrf.mxu1 }
 0x349   :  { %v1357_v20 = vpop.f32.mrf.mxu0 }
 0x34a   :  { %v1687_v6 = vadd.f32 %v1686_v23, %v1357_v20  ;;  %v9595_v20 = vor.u32 %v7559_v42, %v6862_v3 }
 0x34b   :  { %7144 = vmatmul.msk.bf16.gmra.mxu1 %vm930_vm1, %v9581_v17  ;;  %7208 = vmatmul.msk.bf16.gmra.mxu3 %vm930_vm1, %v9581_v17  ;;  %v4105_v17 = vmax.f32 %v2343_v1, 0.0 }
 0x34c   :  { %v4108_v60 = vmax.f32 %v1687_v6, 0.0  ;;  %12315 = vst [vmem:[#allocation133_spill] sm:$0xff] %v9595_v20 }
 0x34e   :  { %v2352_v61 = vpop.f32.mrf.mxu3  ;;  %v9593_v16 = vpack.c.bf16 %v4108_v60, %v4104_v44  ;;  %v6880_v60 = vld [vmem:[%s11946_s1 + $0x358] sm:$0xf0] }
 0x34f   :  { %v2015_v23 = vpop.f32.mrf.mxu2  ;;  %v9607_v42 = vor.u32 %v7562_v27, %v6880_v60  ;;  %v7561_v27 = vld [vmem:[%s11946_s1 + $0x344] sm:$0xf0] }
 0x350   :  { %v2345_v38 = vadd.f32 %v2344_v48, %v2015_v23  ;;  %v1696_v10 = vpop.f32.mrf.mxu1 }
 0x351   :  { %v1360_v19 = vpop.f32.mrf.mxu0  ;;  %12317 = vst [vmem:[#allocation135_spill] sm:$0xff] %v9607_v42 }
 0x352   :  { %v4109_v8 = vmax.f32 %v2345_v38, 0.0  ;;  %v1690_v6 = vadd.f32 %v1689_v12, %v1360_v19 }
 0x354   :  { %1399 = vmatmul.bf16.gmra.mxu0 %v9595_v20  ;;  %2057 = vmatmul.bf16.gmra.mxu2 %v9595_v20  ;;  %v9605_v48 = vpack.c.bf16 %v4109_v8, %v4105_v17  ;;  %v4112_v38 = vmax.f32 %v1690_v6, 0.0  ;;  %v6870_v17 = vld [vmem:[%s11946_s1 + $0x340] sm:$0xf] }
 0x356   :  { %12316 = vst [vmem:[#allocation134_spill] sm:$0xff] %v9605_v48  ;;  %v2354_v44 = vpop.f32.mrf.mxu3 }
 0x357   :  { %v2018_v3 = vpop.f32.mrf.mxu2 }
 0x358   :  { %v2348_v1 = vadd.f32 %v2347_v47, %v2018_v3  ;;  %v1699_v12 = vpop.f32.mrf.mxu1 }
 0x359   :  { %v1362_v19 = vpop.f32.mrf.mxu0 }
 0x35a   :  { %v1692_v23 = vadd.f32 %v1691_v9, %v1362_v19  ;;  %v9621_v19 = vor.u32 %v7561_v27, %v6870_v17 }
 0x35b   :  { %7145 = vmatmul.msk.bf16.gmra.mxu1 %vm930_vm1, %v9607_v42  ;;  %7209 = vmatmul.msk.bf16.gmra.mxu3 %vm930_vm1, %v9607_v42  ;;  %v4113_v42 = vmax.f32 %v2348_v1, 0.0 }
 0x35c   :  { %v4116_v20 = vmax.f32 %v1692_v23, 0.0  ;;  %12318 = vst [vmem:[#allocation136_spill] sm:$0xff] %v9621_v19 }
 0x35e   :  { %v2357_v47 = vpop.f32.mrf.mxu3  ;;  %v9619_v8 = vpack.c.bf16 %v4116_v20, %v4112_v38  ;;  %v6888_v20 = vld [vmem:[%s11946_s1 + $0x368] sm:$0xf0] }
 0x35f   :  { %v2020_v9 = vpop.f32.mrf.mxu2  ;;  %v9633_v27 = vor.u32 %v7564_v51, %v6888_v20  ;;  %v7563_v51 = vld [vmem:[%s11946_s1 + $0x354] sm:$0xf0] }
 0x360   :  { %v2350_v60 = vadd.f32 %v2349_v11, %v2020_v9  ;;  %v1701_v3 = vpop.f32.mrf.mxu1 }
 0x361   :  { %v1365_v48 = vpop.f32.mrf.mxu0  ;;  %12320 = vst [vmem:[#allocation138_spill] sm:$0xff] %v9633_v27 }
 0x362   :  { %v4117_v6 = vmax.f32 %v2350_v60, 0.0  ;;  %v1695_v23 = vadd.f32 %v1694_v29, %v1365_v48 }
 0x364   :  { %1404 = vmatmul.bf16.gmra.mxu0 %v9621_v19  ;;  %2062 = vmatmul.bf16.gmra.mxu2 %v9621_v19  ;;  %v9631_v11 = vpack.c.bf16 %v4117_v6, %v4113_v42  ;;  %v4120_v60 = vmax.f32 %v1695_v23, 0.0  ;;  %v6878_v42 = vld [vmem:[%s11946_s1 + $0x350] sm:$0xf] }
 0x366   :  { %12319 = vst [vmem:[#allocation137_spill] sm:$0xff] %v9631_v11  ;;  %v2359_v38 = vpop.f32.mrf.mxu3 }
 0x367   :  { %v2023_v17 = vpop.f32.mrf.mxu2 }
 0x368   :  { %v2353_v1 = vadd.f32 %v2352_v61, %v2023_v17  ;;  %v1704_v29 = vpop.f32.mrf.mxu1 }
 0x369   :  { %v1367_v48 = vpop.f32.mrf.mxu0 }
 0x36a   :  { %v1697_v9 = vadd.f32 %v1696_v10, %v1367_v48  ;;  %v9647_v48 = vor.u32 %v7563_v51, %v6878_v42 }
 0x36b   :  { %7146 = vmatmul.msk.bf16.gmra.mxu1 %vm930_vm1, %v9633_v27  ;;  %7210 = vmatmul.msk.bf16.gmra.mxu3 %vm930_vm1, %v9633_v27  ;;  %v4121_v27 = vmax.f32 %v2353_v1, 0.0 }
 0x36c   :  { %v4124_v19 = vmax.f32 %v1697_v9, 0.0  ;;  %12321 = vst [vmem:[#allocation139_spill] sm:$0xff] %v9647_v48 }
 0x36e   :  { %v2362_v61 = vpop.f32.mrf.mxu3  ;;  %v9645_v6 = vpack.c.bf16 %v4124_v19, %v4120_v60  ;;  %v6896_v19 = vld [vmem:[%s11946_s1 + $0x378] sm:$0xf0] }
 0x36f   :  { %v2025_v10 = vpop.f32.mrf.mxu2  ;;  %v9659_v51 = vor.u32 %v7566_v62, %v6896_v19  ;;  %v7565_v62 = vld [vmem:[%s11946_s1 + $0x364] sm:$0xf0] }
 0x370   :  { %v2355_v20 = vadd.f32 %v2354_v44, %v2025_v10  ;;  %v1706_v17 = vpop.f32.mrf.mxu1 }
 0x371   :  { %v1370_v11 = vpop.f32.mrf.mxu0  ;;  %12323 = vst [vmem:[#allocation141_spill] sm:$0xff] %v9659_v51 }
 0x372   :  { %v4125_v23 = vmax.f32 %v2355_v20, 0.0  ;;  %v1700_v9 = vadd.f32 %v1699_v12, %v1370_v11 }
 0x374   :  { %1409 = vmatmul.bf16.gmra.mxu0 %v9647_v48  ;;  %2067 = vmatmul.bf16.gmra.mxu2 %v9647_v48  ;;  %v9657_v44 = vpack.c.bf16 %v4125_v23, %v4121_v27  ;;  %v4128_v20 = vmax.f32 %v1700_v9, 0.0  ;;  %v6886_v27 = vld [vmem:[%s11946_s1 + $0x360] sm:$0xf] }
 0x376   :  { %12322 = vst [vmem:[#allocation140_spill] sm:$0xff] %v9657_v44  ;;  %v2364_v60 = vpop.f32.mrf.mxu3 }
 0x377   :  { %v2028_v42 = vpop.f32.mrf.mxu2 }
 0x378   :  { %v2358_v1 = vadd.f32 %v2357_v47, %v2028_v42  ;;  %v1709_v12 = vpop.f32.mrf.mxu1 }
 0x379   :  { %v1372_v11 = vpop.f32.mrf.mxu0 }
 0x37a   :  { %v1702_v10 = vadd.f32 %v1701_v3, %v1372_v11  ;;  %v9673_v11 = vor.u32 %v7565_v62, %v6886_v27 }
 0x37b   :  { %7147 = vmatmul.msk.bf16.gmra.mxu1 %vm930_vm1, %v9659_v51  ;;  %7211 = vmatmul.msk.bf16.gmra.mxu3 %vm930_vm1, %v9659_v51  ;;  %v4129_v51 = vmax.f32 %v2358_v1, 0.0 }
 0x37c   :  { %v4132_v48 = vmax.f32 %v1702_v10, 0.0  ;;  %12324 = vst [vmem:[#allocation142_spill] sm:$0xff] %v9673_v11 }
 0x37e   :  { %v2367_v47 = vpop.f32.mrf.mxu3  ;;  %v9671_v23 = vpack.c.bf16 %v4132_v48, %v4128_v20  ;;  %v6904_v48 = vld [vmem:[%s11946_s1 + $0x388] sm:$0xf0] }
 0x37f   :  { %v2030_v3 = vpop.f32.mrf.mxu2  ;;  %v9685_v62 = vor.u32 %v7568_v13, %v6904_v48  ;;  %v7567_v13 = vld [vmem:[%s11946_s1 + $0x374] sm:$0xf0] }
 0x380   :  { %v2360_v19 = vadd.f32 %v2359_v38, %v2030_v3  ;;  %v1711_v42 = vpop.f32.mrf.mxu1 }
 0x381   :  { %v1375_v44 = vpop.f32.mrf.mxu0  ;;  %12326 = vst [vmem:[#allocation144_spill] sm:$0xff] %v9685_v62 }
 0x382   :  { %v4133_v9 = vmax.f32 %v2360_v19, 0.0  ;;  %v1705_v10 = vadd.f32 %v1704_v29, %v1375_v44 }
 0x384   :  { %1414 = vmatmul.bf16.gmra.mxu0 %v9673_v11  ;;  %2072 = vmatmul.bf16.gmra.mxu2 %v9673_v11  ;;  %v9683_v38 = vpack.c.bf16 %v4133_v9, %v4129_v51  ;;  %v4136_v19 = vmax.f32 %v1705_v10, 0.0  ;;  %v6894_v51 = vld [vmem:[%s11946_s1 + $0x370] sm:$0xf] }
 0x386   :  { %12325 = vst [vmem:[#allocation143_spill] sm:$0xff] %v9683_v38  ;;  %v2369_v20 = vpop.f32.mrf.mxu3 }
 0x387   :  { %v2033_v27 = vpop.f32.mrf.mxu2 }
 0x388   :  { %v2363_v1 = vadd.f32 %v2362_v61, %v2033_v27  ;;  %v1714_v29 = vpop.f32.mrf.mxu1 }
 0x389   :  { %v1377_v44 = vpop.f32.mrf.mxu0 }
 0x38a   :  { %v1707_v3 = vadd.f32 %v1706_v17, %v1377_v44  ;;  %v9699_v44 = vor.u32 %v7567_v13, %v6894_v51 }
 0x38b   :  { %7148 = vmatmul.msk.bf16.gmra.mxu1 %vm930_vm1, %v9685_v62  ;;  %7212 = vmatmul.msk.bf16.gmra.mxu3 %vm930_vm1, %v9685_v62  ;;  %v4137_v62 = vmax.f32 %v2363_v1, 0.0 }
 0x38c   :  { %v4140_v11 = vmax.f32 %v1707_v3, 0.0  ;;  %12327 = vst [vmem:[#allocation145_spill] sm:$0xff] %v9699_v44 }
 0x38e   :  { %v2372_v61 = vpop.f32.mrf.mxu3  ;;  %v9697_v9 = vpack.c.bf16 %v4140_v11, %v4136_v19  ;;  %v6912_v11 = vld [vmem:[%s11946_s1 + $0x398] sm:$0xf0] }
 0x38f   :  { %v2035_v17 = vpop.f32.mrf.mxu2  ;;  %v9711_v13 = vor.u32 %v7570_v56, %v6912_v11  ;;  %v7569_v56 = vld [vmem:[%s11946_s1 + $0x384] sm:$0xf0] }
 0x390   :  { %v2365_v48 = vadd.f32 %v2364_v60, %v2035_v17  ;;  %v1716_v27 = vpop.f32.mrf.mxu1 }
 0x391   :  { %v1380_v38 = vpop.f32.mrf.mxu0  ;;  %12329 = vst [vmem:[#allocation147_spill] sm:$0xff] %v9711_v13 }
 0x392   :  { %v4141_v10 = vmax.f32 %v2365_v48, 0.0  ;;  %v1710_v3 = vadd.f32 %v1709_v12, %v1380_v38 }
 0x394   :  { %1419 = vmatmul.bf16.gmra.mxu0 %v9699_v44  ;;  %2077 = vmatmul.bf16.gmra.mxu2 %v9699_v44  ;;  %v9709_v60 = vpack.c.bf16 %v4141_v10, %v4137_v62  ;;  %v4144_v48 = vmax.f32 %v1710_v3, 0.0  ;;  %v6902_v62 = vld [vmem:[%s11946_s1 + $0x380] sm:$0xf] }
 0x396   :  { %12328 = vst [vmem:[#allocation146_spill] sm:$0xff] %v9709_v60  ;;  %v2374_v19 = vpop.f32.mrf.mxu3 }
 0x397   :  { %v2038_v51 = vpop.f32.mrf.mxu2 }
 0x398   :  { %v2368_v1 = vadd.f32 %v2367_v47, %v2038_v51  ;;  %v1719_v12 = vpop.f32.mrf.mxu1 }
 0x399   :  { %v1382_v38 = vpop.f32.mrf.mxu0 }
 0x39a   :  { %v1712_v17 = vadd.f32 %v1711_v42, %v1382_v38  ;;  %v9725_v38 = vor.u32 %v7569_v56, %v6902_v62 }
 0x39b   :  { %7149 = vmatmul.msk.bf16.gmra.mxu1 %vm930_vm1, %v9711_v13  ;;  %7213 = vmatmul.msk.bf16.gmra.mxu3 %vm930_vm1, %v9711_v13  ;;  %v4145_v13 = vmax.f32 %v2368_v1, 0.0 }
 0x39c   :  { %v4148_v44 = vmax.f32 %v1712_v17, 0.0  ;;  %12330 = vst [vmem:[#allocation148_spill] sm:$0xff] %v9725_v38 }
 0x39e   :  { %v9723_v47 = vpack.c.bf16 %v4148_v44, %v4144_v48  ;;  %v2377_v10 = vpop.f32.mrf.mxu3  ;;  %v7572_v44 = vld [vmem:[%s11946_s1 + $0x3a4] sm:$0xf] }
 0x39f   :  { %v2040_v42 = vpop.f32.mrf.mxu2 }
 0x3a0   :  { %v2370_v11 = vadd.f32 %v2369_v20, %v2040_v42  ;;  %v1721_v51 = vpop.f32.mrf.mxu1  ;;  %v6920_v20 = vld [vmem:[%s11946_s1 + $0x3a8] sm:$0xf0] }
 0x3a1   :  { %v1385_v60 = vpop.f32.mrf.mxu0  ;;  %v9737_v56 = vor.u32 %v7572_v44, %v6920_v20  ;;  %v7571_v44 = vld [vmem:[%s11946_s1 + $0x394] sm:$0xf0] }
 0x3a2   :  { %v4149_v3 = vmax.f32 %v2370_v11, 0.0  ;;  %v1715_v17 = vadd.f32 %v1714_v29, %v1385_v60 }
 0x3a3   :  { %12332 = vst [vmem:[#allocation150_spill] sm:$0xff] %v9737_v56 }
 0x3a4   :  { %v9727_v35 = vpack.c.bf16 %v4149_v3, %v4145_v13  ;;  %1424 = vmatmul.bf16.gmra.mxu0 %v9725_v38  ;;  %2082 = vmatmul.bf16.gmra.mxu2 %v9725_v38  ;;  %v4152_v42 = vmax.f32 %v1715_v17, 0.0  ;;  %v6910_v3 = vld [vmem:[%s11946_s1 + $0x390] sm:$0xf] }
 0x3a6   :  { %12331 = vst [vmem:[#allocation149_spill] sm:$0xff] %v9727_v35  ;;  %v2379_v48 = vpop.f32.mrf.mxu3  ;;  %v9751_v35 = vor.u32 %v7571_v44, %v6910_v3 }
 0x3a7   :  { %v2043_v62 = vpop.f32.mrf.mxu2 }
 0x3a8   :  { %v2373_v1 = vadd.f32 %v2372_v61, %v2043_v62  ;;  %v1724_v29 = vpop.f32.mrf.mxu1  ;;  %12333 = vst [vmem:[#allocation151_spill] sm:$0xff] %v9751_v35 }
 0x3a9   :  { %v1387_v60 = vpop.f32.mrf.mxu0 }
 0x3aa   :  { %v1717_v13 = vadd.f32 %v1716_v27, %v1387_v60 }
 0x3ab   :  { %7150 = vmatmul.msk.bf16.gmra.mxu1 %vm930_vm1, %v9737_v56  ;;  %7214 = vmatmul.msk.bf16.gmra.mxu3 %vm930_vm1, %v9737_v56  ;;  %v4153_v56 = vmax.f32 %v2373_v1, 0.0 }
 0x3ac   :  { %v4156_v11 = vmax.f32 %v1717_v13, 0.0 }
 0x3ae   :  { %v2382_v61 = vpop.f32.mrf.mxu3  ;;  %v9749_v20 = vpack.c.bf16 %v4156_v11, %v4152_v42  ;;  %v6928_v42 = vld [vmem:[%s11946_s1 + $0x3b8] sm:$0xf0] }
 0x3af   :  { %v2045_v27 = vpop.f32.mrf.mxu2  ;;  %v9763_v44 = vor.u32 %v7574_v50, %v6928_v42  ;;  %v7573_v50 = vld [vmem:[%s11946_s1 + $0x3a4] sm:$0xf0] }
 0x3b0   :  { %v2375_v62 = vadd.f32 %v2374_v19, %v2045_v27  ;;  %v1726_v60 = vpop.f32.mrf.mxu1 }
 0x3b1   :  { %v1390_v38 = vpop.f32.mrf.mxu0  ;;  %12335 = vst [vmem:[#allocation153_spill] sm:$0xff] %v9763_v44 }
 0x3b2   :  { %v4157_v17 = vmax.f32 %v2375_v62, 0.0  ;;  %v1720_v13 = vadd.f32 %v1719_v12, %v1390_v38 }
 0x3b4   :  { %1429 = vmatmul.bf16.gmra.mxu0 %v9751_v35  ;;  %2087 = vmatmul.bf16.gmra.mxu2 %v9751_v35  ;;  %v9761_v19 = vpack.c.bf16 %v4157_v17, %v4153_v56  ;;  %v4160_v62 = vmax.f32 %v1720_v13, 0.0  ;;  %v6918_v56 = vld [vmem:[%s11946_s1 + $0x3a0] sm:$0xf] }
 0x3b6   :  { %12334 = vst [vmem:[#allocation152_spill] sm:$0xff] %v9761_v19  ;;  %v2384_v11 = vpop.f32.mrf.mxu3 }
 0x3b7   :  { %v2048_v3 = vpop.f32.mrf.mxu2 }
 0x3b8   :  { %v2378_v1 = vadd.f32 %v2377_v10, %v2048_v3  ;;  %v1729_v12 = vpop.f32.mrf.mxu1 }
 0x3b9   :  { %v1392_v38 = vpop.f32.mrf.mxu0 }
 0x3ba   :  { %v1722_v27 = vadd.f32 %v1721_v51, %v1392_v38  ;;  %v9777_v38 = vor.u32 %v7573_v50, %v6918_v56 }
 0x3bb   :  { %7151 = vmatmul.msk.bf16.gmra.mxu1 %vm930_vm1, %v9763_v44  ;;  %7215 = vmatmul.msk.bf16.gmra.mxu3 %vm930_vm1, %v9763_v44  ;;  %v4161_v44 = vmax.f32 %v2378_v1, 0.0 }
 0x3bc   :  { %v4164_v35 = vmax.f32 %v1722_v27, 0.0  ;;  %12336 = vst [vmem:[#allocation154_spill] sm:$0xff] %v9777_v38 }
 0x3be   :  { %v2387_v10 = vpop.f32.mrf.mxu3  ;;  %v9775_v17 = vpack.c.bf16 %v4164_v35, %v4160_v62  ;;  %v6936_v35 = vld [vmem:[%s11946_s1 + $0x3c8] sm:$0xf0] }
 0x3bf   :  { %v2050_v51 = vpop.f32.mrf.mxu2  ;;  %v9789_v50 = vor.u32 %v7576_v30, %v6936_v35  ;;  %v7575_v30 = vld [vmem:[%s11946_s1 + $0x3b4] sm:$0xf0] }
 0x3c0   :  { %v2380_v42 = vadd.f32 %v2379_v48, %v2050_v51  ;;  %v1731_v3 = vpop.f32.mrf.mxu1 }
 0x3c1   :  { %v1395_v19 = vpop.f32.mrf.mxu0  ;;  %12338 = vst [vmem:[#allocation156_spill] sm:$0xff] %v9789_v50 }
 0x3c2   :  { %v4165_v13 = vmax.f32 %v2380_v42, 0.0  ;;  %v1725_v27 = vadd.f32 %v1724_v29, %v1395_v19 }
 0x3c4   :  { %1434 = vmatmul.bf16.gmra.mxu0 %v9777_v38  ;;  %2092 = vmatmul.bf16.gmra.mxu2 %v9777_v38  ;;  %v9787_v48 = vpack.c.bf16 %v4165_v13, %v4161_v44  ;;  %v4168_v42 = vmax.f32 %v1725_v27, 0.0  ;;  %v6926_v44 = vld [vmem:[%s11946_s1 + $0x3b0] sm:$0xf] }
 0x3c6   :  { %12337 = vst [vmem:[#allocation155_spill] sm:$0xff] %v9787_v48  ;;  %v2389_v62 = vpop.f32.mrf.mxu3 }
 0x3c7   :  { %v2053_v56 = vpop.f32.mrf.mxu2 }
 0x3c8   :  { %v2383_v1 = vadd.f32 %v2382_v61, %v2053_v56  ;;  %v1734_v29 = vpop.f32.mrf.mxu1 }
 0x3c9   :  { %v1397_v19 = vpop.f32.mrf.mxu0 }
 0x3ca   :  { %v1727_v51 = vadd.f32 %v1726_v60, %v1397_v19  ;;  %v9803_v19 = vor.u32 %v7575_v30, %v6926_v44 }
 0x3cb   :  { %7152 = vmatmul.msk.bf16.gmra.mxu1 %vm930_vm1, %v9789_v50  ;;  %7216 = vmatmul.msk.bf16.gmra.mxu3 %vm930_vm1, %v9789_v50  ;;  %v4169_v50 = vmax.f32 %v2383_v1, 0.0 }
 0x3cc   :  { %v4172_v38 = vmax.f32 %v1727_v51, 0.0  ;;  %12339 = vst [vmem:[#allocation157_spill] sm:$0xff] %v9803_v19 }
 0x3ce   :  { %v2392_v61 = vpop.f32.mrf.mxu3  ;;  %v9801_v13 = vpack.c.bf16 %v4172_v38, %v4168_v42  ;;  %v6944_v38 = vld [vmem:[%s11946_s1 + $0x3d8] sm:$0xf0] }
 0x3cf   :  { %v2055_v60 = vpop.f32.mrf.mxu2  ;;  %v9815_v30 = vor.u32 %v7578_v41, %v6944_v38  ;;  %v7577_v41 = vld [vmem:[%s11946_s1 + $0x3c4] sm:$0xf0] }
 0x3d0   :  { %v2385_v35 = vadd.f32 %v2384_v11, %v2055_v60  ;;  %v1736_v56 = vpop.f32.mrf.mxu1 }
 0x3d1   :  { %v1400_v48 = vpop.f32.mrf.mxu0  ;;  %12341 = vst [vmem:[#allocation159_spill] sm:$0xff] %v9815_v30 }
 0x3d2   :  { %v4173_v27 = vmax.f32 %v2385_v35, 0.0  ;;  %v1730_v51 = vadd.f32 %v1729_v12, %v1400_v48 }
 0x3d4   :  { %1439 = vmatmul.bf16.gmra.mxu0 %v9803_v19  ;;  %2097 = vmatmul.bf16.gmra.mxu2 %v9803_v19  ;;  %v9813_v11 = vpack.c.bf16 %v4173_v27, %v4169_v50  ;;  %v4176_v35 = vmax.f32 %v1730_v51, 0.0  ;;  %v6934_v50 = vld [vmem:[%s11946_s1 + $0x3c0] sm:$0xf] }
 0x3d6   :  { %12340 = vst [vmem:[#allocation158_spill] sm:$0xff] %v9813_v11  ;;  %v2394_v42 = vpop.f32.mrf.mxu3 }
 0x3d7   :  { %v2058_v44 = vpop.f32.mrf.mxu2 }
 0x3d8   :  { %v2388_v1 = vadd.f32 %v2387_v10, %v2058_v44  ;;  %v9817_v12 = vpop.f32.mrf.mxu1 }
 0x3d9   :  { %v1402_v48 = vpop.f32.mrf.mxu0 }
 0x3da   :  { %v1732_v60 = vadd.f32 %v1731_v3, %v1402_v48  ;;  %v9833_v48 = vor.u32 %v7577_v41, %v6934_v50  ;;  %v4177_v51 = vmax.f32 %v2388_v1, 0.0 }
 0x3db   :  { %7153 = vmatmul.msk.bf16.gmra.mxu1 %vm930_vm1, %v9815_v30  ;;  %7217 = vmatmul.msk.bf16.gmra.mxu3 %vm930_vm1, %v9815_v30 }
 0x3dc   :  { %v4180_v19 = vmax.f32 %v1732_v60, 0.0  ;;  %12342 = vst [vmem:[#allocation160_spill] sm:$0xff] %v9833_v48 }
 0x3de   :  { %v2397_v10 = vpop.f32.mrf.mxu3  ;;  %v9829_v27 = vpack.c.bf16 %v4180_v19, %v4176_v35 }
 0x3df   :  { %v2060_v3 = vpop.f32.mrf.mxu2 }
 0x3e0   :  { %v2390_v38 = vadd.f32 %v2389_v62, %v2060_v3  ;;  %v9831_v44 = vpop.f32.mrf.mxu1  ;;  %v6952_v62 = vld [vmem:[%s11946_s1 + $0x3e8] sm:$0xf0] }
 0x3e1   :  { %v1405_v11 = vpop.f32.mrf.mxu0  ;;  %v9845_v41 = vor.u32 %v7580_v58, %v6952_v62  ;;  %v7579_v58 = vld [vmem:[%s11946_s1 + $0x3d4] sm:$0xf0] }
 0x3e2   :  { %v4181_v60 = vmax.f32 %v2390_v38, 0.0  ;;  %v1735_v30 = vadd.f32 %v1734_v29, %v1405_v11 }
 0x3e3   :  { %12344 = vst [vmem:[#allocation162_spill] sm:$0xff] %v9845_v41 }
 0x3e4   :  { %1444 = vmatmul.bf16.gmra.mxu0 %v9833_v48  ;;  %2102 = vmatmul.bf16.gmra.mxu2 %v9833_v48  ;;  %v9843_v19 = vpack.c.bf16 %v4181_v60, %v4177_v51  ;;  %v4184_v38 = vmax.f32 %v1735_v30, 0.0  ;;  %v6942_v51 = vld [vmem:[%s11946_s1 + $0x3d0] sm:$0xf] }
 0x3e6   :  { %12343 = vst [vmem:[#allocation161_spill] sm:$0xff] %v9843_v19  ;;  %v2399_v35 = vpop.f32.mrf.mxu3 }
 0x3e7   :  { %v2063_v50 = vpop.f32.mrf.mxu2 }
 0x3e8   :  { %v2393_v1 = vadd.f32 %v2392_v61, %v2063_v50  ;;  %v9847_v29 = vpop.f32.mrf.mxu1 }
 0x3e9   :  { %v1407_v11 = vpop.f32.mrf.mxu0 }
 0x3ea   :  { %v1737_v3 = vadd.f32 %v1736_v56, %v1407_v11  ;;  %v9863_v11 = vor.u32 %v7579_v58, %v6942_v51  ;;  %v4185_v30 = vmax.f32 %v2393_v1, 0.0 }
 0x3eb   :  { %7154 = vmatmul.msk.bf16.gmra.mxu1 %vm930_vm1, %v9845_v41  ;;  %7218 = vmatmul.msk.bf16.gmra.mxu3 %vm930_vm1, %v9845_v41  ;;  %v7582_v41 = vld [vmem:[%s11946_s1 + $0x3f4] sm:$0xf] }
 0x3ec   :  { %v4188_v48 = vmax.f32 %v1737_v3, 0.0  ;;  %12345 = vst [vmem:[#allocation163_spill] sm:$0xff] %v9863_v11 }
 0x3ee   :  { %v2402_v61 = vpop.f32.mrf.mxu3  ;;  %v9859_v60 = vpack.c.bf16 %v4188_v48, %v4184_v38 }
 0x3ef   :  { %v2065_v56 = vpop.f32.mrf.mxu2 }
 0x3f0   :  { %v2395_v62 = vadd.f32 %v2394_v42, %v2065_v56  ;;  %v9861_v50 = vpop.f32.mrf.mxu1  ;;  %v6960_v42 = vld [vmem:[%s11946_s1 + $0x3f8] sm:$0xf0] }
 0x3f1   :  { %v9865_v19 = vpop.f32.mrf.mxu0  ;;  %v9877_v58 = vor.u32 %v7582_v41, %v6960_v42 }
 0x3f2   :  { %v4189_v3 = vmax.f32 %v2395_v62, 0.0 }
 0x3f3   :  { %12347 = vst [vmem:[#allocation165_spill] sm:$0xff] %v9877_v58 }
 0x3f4   :  { %1449 = vmatmul.bf16.gmra.mxu0 %v9863_v11  ;;  %2107 = vmatmul.bf16.gmra.mxu2 %v9863_v11  ;;  %v9875_v48 = vpack.c.bf16 %v4189_v3, %v4185_v30  ;;  %v6950_v11 = vld [vmem:[%s11946_s1 + $0x3e0] sm:$0xf]  ;;  %v7581_v30 = vld [vmem:[%s11946_s1 + $0x3e4] sm:$0xf0] }
 0x3f6   :  { %12346 = vst [vmem:[#allocation164_spill] sm:$0xff] %v9875_v48  ;;  %v2404_v38 = vpop.f32.mrf.mxu3 }
 0x3f7   :  { %v2068_v51 = vpop.f32.mrf.mxu2 }
 0x3f8   :  { %v2398_v1 = vadd.f32 %v2397_v10, %v2068_v51  ;;  %v1749_v56 = vpop.f32.mrf.mxu1  ;;  %v9891_v51 = vor.u32 %v7581_v30, %v6950_v11 }
 0x3f9   :  { %v9879_v62 = vpop.f32.mrf.mxu0 }
 0x3fa   :  { %v4193_v55 = vmax.f32 %v2398_v1, 0.0 }
 0x3fb   :  { %7155 = vmatmul.msk.bf16.gmra.mxu1 %vm930_vm1, %v9877_v58  ;;  %7219 = vmatmul.msk.bf16.gmra.mxu3 %vm930_vm1, %v9877_v58 }
 0x3fe   :  { %v2407_v41 = vpop.f32.mrf.mxu3 }
 0x3ff   :  { %v2070_v3 = vpop.f32.mrf.mxu2 }
 0x400   :  { %v2400_v10 = vadd.f32 %v2399_v35, %v2070_v3  ;;  %v1751_v42 = vpop.f32.mrf.mxu1 }
 0x401   :  { %v1415_v48 = vpop.f32.mrf.mxu0 }
 0x402   :  { %v4197_v14 = vmax.f32 %v2400_v10, 0.0 }
 0x404   :  { %1454 = vmatmul.bf16.gmra.mxu0 %v9891_v51  ;;  %2112 = vmatmul.bf16.gmra.mxu2 %v9891_v51  ;;  %v9895_v58 = vpack.c.bf16 %v4197_v14, %v4193_v55  ;;  %v6958_v14 = vld [vmem:[%s11946_s1 + $0x3f0] sm:$0xf] }
 0x406   :  { %v2409_v15 = vpop.f32.mrf.mxu3 }
 0x407   :  { %v2073_v0 = vpop.f32.mrf.mxu2 }
 0x408   :  { %v2403_v39 = vadd.f32 %v2402_v61, %v2073_v0  ;;  %v1754_v53 = vpop.f32.mrf.mxu1  ;;  %v7583_v0 = vld [vmem:[%s11946_s1 + $0x3f4] sm:$0xf0] }
 0x409   :  { %v1417_v7 = vpop.f32.mrf.mxu0 }
 0x40b   :  { %2460 = vmatmul.bf16.vlgmr.msrb.gmra.mxu1 %v8074_v63  ;;  %7220 = vmatmul.msk.bf16.vlgmr.msrb.gmra.mxu3 %vm930_vm1, %v7990_v25 }
 0x40c   :  { %4812 = vmatpush.bf16.msrb.mxu1 %v9515_v22  ;;  %4836 = vmatpush.bf16.msrb.mxu3 %v9723_v47  ;;  %v9910_v22 = vor.u32 %v7583_v0, %v6958_v14  ;;  %v4201_v47 = vmax.f32 %v2403_v39, 0.0 }
 0x40e   :  { %v2412_v35 = vpop.f32.mrf.mxu3 }
 0x40f   :  { %v2075_v55 = vpop.f32.mrf.mxu2 }
 0x410   :  { %v2405_v61 = vadd.f32 %v2404_v38, %v2075_v55  ;;  %4813 = vmatpush.bf16.msrb.mxu1 %v9489_v57  ;;  %4837 = vmatpush.bf16.msrb.mxu3 %v9697_v9  ;;  %v1756_v11 = vpop.f32.mrf.mxu1 }
 0x411   :  { %v1420_v1 = vpop.f32.mrf.mxu0 }
 0x412   :  { %v4205_v30 = vmax.f32 %v2405_v61, 0.0  ;;  %v1745_v61 = vadd.f32 %v9847_v29, %v1415_v48 }
 0x414   :  { %4814 = vmatpush.bf16.msrb.mxu1 %v9463_v26  ;;  %4838 = vmatpush.bf16.msrb.mxu3 %v9671_v23  ;;  %v9914_v3 = vpack.c.bf16 %v4205_v30, %v4201_v47  ;;  %v1750_v23 = vadd.f32 %v1749_v56, %v1420_v1 }
 0x415   :  { %1459 = vmatmul.bf16.gmra.mxu0 %v9910_v22  ;;  %2117 = vmatmul.bf16.gmra.mxu2 %v9910_v22 }
 0x416   :  { %v2414_v38 = vpop.f32.mrf.mxu3 }
 0x417   :  { %v2078_v57 = vpop.f32.mrf.mxu2 }
 0x418   :  { %v2408_v10 = vadd.f32 %v2407_v41, %v2078_v57  ;;  %4815 = vmatpush.bf16.msrb.mxu1 %v9437_v45  ;;  %4839 = vmatpush.bf16.msrb.mxu3 %v9645_v6  ;;  %v1759_v9 = vpop.f32.mrf.mxu1  ;;  %v1747_v41 = vadd.f32 %v9861_v50, %v1417_v7 }
 0x419   :  { %v1422_v39 = vpop.f32.mrf.mxu0 }
 0x41a   :  { %v1752_v26 = vadd.f32 %v1751_v42, %v1422_v39  ;;  %v4208_v42 = vmax.f32 %v1750_v23, 0.0  ;;  %v4209_v30 = vmax.f32 %v2408_v10, 0.0  ;;  %v4204_v56 = vmax.f32 %v1747_v41, 0.0 }
 0x41b   :  { %2465 = vmatmul.bf16.gmra.mxu1 %v8113_v18  ;;  %7221 = vmatmul.msk.bf16.gmra.mxu3 %vm930_vm1, %v8050_v52 }
 0x41c   :  { %4816 = vmatpush.bf16.msrb.mxu1 %v9411_v36  ;;  %4840 = vmatpush.bf16.msrb.mxu3 %v9619_v8  ;;  %v4212_v45 = vmax.f32 %v1752_v26, 0.0  ;;  %v1742_v8 = vadd.f32 %v9831_v44, %v9879_v62 }
 0x41e   :  { %v2417_v14 = vpop.f32.mrf.mxu3  ;;  %v4500_v1 = vpack.c.bf16 %v4212_v45, %v4208_v42  ;;  %v4196_v44 = vmax.f32 %v1742_v8, 0.0 }
 0x41f   :  { %v2080_v0 = vpop.f32.mrf.mxu2 }
 0x420   :  { %v2410_v55 = vadd.f32 %v2409_v15, %v2080_v0  ;;  %4817 = vmatpush.bf16.msrb.mxu1 %v9385_v5  ;;  %4841 = vmatpush.bf16.msrb.mxu3 %v9593_v16  ;;  %v1761_v6 = vpop.f32.mrf.mxu1  ;;  %v1740_v15 = vadd.f32 %v9817_v12, %v9865_v19 }
 0x421   :  { %v1425_v47 = vpop.f32.mrf.mxu0 }
 0x422   :  { %v4213_v36 = vmax.f32 %v2410_v55, 0.0  ;;  %v1755_v57 = vadd.f32 %v1754_v53, %v1425_v47  ;;  %v4200_v53 = vmax.f32 %v1745_v61, 0.0 }
 0x424   :  { %v9931_v7 = vpack.c.bf16 %v4213_v36, %v4209_v30  ;;  %4818 = vmatpush.bf16.msrb.mxu1 %v9359_v32  ;;  %4842 = vmatpush.bf16.msrb.mxu3 %v9567_v2  ;;  %v4496_v2 = vpack.c.bf16 %v4204_v56, %v4200_v53 }
 0x425   :  { %3118 = vmatmul.bf16.vlgmr.msrb.gmra.mxu0 %v8074_v63  ;;  %7284 = vmatmul.msk.bf16.vlgmr.msrb.gmra.mxu2 %vm930_vm1, %v7990_v25  ;;  %v4192_v63 = vmax.f32 %v1740_v15, 0.0  ;;  %v4216_v25 = vmax.f32 %v1755_v57, 0.0 }
 0x426   :  { %4860 = vmatpush.bf16.msrb.mxu0 %v4500_v1  ;;  %v2419_v5 = vpop.f32.mrf.mxu3 }
 0x427   :  { %v2083_v16 = vpop.f32.mrf.mxu2  ;;  %v4492_v19 = vpack.c.bf16 %v4196_v44, %v4192_v63 }
 0x428   :  { %v2413_v29 = vadd.f32 %v2412_v35, %v2083_v16  ;;  %4819 = vmatpush.bf16.msrb.mxu1 %v9326_v33  ;;  %4843 = vmatpush.bf16.msrb.mxu3 %v9541_v54  ;;  %v1764_v32 = vpop.f32.mrf.mxu1 }
 0x429   :  { %v1427_v50 = vpop.f32.mrf.mxu0 }
 0x42a   :  { %4861 = vmatpush.bf16.msrb.mxu0 %v4496_v2  ;;  %v1757_v48 = vadd.f32 %v1756_v11, %v1427_v50  ;;  %v4217_v26 = vmax.f32 %v2413_v29, 0.0 }
 0x42b   :  { %2470 = vmatmul.bf16.gmra.mxu1 %v8135_v24  ;;  %7222 = vmatmul.msk.bf16.gmra.mxu3 %vm930_vm1, %v8087_v4 }
 0x42c   :  { %v4220_v12 = vmax.f32 %v1757_v48, 0.0 }
 0x42e   :  { %4862 = vmatpush.bf16.msrb.mxu0 %v4492_v19  ;;  %v2422_v62 = vpop.f32.mrf.mxu3  ;;  %v9945_v35 = vpack.c.bf16 %v4220_v12, %v4216_v25 }
 0x42f   :  { %v2085_v33 = vpop.f32.mrf.mxu2 }
 0x430   :  { %v2415_v54 = vadd.f32 %v2414_v38, %v2085_v33  ;;  %v1766_v10 = vpop.f32.mrf.mxu1 }
 0x431   :  { %v1430_v39 = vpop.f32.mrf.mxu0 }
 0x432   :  { %v4221_v23 = vmax.f32 %v2415_v54, 0.0  ;;  %4863 = vmatpush.bf16.msrb.mxu0 %v9859_v60  ;;  %v1760_v11 = vadd.f32 %v1759_v9, %v1430_v39 }
 0x434   :  { %v9948_v0 = vpack.c.bf16 %v4221_v23, %v4217_v26  ;;  %v4224_v60 = vmax.f32 %v1760_v11, 0.0 }
 0x435   :  { %3123 = vmatmul.bf16.gmra.mxu0 %v8113_v18  ;;  %7285 = vmatmul.msk.bf16.gmra.mxu2 %vm930_vm1, %v8050_v52 }
 0x436   :  { %4864 = vmatpush.bf16.msrb.mxu0 %v9829_v27  ;;  %v2424_v41 = vpop.f32.mrf.mxu3 }
 0x437   :  { %v2088_v45 = vpop.f32.mrf.mxu2 }
 0x438   :  { %v2418_v55 = vadd.f32 %v2417_v14, %v2088_v45  ;;  %v1769_v38 = vpop.f32.mrf.mxu1 }
 0x439   :  { %v1432_v61 = vpop.f32.mrf.mxu0 }
 0x43a   :  { %4865 = vmatpush.bf16.msrb.mxu0 %v9801_v13  ;;  %v1762_v47 = vadd.f32 %v1761_v6, %v1432_v61  ;;  %v4225_v36 = vmax.f32 %v2418_v55, 0.0 }
 0x43b   :  { %2475 = vmatmul.bf16.gmra.mxu1 %v8157_v31  ;;  %7223 = vmatmul.msk.bf16.gmra.mxu3 %vm930_vm1, %v8123_v21 }
 0x43c   :  { %v4228_v18 = vmax.f32 %v1762_v47, 0.0 }
 0x43e   :  { %4866 = vmatpush.bf16.msrb.mxu0 %v9775_v17  ;;  %v2427_v52 = vpop.f32.mrf.mxu3  ;;  %v9959_v9 = vpack.c.bf16 %v4228_v18, %v4224_v60 }
 0x43f   :  { %v2090_v27 = vpop.f32.mrf.mxu2 }
 0x440   :  { %v2420_v42 = vadd.f32 %v2419_v5, %v2090_v27  ;;  %v1771_v14 = vpop.f32.mrf.mxu1 }
 0x441   :  { %v1435_v30 = vpop.f32.mrf.mxu0 }
 0x442   :  { %v4229_v57 = vmax.f32 %v2420_v42, 0.0  ;;  %4867 = vmatpush.bf16.msrb.mxu0 %v9749_v20  ;;  %v1765_v13 = vadd.f32 %v1764_v32, %v1435_v30 }
 0x444   :  { %v9962_v6 = vpack.c.bf16 %v4229_v57, %v4225_v36  ;;  %v4232_v20 = vmax.f32 %v1765_v13, 0.0 }
 0x445   :  { %3128 = vmatmul.bf16.gmra.mxu0 %v8135_v24  ;;  %7286 = vmatmul.msk.bf16.gmra.mxu2 %vm930_vm1, %v8087_v4 }
 0x446   :  { %v2429_v17 = vpop.f32.mrf.mxu3 }
 0x447   :  { %v2093_v8 = vpop.f32.mrf.mxu2 }
 0x448   :  { %v2423_v56 = vadd.f32 %v2422_v62, %v2093_v8  ;;  %v1774_v1 = vpop.f32.mrf.mxu1 }
 0x449   :  { %v1437_v15 = vpop.f32.mrf.mxu0 }
 0x44a   :  { %v1767_v53 = vadd.f32 %v1766_v10, %v1437_v15  ;;  %v4233_v2 = vmax.f32 %v2423_v56, 0.0 }
 0x44b   :  { %2480 = vmatmul.bf16.gmra.mxu1 %v8179_v37  ;;  %7224 = vmatmul.msk.bf16.gmra.mxu3 %vm930_vm1, %v8145_v28 }
 0x44c   :  { %v4236_v5 = vmax.f32 %v1767_v53, 0.0 }
 0x44e   :  { %v2432_v16 = vpop.f32.mrf.mxu3  ;;  %v9970_v44 = vpack.c.bf16 %v4236_v5, %v4232_v20 }
 0x44f   :  { %v2095_v24 = vpop.f32.mrf.mxu2 }
 0x450   :  { %v2425_v29 = vadd.f32 %v2424_v41, %v2095_v24  ;;  %v9972_v32 = vpop.f32.mrf.mxu1 }
 0x451   :  { %v1440_v4 = vpop.f32.mrf.mxu0 }
 0x452   :  { %v4237_v50 = vmax.f32 %v2425_v29, 0.0  ;;  %v1770_v63 = vadd.f32 %v1769_v38, %v1440_v4 }
 0x454   :  { %v9974_v48 = vpack.c.bf16 %v4237_v50, %v4233_v2  ;;  %v4240_v10 = vmax.f32 %v1770_v63, 0.0 }
 0x455   :  { %3133 = vmatmul.bf16.gmra.mxu0 %v8157_v31  ;;  %7287 = vmatmul.msk.bf16.gmra.mxu2 %vm930_vm1, %v8123_v21 }
 0x456   :  { %v2434_v25 = vpop.f32.mrf.mxu3 }
 0x457   :  { %v2098_v12 = vpop.f32.mrf.mxu2 }
 0x458   :  { %v2428_v19 = vadd.f32 %v2427_v52, %v2098_v12  ;;  %v9979_v62 = vpop.f32.mrf.mxu1  ;;  %v12348_v12 = vld [vmem:[#allocation5_spill] sm:$0xff] }
 0x459   :  { %v1442_v33 = vpop.f32.mrf.mxu0 }
 0x45a   :  { %v1772_v54 = vadd.f32 %v1771_v14, %v1442_v33  ;;  %v4241_v45 = vmax.f32 %v2428_v19, 0.0  ;;  %v12349_v19 = vld [vmem:[#allocation3_spill] sm:$0xff] }
 0x45b   :  { %2485 = vmatmul.bf16.gmra.mxu1 %v8201_v43  ;;  %7225 = vmatmul.msk.bf16.gmra.mxu3 %vm930_vm1, %v8167_v34 }
 0x45c   :  { %v4244_v39 = vmax.f32 %v1772_v54, 0.0 }
 0x45e   :  { %v2437_v26 = vpop.f32.mrf.mxu3  ;;  %v9984_v23 = vpack.c.bf16 %v4244_v39, %v4240_v10 }
 0x45f   :  { %v2100_v31 = vpop.f32.mrf.mxu2 }
 0x460   :  { %v2430_v11 = vadd.f32 %v2429_v17, %v2100_v31  ;;  %v9986_v21 = vpop.f32.mrf.mxu1 }
 0x461   :  { %v1445_v41 = vpop.f32.mrf.mxu0 }
 0x462   :  { %v4245_v55 = vmax.f32 %v2430_v11, 0.0  ;;  %v9988_v38 = vadd.f32 %v1774_v1, %v1445_v41 }
 0x464   :  { %v9990_v61 = vpack.c.bf16 %v4245_v55, %v4241_v45 }
 0x465   :  { %3138 = vmatmul.bf16.gmra.mxu0 %v8179_v37  ;;  %7288 = vmatmul.msk.bf16.gmra.mxu2 %vm930_vm1, %v8145_v28 }
 0x466   :  { %v2439_v47 = vpop.f32.mrf.mxu3 }
 0x467   :  { %v2103_v60 = vpop.f32.mrf.mxu2 }
 0x468   :  { %v2433_v18 = vadd.f32 %v2432_v16, %v2103_v60  ;;  %v9995_v52 = vpop.f32.mrf.mxu1 }
 0x469   :  { %v9997_v27 = vpop.f32.mrf.mxu0 }
 0x46a   :  { %v4249_v57 = vmax.f32 %v2433_v18, 0.0 }
 0x46b   :  { %2490 = vmatmul.bf16.gmra.mxu1 %v8223_v49  ;;  %7226 = vmatmul.msk.bf16.gmra.mxu3 %vm930_vm1, %v8189_v40 }
 0x46e   :  { %v2442_v42 = vpop.f32.mrf.mxu3 }
 0x46f   :  { %v2105_v14 = vpop.f32.mrf.mxu2 }
 0x470   :  { %v2435_v30 = vadd.f32 %v2434_v25, %v2105_v14  ;;  %v1786_v36 = vpop.f32.mrf.mxu1 }
 0x471   :  { %v10002_v37 = vpop.f32.mrf.mxu0 }
 0x472   :  { %v4253_v28 = vmax.f32 %v2435_v30, 0.0 }
 0x474   :  { %v10004_v13 = vpack.c.bf16 %v4253_v28, %v4249_v57  ;;  %v12350_v28 = vld [vmem:[#allocation7_spill] sm:$0xff] }
 0x475   :  { %3143 = vmatmul.bf16.gmra.mxu0 %v8201_v43  ;;  %7289 = vmatmul.msk.bf16.gmra.mxu2 %vm930_vm1, %v8167_v34 }
 0x476   :  { %v2444_v17 = vpop.f32.mrf.mxu3 }
 0x477   :  { %v2108_v8 = vpop.f32.mrf.mxu2 }
 0x478   :  { %v2438_v56 = vadd.f32 %v2437_v26, %v2108_v8  ;;  %v1789_v1 = vpop.f32.mrf.mxu1 }
 0x479   :  { %v1452_v15 = vpop.f32.mrf.mxu0 }
 0x47a   :  { %v4257_v29 = vmax.f32 %v2438_v56, 0.0 }
 0x47b   :  { %2495 = vmatmul.bf16.gmra.mxu1 %v8245_v59  ;;  %7227 = vmatmul.msk.bf16.gmra.mxu3 %vm930_vm1, %v8211_v46 }
 0x47e   :  { %v2447_v53 = vpop.f32.mrf.mxu3 }
 0x47f   :  { %v2110_v20 = vpop.f32.mrf.mxu2 }
 0x480   :  { %v2440_v5 = vadd.f32 %v2439_v47, %v2110_v20  ;;  %v1791_v16 = vpop.f32.mrf.mxu1 }
 0x481   :  { %v1455_v24 = vpop.f32.mrf.mxu0 }
 0x482   :  { %v4261_v43 = vmax.f32 %v2440_v5, 0.0  ;;  %v1785_v20 = vadd.f32 %v9995_v52, %v1455_v24  ;;  %v1777_v52 = vadd.f32 %v9972_v32, %v9997_v27  ;;  %v4248_v27 = vmax.f32 %v9988_v38, 0.0 }
 0x484   :  { %v10012_v4 = vpack.c.bf16 %v4261_v43, %v4257_v29 }
 0x485   :  { %3148 = vmatmul.bf16.gmra.mxu0 %v8223_v49  ;;  %7290 = vmatmul.msk.bf16.gmra.mxu2 %vm930_vm1, %v8189_v40 }
 0x486   :  { %v2449_v34 = vpop.f32.mrf.mxu3 }
 0x487   :  { %v2113_v2 = vpop.f32.mrf.mxu2 }
 0x488   :  { %v2443_v50 = vadd.f32 %v2442_v42, %v2113_v2  ;;  %v2461_v63 = vpop.f32.mrf.mxu1 }
 0x489   :  { %v1457_v25 = vpop.f32.mrf.mxu0 }
 0x48a   :  { %v4265_v31 = vmax.f32 %v2443_v50, 0.0 }
 0x48b   :  { %2500 = vmatmul.bf16.gmra.mxu1 %v12348_v12  ;;  %7228 = vmatmul.msk.bf16.gmra.mxu3 %vm930_vm1, %v12349_v19 }
 0x48e   :  { %v2790_v33 = vpop.f32.mrf.mxu3 }
 0x48f   :  { %v2791_v54 = vadd.f32 %v2790_v33, %v2461_v63  ;;  %v2115_v10 = vpop.f32.mrf.mxu2  ;;  %v1780_v63 = vadd.f32 %v9979_v62, %v10002_v37  ;;  %v4264_v33 = vmax.f32 %v1785_v20, 0.0 }
 0x490   :  { %v2445_v39 = vadd.f32 %v2444_v17, %v2115_v10  ;;  %v2463_v26 = vpop.f32.mrf.mxu1  ;;  %v12351_v17 = vld [vmem:[#allocation4_spill] sm:$0xff] }
 0x491   :  { %v3770_v45 = vmax.f32 %v2791_v54, 0.0 }
 0x492   :  { %v4269_v49 = vmax.f32 %v2445_v39, 0.0  ;;  %v1460_v11 = vpop.f32.mrf.mxu0 }
 0x493   :  { %v1790_v18 = vadd.f32 %v1789_v1, %v1460_v11  ;;  %v1782_v1 = vadd.f32 %v9986_v21, %v1452_v15  ;;  %v4256_v21 = vmax.f32 %v1780_v63, 0.0 }
 0x494   :  { %v10020_v41 = vpack.c.bf16 %v4269_v49, %v4265_v31 }
 0x495   :  { %3153 = vmatmul.bf16.gmra.mxu0 %v8245_v59  ;;  %7291 = vmatmul.msk.bf16.gmra.mxu2 %vm930_vm1, %v8211_v46  ;;  %v1787_v59 = vadd.f32 %v1786_v36, %v1457_v25  ;;  %v4272_v56 = vmax.f32 %v1790_v18, 0.0  ;;  %v4260_v24 = vmax.f32 %v1782_v1, 0.0 }
 0x496   :  { %v2792_v40 = vpop.f32.mrf.mxu3 }
 0x497   :  { %v2793_v55 = vadd.f32 %v2792_v40, %v2463_v26  ;;  %v4524_v49 = vpack.c.bf16 %v4260_v24, %v4256_v21 }
 0x498   :  { %v2118_v47 = vpop.f32.mrf.mxu2  ;;  %v2466_v60 = vpop.f32.mrf.mxu1 }
 0x499   :  { %v3774_v42 = vmax.f32 %v2793_v55, 0.0  ;;  %v2448_v14 = vadd.f32 %v2447_v53, %v2118_v47  ;;  %v4268_v53 = vmax.f32 %v1787_v59, 0.0 }
 0x49a   :  { %v1462_v30 = vpop.f32.mrf.mxu0 }
 0x49b   :  { %v1792_v57 = vadd.f32 %v1791_v16, %v1462_v30  ;;  %2505 = vmatmul.bf16.gmra.mxu1 %v12350_v28  ;;  %7229 = vmatmul.msk.bf16.gmra.mxu3 %vm930_vm1, %v12351_v17  ;;  %v10028_v8 = vpack.c.bf16 %v3774_v42, %v3770_v45  ;;  %v4273_v36 = vmax.f32 %v2448_v14, 0.0  ;;  %v4528_v10 = vpack.c.bf16 %v4268_v53, %v4264_v33  ;;  %v12352_v45 = vld [vmem:[#allocation10_spill] sm:$0xff]  ;;  %v12355_v53 = vld [vmem:[#allocation13_spill] sm:$0xff] }
 0x49d   :  { %v4276_v46 = vmax.f32 %v1792_v57, 0.0 }
 0x49e   :  { %v2795_v5 = vpop.f32.mrf.mxu3 }
 0x49f   :  { %v4532_v29 = vpack.c.bf16 %v4276_v46, %v4272_v56  ;;  %v2796_v43 = vadd.f32 %v2795_v5, %v2466_v60 }
 0x4a0   :  { %v2120_v2 = vpop.f32.mrf.mxu2  ;;  %v2468_v16 = vpop.f32.mrf.mxu1 }
 0x4a1   :  { %v2450_v50 = vadd.f32 %v2449_v34, %v2120_v2  ;;  %4884 = vmatpush.bf16.msrb.mxu2 %v4532_v29  ;;  %v3778_v62 = vmax.f32 %v2796_v43, 0.0  ;;  %v4252_v34 = vmax.f32 %v1777_v52, 0.0 }
 0x4a2   :  { %v3119_v54 = vpop.f32.mrf.mxu0 }
 0x4a3   :  { %v4277_v25 = vmax.f32 %v2450_v50, 0.0  ;;  %v4520_v55 = vpack.c.bf16 %v4252_v34, %v4248_v27  ;;  %v12359_v34 = vld [vmem:[#allocation12_spill] sm:$0xff] }
 0x4a5   :  { %v10036_v39 = vpack.c.bf16 %v4277_v25, %v4273_v36  ;;  %3158 = vmatmul.bf16.gmra.mxu0 %v12348_v12  ;;  %7292 = vmatmul.msk.bf16.gmra.mxu2 %vm930_vm1, %v12349_v19  ;;  %v12353_v12 = vld [vmem:[#allocation6_spill] sm:$0xff] }
 0x4a6   :  { %4885 = vmatpush.bf16.msrb.mxu2 %v4528_v10  ;;  %v2797_v15 = vpop.f32.mrf.mxu3 }
 0x4a7   :  { %v2798_v37 = vadd.f32 %v2797_v15, %v2468_v16 }
 0x4a8   :  { %v3448_v26 = vpop.f32.mrf.mxu2  ;;  %v2471_v31 = vpop.f32.mrf.mxu1 }
 0x4a9   :  { %v3782_v11 = vmax.f32 %v2798_v37, 0.0  ;;  %v3449_v32 = vadd.f32 %v3448_v26, %v3119_v54  ;;  %v12358_v37 = vld [vmem:[#allocation16_spill] sm:$0xff] }
 0x4aa   :  { %4886 = vmatpush.bf16.msrb.mxu2 %v4524_v49  ;;  %v3121_v40 = vpop.f32.mrf.mxu0 }
 0x4ab   :  { %2510 = vmatmul.bf16.gmra.mxu1 %v12352_v45  ;;  %7230 = vmatmul.msk.bf16.gmra.mxu3 %vm930_vm1, %v12353_v12  ;;  %v10045_v19 = vpack.c.bf16 %v3782_v11, %v3778_v62  ;;  %v3771_v38 = vmax.f32 %v3449_v32, 0.0 }
 0x4ae   :  { %4887 = vmatpush.bf16.msrb.mxu2 %v4520_v55  ;;  %v2800_v47 = vpop.f32.mrf.mxu3 }
 0x4af   :  { %v2801_v60 = vadd.f32 %v2800_v47, %v2471_v31 }
 0x4b0   :  { %v3450_v18 = vpop.f32.mrf.mxu2  ;;  %v2473_v42 = vpop.f32.mrf.mxu1 }
 0x4b1   :  { %v3451_v14 = vadd.f32 %v3450_v18, %v3121_v40  ;;  %v3786_v46 = vmax.f32 %v2801_v60, 0.0 }
 0x4b2   :  { %4888 = vmatpush.bf16.msrb.mxu2 %v9984_v23  ;;  %v3124_v30 = vpop.f32.mrf.mxu0 }
 0x4b3   :  { %v3775_v57 = vmax.f32 %v3451_v14, 0.0 }
 0x4b5   :  { %3163 = vmatmul.bf16.gmra.mxu0 %v12350_v28  ;;  %7293 = vmatmul.msk.bf16.gmra.mxu2 %vm930_vm1, %v12351_v17  ;;  %v10051_v59 = vpack.c.bf16 %v3775_v57, %v3771_v38  ;;  %v12356_v28 = vld [vmem:[#allocation9_spill] sm:$0xff] }
 0x4b6   :  { %4889 = vmatpush.bf16.msrb.mxu2 %v9970_v44  ;;  %v2802_v56 = vpop.f32.mrf.mxu3 }
 0x4b7   :  { %12354 = vst [vmem:[#allocation5_spill] sm:$0xff] %v10051_v59  ;;  %v2803_v20 = vadd.f32 %v2802_v56, %v2473_v42  ;;  %v12361_v56 = vld [vmem:[#allocation19_spill] sm:$0xff] }
 0x4b8   :  { %v3453_v5 = vpop.f32.mrf.mxu2  ;;  %v2476_v29 = vpop.f32.mrf.mxu1  ;;  %v12397_v59 = vld [vmem:[#allocation55_spill] sm:$0xff] }
 0x4b9   :  { %v3790_v43 = vmax.f32 %v2803_v20, 0.0  ;;  %v3454_v1 = vadd.f32 %v3453_v5, %v3124_v30 }
 0x4ba   :  { %4890 = vmatpush.bf16.msrb.mxu2 %v9959_v9  ;;  %v3126_v23 = vpop.f32.mrf.mxu0 }
 0x4bb   :  { %2515 = vmatmul.bf16.gmra.mxu1 %v12355_v53  ;;  %7231 = vmatmul.msk.bf16.gmra.mxu3 %vm930_vm1, %v12356_v28  ;;  %v10058_v17 = vpack.c.bf16 %v3790_v43, %v3786_v46  ;;  %v3779_v54 = vmax.f32 %v3454_v1, 0.0  ;;  %v12362_v46 = vld [vmem:[#allocation15_spill] sm:$0xff] }
 0x4be   :  { %4891 = vmatpush.bf16.msrb.mxu2 %v9945_v35  ;;  %v2805_v44 = vpop.f32.mrf.mxu3 }
 0x4bf   :  { %v2806_v2 = vadd.f32 %v2805_v44, %v2476_v29 }
 0x4c0   :  { %v3455_v16 = vpop.f32.mrf.mxu2  ;;  %v2478_v50 = vpop.f32.mrf.mxu1 }
 0x4c1   :  { %v3456_v63 = vadd.f32 %v3455_v16, %v3126_v23  ;;  %v3794_v52 = vmax.f32 %v2806_v2, 0.0 }
 0x4c2   :  { %v3129_v33 = vpop.f32.mrf.mxu0 }
 0x4c3   :  { %v3783_v36 = vmax.f32 %v3456_v63, 0.0 }
 0x4c5   :  { %3168 = vmatmul.bf16.gmra.mxu0 %v12352_v45  ;;  %7294 = vmatmul.msk.bf16.gmra.mxu2 %vm930_vm1, %v12353_v12  ;;  %v10064_v9 = vpack.c.bf16 %v3783_v36, %v3779_v54 }
 0x4c6   :  { %v2807_v25 = vpop.f32.mrf.mxu3 }
 0x4c7   :  { %12357 = vst [vmem:[#allocation3_spill] sm:$0xff] %v10064_v9  ;;  %v2808_v24 = vadd.f32 %v2807_v25, %v2478_v50  ;;  %v12401_v9 = vld [vmem:[#allocation58_spill] sm:$0xff] }
 0x4c8   :  { %v3458_v10 = vpop.f32.mrf.mxu2  ;;  %v2481_v35 = vpop.f32.mrf.mxu1 }
 0x4c9   :  { %v3798_v21 = vmax.f32 %v2808_v24, 0.0  ;;  %v3459_v15 = vadd.f32 %v3458_v10, %v3129_v33  ;;  %v12364_v24 = vld [vmem:[#allocation22_spill] sm:$0xff] }
 0x4ca   :  { %v3131_v62 = vpop.f32.mrf.mxu0  ;;  %v12365_v10 = vld [vmem:[#allocation18_spill] sm:$0xff] }
 0x4cb   :  { %2520 = vmatmul.bf16.gmra.mxu1 %v12358_v37  ;;  %7232 = vmatmul.msk.bf16.gmra.mxu3 %vm930_vm1, %v12359_v34  ;;  %v10069_v26 = vpack.c.bf16 %v3798_v21, %v3794_v52  ;;  %v3787_v45 = vmax.f32 %v3459_v15, 0.0 }
 0x4ce   :  { %v2810_v31 = vpop.f32.mrf.mxu3 }
 0x4cf   :  { %v2811_v49 = vadd.f32 %v2810_v31, %v2481_v35 }
 0x4d0   :  { %v3460_v11 = vpop.f32.mrf.mxu2  ;;  %v2483_v32 = vpop.f32.mrf.mxu1 }
 0x4d1   :  { %v3461_v27 = vadd.f32 %v3460_v11, %v3131_v62  ;;  %v3802_v60 = vmax.f32 %v2811_v49, 0.0 }
 0x4d2   :  { %v3134_v40 = vpop.f32.mrf.mxu0 }
 0x4d3   :  { %v3791_v12 = vmax.f32 %v3461_v27, 0.0 }
 0x4d5   :  { %3173 = vmatmul.bf16.gmra.mxu0 %v12355_v53  ;;  %7295 = vmatmul.msk.bf16.gmra.mxu2 %vm930_vm1, %v12356_v28  ;;  %v10074_v55 = vpack.c.bf16 %v3791_v12, %v3787_v45 }
 0x4d6   :  { %v2812_v47 = vpop.f32.mrf.mxu3 }
 0x4d7   :  { %12360 = vst [vmem:[#allocation7_spill] sm:$0xff] %v10074_v55  ;;  %v2813_v18 = vadd.f32 %v2812_v47, %v2483_v32  ;;  %v12405_v55 = vld [vmem:[#allocation61_spill] sm:$0xff] }
 0x4d8   :  { %v3463_v42 = vpop.f32.mrf.mxu2  ;;  %v2486_v14 = vpop.f32.mrf.mxu1 }
 0x4d9   :  { %v3806_v30 = vmax.f32 %v2813_v18, 0.0  ;;  %v3464_v38 = vadd.f32 %v3463_v42, %v3134_v40 }
 0x4da   :  { %v3136_v57 = vpop.f32.mrf.mxu0 }
 0x4db   :  { %2525 = vmatmul.bf16.gmra.mxu1 %v12361_v56  ;;  %7233 = vmatmul.msk.bf16.gmra.mxu3 %vm930_vm1, %v12362_v46  ;;  %v10079_v20 = vpack.c.bf16 %v3806_v30, %v3802_v60  ;;  %v3795_v28 = vmax.f32 %v3464_v38, 0.0  ;;  %v12368_v30 = vld [vmem:[#allocation21_spill] sm:$0xff] }
 0x4de   :  { %v2815_v5 = vpop.f32.mrf.mxu3 }
 0x4df   :  { %v2816_v29 = vadd.f32 %v2815_v5, %v2486_v14  ;;  %v12367_v14 = vld [vmem:[#allocation25_spill] sm:$0xff] }
 0x4e0   :  { %v3465_v43 = vpop.f32.mrf.mxu2  ;;  %v2488_v1 = vpop.f32.mrf.mxu1 }
 0x4e1   :  { %v3466_v23 = vadd.f32 %v3465_v43, %v3136_v57  ;;  %v3810_v50 = vmax.f32 %v2816_v29, 0.0 }
 0x4e2   :  { %v3139_v53 = vpop.f32.mrf.mxu0 }
 0x4e3   :  { %v3799_v44 = vmax.f32 %v3466_v23, 0.0 }
 0x4e5   :  { %3178 = vmatmul.bf16.gmra.mxu0 %v12358_v37  ;;  %7296 = vmatmul.msk.bf16.gmra.mxu2 %vm930_vm1, %v12359_v34  ;;  %v10084_v2 = vpack.c.bf16 %v3799_v44, %v3795_v28 }
 0x4e6   :  { %v2817_v16 = vpop.f32.mrf.mxu3 }
 0x4e7   :  { %12363 = vst [vmem:[#allocation4_spill] sm:$0xff] %v10084_v2  ;;  %v2818_v63 = vadd.f32 %v2817_v16, %v2488_v1  ;;  %v12413_v2 = vld [vmem:[#allocation67_spill] sm:$0xff] }
 0x4e8   :  { %v3468_v33 = vpop.f32.mrf.mxu2  ;;  %v2491_v54 = vpop.f32.mrf.mxu1 }
 0x4e9   :  { %v3814_v36 = vmax.f32 %v2818_v63, 0.0  ;;  %v3469_v25 = vadd.f32 %v3468_v33, %v3139_v53 }
 0x4ea   :  { %v3141_v52 = vpop.f32.mrf.mxu0 }
 0x4eb   :  { %2530 = vmatmul.bf16.gmra.mxu1 %v12364_v24  ;;  %7234 = vmatmul.msk.bf16.gmra.mxu3 %vm930_vm1, %v12365_v10  ;;  %v10089_v35 = vpack.c.bf16 %v3814_v36, %v3810_v50  ;;  %v3803_v49 = vmax.f32 %v3469_v25, 0.0 }
 0x4ee   :  { %v2820_v21 = vpop.f32.mrf.mxu3 }
 0x4ef   :  { %v2821_v15 = vadd.f32 %v2820_v21, %v2491_v54  ;;  %v12371_v21 = vld [vmem:[#allocation24_spill] sm:$0xff] }
 0x4f0   :  { %v3470_v62 = vpop.f32.mrf.mxu2  ;;  %v2493_v37 = vpop.f32.mrf.mxu1 }
 0x4f1   :  { %v3471_v34 = vadd.f32 %v3470_v62, %v3141_v52  ;;  %v3818_v40 = vmax.f32 %v2821_v15, 0.0  ;;  %v12370_v52 = vld [vmem:[#allocation28_spill] sm:$0xff] }
 0x4f2   :  { %v3144_v31 = vpop.f32.mrf.mxu0 }
 0x4f3   :  { %v3807_v11 = vmax.f32 %v3471_v34, 0.0 }
 0x4f5   :  { %3183 = vmatmul.bf16.gmra.mxu0 %v12361_v56  ;;  %7297 = vmatmul.msk.bf16.gmra.mxu2 %vm930_vm1, %v12362_v46  ;;  %v10094_v32 = vpack.c.bf16 %v3807_v11, %v3803_v49 }
 0x4f6   :  { %v2822_v27 = vpop.f32.mrf.mxu3 }
 0x4f7   :  { %12366 = vst [vmem:[#allocation10_spill] sm:$0xff] %v10094_v32  ;;  %v2823_v45 = vadd.f32 %v2822_v27, %v2493_v37  ;;  %v12420_v32 = vld [vmem:[#allocation73_spill] sm:$0xff] }
 0x4f8   :  { %v3473_v12 = vpop.f32.mrf.mxu2  ;;  %v2496_v47 = vpop.f32.mrf.mxu1 }
 0x4f9   :  { %v3822_v60 = vmax.f32 %v2823_v45, 0.0  ;;  %v3474_v18 = vadd.f32 %v3473_v12, %v3144_v31 }
 0x4fa   :  { %v3146_v42 = vpop.f32.mrf.mxu0 }
 0x4fb   :  { %2535 = vmatmul.bf16.gmra.mxu1 %v12367_v14  ;;  %7235 = vmatmul.msk.bf16.gmra.mxu3 %vm930_vm1, %v12368_v30  ;;  %v10099_v38 = vpack.c.bf16 %v3822_v60, %v3818_v40  ;;  %v3811_v1 = vmax.f32 %v3474_v18, 0.0 }
 0x4fe   :  { %v2825_v57 = vpop.f32.mrf.mxu3 }
 0x4ff   :  { %v2826_v56 = vadd.f32 %v2825_v57, %v2496_v47  ;;  %v12373_v57 = vld [vmem:[#allocation31_spill] sm:$0xff] }
 0x500   :  { %v3475_v46 = vpop.f32.mrf.mxu2  ;;  %v2498_v5 = vpop.f32.mrf.mxu1 }
 0x501   :  { %v3476_v29 = vadd.f32 %v3475_v46, %v3146_v42  ;;  %v3826_v44 = vmax.f32 %v2826_v56, 0.0  ;;  %v12374_v56 = vld [vmem:[#allocation27_spill] sm:$0xff] }
 0x502   :  { %v3149_v43 = vpop.f32.mrf.mxu0 }
 0x503   :  { %v3815_v23 = vmax.f32 %v3476_v29, 0.0 }
 0x505   :  { %3188 = vmatmul.bf16.gmra.mxu0 %v12364_v24  ;;  %7298 = vmatmul.msk.bf16.gmra.mxu2 %vm930_vm1, %v12365_v10  ;;  %v10104_v53 = vpack.c.bf16 %v3815_v23, %v3811_v1 }
 0x506   :  { %v2827_v28 = vpop.f32.mrf.mxu3 }
 0x507   :  { %12369 = vst [vmem:[#allocation6_spill] sm:$0xff] %v10104_v53  ;;  %v2828_v16 = vadd.f32 %v2827_v28, %v2498_v5  ;;  %v12426_v53 = vld [vmem:[#allocation79_spill] sm:$0xff] }
 0x508   :  { %v3478_v50 = vpop.f32.mrf.mxu2  ;;  %v2501_v63 = vpop.f32.mrf.mxu1 }
 0x509   :  { %v3830_v33 = vmax.f32 %v2828_v16, 0.0  ;;  %v3479_v54 = vadd.f32 %v3478_v50, %v3149_v43 }
 0x50a   :  { %v3151_v36 = vpop.f32.mrf.mxu0 }
 0x50b   :  { %v10106_v25 = vpack.c.bf16 %v3830_v33, %v3826_v44  ;;  %2540 = vmatmul.bf16.gmra.mxu1 %v12370_v52  ;;  %7236 = vmatmul.msk.bf16.gmra.mxu3 %vm930_vm1, %v12371_v21  ;;  %v3819_v31 = vmax.f32 %v3479_v54, 0.0 }
 0x50e   :  { %v2830_v24 = vpop.f32.mrf.mxu3 }
 0x50f   :  { %v2831_v15 = vadd.f32 %v2830_v24, %v2501_v63 }
 0x510   :  { %v3480_v10 = vpop.f32.mrf.mxu2  ;;  %v2503_v62 = vpop.f32.mrf.mxu1 }
 0x511   :  { %v3481_v37 = vadd.f32 %v3480_v10, %v3151_v36  ;;  %v3834_v40 = vmax.f32 %v2831_v15, 0.0  ;;  %v12376_v10 = vld [vmem:[#allocation34_spill] sm:$0xff] }
 0x512   :  { %v3154_v34 = vpop.f32.mrf.mxu0 }
 0x513   :  { %v3823_v49 = vmax.f32 %v3481_v37, 0.0 }
 0x515   :  { %3193 = vmatmul.bf16.gmra.mxu0 %v12367_v14  ;;  %7299 = vmatmul.msk.bf16.gmra.mxu2 %vm930_vm1, %v12368_v30  ;;  %v10114_v11 = vpack.c.bf16 %v3823_v49, %v3819_v31 }
 0x516   :  { %v2832_v27 = vpop.f32.mrf.mxu3 }
 0x517   :  { %12372 = vst [vmem:[#allocation13_spill] sm:$0xff] %v10114_v11  ;;  %v2833_v45 = vadd.f32 %v2832_v27, %v2503_v62  ;;  %v12377_v62 = vld [vmem:[#allocation30_spill] sm:$0xff]  ;;  %v12434_v11 = vld [vmem:[#allocation85_spill] sm:$0xff] }
 0x518   :  { %v3483_v12 = vpop.f32.mrf.mxu2  ;;  %v2506_v47 = vpop.f32.mrf.mxu1 }
 0x519   :  { %v3838_v60 = vmax.f32 %v2833_v45, 0.0  ;;  %v3484_v18 = vadd.f32 %v3483_v12, %v3154_v34 }
 0x51a   :  { %v3156_v42 = vpop.f32.mrf.mxu0 }
 0x51b   :  { %2545 = vmatmul.bf16.gmra.mxu1 %v12373_v57  ;;  %7237 = vmatmul.msk.bf16.gmra.mxu3 %vm930_vm1, %v12374_v56  ;;  %v10119_v46 = vpack.c.bf16 %v3838_v60, %v3834_v40  ;;  %v3827_v23 = vmax.f32 %v3484_v18, 0.0 }
 0x51e   :  { %v2835_v14 = vpop.f32.mrf.mxu3 }
 0x51f   :  { %v2836_v5 = vadd.f32 %v2835_v14, %v2506_v47 }
 0x520   :  { %v3485_v30 = vpop.f32.mrf.mxu2  ;;  %v2508_v29 = vpop.f32.mrf.mxu1 }
 0x521   :  { %v3486_v43 = vadd.f32 %v3485_v30, %v3156_v42  ;;  %v3842_v50 = vmax.f32 %v2836_v5, 0.0 }
 0x522   :  { %v3159_v1 = vpop.f32.mrf.mxu0 }
 0x523   :  { %v3831_v28 = vmax.f32 %v3486_v43, 0.0  ;;  %v12379_v43 = vld [vmem:[#allocation37_spill] sm:$0xff] }
 0x525   :  { %v10121_v44 = vpack.c.bf16 %v3831_v28, %v3827_v23  ;;  %3198 = vmatmul.bf16.gmra.mxu0 %v12370_v52  ;;  %7300 = vmatmul.msk.bf16.gmra.mxu2 %vm930_vm1, %v12371_v21 }
 0x526   :  { %v2837_v16 = vpop.f32.mrf.mxu3 }
 0x527   :  { %12375 = vst [vmem:[#allocation9_spill] sm:$0xff] %v10121_v44  ;;  %v2838_v63 = vadd.f32 %v2837_v16, %v2508_v29  ;;  %v12442_v44 = vld [vmem:[#allocation91_spill] sm:$0xff] }
 0x528   :  { %v3488_v33 = vpop.f32.mrf.mxu2  ;;  %v2511_v54 = vpop.f32.mrf.mxu1 }
 0x529   :  { %v3846_v36 = vmax.f32 %v2838_v63, 0.0  ;;  %v3489_v24 = vadd.f32 %v3488_v33, %v3159_v1  ;;  %v12380_v1 = vld [vmem:[#allocation33_spill] sm:$0xff] }
 0x52a   :  { %v3161_v15 = vpop.f32.mrf.mxu0 }
 0x52b   :  { %2550 = vmatmul.bf16.gmra.mxu1 %v12376_v10  ;;  %7238 = vmatmul.msk.bf16.gmra.mxu3 %vm930_vm1, %v12377_v62  ;;  %v10129_v37 = vpack.c.bf16 %v3846_v36, %v3842_v50  ;;  %v3835_v40 = vmax.f32 %v3489_v24, 0.0 }
 0x52e   :  { %v2840_v34 = vpop.f32.mrf.mxu3 }
 0x52f   :  { %v2841_v52 = vadd.f32 %v2840_v34, %v2511_v54 }
 0x530   :  { %v3490_v31 = vpop.f32.mrf.mxu2  ;;  %v2513_v49 = vpop.f32.mrf.mxu1 }
 0x531   :  { %v3491_v21 = vadd.f32 %v3490_v31, %v3161_v15  ;;  %v3850_v60 = vmax.f32 %v2841_v52, 0.0 }
 0x532   :  { %v3164_v27 = vpop.f32.mrf.mxu0 }
 0x533   :  { %v3839_v45 = vmax.f32 %v3491_v21, 0.0 }
 0x535   :  { %3203 = vmatmul.bf16.gmra.mxu0 %v12373_v57  ;;  %7301 = vmatmul.msk.bf16.gmra.mxu2 %vm930_vm1, %v12374_v56  ;;  %v10134_v12 = vpack.c.bf16 %v3839_v45, %v3835_v40  ;;  %v12382_v40 = vld [vmem:[#allocation40_spill] sm:$0xff] }
 0x536   :  { %v2842_v47 = vpop.f32.mrf.mxu3  ;;  %v12383_v45 = vld [vmem:[#allocation36_spill] sm:$0xff] }
 0x537   :  { %12378 = vst [vmem:[#allocation16_spill] sm:$0xff] %v10134_v12  ;;  %v2843_v18 = vadd.f32 %v2842_v47, %v2513_v49 }
 0x538   :  { %v3493_v42 = vpop.f32.mrf.mxu2  ;;  %v2516_v14 = vpop.f32.mrf.mxu1 }
 0x539   :  { %v3854_v5 = vmax.f32 %v2843_v18, 0.0  ;;  %v3494_v30 = vadd.f32 %v3493_v42, %v3164_v27 }
 0x53a   :  { %v3166_v29 = vpop.f32.mrf.mxu0 }
 0x53b   :  { %2555 = vmatmul.bf16.gmra.mxu1 %v12379_v43  ;;  %7239 = vmatmul.msk.bf16.gmra.mxu3 %vm930_vm1, %v12380_v1  ;;  %v10139_v23 = vpack.c.bf16 %v3854_v5, %v3850_v60  ;;  %v3843_v33 = vmax.f32 %v3494_v30, 0.0 }
 0x53e   :  { %v2845_v57 = vpop.f32.mrf.mxu3 }
 0x53f   :  { %v2846_v28 = vadd.f32 %v2845_v57, %v2516_v14 }
 0x540   :  { %v3495_v56 = vpop.f32.mrf.mxu2  ;;  %v2518_v16 = vpop.f32.mrf.mxu1 }
 0x541   :  { %v3496_v50 = vadd.f32 %v3495_v56, %v3166_v29  ;;  %v3858_v15 = vmax.f32 %v2846_v28, 0.0 }
 0x542   :  { %v3169_v63 = vpop.f32.mrf.mxu0 }
 0x543   :  { %v3847_v54 = vmax.f32 %v3496_v50, 0.0 }
 0x545   :  { %3208 = vmatmul.bf16.gmra.mxu0 %v12376_v10  ;;  %7302 = vmatmul.msk.bf16.gmra.mxu2 %vm930_vm1, %v12377_v62  ;;  %v10144_v36 = vpack.c.bf16 %v3847_v54, %v3843_v33 }
 0x546   :  { %v2847_v24 = vpop.f32.mrf.mxu3 }
 0x547   :  { %12381 = vst [vmem:[#allocation12_spill] sm:$0xff] %v10144_v36  ;;  %v2848_v34 = vadd.f32 %v2847_v24, %v2518_v16  ;;  %v12385_v24 = vld [vmem:[#allocation43_spill] sm:$0xff] }
 0x548   :  { %v3498_v52 = vpop.f32.mrf.mxu2  ;;  %v2521_v31 = vpop.f32.mrf.mxu1 }
 0x549   :  { %v3862_v49 = vmax.f32 %v2848_v34, 0.0  ;;  %v3499_v21 = vadd.f32 %v3498_v52, %v3169_v63 }
 0x54a   :  { %v3171_v27 = vpop.f32.mrf.mxu0 }
 0x54b   :  { %2560 = vmatmul.bf16.gmra.mxu1 %v12382_v40  ;;  %7240 = vmatmul.msk.bf16.gmra.mxu3 %vm930_vm1, %v12383_v45  ;;  %v10149_v47 = vpack.c.bf16 %v3862_v49, %v3858_v15  ;;  %v3851_v5 = vmax.f32 %v3499_v21, 0.0  ;;  %v12386_v15 = vld [vmem:[#allocation39_spill] sm:$0xff] }
 0x54e   :  { %v2850_v10 = vpop.f32.mrf.mxu3 }
 0x54f   :  { %v2851_v60 = vadd.f32 %v2850_v10, %v2521_v31 }
 0x550   :  { %v3500_v62 = vpop.f32.mrf.mxu2  ;;  %v2523_v18 = vpop.f32.mrf.mxu1 }
 0x551   :  { %v3501_v42 = vadd.f32 %v3500_v62, %v3171_v27  ;;  %v3866_v28 = vmax.f32 %v2851_v60, 0.0 }
 0x552   :  { %v3174_v14 = vpop.f32.mrf.mxu0 }
 0x553   :  { %v3855_v30 = vmax.f32 %v3501_v42, 0.0 }
 0x555   :  { %3213 = vmatmul.bf16.gmra.mxu0 %v12379_v43  ;;  %7303 = vmatmul.msk.bf16.gmra.mxu2 %vm930_vm1, %v12380_v1  ;;  %v10154_v29 = vpack.c.bf16 %v3855_v30, %v3851_v5 }
 0x556   :  { %v2852_v57 = vpop.f32.mrf.mxu3 }
 0x557   :  { %12384 = vst [vmem:[#allocation19_spill] sm:$0xff] %v10154_v29  ;;  %v2853_v56 = vadd.f32 %v2852_v57, %v2523_v18 }
 0x558   :  { %v3503_v16 = vpop.f32.mrf.mxu2  ;;  %v2526_v50 = vpop.f32.mrf.mxu1 }
 0x559   :  { %v3870_v63 = vmax.f32 %v2853_v56, 0.0  ;;  %v3504_v33 = vadd.f32 %v3503_v16, %v3174_v14  ;;  %v12388_v56 = vld [vmem:[#allocation46_spill] sm:$0xff] }
 0x55a   :  { %v3176_v54 = vpop.f32.mrf.mxu0  ;;  %v12389_v16 = vld [vmem:[#allocation42_spill] sm:$0xff] }
 0x55b   :  { %2565 = vmatmul.bf16.gmra.mxu1 %v12385_v24  ;;  %7241 = vmatmul.msk.bf16.gmra.mxu3 %vm930_vm1, %v12386_v15  ;;  %v10159_v34 = vpack.c.bf16 %v3870_v63, %v3866_v28  ;;  %v3859_v27 = vmax.f32 %v3504_v33, 0.0 }
 0x55e   :  { %v2855_v43 = vpop.f32.mrf.mxu3 }
 0x55f   :  { %v2856_v52 = vadd.f32 %v2855_v43, %v2526_v50 }
 0x560   :  { %v3505_v1 = vpop.f32.mrf.mxu2  ;;  %v2528_v31 = vpop.f32.mrf.mxu1 }
 0x561   :  { %v3506_v49 = vadd.f32 %v3505_v1, %v3176_v54  ;;  %v3874_v18 = vmax.f32 %v2856_v52, 0.0 }
 0x562   :  { %v3179_v21 = vpop.f32.mrf.mxu0 }
 0x563   :  { %v3863_v10 = vmax.f32 %v3506_v49, 0.0 }
 0x565   :  { %3218 = vmatmul.bf16.gmra.mxu0 %v12382_v40  ;;  %7304 = vmatmul.msk.bf16.gmra.mxu2 %vm930_vm1, %v12383_v45  ;;  %v10164_v60 = vpack.c.bf16 %v3863_v10, %v3859_v27 }
 0x566   :  { %v2857_v62 = vpop.f32.mrf.mxu3 }
 0x567   :  { %12387 = vst [vmem:[#allocation15_spill] sm:$0xff] %v10164_v60  ;;  %v2858_v42 = vadd.f32 %v2857_v62, %v2528_v31  ;;  %v12409_v60 = vld [vmem:[#allocation64_spill] sm:$0xff] }
 0x568   :  { %v3508_v14 = vpop.f32.mrf.mxu2  ;;  %v2531_v5 = vpop.f32.mrf.mxu1 }
 0x569   :  { %v3878_v30 = vmax.f32 %v2858_v42, 0.0  ;;  %v3509_v57 = vadd.f32 %v3508_v14, %v3179_v21 }
 0x56a   :  { %v3181_v28 = vpop.f32.mrf.mxu0 }
 0x56b   :  { %2570 = vmatmul.bf16.gmra.mxu1 %v12388_v56  ;;  %7242 = vmatmul.msk.bf16.gmra.mxu3 %vm930_vm1, %v12389_v16  ;;  %v10169_v50 = vpack.c.bf16 %v3878_v30, %v3874_v18  ;;  %v3867_v52 = vmax.f32 %v3509_v57, 0.0  ;;  %v12392_v30 = vld [vmem:[#allocation45_spill] sm:$0xff] }
 0x56e   :  { %v2860_v40 = vpop.f32.mrf.mxu3 }
 0x56f   :  { %v2861_v63 = vadd.f32 %v2860_v40, %v2531_v5  ;;  %v12391_v5 = vld [vmem:[#allocation49_spill] sm:$0xff] }
 0x570   :  { %v3510_v45 = vpop.f32.mrf.mxu2  ;;  %v2533_v33 = vpop.f32.mrf.mxu1 }
 0x571   :  { %v3511_v54 = vadd.f32 %v3510_v45, %v3181_v28  ;;  %v3882_v21 = vmax.f32 %v2861_v63, 0.0 }
 0x572   :  { %v3184_v43 = vpop.f32.mrf.mxu0 }
 0x573   :  { %v3871_v1 = vmax.f32 %v3511_v54, 0.0 }
 0x575   :  { %3223 = vmatmul.bf16.gmra.mxu0 %v12385_v24  ;;  %7305 = vmatmul.msk.bf16.gmra.mxu2 %vm930_vm1, %v12386_v15  ;;  %v10174_v31 = vpack.c.bf16 %v3871_v1, %v3867_v52 }
 0x576   :  { %v2862_v49 = vpop.f32.mrf.mxu3 }
 0x577   :  { %12390 = vst [vmem:[#allocation22_spill] sm:$0xff] %v10174_v31  ;;  %v2863_v27 = vadd.f32 %v2862_v49, %v2533_v33  ;;  %v12417_v31 = vld [vmem:[#allocation70_spill] sm:$0xff] }
 0x578   :  { %v3513_v10 = vpop.f32.mrf.mxu2  ;;  %v2536_v62 = vpop.f32.mrf.mxu1 }
 0x579   :  { %v3886_v18 = vmax.f32 %v2863_v27, 0.0  ;;  %v3514_v42 = vadd.f32 %v3513_v10, %v3184_v43 }
 0x57a   :  { %v3186_v14 = vpop.f32.mrf.mxu0 }
 0x57b   :  { %2575 = vmatmul.bf16.gmra.mxu1 %v12391_v5  ;;  %7243 = vmatmul.msk.bf16.gmra.mxu3 %vm930_vm1, %v12392_v30  ;;  %v10179_v57 = vpack.c.bf16 %v3886_v18, %v3882_v21  ;;  %v3875_v63 = vmax.f32 %v3514_v42, 0.0  ;;  %v12395_v42 = vld [vmem:[#allocation48_spill] sm:$0xff] }
 0x57e   :  { %v2865_v24 = vpop.f32.mrf.mxu3 }
 0x57f   :  { %v2866_v28 = vadd.f32 %v2865_v24, %v2536_v62 }
 0x580   :  { %v3515_v15 = vpop.f32.mrf.mxu2  ;;  %v2538_v40 = vpop.f32.mrf.mxu1 }
 0x581   :  { %v3516_v45 = vadd.f32 %v3515_v15, %v3186_v14  ;;  %v3890_v1 = vmax.f32 %v2866_v28, 0.0  ;;  %v12394_v14 = vld [vmem:[#allocation52_spill] sm:$0xff] }
 0x582   :  { %v3189_v54 = vpop.f32.mrf.mxu0 }
 0x583   :  { %v3879_v33 = vmax.f32 %v3516_v45, 0.0 }
 0x585   :  { %3228 = vmatmul.bf16.gmra.mxu0 %v12388_v56  ;;  %7306 = vmatmul.msk.bf16.gmra.mxu2 %vm930_vm1, %v12389_v16  ;;  %v10184_v43 = vpack.c.bf16 %v3879_v33, %v3875_v63 }
 0x586   :  { %v2867_v52 = vpop.f32.mrf.mxu3 }
 0x587   :  { %12393 = vst [vmem:[#allocation18_spill] sm:$0xff] %v10184_v43  ;;  %v2868_v49 = vadd.f32 %v2867_v52, %v2538_v40 }
 0x588   :  { %v3518_v21 = vpop.f32.mrf.mxu2  ;;  %v2541_v27 = vpop.f32.mrf.mxu1 }
 0x589   :  { %v3894_v10 = vmax.f32 %v2868_v49, 0.0  ;;  %v3519_v62 = vadd.f32 %v3518_v21, %v3189_v54 }
 0x58a   :  { %v3191_v18 = vpop.f32.mrf.mxu0 }
 0x58b   :  { %v10186_v24 = vpack.c.bf16 %v3894_v10, %v3890_v1  ;;  %2580 = vmatmul.bf16.gmra.mxu1 %v12394_v14  ;;  %7244 = vmatmul.msk.bf16.gmra.mxu3 %vm930_vm1, %v12395_v42  ;;  %v3883_v28 = vmax.f32 %v3519_v62, 0.0 }
 0x58e   :  { %v2870_v56 = vpop.f32.mrf.mxu3 }
 0x58f   :  { %v2871_v15 = vadd.f32 %v2870_v56, %v2541_v27 }
 0x590   :  { %v3520_v16 = vpop.f32.mrf.mxu2  ;;  %v2543_v45 = vpop.f32.mrf.mxu1 }
 0x591   :  { %v3521_v63 = vadd.f32 %v3520_v16, %v3191_v18  ;;  %v3898_v1 = vmax.f32 %v2871_v15, 0.0  ;;  %v12398_v18 = vld [vmem:[#allocation51_spill] sm:$0xff] }
 0x592   :  { %v3194_v33 = vpop.f32.mrf.mxu0 }
 0x593   :  { %v3887_v40 = vmax.f32 %v3521_v63, 0.0 }
 0x595   :  { %3233 = vmatmul.bf16.gmra.mxu0 %v12391_v5  ;;  %7307 = vmatmul.msk.bf16.gmra.mxu2 %vm930_vm1, %v12392_v30  ;;  %v10194_v54 = vpack.c.bf16 %v3887_v40, %v3883_v28 }
 0x596   :  { %v2872_v52 = vpop.f32.mrf.mxu3 }
 0x597   :  { %12396 = vst [vmem:[#allocation25_spill] sm:$0xff] %v10194_v54  ;;  %v2873_v49 = vadd.f32 %v2872_v52, %v2543_v45  ;;  %v12430_v54 = vld [vmem:[#allocation82_spill] sm:$0xff] }
 0x598   :  { %v3523_v21 = vpop.f32.mrf.mxu2  ;;  %v2546_v10 = vpop.f32.mrf.mxu1 }
 0x599   :  { %v3902_v12 = vmax.f32 %v2873_v49, 0.0  ;;  %v3524_v27 = vadd.f32 %v3523_v21, %v3194_v33 }
 0x59a   :  { %v3196_v56 = vpop.f32.mrf.mxu0 }
 0x59b   :  { %2585 = vmatmul.bf16.gmra.mxu1 %v12397_v59  ;;  %7245 = vmatmul.msk.bf16.gmra.mxu3 %vm930_vm1, %v12398_v18  ;;  %v10199_v62 = vpack.c.bf16 %v3902_v12, %v3898_v1  ;;  %v3891_v15 = vmax.f32 %v3524_v27, 0.0 }
 0x59d   :  { %12399 = vst [vmem:[#allocation21_spill] sm:$0xff] %v10199_v62  ;;  %v12449_v62 = vld [vmem:[#allocation97_spill] sm:$0xff] }
 0x59e   :  { %v2875_v5 = vpop.f32.mrf.mxu3 }
 0x59f   :  { %v2876_v16 = vadd.f32 %v2875_v5, %v2546_v10 }
 0x5a0   :  { %v3525_v30 = vpop.f32.mrf.mxu2  ;;  %v2548_v63 = vpop.f32.mrf.mxu1 }
 0x5a1   :  { %v3526_v28 = vadd.f32 %v3525_v30, %v3196_v56  ;;  %v3906_v49 = vmax.f32 %v2876_v16, 0.0  ;;  %v12402_v56 = vld [vmem:[#allocation54_spill] sm:$0xff] }
 0x5a2   :  { %v3199_v40 = vpop.f32.mrf.mxu0 }
 0x5a3   :  { %v3895_v45 = vmax.f32 %v3526_v28, 0.0 }
 0x5a5   :  { %v10201_v52 = vpack.c.bf16 %v3895_v45, %v3891_v15  ;;  %3238 = vmatmul.bf16.gmra.mxu0 %v12394_v14  ;;  %7308 = vmatmul.msk.bf16.gmra.mxu2 %vm930_vm1, %v12395_v42 }
 0x5a6   :  { %v2877_v33 = vpop.f32.mrf.mxu3 }
 0x5a7   :  { %12400 = vst [vmem:[#allocation28_spill] sm:$0xff] %v10201_v52  ;;  %v2878_v21 = vadd.f32 %v2877_v33, %v2548_v63  ;;  %v12438_v52 = vld [vmem:[#allocation88_spill] sm:$0xff] }
 0x5a8   :  { %v3528_v12 = vpop.f32.mrf.mxu2  ;;  %v2551_v1 = vpop.f32.mrf.mxu1 }
 0x5a9   :  { %v3910_v36 = vmax.f32 %v2878_v21, 0.0  ;;  %v3529_v10 = vadd.f32 %v3528_v12, %v3199_v40 }
 0x5aa   :  { %v3201_v5 = vpop.f32.mrf.mxu0 }
 0x5ab   :  { %2590 = vmatmul.bf16.gmra.mxu1 %v12401_v9  ;;  %7246 = vmatmul.msk.bf16.gmra.mxu3 %vm930_vm1, %v12402_v56  ;;  %v10209_v27 = vpack.c.bf16 %v3910_v36, %v3906_v49  ;;  %v3899_v16 = vmax.f32 %v3529_v10, 0.0 }
 0x5ad   :  { %12403 = vst [vmem:[#allocation24_spill] sm:$0xff] %v10209_v27  ;;  %v12455_v27 = vld [vmem:[#allocation103_spill] sm:$0xff] }
 0x5ae   :  { %v2880_v30 = vpop.f32.mrf.mxu3 }
 0x5af   :  { %v2881_v14 = vadd.f32 %v2880_v30, %v2551_v1 }
 0x5b0   :  { %v3530_v28 = vpop.f32.mrf.mxu2  ;;  %v2553_v15 = vpop.f32.mrf.mxu1 }
 0x5b1   :  { %v3531_v42 = vadd.f32 %v3530_v28, %v3201_v5  ;;  %v3914_v21 = vmax.f32 %v2881_v14, 0.0  ;;  %v12406_v5 = vld [vmem:[#allocation57_spill] sm:$0xff] }
 0x5b2   :  { %v3204_v45 = vpop.f32.mrf.mxu0 }
 0x5b3   :  { %v3903_v63 = vmax.f32 %v3531_v42, 0.0 }
 0x5b5   :  { %3243 = vmatmul.bf16.gmra.mxu0 %v12397_v59  ;;  %7309 = vmatmul.msk.bf16.gmra.mxu2 %vm930_vm1, %v12398_v18  ;;  %v10214_v40 = vpack.c.bf16 %v3903_v63, %v3899_v16 }
 0x5b6   :  { %v2882_v33 = vpop.f32.mrf.mxu3 }
 0x5b7   :  { %12404 = vst [vmem:[#allocation31_spill] sm:$0xff] %v10214_v40  ;;  %v2883_v12 = vadd.f32 %v2882_v33, %v2553_v15 }
 0x5b8   :  { %v3533_v36 = vpop.f32.mrf.mxu2  ;;  %v2556_v49 = vpop.f32.mrf.mxu1 }
 0x5b9   :  { %v3918_v29 = vmax.f32 %v2883_v12, 0.0  ;;  %v3534_v1 = vadd.f32 %v3533_v36, %v3204_v45 }
 0x5ba   :  { %v3206_v30 = vpop.f32.mrf.mxu0 }
 0x5bb   :  { %2595 = vmatmul.bf16.gmra.mxu1 %v12405_v55  ;;  %7247 = vmatmul.msk.bf16.gmra.mxu3 %vm930_vm1, %v12406_v5  ;;  %v10219_v10 = vpack.c.bf16 %v3918_v29, %v3914_v21  ;;  %v3907_v14 = vmax.f32 %v3534_v1, 0.0 }
 0x5bd   :  { %12407 = vst [vmem:[#allocation27_spill] sm:$0xff] %v10219_v10 }
 0x5be   :  { %v2885_v59 = vpop.f32.mrf.mxu3 }
 0x5bf   :  { %v2886_v28 = vadd.f32 %v2885_v59, %v2556_v49 }
 0x5c0   :  { %v3535_v18 = vpop.f32.mrf.mxu2  ;;  %v2558_v42 = vpop.f32.mrf.mxu1 }
 0x5c1   :  { %v3536_v16 = vadd.f32 %v3535_v18, %v3206_v30  ;;  %v3922_v12 = vmax.f32 %v2886_v28, 0.0  ;;  %v12410_v30 = vld [vmem:[#allocation60_spill] sm:$0xff] }
 0x5c2   :  { %v3209_v63 = vpop.f32.mrf.mxu0 }
 0x5c3   :  { %v3911_v15 = vmax.f32 %v3536_v16, 0.0 }
 0x5c5   :  { %3248 = vmatmul.bf16.gmra.mxu0 %v12401_v9  ;;  %7310 = vmatmul.msk.bf16.gmra.mxu2 %vm930_vm1, %v12402_v56  ;;  %v10224_v45 = vpack.c.bf16 %v3911_v15, %v3907_v14 }
 0x5c6   :  { %v2887_v33 = vpop.f32.mrf.mxu3 }
 0x5c7   :  { %12408 = vst [vmem:[#allocation34_spill] sm:$0xff] %v10224_v45  ;;  %v2888_v36 = vadd.f32 %v2887_v33, %v2558_v42 }
 0x5c8   :  { %v3538_v29 = vpop.f32.mrf.mxu2  ;;  %v2561_v21 = vpop.f32.mrf.mxu1 }
 0x5c9   :  { %v3926_v40 = vmax.f32 %v2888_v36, 0.0  ;;  %v3539_v49 = vadd.f32 %v3538_v29, %v3209_v63 }
 0x5ca   :  { %v3211_v59 = vpop.f32.mrf.mxu0 }
 0x5cb   :  { %2600 = vmatmul.bf16.gmra.mxu1 %v12409_v60  ;;  %7248 = vmatmul.msk.bf16.gmra.mxu3 %vm930_vm1, %v12410_v30  ;;  %v10229_v1 = vpack.c.bf16 %v3926_v40, %v3922_v12  ;;  %v3915_v28 = vmax.f32 %v3539_v49, 0.0 }
 0x5cd   :  { %12411 = vst [vmem:[#allocation30_spill] sm:$0xff] %v10229_v1 }
 0x5ce   :  { %v2890_v9 = vpop.f32.mrf.mxu3 }
 0x5cf   :  { %v2891_v18 = vadd.f32 %v2890_v9, %v2561_v21 }
 0x5d0   :  { %v3540_v56 = vpop.f32.mrf.mxu2  ;;  %v2563_v16 = vpop.f32.mrf.mxu1 }
 0x5d1   :  { %v3541_v14 = vadd.f32 %v3540_v56, %v3211_v59  ;;  %v3930_v36 = vmax.f32 %v2891_v18, 0.0  ;;  %v12414_v59 = vld [vmem:[#allocation63_spill] sm:$0xff] }
 0x5d2   :  { %v3214_v15 = vpop.f32.mrf.mxu0 }
 0x5d3   :  { %v3919_v42 = vmax.f32 %v3541_v14, 0.0 }
 0x5d5   :  { %3253 = vmatmul.bf16.gmra.mxu0 %v12405_v55  ;;  %7311 = vmatmul.msk.bf16.gmra.mxu2 %vm930_vm1, %v12406_v5  ;;  %v10234_v63 = vpack.c.bf16 %v3919_v42, %v3915_v28 }
 0x5d6   :  { %v2892_v33 = vpop.f32.mrf.mxu3 }
 0x5d7   :  { %12412 = vst [vmem:[#allocation37_spill] sm:$0xff] %v10234_v63  ;;  %v2893_v29 = vadd.f32 %v2892_v33, %v2563_v16 }
 0x5d8   :  { %v3543_v40 = vpop.f32.mrf.mxu2  ;;  %v2566_v12 = vpop.f32.mrf.mxu1 }
 0x5d9   :  { %v3934_v45 = vmax.f32 %v2893_v29, 0.0  ;;  %v3544_v21 = vadd.f32 %v3543_v40, %v3214_v15 }
 0x5da   :  { %v3216_v9 = vpop.f32.mrf.mxu0 }
 0x5db   :  { %2605 = vmatmul.bf16.gmra.mxu1 %v12413_v2  ;;  %7249 = vmatmul.msk.bf16.gmra.mxu3 %vm930_vm1, %v12414_v59  ;;  %v10239_v49 = vpack.c.bf16 %v3934_v45, %v3930_v36  ;;  %v3923_v18 = vmax.f32 %v3544_v21, 0.0 }
 0x5dd   :  { %12415 = vst [vmem:[#allocation33_spill] sm:$0xff] %v10239_v49 }
 0x5de   :  { %v2895_v55 = vpop.f32.mrf.mxu3 }
 0x5df   :  { %v2896_v56 = vadd.f32 %v2895_v55, %v2566_v12 }
 0x5e0   :  { %v3545_v5 = vpop.f32.mrf.mxu2  ;;  %v2568_v14 = vpop.f32.mrf.mxu1 }
 0x5e1   :  { %v3546_v28 = vadd.f32 %v3545_v5, %v3216_v9  ;;  %v3938_v29 = vmax.f32 %v2896_v56, 0.0  ;;  %v12418_v9 = vld [vmem:[#allocation66_spill] sm:$0xff] }
 0x5e2   :  { %v3219_v42 = vpop.f32.mrf.mxu0 }
 0x5e3   :  { %v3927_v16 = vmax.f32 %v3546_v28, 0.0 }
 0x5e5   :  { %3258 = vmatmul.bf16.gmra.mxu0 %v12409_v60  ;;  %7312 = vmatmul.msk.bf16.gmra.mxu2 %vm930_vm1, %v12410_v30  ;;  %v10244_v15 = vpack.c.bf16 %v3927_v16, %v3923_v18 }
 0x5e6   :  { %v2897_v33 = vpop.f32.mrf.mxu3 }
 0x5e7   :  { %12416 = vst [vmem:[#allocation40_spill] sm:$0xff] %v10244_v15  ;;  %v2898_v40 = vadd.f32 %v2897_v33, %v2568_v14 }
 0x5e8   :  { %v3548_v45 = vpop.f32.mrf.mxu2  ;;  %v2571_v36 = vpop.f32.mrf.mxu1 }
 0x5e9   :  { %v3942_v63 = vmax.f32 %v2898_v40, 0.0  ;;  %v3549_v12 = vadd.f32 %v3548_v45, %v3219_v42 }
 0x5ea   :  { %v3221_v55 = vpop.f32.mrf.mxu0 }
 0x5eb   :  { %2610 = vmatmul.bf16.gmra.mxu1 %v12417_v31  ;;  %7250 = vmatmul.msk.bf16.gmra.mxu3 %vm930_vm1, %v12418_v9  ;;  %v10249_v21 = vpack.c.bf16 %v3942_v63, %v3938_v29  ;;  %v3931_v56 = vmax.f32 %v3549_v12, 0.0 }
 0x5ee   :  { %v2900_v60 = vpop.f32.mrf.mxu3 }
 0x5ef   :  { %v2901_v5 = vadd.f32 %v2900_v60, %v2571_v36 }
 0x5f0   :  { %v3550_v30 = vpop.f32.mrf.mxu2  ;;  %v2573_v28 = vpop.f32.mrf.mxu1 }
 0x5f1   :  { %v3551_v18 = vadd.f32 %v3550_v30, %v3221_v55  ;;  %v3946_v40 = vmax.f32 %v2901_v5, 0.0  ;;  %v12421_v55 = vld [vmem:[#allocation69_spill] sm:$0xff] }
 0x5f2   :  { %v3224_v16 = vpop.f32.mrf.mxu0 }
 0x5f3   :  { %v3935_v14 = vmax.f32 %v3551_v18, 0.0 }
 0x5f5   :  { %3263 = vmatmul.bf16.gmra.mxu0 %v12413_v2  ;;  %7313 = vmatmul.msk.bf16.gmra.mxu2 %vm930_vm1, %v12414_v59  ;;  %v10254_v42 = vpack.c.bf16 %v3935_v14, %v3931_v56 }
 0x5f6   :  { %v2902_v33 = vpop.f32.mrf.mxu3 }
 0x5f7   :  { %12419 = vst [vmem:[#allocation36_spill] sm:$0xff] %v10254_v42  ;;  %v2903_v45 = vadd.f32 %v2902_v33, %v2573_v28 }
 0x5f8   :  { %v3553_v63 = vpop.f32.mrf.mxu2  ;;  %v2576_v29 = vpop.f32.mrf.mxu1 }
 0x5f9   :  { %v3950_v15 = vmax.f32 %v2903_v45, 0.0  ;;  %v3554_v36 = vadd.f32 %v3553_v63, %v3224_v16 }
 0x5fa   :  { %v3226_v60 = vpop.f32.mrf.mxu0 }
 0x5fb   :  { %2615 = vmatmul.bf16.gmra.mxu1 %v12420_v32  ;;  %7251 = vmatmul.msk.bf16.gmra.mxu3 %vm930_vm1, %v12421_v55  ;;  %v10259_v12 = vpack.c.bf16 %v3950_v15, %v3946_v40  ;;  %v3939_v5 = vmax.f32 %v3554_v36, 0.0  ;;  %v12424_v36 = vld [vmem:[#allocation72_spill] sm:$0xff] }
 0x5fe   :  { %v2905_v2 = vpop.f32.mrf.mxu3 }
 0x5ff   :  { %v2906_v30 = vadd.f32 %v2905_v2, %v2576_v29 }
 0x600   :  { %v3555_v59 = vpop.f32.mrf.mxu2  ;;  %v2578_v18 = vpop.f32.mrf.mxu1 }
 0x601   :  { %v3556_v56 = vadd.f32 %v3555_v59, %v3226_v60  ;;  %v3954_v45 = vmax.f32 %v2906_v30, 0.0  ;;  %v12423_v60 = vld [vmem:[#allocation76_spill] sm:$0xff] }
 0x602   :  { %v3229_v14 = vpop.f32.mrf.mxu0 }
 0x603   :  { %v3943_v28 = vmax.f32 %v3556_v56, 0.0 }
 0x605   :  { %3268 = vmatmul.bf16.gmra.mxu0 %v12417_v31  ;;  %7314 = vmatmul.msk.bf16.gmra.mxu2 %vm930_vm1, %v12418_v9  ;;  %v10264_v16 = vpack.c.bf16 %v3943_v28, %v3939_v5 }
 0x606   :  { %v2907_v33 = vpop.f32.mrf.mxu3 }
 0x607   :  { %12422 = vst [vmem:[#allocation43_spill] sm:$0xff] %v10264_v16  ;;  %v2908_v63 = vadd.f32 %v2907_v33, %v2578_v18 }
 0x608   :  { %v3558_v15 = vpop.f32.mrf.mxu2  ;;  %v2581_v40 = vpop.f32.mrf.mxu1 }
 0x609   :  { %v3958_v42 = vmax.f32 %v2908_v63, 0.0  ;;  %v3559_v29 = vadd.f32 %v3558_v15, %v3229_v14 }
 0x60a   :  { %v3231_v2 = vpop.f32.mrf.mxu0 }
 0x60b   :  { %v10266_v43 = vpack.c.bf16 %v3958_v42, %v3954_v45  ;;  %2620 = vmatmul.bf16.gmra.mxu1 %v12423_v60  ;;  %7252 = vmatmul.msk.bf16.gmra.mxu3 %vm930_vm1, %v12424_v36  ;;  %v3947_v30 = vmax.f32 %v3559_v29, 0.0 }
 0x60e   :  { %v2910_v31 = vpop.f32.mrf.mxu3 }
 0x60f   :  { %v2911_v59 = vadd.f32 %v2910_v31, %v2581_v40 }
 0x610   :  { %v3560_v9 = vpop.f32.mrf.mxu2  ;;  %v2583_v56 = vpop.f32.mrf.mxu1 }
 0x611   :  { %v3561_v5 = vadd.f32 %v3560_v9, %v3231_v2  ;;  %v3962_v33 = vmax.f32 %v2911_v59, 0.0  ;;  %v12427_v2 = vld [vmem:[#allocation75_spill] sm:$0xff] }
 0x612   :  { %v3234_v28 = vpop.f32.mrf.mxu0 }
 0x613   :  { %v3951_v18 = vmax.f32 %v3561_v5, 0.0 }
 0x615   :  { %3273 = vmatmul.bf16.gmra.mxu0 %v12420_v32  ;;  %7315 = vmatmul.msk.bf16.gmra.mxu2 %vm930_vm1, %v12421_v55  ;;  %v10274_v42 = vpack.c.bf16 %v3951_v18, %v3947_v30 }
 0x616   :  { %v2912_v14 = vpop.f32.mrf.mxu3 }
 0x617   :  { %12425 = vst [vmem:[#allocation39_spill] sm:$0xff] %v10274_v42  ;;  %v2913_v45 = vadd.f32 %v2912_v14, %v2583_v56 }
 0x618   :  { %v3563_v63 = vpop.f32.mrf.mxu2  ;;  %v2586_v15 = vpop.f32.mrf.mxu1 }
 0x619   :  { %v3966_v16 = vmax.f32 %v2913_v45, 0.0  ;;  %v3564_v40 = vadd.f32 %v3563_v63, %v3234_v28 }
 0x61a   :  { %v3236_v31 = vpop.f32.mrf.mxu0 }
 0x61b   :  { %2625 = vmatmul.bf16.gmra.mxu1 %v12426_v53  ;;  %7253 = vmatmul.msk.bf16.gmra.mxu3 %vm930_vm1, %v12427_v2  ;;  %v10279_v29 = vpack.c.bf16 %v3966_v16, %v3962_v33  ;;  %v3955_v59 = vmax.f32 %v3564_v40, 0.0 }
 0x61d   :  { %12428 = vst [vmem:[#allocation46_spill] sm:$0xff] %v10279_v29  ;;  %v12446_v29 = vld [vmem:[#allocation94_spill] sm:$0xff] }
 0x61e   :  { %v2915_v32 = vpop.f32.mrf.mxu3 }
 0x61f   :  { %v2916_v9 = vadd.f32 %v2915_v32, %v2586_v15 }
 0x620   :  { %v3565_v55 = vpop.f32.mrf.mxu2  ;;  %v2588_v5 = vpop.f32.mrf.mxu1 }
 0x621   :  { %v3566_v30 = vadd.f32 %v3565_v55, %v3236_v31  ;;  %v3970_v45 = vmax.f32 %v2916_v9, 0.0  ;;  %v12431_v31 = vld [vmem:[#allocation78_spill] sm:$0xff] }
 0x622   :  { %v3239_v18 = vpop.f32.mrf.mxu0 }
 0x623   :  { %v3959_v56 = vmax.f32 %v3566_v30, 0.0 }
 0x625   :  { %v10281_v14 = vpack.c.bf16 %v3959_v56, %v3955_v59  ;;  %3278 = vmatmul.bf16.gmra.mxu0 %v12423_v60  ;;  %7316 = vmatmul.msk.bf16.gmra.mxu2 %vm930_vm1, %v12424_v36 }
 0x626   :  { %v2917_v28 = vpop.f32.mrf.mxu3 }
 0x627   :  { %12429 = vst [vmem:[#allocation42_spill] sm:$0xff] %v10281_v14  ;;  %v2918_v63 = vadd.f32 %v2917_v28, %v2588_v5 }
 0x628   :  { %v3568_v16 = vpop.f32.mrf.mxu2  ;;  %v2591_v33 = vpop.f32.mrf.mxu1 }
 0x629   :  { %v3974_v42 = vmax.f32 %v2918_v63, 0.0  ;;  %v3569_v15 = vadd.f32 %v3568_v16, %v3239_v18 }
 0x62a   :  { %v3241_v32 = vpop.f32.mrf.mxu0 }
 0x62b   :  { %2630 = vmatmul.bf16.gmra.mxu1 %v12430_v54  ;;  %7254 = vmatmul.msk.bf16.gmra.mxu3 %vm930_vm1, %v12431_v31  ;;  %v10289_v40 = vpack.c.bf16 %v3974_v42, %v3970_v45  ;;  %v3963_v9 = vmax.f32 %v3569_v15, 0.0 }
 0x62d   :  { %12432 = vst [vmem:[#allocation49_spill] sm:$0xff] %v10289_v40 }
 0x62e   :  { %v2920_v55 = vpop.f32.mrf.mxu3 }
 0x62f   :  { %v2921_v60 = vadd.f32 %v2920_v55, %v2591_v33 }
 0x630   :  { %v3570_v30 = vpop.f32.mrf.mxu2  ;;  %v2593_v59 = vpop.f32.mrf.mxu1 }
 0x631   :  { %v3571_v36 = vadd.f32 %v3570_v30, %v3241_v32  ;;  %v3978_v63 = vmax.f32 %v2921_v60, 0.0  ;;  %v12435_v32 = vld [vmem:[#allocation81_spill] sm:$0xff] }
 0x632   :  { %v3244_v56 = vpop.f32.mrf.mxu0 }
 0x633   :  { %v3967_v5 = vmax.f32 %v3571_v36, 0.0 }
 0x635   :  { %3283 = vmatmul.bf16.gmra.mxu0 %v12426_v53  ;;  %7317 = vmatmul.msk.bf16.gmra.mxu2 %vm930_vm1, %v12427_v2  ;;  %v10294_v18 = vpack.c.bf16 %v3967_v5, %v3963_v9 }
 0x636   :  { %v2922_v28 = vpop.f32.mrf.mxu3 }
 0x637   :  { %12433 = vst [vmem:[#allocation45_spill] sm:$0xff] %v10294_v18  ;;  %v2923_v16 = vadd.f32 %v2922_v28, %v2593_v59 }
 0x638   :  { %v3573_v42 = vpop.f32.mrf.mxu2  ;;  %v2596_v45 = vpop.f32.mrf.mxu1 }
 0x639   :  { %v3982_v14 = vmax.f32 %v2923_v16, 0.0  ;;  %v3574_v33 = vadd.f32 %v3573_v42, %v3244_v56 }
 0x63a   :  { %v3246_v55 = vpop.f32.mrf.mxu0 }
 0x63b   :  { %2635 = vmatmul.bf16.gmra.mxu1 %v12434_v11  ;;  %7255 = vmatmul.msk.bf16.gmra.mxu3 %vm930_vm1, %v12435_v32  ;;  %v10299_v15 = vpack.c.bf16 %v3982_v14, %v3978_v63  ;;  %v3971_v60 = vmax.f32 %v3574_v33, 0.0 }
 0x63d   :  { %12436 = vst [vmem:[#allocation52_spill] sm:$0xff] %v10299_v15 }
 0x63e   :  { %v2925_v53 = vpop.f32.mrf.mxu3 }
 0x63f   :  { %v2926_v30 = vadd.f32 %v2925_v53, %v2596_v45 }
 0x640   :  { %v3575_v2 = vpop.f32.mrf.mxu2  ;;  %v2598_v36 = vpop.f32.mrf.mxu1 }
 0x641   :  { %v3576_v9 = vadd.f32 %v3575_v2, %v3246_v55  ;;  %v3986_v16 = vmax.f32 %v2926_v30, 0.0  ;;  %v12439_v55 = vld [vmem:[#allocation84_spill] sm:$0xff] }
 0x642   :  { %v3249_v5 = vpop.f32.mrf.mxu0 }
 0x643   :  { %v3975_v59 = vmax.f32 %v3576_v9, 0.0 }
 0x645   :  { %3288 = vmatmul.bf16.gmra.mxu0 %v12430_v54  ;;  %7318 = vmatmul.msk.bf16.gmra.mxu2 %vm930_vm1, %v12431_v31  ;;  %v10304_v56 = vpack.c.bf16 %v3975_v59, %v3971_v60 }
 0x646   :  { %v2927_v28 = vpop.f32.mrf.mxu3 }
 0x647   :  { %12437 = vst [vmem:[#allocation48_spill] sm:$0xff] %v10304_v56  ;;  %v2928_v42 = vadd.f32 %v2927_v28, %v2598_v36 }
 0x648   :  { %v3578_v14 = vpop.f32.mrf.mxu2  ;;  %v2601_v63 = vpop.f32.mrf.mxu1 }
 0x649   :  { %v3990_v18 = vmax.f32 %v2928_v42, 0.0  ;;  %v3579_v45 = vadd.f32 %v3578_v14, %v3249_v5 }
 0x64a   :  { %v3251_v53 = vpop.f32.mrf.mxu0 }
 0x64b   :  { %2640 = vmatmul.bf16.gmra.mxu1 %v12438_v52  ;;  %7256 = vmatmul.msk.bf16.gmra.mxu3 %vm930_vm1, %v12439_v55  ;;  %v10309_v33 = vpack.c.bf16 %v3990_v18, %v3986_v16  ;;  %v3979_v30 = vmax.f32 %v3579_v45, 0.0 }
 0x64d   :  { %12440 = vst [vmem:[#allocation55_spill] sm:$0xff] %v10309_v33 }
 0x64e   :  { %v2930_v54 = vpop.f32.mrf.mxu3 }
 0x64f   :  { %v2931_v2 = vadd.f32 %v2930_v54, %v2601_v63 }
 0x650   :  { %v3580_v31 = vpop.f32.mrf.mxu2  ;;  %v2603_v9 = vpop.f32.mrf.mxu1 }
 0x651   :  { %v3581_v60 = vadd.f32 %v3580_v31, %v3251_v53  ;;  %v3994_v42 = vmax.f32 %v2931_v2, 0.0  ;;  %v12443_v53 = vld [vmem:[#allocation87_spill] sm:$0xff] }
 0x652   :  { %v3254_v59 = vpop.f32.mrf.mxu0 }
 0x653   :  { %v3983_v36 = vmax.f32 %v3581_v60, 0.0 }
 0x655   :  { %3293 = vmatmul.bf16.gmra.mxu0 %v12434_v11  ;;  %7319 = vmatmul.msk.bf16.gmra.mxu2 %vm930_vm1, %v12435_v32  ;;  %v10314_v5 = vpack.c.bf16 %v3983_v36, %v3979_v30 }
 0x656   :  { %v2932_v28 = vpop.f32.mrf.mxu3 }
 0x657   :  { %12441 = vst [vmem:[#allocation51_spill] sm:$0xff] %v10314_v5  ;;  %v2933_v14 = vadd.f32 %v2932_v28, %v2603_v9 }
 0x658   :  { %v3583_v18 = vpop.f32.mrf.mxu2  ;;  %v2606_v16 = vpop.f32.mrf.mxu1 }
 0x659   :  { %v3998_v56 = vmax.f32 %v2933_v14, 0.0  ;;  %v3584_v63 = vadd.f32 %v3583_v18, %v3254_v59 }
 0x65a   :  { %v3256_v54 = vpop.f32.mrf.mxu0 }
 0x65b   :  { %2645 = vmatmul.bf16.gmra.mxu1 %v12442_v44  ;;  %7257 = vmatmul.msk.bf16.gmra.mxu3 %vm930_vm1, %v12443_v53  ;;  %v10319_v45 = vpack.c.bf16 %v3998_v56, %v3994_v42  ;;  %v3987_v2 = vmax.f32 %v3584_v63, 0.0 }
 0x65d   :  { %12444 = vst [vmem:[#allocation58_spill] sm:$0xff] %v10319_v45 }
 0x65e   :  { %v2935_v11 = vpop.f32.mrf.mxu3 }
 0x65f   :  { %v2936_v31 = vadd.f32 %v2935_v11, %v2606_v16 }
 0x660   :  { %v3585_v32 = vpop.f32.mrf.mxu2  ;;  %v2608_v60 = vpop.f32.mrf.mxu1 }
 0x661   :  { %v3586_v30 = vadd.f32 %v3585_v32, %v3256_v54  ;;  %v4002_v14 = vmax.f32 %v2936_v31, 0.0  ;;  %v12447_v54 = vld [vmem:[#allocation90_spill] sm:$0xff] }
 0x662   :  { %v3259_v36 = vpop.f32.mrf.mxu0 }
 0x663   :  { %v3991_v9 = vmax.f32 %v3586_v30, 0.0 }
 0x665   :  { %3298 = vmatmul.bf16.gmra.mxu0 %v12438_v52  ;;  %7320 = vmatmul.msk.bf16.gmra.mxu2 %vm930_vm1, %v12439_v55  ;;  %v10324_v59 = vpack.c.bf16 %v3991_v9, %v3987_v2 }
 0x666   :  { %v2937_v28 = vpop.f32.mrf.mxu3 }
 0x667   :  { %12445 = vst [vmem:[#allocation54_spill] sm:$0xff] %v10324_v59  ;;  %v2938_v18 = vadd.f32 %v2937_v28, %v2608_v60 }
 0x668   :  { %v3588_v56 = vpop.f32.mrf.mxu2  ;;  %v2611_v42 = vpop.f32.mrf.mxu1 }
 0x669   :  { %v4006_v5 = vmax.f32 %v2938_v18, 0.0  ;;  %v3589_v16 = vadd.f32 %v3588_v56, %v3259_v36 }
 0x66a   :  { %v3261_v11 = vpop.f32.mrf.mxu0 }
 0x66b   :  { %2650 = vmatmul.bf16.gmra.mxu1 %v12446_v29  ;;  %7258 = vmatmul.msk.bf16.gmra.mxu3 %vm930_vm1, %v12447_v54  ;;  %v10329_v63 = vpack.c.bf16 %v4006_v5, %v4002_v14  ;;  %v3995_v31 = vmax.f32 %v3589_v16, 0.0 }
 0x66e   :  { %v2940_v52 = vpop.f32.mrf.mxu3 }
 0x66f   :  { %v2941_v32 = vadd.f32 %v2940_v52, %v2611_v42 }
 0x670   :  { %v3590_v55 = vpop.f32.mrf.mxu2  ;;  %v2613_v30 = vpop.f32.mrf.mxu1 }
 0x671   :  { %v3591_v2 = vadd.f32 %v3590_v55, %v3261_v11  ;;  %v4010_v18 = vmax.f32 %v2941_v32, 0.0  ;;  %v12450_v11 = vld [vmem:[#allocation93_spill] sm:$0xff] }
 0x672   :  { %v3264_v9 = vpop.f32.mrf.mxu0 }
 0x673   :  { %v3999_v60 = vmax.f32 %v3591_v2, 0.0 }
 0x675   :  { %3303 = vmatmul.bf16.gmra.mxu0 %v12442_v44  ;;  %7321 = vmatmul.msk.bf16.gmra.mxu2 %vm930_vm1, %v12443_v53  ;;  %v10334_v36 = vpack.c.bf16 %v3999_v60, %v3995_v31 }
 0x676   :  { %v2942_v28 = vpop.f32.mrf.mxu3 }
 0x677   :  { %12448 = vst [vmem:[#allocation61_spill] sm:$0xff] %v10334_v36  ;;  %v2943_v56 = vadd.f32 %v2942_v28, %v2613_v30 }
 0x678   :  { %v3593_v5 = vpop.f32.mrf.mxu2  ;;  %v2616_v14 = vpop.f32.mrf.mxu1 }
 0x679   :  { %v4014_v59 = vmax.f32 %v2943_v56, 0.0  ;;  %v3594_v42 = vadd.f32 %v3593_v5, %v3264_v9 }
 0x67a   :  { %v3266_v52 = vpop.f32.mrf.mxu0 }
 0x67b   :  { %2655 = vmatmul.bf16.gmra.mxu1 %v12449_v62  ;;  %7259 = vmatmul.msk.bf16.gmra.mxu3 %vm930_vm1, %v12450_v11  ;;  %v10339_v16 = vpack.c.bf16 %v4014_v59, %v4010_v18  ;;  %v4003_v32 = vmax.f32 %v3594_v42, 0.0  ;;  %v12453_v42 = vld [vmem:[#allocation96_spill] sm:$0xff] }
 0x67e   :  { %v2945_v44 = vpop.f32.mrf.mxu3 }
 0x67f   :  { %v2946_v55 = vadd.f32 %v2945_v44, %v2616_v14 }
 0x680   :  { %v3595_v53 = vpop.f32.mrf.mxu2  ;;  %v2618_v2 = vpop.f32.mrf.mxu1 }
 0x681   :  { %v3596_v31 = vadd.f32 %v3595_v53, %v3266_v52  ;;  %v4018_v56 = vmax.f32 %v2946_v55, 0.0  ;;  %v12452_v52 = vld [vmem:[#allocation100_spill] sm:$0xff] }
 0x682   :  { %v3269_v60 = vpop.f32.mrf.mxu0 }
 0x683   :  { %v4007_v30 = vmax.f32 %v3596_v31, 0.0 }
 0x685   :  { %3308 = vmatmul.bf16.gmra.mxu0 %v12446_v29  ;;  %7322 = vmatmul.msk.bf16.gmra.mxu2 %vm930_vm1, %v12447_v54  ;;  %v10344_v9 = vpack.c.bf16 %v4007_v30, %v4003_v32 }
 0x686   :  { %v2947_v28 = vpop.f32.mrf.mxu3 }
 0x687   :  { %12451 = vst [vmem:[#allocation57_spill] sm:$0xff] %v10344_v9  ;;  %v2948_v5 = vadd.f32 %v2947_v28, %v2618_v2 }
 0x688   :  { %v3598_v59 = vpop.f32.mrf.mxu2  ;;  %v2621_v18 = vpop.f32.mrf.mxu1 }
 0x689   :  { %v4022_v36 = vmax.f32 %v2948_v5, 0.0  ;;  %v3599_v14 = vadd.f32 %v3598_v59, %v3269_v60 }
 0x68a   :  { %v3271_v44 = vpop.f32.mrf.mxu0 }
 0x68b   :  { %v10346_v40 = vpack.c.bf16 %v4022_v36, %v4018_v56  ;;  %2660 = vmatmul.bf16.gmra.mxu1 %v12452_v52  ;;  %7260 = vmatmul.msk.bf16.gmra.mxu3 %vm930_vm1, %v12453_v42  ;;  %v4011_v55 = vmax.f32 %v3599_v14, 0.0 }
 0x68e   :  { %v2950_v29 = vpop.f32.mrf.mxu3 }
 0x68f   :  { %v2951_v53 = vadd.f32 %v2950_v29, %v2621_v18 }
 0x690   :  { %v3600_v54 = vpop.f32.mrf.mxu2  ;;  %v2623_v31 = vpop.f32.mrf.mxu1 }
 0x691   :  { %v3601_v32 = vadd.f32 %v3600_v54, %v3271_v44  ;;  %v4026_v28 = vmax.f32 %v2951_v53, 0.0  ;;  %v12456_v44 = vld [vmem:[#allocation99_spill] sm:$0xff] }
 0x692   :  { %v3274_v30 = vpop.f32.mrf.mxu0 }
 0x693   :  { %v4015_v2 = vmax.f32 %v3601_v32, 0.0 }
 0x695   :  { %3313 = vmatmul.bf16.gmra.mxu0 %v12449_v62  ;;  %7323 = vmatmul.msk.bf16.gmra.mxu2 %vm930_vm1, %v12450_v11  ;;  %v10354_v36 = vpack.c.bf16 %v4015_v2, %v4011_v55 }
 0x696   :  { %v2952_v60 = vpop.f32.mrf.mxu3 }
 0x697   :  { %12454 = vst [vmem:[#allocation64_spill] sm:$0xff] %v10354_v36  ;;  %v2953_v56 = vadd.f32 %v2952_v60, %v2623_v31 }
 0x698   :  { %v3603_v5 = vpop.f32.mrf.mxu2  ;;  %v2626_v59 = vpop.f32.mrf.mxu1 }
 0x699   :  { %v4030_v9 = vmax.f32 %v2953_v56, 0.0  ;;  %v3604_v18 = vadd.f32 %v3603_v5, %v3274_v30 }
 0x69a   :  { %v3276_v29 = vpop.f32.mrf.mxu0 }
 0x69b   :  { %2665 = vmatmul.bf16.gmra.mxu1 %v12455_v27  ;;  %7261 = vmatmul.msk.bf16.gmra.mxu3 %vm930_vm1, %v12456_v44  ;;  %v10359_v14 = vpack.c.bf16 %v4030_v9, %v4026_v28  ;;  %v4019_v53 = vmax.f32 %v3604_v18, 0.0 }
 0x69d   :  { %12457 = vst [vmem:[#allocation60_spill] sm:$0xff] %v10359_v14  ;;  %v12459_v14 = vld [vmem:[#allocation106_spill] sm:$0xff] }
 0x69e   :  { %v2955_v62 = vpop.f32.mrf.mxu3 }
 0x69f   :  { %v2956_v54 = vadd.f32 %v2955_v62, %v2626_v59 }
 0x6a0   :  { %v3605_v11 = vpop.f32.mrf.mxu2  ;;  %v2628_v32 = vpop.f32.mrf.mxu1 }
 0x6a1   :  { %v3606_v55 = vadd.f32 %v3605_v11, %v3276_v29  ;;  %v4034_v56 = vmax.f32 %v2956_v54, 0.0  ;;  %v12460_v29 = vld [vmem:[#allocation102_spill] sm:$0xff] }
 0x6a2   :  { %v3279_v2 = vpop.f32.mrf.mxu0 }
 0x6a3   :  { %v4023_v31 = vmax.f32 %v3606_v55, 0.0 }
 0x6a5   :  { %v10361_v60 = vpack.c.bf16 %v4023_v31, %v4019_v53  ;;  %3318 = vmatmul.bf16.gmra.mxu0 %v12452_v52  ;;  %7324 = vmatmul.msk.bf16.gmra.mxu2 %vm930_vm1, %v12453_v42 }
 0x6a6   :  { %v2957_v30 = vpop.f32.mrf.mxu3 }
 0x6a7   :  { %12458 = vst [vmem:[#allocation67_spill] sm:$0xff] %v10361_v60  ;;  %v2958_v5 = vadd.f32 %v2957_v30, %v2628_v32 }
 0x6a8   :  { %v3608_v9 = vpop.f32.mrf.mxu2  ;;  %v2631_v28 = vpop.f32.mrf.mxu1 }
 0x6a9   :  { %v4038_v36 = vmax.f32 %v2958_v5, 0.0  ;;  %v3609_v59 = vadd.f32 %v3608_v9, %v3279_v2 }
 0x6aa   :  { %v3281_v62 = vpop.f32.mrf.mxu0 }
 0x6ab   :  { %2670 = vmatmul.bf16.gmra.mxu1 %v12459_v14  ;;  %7262 = vmatmul.msk.bf16.gmra.mxu3 %vm930_vm1, %v12460_v29  ;;  %v10369_v18 = vpack.c.bf16 %v4038_v36, %v4034_v56  ;;  %v4027_v54 = vmax.f32 %v3609_v59, 0.0 }
 0x6ad   :  { %12461 = vst [vmem:[#allocation63_spill] sm:$0xff] %v10369_v18  ;;  %v12463_v18 = vld [vmem:[#allocation109_spill] sm:$0xff] }
 0x6ae   :  { %v2960_v11 = vpop.f32.mrf.mxu3 }
 0x6af   :  { %v2961_v52 = vadd.f32 %v2960_v11, %v2631_v28 }
 0x6b0   :  { %v3610_v55 = vpop.f32.mrf.mxu2  ;;  %v2633_v53 = vpop.f32.mrf.mxu1 }
 0x6b1   :  { %v3611_v42 = vadd.f32 %v3610_v55, %v3281_v62  ;;  %v4042_v5 = vmax.f32 %v2961_v52, 0.0  ;;  %v12464_v62 = vld [vmem:[#allocation105_spill] sm:$0xff] }
 0x6b2   :  { %v3284_v31 = vpop.f32.mrf.mxu0 }
 0x6b3   :  { %v4031_v32 = vmax.f32 %v3611_v42, 0.0 }
 0x6b5   :  { %3323 = vmatmul.bf16.gmra.mxu0 %v12455_v27  ;;  %7325 = vmatmul.msk.bf16.gmra.mxu2 %vm930_vm1, %v12456_v44  ;;  %v10374_v2 = vpack.c.bf16 %v4031_v32, %v4027_v54 }
 0x6b6   :  { %v2962_v30 = vpop.f32.mrf.mxu3 }
 0x6b7   :  { %12462 = vst [vmem:[#allocation70_spill] sm:$0xff] %v10374_v2  ;;  %v2963_v9 = vadd.f32 %v2962_v30, %v2633_v53 }
 0x6b8   :  { %v3613_v36 = vpop.f32.mrf.mxu2  ;;  %v2636_v56 = vpop.f32.mrf.mxu1 }
 0x6b9   :  { %v4046_v60 = vmax.f32 %v2963_v9, 0.0  ;;  %v3614_v28 = vadd.f32 %v3613_v36, %v3284_v31 }
 0x6ba   :  { %v3286_v11 = vpop.f32.mrf.mxu0 }
 0x6bb   :  { %2675 = vmatmul.bf16.gmra.mxu1 %v12463_v18  ;;  %7263 = vmatmul.msk.bf16.gmra.mxu3 %vm930_vm1, %v12464_v62  ;;  %v10379_v59 = vpack.c.bf16 %v4046_v60, %v4042_v5  ;;  %v4035_v52 = vmax.f32 %v3614_v28, 0.0 }
 0x6bd   :  { %12465 = vst [vmem:[#allocation66_spill] sm:$0xff] %v10379_v59  ;;  %v12467_v59 = vld [vmem:[#allocation112_spill] sm:$0xff] }
 0x6be   :  { %v2965_v27 = vpop.f32.mrf.mxu3 }
 0x6bf   :  { %v2966_v55 = vadd.f32 %v2965_v27, %v2636_v56 }
 0x6c0   :  { %v3615_v44 = vpop.f32.mrf.mxu2  ;;  %v2638_v42 = vpop.f32.mrf.mxu1 }
 0x6c1   :  { %v3616_v54 = vadd.f32 %v3615_v44, %v3286_v11  ;;  %v4050_v9 = vmax.f32 %v2966_v55, 0.0  ;;  %v12468_v11 = vld [vmem:[#allocation108_spill] sm:$0xff] }
 0x6c2   :  { %v3289_v32 = vpop.f32.mrf.mxu0 }
 0x6c3   :  { %v4039_v53 = vmax.f32 %v3616_v54, 0.0 }
 0x6c5   :  { %3328 = vmatmul.bf16.gmra.mxu0 %v12459_v14  ;;  %7326 = vmatmul.msk.bf16.gmra.mxu2 %vm930_vm1, %v12460_v29  ;;  %v10384_v31 = vpack.c.bf16 %v4039_v53, %v4035_v52 }
 0x6c6   :  { %v2967_v30 = vpop.f32.mrf.mxu3 }
 0x6c7   :  { %12466 = vst [vmem:[#allocation73_spill] sm:$0xff] %v10384_v31  ;;  %v2968_v36 = vadd.f32 %v2967_v30, %v2638_v42 }
 0x6c8   :  { %v3618_v60 = vpop.f32.mrf.mxu2  ;;  %v2641_v5 = vpop.f32.mrf.mxu1 }
 0x6c9   :  { %v4054_v2 = vmax.f32 %v2968_v36, 0.0  ;;  %v3619_v56 = vadd.f32 %v3618_v60, %v3289_v32 }
 0x6ca   :  { %v3291_v27 = vpop.f32.mrf.mxu0 }
 0x6cb   :  { %2680 = vmatmul.bf16.gmra.mxu1 %v12467_v59  ;;  %7264 = vmatmul.msk.bf16.gmra.mxu3 %vm930_vm1, %v12468_v11  ;;  %v10389_v28 = vpack.c.bf16 %v4054_v2, %v4050_v9  ;;  %v4043_v55 = vmax.f32 %v3619_v56, 0.0 }
 0x6cd   :  { %12469 = vst [vmem:[#allocation69_spill] sm:$0xff] %v10389_v28  ;;  %v12471_v28 = vld [vmem:[#allocation115_spill] sm:$0xff] }
 0x6ce   :  { %v2970_v14 = vpop.f32.mrf.mxu3 }
 0x6cf   :  { %v2971_v44 = vadd.f32 %v2970_v14, %v2641_v5 }
 0x6d0   :  { %v3620_v29 = vpop.f32.mrf.mxu2  ;;  %v2643_v54 = vpop.f32.mrf.mxu1 }
 0x6d1   :  { %v3621_v52 = vadd.f32 %v3620_v29, %v3291_v27  ;;  %v4058_v36 = vmax.f32 %v2971_v44, 0.0  ;;  %v12472_v27 = vld [vmem:[#allocation111_spill] sm:$0xff] }
 0x6d2   :  { %v3294_v53 = vpop.f32.mrf.mxu0 }
 0x6d3   :  { %v4047_v42 = vmax.f32 %v3621_v52, 0.0 }
 0x6d5   :  { %3333 = vmatmul.bf16.gmra.mxu0 %v12463_v18  ;;  %7327 = vmatmul.msk.bf16.gmra.mxu2 %vm930_vm1, %v12464_v62  ;;  %v10394_v32 = vpack.c.bf16 %v4047_v42, %v4043_v55 }
 0x6d6   :  { %v2972_v30 = vpop.f32.mrf.mxu3 }
 0x6d7   :  { %12470 = vst [vmem:[#allocation76_spill] sm:$0xff] %v10394_v32  ;;  %v2973_v60 = vadd.f32 %v2972_v30, %v2643_v54 }
 0x6d8   :  { %v3623_v2 = vpop.f32.mrf.mxu2  ;;  %v2646_v9 = vpop.f32.mrf.mxu1 }
 0x6d9   :  { %v4062_v31 = vmax.f32 %v2973_v60, 0.0  ;;  %v3624_v5 = vadd.f32 %v3623_v2, %v3294_v53 }
 0x6da   :  { %v3296_v14 = vpop.f32.mrf.mxu0 }
 0x6db   :  { %2685 = vmatmul.bf16.gmra.mxu1 %v12471_v28  ;;  %7265 = vmatmul.msk.bf16.gmra.mxu3 %vm930_vm1, %v12472_v27  ;;  %v10399_v56 = vpack.c.bf16 %v4062_v31, %v4058_v36  ;;  %v4051_v44 = vmax.f32 %v3624_v5, 0.0 }
 0x6dd   :  { %12473 = vst [vmem:[#allocation72_spill] sm:$0xff] %v10399_v56  ;;  %v12475_v56 = vld [vmem:[#allocation118_spill] sm:$0xff] }
 0x6de   :  { %v2975_v18 = vpop.f32.mrf.mxu3 }
 0x6df   :  { %v2976_v29 = vadd.f32 %v2975_v18, %v2646_v9 }
 0x6e0   :  { %v3625_v62 = vpop.f32.mrf.mxu2  ;;  %v2648_v52 = vpop.f32.mrf.mxu1 }
 0x6e1   :  { %v3626_v55 = vadd.f32 %v3625_v62, %v3296_v14  ;;  %v4066_v60 = vmax.f32 %v2976_v29, 0.0  ;;  %v12476_v14 = vld [vmem:[#allocation114_spill] sm:$0xff] }
 0x6e2   :  { %v3299_v42 = vpop.f32.mrf.mxu0 }
 0x6e3   :  { %v4055_v54 = vmax.f32 %v3626_v55, 0.0 }
 0x6e5   :  { %3338 = vmatmul.bf16.gmra.mxu0 %v12467_v59  ;;  %7328 = vmatmul.msk.bf16.gmra.mxu2 %vm930_vm1, %v12468_v11  ;;  %v10404_v53 = vpack.c.bf16 %v4055_v54, %v4051_v44 }
 0x6e6   :  { %v2977_v30 = vpop.f32.mrf.mxu3 }
 0x6e7   :  { %12474 = vst [vmem:[#allocation79_spill] sm:$0xff] %v10404_v53  ;;  %v2978_v2 = vadd.f32 %v2977_v30, %v2648_v52 }
 0x6e8   :  { %v3628_v31 = vpop.f32.mrf.mxu2  ;;  %v2651_v36 = vpop.f32.mrf.mxu1 }
 0x6e9   :  { %v4070_v32 = vmax.f32 %v2978_v2, 0.0  ;;  %v3629_v9 = vadd.f32 %v3628_v31, %v3299_v42 }
 0x6ea   :  { %v3301_v18 = vpop.f32.mrf.mxu0 }
 0x6eb   :  { %2690 = vmatmul.bf16.gmra.mxu1 %v12475_v56  ;;  %7266 = vmatmul.msk.bf16.gmra.mxu3 %vm930_vm1, %v12476_v14  ;;  %v10409_v5 = vpack.c.bf16 %v4070_v32, %v4066_v60  ;;  %v4059_v29 = vmax.f32 %v3629_v9, 0.0 }
 0x6ed   :  { %12477 = vst [vmem:[#allocation75_spill] sm:$0xff] %v10409_v5  ;;  %v12479_v5 = vld [vmem:[#allocation121_spill] sm:$0xff] }
 0x6ee   :  { %v2980_v59 = vpop.f32.mrf.mxu3 }
 0x6ef   :  { %v2981_v62 = vadd.f32 %v2980_v59, %v2651_v36 }
 0x6f0   :  { %v3630_v11 = vpop.f32.mrf.mxu2  ;;  %v2653_v55 = vpop.f32.mrf.mxu1 }
 0x6f1   :  { %v3631_v44 = vadd.f32 %v3630_v11, %v3301_v18  ;;  %v4074_v2 = vmax.f32 %v2981_v62, 0.0  ;;  %v12480_v18 = vld [vmem:[#allocation117_spill] sm:$0xff] }
 0x6f2   :  { %v3304_v54 = vpop.f32.mrf.mxu0 }
 0x6f3   :  { %v4063_v52 = vmax.f32 %v3631_v44, 0.0 }
 0x6f5   :  { %3343 = vmatmul.bf16.gmra.mxu0 %v12471_v28  ;;  %7329 = vmatmul.msk.bf16.gmra.mxu2 %vm930_vm1, %v12472_v27  ;;  %v10414_v42 = vpack.c.bf16 %v4063_v52, %v4059_v29 }
 0x6f6   :  { %v2982_v30 = vpop.f32.mrf.mxu3 }
 0x6f7   :  { %12478 = vst [vmem:[#allocation82_spill] sm:$0xff] %v10414_v42  ;;  %v2983_v31 = vadd.f32 %v2982_v30, %v2653_v55 }
 0x6f8   :  { %v3633_v32 = vpop.f32.mrf.mxu2  ;;  %v2656_v60 = vpop.f32.mrf.mxu1 }
 0x6f9   :  { %v4078_v53 = vmax.f32 %v2983_v31, 0.0  ;;  %v3634_v36 = vadd.f32 %v3633_v32, %v3304_v54 }
 0x6fa   :  { %v3306_v59 = vpop.f32.mrf.mxu0 }
 0x6fb   :  { %2695 = vmatmul.bf16.gmra.mxu1 %v12479_v5  ;;  %7267 = vmatmul.msk.bf16.gmra.mxu3 %vm930_vm1, %v12480_v18  ;;  %v10419_v9 = vpack.c.bf16 %v4078_v53, %v4074_v2  ;;  %v4067_v62 = vmax.f32 %v3634_v36, 0.0  ;;  %v12485_v36 = vld [vmem:[#allocation120_spill] sm:$0xff] }
 0x6fd   :  { %12481 = vst [vmem:[#allocation78_spill] sm:$0xff] %v10419_v9 }
 0x6fe   :  { %v2985_v28 = vpop.f32.mrf.mxu3 }
 0x6ff   :  { %v2986_v11 = vadd.f32 %v2985_v28, %v2656_v60 }
 0x700   :  { %v3635_v27 = vpop.f32.mrf.mxu2  ;;  %v2658_v44 = vpop.f32.mrf.mxu1 }
 0x701   :  { %v3636_v29 = vadd.f32 %v3635_v27, %v3306_v59  ;;  %v4082_v31 = vmax.f32 %v2986_v11, 0.0  ;;  %v12484_v59 = vld [vmem:[#allocation124_spill] sm:$0xff] }
 0x702   :  { %v3309_v52 = vpop.f32.mrf.mxu0 }
 0x703   :  { %v4071_v55 = vmax.f32 %v3636_v29, 0.0 }
 0x705   :  { %3348 = vmatmul.bf16.gmra.mxu0 %v12475_v56  ;;  %7330 = vmatmul.msk.bf16.gmra.mxu2 %vm930_vm1, %v12476_v14  ;;  %v10424_v54 = vpack.c.bf16 %v4071_v55, %v4067_v62 }
 0x706   :  { %v2987_v30 = vpop.f32.mrf.mxu3 }
 0x707   :  { %12482 = vst [vmem:[#allocation85_spill] sm:$0xff] %v10424_v54  ;;  %v2988_v32 = vadd.f32 %v2987_v30, %v2658_v44 }
 0x708   :  { %v3638_v53 = vpop.f32.mrf.mxu2  ;;  %v2661_v2 = vpop.f32.mrf.mxu1 }
 0x709   :  { %v4086_v42 = vmax.f32 %v2988_v32, 0.0  ;;  %v3639_v60 = vadd.f32 %v3638_v53, %v3309_v52 }
 0x70a   :  { %v3311_v28 = vpop.f32.mrf.mxu0 }
 0x70b   :  { %v10426_v9 = vpack.c.bf16 %v4086_v42, %v4082_v31  ;;  %2700 = vmatmul.bf16.gmra.mxu1 %v12484_v59  ;;  %7268 = vmatmul.msk.bf16.gmra.mxu3 %vm930_vm1, %v12485_v36  ;;  %v4075_v11 = vmax.f32 %v3639_v60, 0.0 }
 0x70d   :  { %12483 = vst [vmem:[#allocation81_spill] sm:$0xff] %v10426_v9  ;;  %v12487_v9 = vld [vmem:[#allocation127_spill] sm:$0xff] }
 0x70e   :  { %v2990_v56 = vpop.f32.mrf.mxu3 }
 0x70f   :  { %v2991_v27 = vadd.f32 %v2990_v56, %v2661_v2 }
 0x710   :  { %v3640_v14 = vpop.f32.mrf.mxu2  ;;  %v2663_v29 = vpop.f32.mrf.mxu1 }
 0x711   :  { %v3641_v62 = vadd.f32 %v3640_v14, %v3311_v28  ;;  %v4090_v30 = vmax.f32 %v2991_v27, 0.0  ;;  %v12488_v28 = vld [vmem:[#allocation123_spill] sm:$0xff] }
 0x712   :  { %v3314_v55 = vpop.f32.mrf.mxu0 }
 0x713   :  { %v4079_v44 = vmax.f32 %v3641_v62, 0.0 }
 0x715   :  { %3353 = vmatmul.bf16.gmra.mxu0 %v12479_v5  ;;  %7331 = vmatmul.msk.bf16.gmra.mxu2 %vm930_vm1, %v12480_v18  ;;  %v10434_v42 = vpack.c.bf16 %v4079_v44, %v4075_v11 }
 0x716   :  { %v2992_v52 = vpop.f32.mrf.mxu3 }
 0x717   :  { %12486 = vst [vmem:[#allocation88_spill] sm:$0xff] %v10434_v42  ;;  %v2993_v31 = vadd.f32 %v2992_v52, %v2663_v29 }
 0x718   :  { %v3643_v32 = vpop.f32.mrf.mxu2  ;;  %v2666_v53 = vpop.f32.mrf.mxu1 }
 0x719   :  { %v4094_v54 = vmax.f32 %v2993_v31, 0.0  ;;  %v3644_v2 = vadd.f32 %v3643_v32, %v3314_v55 }
 0x71a   :  { %v3316_v56 = vpop.f32.mrf.mxu0 }
 0x71b   :  { %2705 = vmatmul.bf16.gmra.mxu1 %v12487_v9  ;;  %7269 = vmatmul.msk.bf16.gmra.mxu3 %vm930_vm1, %v12488_v28  ;;  %v10439_v60 = vpack.c.bf16 %v4094_v54, %v4090_v30  ;;  %v4083_v27 = vmax.f32 %v3644_v2, 0.0 }
 0x71d   :  { %12489 = vst [vmem:[#allocation84_spill] sm:$0xff] %v10439_v60  ;;  %v12491_v60 = vld [vmem:[#allocation130_spill] sm:$0xff] }
 0x71e   :  { %v2995_v5 = vpop.f32.mrf.mxu3 }
 0x71f   :  { %v2996_v14 = vadd.f32 %v2995_v5, %v2666_v53 }
 0x720   :  { %v3645_v18 = vpop.f32.mrf.mxu2  ;;  %v2668_v62 = vpop.f32.mrf.mxu1 }
 0x721   :  { %v3646_v11 = vadd.f32 %v3645_v18, %v3316_v56  ;;  %v4098_v31 = vmax.f32 %v2996_v14, 0.0  ;;  %v12492_v56 = vld [vmem:[#allocation126_spill] sm:$0xff] }
 0x722   :  { %v3319_v44 = vpop.f32.mrf.mxu0 }
 0x723   :  { %v4087_v29 = vmax.f32 %v3646_v11, 0.0 }
 0x725   :  { %v10441_v52 = vpack.c.bf16 %v4087_v29, %v4083_v27  ;;  %3358 = vmatmul.bf16.gmra.mxu0 %v12484_v59  ;;  %7332 = vmatmul.msk.bf16.gmra.mxu2 %vm930_vm1, %v12485_v36 }
 0x726   :  { %v2997_v55 = vpop.f32.mrf.mxu3 }
 0x727   :  { %12490 = vst [vmem:[#allocation91_spill] sm:$0xff] %v10441_v52  ;;  %v2998_v32 = vadd.f32 %v2997_v55, %v2668_v62 }
 0x728   :  { %v3648_v54 = vpop.f32.mrf.mxu2  ;;  %v2671_v30 = vpop.f32.mrf.mxu1 }
 0x729   :  { %v4102_v42 = vmax.f32 %v2998_v32, 0.0  ;;  %v3649_v53 = vadd.f32 %v3648_v54, %v3319_v44 }
 0x72a   :  { %v3321_v5 = vpop.f32.mrf.mxu0 }
 0x72b   :  { %2710 = vmatmul.bf16.gmra.mxu1 %v12491_v60  ;;  %7270 = vmatmul.msk.bf16.gmra.mxu3 %vm930_vm1, %v12492_v56  ;;  %v10449_v2 = vpack.c.bf16 %v4102_v42, %v4098_v31  ;;  %v4091_v14 = vmax.f32 %v3649_v53, 0.0 }
 0x72d   :  { %12493 = vst [vmem:[#allocation87_spill] sm:$0xff] %v10449_v2  ;;  %v12495_v2 = vld [vmem:[#allocation133_spill] sm:$0xff] }
 0x72e   :  { %v3000_v18 = vpop.f32.mrf.mxu3 }
 0x72f   :  { %v3001_v59 = vadd.f32 %v3000_v18, %v2671_v30 }
 0x730   :  { %v3650_v11 = vpop.f32.mrf.mxu2  ;;  %v2673_v27 = vpop.f32.mrf.mxu1 }
 0x731   :  { %v3651_v36 = vadd.f32 %v3650_v11, %v3321_v5  ;;  %v4106_v32 = vmax.f32 %v3001_v59, 0.0  ;;  %v12496_v5 = vld [vmem:[#allocation129_spill] sm:$0xff] }
 0x732   :  { %v3324_v29 = vpop.f32.mrf.mxu0 }
 0x733   :  { %v4095_v62 = vmax.f32 %v3651_v36, 0.0 }
 0x735   :  { %3363 = vmatmul.bf16.gmra.mxu0 %v12487_v9  ;;  %7333 = vmatmul.msk.bf16.gmra.mxu2 %vm930_vm1, %v12488_v28  ;;  %v10454_v44 = vpack.c.bf16 %v4095_v62, %v4091_v14 }
 0x736   :  { %v3002_v55 = vpop.f32.mrf.mxu3 }
 0x737   :  { %12494 = vst [vmem:[#allocation94_spill] sm:$0xff] %v10454_v44  ;;  %v3003_v54 = vadd.f32 %v3002_v55, %v2673_v27 }
 0x738   :  { %v3653_v42 = vpop.f32.mrf.mxu2  ;;  %v2676_v31 = vpop.f32.mrf.mxu1 }
 0x739   :  { %v4110_v52 = vmax.f32 %v3003_v54, 0.0  ;;  %v3654_v30 = vadd.f32 %v3653_v42, %v3324_v29 }
 0x73a   :  { %v3326_v18 = vpop.f32.mrf.mxu0 }
 0x73b   :  { %2715 = vmatmul.bf16.gmra.mxu1 %v12495_v2  ;;  %7271 = vmatmul.msk.bf16.gmra.mxu3 %vm930_vm1, %v12496_v5  ;;  %v10459_v53 = vpack.c.bf16 %v4110_v52, %v4106_v32  ;;  %v4099_v59 = vmax.f32 %v3654_v30, 0.0 }
 0x73d   :  { %12497 = vst [vmem:[#allocation90_spill] sm:$0xff] %v10459_v53  ;;  %v12499_v53 = vld [vmem:[#allocation136_spill] sm:$0xff] }
 0x73e   :  { %v3005_v9 = vpop.f32.mrf.mxu3 }
 0x73f   :  { %v3006_v11 = vadd.f32 %v3005_v9, %v2676_v31 }
 0x740   :  { %v3655_v28 = vpop.f32.mrf.mxu2  ;;  %v2678_v36 = vpop.f32.mrf.mxu1 }
 0x741   :  { %v3656_v14 = vadd.f32 %v3655_v28, %v3326_v18  ;;  %v4114_v54 = vmax.f32 %v3006_v11, 0.0  ;;  %v12500_v18 = vld [vmem:[#allocation132_spill] sm:$0xff] }
 0x742   :  { %v3329_v62 = vpop.f32.mrf.mxu0 }
 0x743   :  { %v4103_v27 = vmax.f32 %v3656_v14, 0.0 }
 0x745   :  { %3368 = vmatmul.bf16.gmra.mxu0 %v12491_v60  ;;  %7334 = vmatmul.msk.bf16.gmra.mxu2 %vm930_vm1, %v12492_v56  ;;  %v10464_v29 = vpack.c.bf16 %v4103_v27, %v4099_v59 }
 0x746   :  { %v3007_v55 = vpop.f32.mrf.mxu3 }
 0x747   :  { %12498 = vst [vmem:[#allocation97_spill] sm:$0xff] %v10464_v29  ;;  %v3008_v42 = vadd.f32 %v3007_v55, %v2678_v36 }
 0x748   :  { %v3658_v52 = vpop.f32.mrf.mxu2  ;;  %v2681_v32 = vpop.f32.mrf.mxu1 }
 0x749   :  { %v4118_v44 = vmax.f32 %v3008_v42, 0.0  ;;  %v3659_v31 = vadd.f32 %v3658_v52, %v3329_v62 }
 0x74a   :  { %v3331_v9 = vpop.f32.mrf.mxu0 }
 0x74b   :  { %2720 = vmatmul.bf16.gmra.mxu1 %v12499_v53  ;;  %7272 = vmatmul.msk.bf16.gmra.mxu3 %vm930_vm1, %v12500_v18  ;;  %v10469_v30 = vpack.c.bf16 %v4118_v44, %v4114_v54  ;;  %v4107_v11 = vmax.f32 %v3659_v31, 0.0 }
 0x74d   :  { %12501 = vst [vmem:[#allocation93_spill] sm:$0xff] %v10469_v30  ;;  %v12503_v30 = vld [vmem:[#allocation139_spill] sm:$0xff] }
 0x74e   :  { %v3010_v60 = vpop.f32.mrf.mxu3 }
 0x74f   :  { %v3011_v28 = vadd.f32 %v3010_v60, %v2681_v32 }
 0x750   :  { %v3660_v56 = vpop.f32.mrf.mxu2  ;;  %v2683_v14 = vpop.f32.mrf.mxu1 }
 0x751   :  { %v3661_v59 = vadd.f32 %v3660_v56, %v3331_v9  ;;  %v4122_v42 = vmax.f32 %v3011_v28, 0.0  ;;  %v12504_v9 = vld [vmem:[#allocation135_spill] sm:$0xff] }
 0x752   :  { %v3334_v27 = vpop.f32.mrf.mxu0 }
 0x753   :  { %v4111_v36 = vmax.f32 %v3661_v59, 0.0 }
 0x755   :  { %3373 = vmatmul.bf16.gmra.mxu0 %v12495_v2  ;;  %7335 = vmatmul.msk.bf16.gmra.mxu2 %vm930_vm1, %v12496_v5  ;;  %v10474_v62 = vpack.c.bf16 %v4111_v36, %v4107_v11 }
 0x756   :  { %v3012_v55 = vpop.f32.mrf.mxu3 }
 0x757   :  { %12502 = vst [vmem:[#allocation100_spill] sm:$0xff] %v10474_v62  ;;  %v3013_v52 = vadd.f32 %v3012_v55, %v2683_v14 }
 0x758   :  { %v3663_v44 = vpop.f32.mrf.mxu2  ;;  %v2686_v54 = vpop.f32.mrf.mxu1 }
 0x759   :  { %v4126_v29 = vmax.f32 %v3013_v52, 0.0  ;;  %v3664_v32 = vadd.f32 %v3663_v44, %v3334_v27 }
 0x75a   :  { %v3336_v60 = vpop.f32.mrf.mxu0 }
 0x75b   :  { %2725 = vmatmul.bf16.gmra.mxu1 %v12503_v30  ;;  %7273 = vmatmul.msk.bf16.gmra.mxu3 %vm930_vm1, %v12504_v9  ;;  %v10479_v31 = vpack.c.bf16 %v4126_v29, %v4122_v42  ;;  %v4115_v28 = vmax.f32 %v3664_v32, 0.0 }
 0x75d   :  { %12505 = vst [vmem:[#allocation96_spill] sm:$0xff] %v10479_v31  ;;  %v12507_v31 = vld [vmem:[#allocation142_spill] sm:$0xff] }
 0x75e   :  { %v3015_v2 = vpop.f32.mrf.mxu3 }
 0x75f   :  { %v3016_v56 = vadd.f32 %v3015_v2, %v2686_v54 }
 0x760   :  { %v3665_v5 = vpop.f32.mrf.mxu2  ;;  %v2688_v59 = vpop.f32.mrf.mxu1 }
 0x761   :  { %v3666_v11 = vadd.f32 %v3665_v5, %v3336_v60  ;;  %v4130_v52 = vmax.f32 %v3016_v56, 0.0  ;;  %v12508_v60 = vld [vmem:[#allocation138_spill] sm:$0xff] }
 0x762   :  { %v3339_v36 = vpop.f32.mrf.mxu0 }
 0x763   :  { %v4119_v14 = vmax.f32 %v3666_v11, 0.0 }
 0x765   :  { %3378 = vmatmul.bf16.gmra.mxu0 %v12499_v53  ;;  %7336 = vmatmul.msk.bf16.gmra.mxu2 %vm930_vm1, %v12500_v18  ;;  %v10484_v27 = vpack.c.bf16 %v4119_v14, %v4115_v28 }
 0x766   :  { %v3017_v55 = vpop.f32.mrf.mxu3 }
 0x767   :  { %12506 = vst [vmem:[#allocation103_spill] sm:$0xff] %v10484_v27  ;;  %v3018_v44 = vadd.f32 %v3017_v55, %v2688_v59 }
 0x768   :  { %v3668_v29 = vpop.f32.mrf.mxu2  ;;  %v2691_v42 = vpop.f32.mrf.mxu1 }
 0x769   :  { %v4134_v62 = vmax.f32 %v3018_v44, 0.0  ;;  %v3669_v54 = vadd.f32 %v3668_v29, %v3339_v36 }
 0x76a   :  { %v3341_v2 = vpop.f32.mrf.mxu0 }
 0x76b   :  { %2730 = vmatmul.bf16.gmra.mxu1 %v12507_v31  ;;  %7274 = vmatmul.msk.bf16.gmra.mxu3 %vm930_vm1, %v12508_v60  ;;  %v10489_v32 = vpack.c.bf16 %v4134_v62, %v4130_v52  ;;  %v4123_v56 = vmax.f32 %v3669_v54, 0.0 }
 0x76d   :  { %12509 = vst [vmem:[#allocation99_spill] sm:$0xff] %v10489_v32  ;;  %v12511_v32 = vld [vmem:[#allocation145_spill] sm:$0xff] }
 0x76e   :  { %v3020_v53 = vpop.f32.mrf.mxu3 }
 0x76f   :  { %v3021_v5 = vadd.f32 %v3020_v53, %v2691_v42 }
 0x770   :  { %v3670_v18 = vpop.f32.mrf.mxu2  ;;  %v2693_v11 = vpop.f32.mrf.mxu1 }
 0x771   :  { %v3671_v28 = vadd.f32 %v3670_v18, %v3341_v2  ;;  %v4138_v44 = vmax.f32 %v3021_v5, 0.0  ;;  %v12512_v2 = vld [vmem:[#allocation141_spill] sm:$0xff] }
 0x772   :  { %v3344_v14 = vpop.f32.mrf.mxu0 }
 0x773   :  { %v4127_v59 = vmax.f32 %v3671_v28, 0.0 }
 0x775   :  { %3383 = vmatmul.bf16.gmra.mxu0 %v12503_v30  ;;  %7337 = vmatmul.msk.bf16.gmra.mxu2 %vm930_vm1, %v12504_v9  ;;  %v10494_v36 = vpack.c.bf16 %v4127_v59, %v4123_v56 }
 0x776   :  { %v3022_v55 = vpop.f32.mrf.mxu3 }
 0x777   :  { %12510 = vst [vmem:[#allocation106_spill] sm:$0xff] %v10494_v36  ;;  %v3023_v29 = vadd.f32 %v3022_v55, %v2693_v11 }
 0x778   :  { %v3673_v62 = vpop.f32.mrf.mxu2  ;;  %v2696_v52 = vpop.f32.mrf.mxu1 }
 0x779   :  { %v4142_v27 = vmax.f32 %v3023_v29, 0.0  ;;  %v3674_v42 = vadd.f32 %v3673_v62, %v3344_v14 }
 0x77a   :  { %v3346_v53 = vpop.f32.mrf.mxu0 }
 0x77b   :  { %2735 = vmatmul.bf16.gmra.mxu1 %v12511_v32  ;;  %7275 = vmatmul.msk.bf16.gmra.mxu3 %vm930_vm1, %v12512_v2  ;;  %v10499_v54 = vpack.c.bf16 %v4142_v27, %v4138_v44  ;;  %v4131_v5 = vmax.f32 %v3674_v42, 0.0  ;;  %v12517_v42 = vld [vmem:[#allocation144_spill] sm:$0xff] }
 0x77d   :  { %12513 = vst [vmem:[#allocation102_spill] sm:$0xff] %v10499_v54 }
 0x77e   :  { %v3025_v30 = vpop.f32.mrf.mxu3 }
 0x77f   :  { %v3026_v18 = vadd.f32 %v3025_v30, %v2696_v52 }
 0x780   :  { %v3675_v9 = vpop.f32.mrf.mxu2  ;;  %v2698_v28 = vpop.f32.mrf.mxu1 }
 0x781   :  { %v3676_v56 = vadd.f32 %v3675_v9, %v3346_v53  ;;  %v4146_v29 = vmax.f32 %v3026_v18, 0.0  ;;  %v12516_v53 = vld [vmem:[#allocation148_spill] sm:$0xff] }
 0x782   :  { %v3349_v59 = vpop.f32.mrf.mxu0 }
 0x783   :  { %v4135_v11 = vmax.f32 %v3676_v56, 0.0 }
 0x785   :  { %3388 = vmatmul.bf16.gmra.mxu0 %v12507_v31  ;;  %7338 = vmatmul.msk.bf16.gmra.mxu2 %vm930_vm1, %v12508_v60  ;;  %v10504_v14 = vpack.c.bf16 %v4135_v11, %v4131_v5 }
 0x786   :  { %v3027_v55 = vpop.f32.mrf.mxu3 }
 0x787   :  { %12514 = vst [vmem:[#allocation109_spill] sm:$0xff] %v10504_v14  ;;  %v3028_v62 = vadd.f32 %v3027_v55, %v2698_v28 }
 0x788   :  { %v3678_v27 = vpop.f32.mrf.mxu2  ;;  %v2701_v44 = vpop.f32.mrf.mxu1 }
 0x789   :  { %v4150_v36 = vmax.f32 %v3028_v62, 0.0  ;;  %v3679_v52 = vadd.f32 %v3678_v27, %v3349_v59 }
 0x78a   :  { %v3351_v30 = vpop.f32.mrf.mxu0 }
 0x78b   :  { %v10506_v54 = vpack.c.bf16 %v4150_v36, %v4146_v29  ;;  %2740 = vmatmul.bf16.gmra.mxu1 %v12516_v53  ;;  %7276 = vmatmul.msk.bf16.gmra.mxu3 %vm930_vm1, %v12517_v42  ;;  %v4139_v18 = vmax.f32 %v3679_v52, 0.0 }
 0x78d   :  { %12515 = vst [vmem:[#allocation105_spill] sm:$0xff] %v10506_v54  ;;  %v12519_v54 = vld [vmem:[#allocation151_spill] sm:$0xff] }
 0x78e   :  { %v3030_v31 = vpop.f32.mrf.mxu3 }
 0x78f   :  { %v3031_v9 = vadd.f32 %v3030_v31, %v2701_v44 }
 0x790   :  { %v3680_v60 = vpop.f32.mrf.mxu2  ;;  %v2703_v56 = vpop.f32.mrf.mxu1 }
 0x791   :  { %v3681_v5 = vadd.f32 %v3680_v60, %v3351_v30  ;;  %v4154_v55 = vmax.f32 %v3031_v9, 0.0  ;;  %v12520_v30 = vld [vmem:[#allocation147_spill] sm:$0xff] }
 0x792   :  { %v3354_v11 = vpop.f32.mrf.mxu0 }
 0x793   :  { %v4143_v28 = vmax.f32 %v3681_v5, 0.0 }
 0x795   :  { %3393 = vmatmul.bf16.gmra.mxu0 %v12511_v32  ;;  %7339 = vmatmul.msk.bf16.gmra.mxu2 %vm930_vm1, %v12512_v2  ;;  %v10514_v36 = vpack.c.bf16 %v4143_v28, %v4139_v18 }
 0x796   :  { %v3032_v59 = vpop.f32.mrf.mxu3 }
 0x797   :  { %12518 = vst [vmem:[#allocation112_spill] sm:$0xff] %v10514_v36  ;;  %v3033_v29 = vadd.f32 %v3032_v59, %v2703_v56 }
 0x798   :  { %v3683_v62 = vpop.f32.mrf.mxu2  ;;  %v2706_v27 = vpop.f32.mrf.mxu1 }
 0x799   :  { %v4158_v14 = vmax.f32 %v3033_v29, 0.0  ;;  %v3684_v44 = vadd.f32 %v3683_v62, %v3354_v11 }
 0x79a   :  { %v3356_v31 = vpop.f32.mrf.mxu0 }
 0x79b   :  { %2745 = vmatmul.bf16.gmra.mxu1 %v12519_v54  ;;  %7277 = vmatmul.msk.bf16.gmra.mxu3 %vm930_vm1, %v12520_v30  ;;  %v10519_v52 = vpack.c.bf16 %v4158_v14, %v4154_v55  ;;  %v4147_v9 = vmax.f32 %v3684_v44, 0.0 }
 0x79d   :  { %12521 = vst [vmem:[#allocation108_spill] sm:$0xff] %v10519_v52  ;;  %v12523_v52 = vld [vmem:[#allocation154_spill] sm:$0xff] }
 0x79e   :  { %v3035_v32 = vpop.f32.mrf.mxu3 }
 0x79f   :  { %v3036_v60 = vadd.f32 %v3035_v32, %v2706_v27 }
 0x7a0   :  { %v3685_v2 = vpop.f32.mrf.mxu2  ;;  %v2708_v5 = vpop.f32.mrf.mxu1 }
 0x7a1   :  { %v3686_v18 = vadd.f32 %v3685_v2, %v3356_v31  ;;  %v4162_v29 = vmax.f32 %v3036_v60, 0.0  ;;  %v12524_v31 = vld [vmem:[#allocation150_spill] sm:$0xff] }
 0x7a2   :  { %v3359_v28 = vpop.f32.mrf.mxu0 }
 0x7a3   :  { %v4151_v56 = vmax.f32 %v3686_v18, 0.0 }
 0x7a5   :  { %v10521_v59 = vpack.c.bf16 %v4151_v56, %v4147_v9  ;;  %3398 = vmatmul.bf16.gmra.mxu0 %v12516_v53  ;;  %7340 = vmatmul.msk.bf16.gmra.mxu2 %vm930_vm1, %v12517_v42 }
 0x7a6   :  { %v3037_v11 = vpop.f32.mrf.mxu3 }
 0x7a7   :  { %12522 = vst [vmem:[#allocation115_spill] sm:$0xff] %v10521_v59  ;;  %v3038_v62 = vadd.f32 %v3037_v11, %v2708_v5 }
 0x7a8   :  { %v3688_v14 = vpop.f32.mrf.mxu2  ;;  %v2711_v55 = vpop.f32.mrf.mxu1 }
 0x7a9   :  { %v4166_v36 = vmax.f32 %v3038_v62, 0.0  ;;  %v3689_v27 = vadd.f32 %v3688_v14, %v3359_v28 }
 0x7aa   :  { %v3361_v32 = vpop.f32.mrf.mxu0 }
 0x7ab   :  { %2750 = vmatmul.bf16.gmra.mxu1 %v12523_v52  ;;  %7278 = vmatmul.msk.bf16.gmra.mxu3 %vm930_vm1, %v12524_v31  ;;  %v10529_v44 = vpack.c.bf16 %v4166_v36, %v4162_v29  ;;  %v4155_v60 = vmax.f32 %v3689_v27, 0.0 }
 0x7ad   :  { %12525 = vst [vmem:[#allocation111_spill] sm:$0xff] %v10529_v44  ;;  %v12527_v44 = vld [vmem:[#allocation157_spill] sm:$0xff] }
 0x7ae   :  { %v3040_v2 = vpop.f32.mrf.mxu3 }
 0x7af   :  { %v3041_v53 = vadd.f32 %v3040_v2, %v2711_v55 }
 0x7b0   :  { %v3690_v18 = vpop.f32.mrf.mxu2  ;;  %v2713_v9 = vpop.f32.mrf.mxu1 }
 0x7b1   :  { %v3691_v42 = vadd.f32 %v3690_v18, %v3361_v32  ;;  %v4170_v62 = vmax.f32 %v3041_v53, 0.0  ;;  %v12528_v32 = vld [vmem:[#allocation153_spill] sm:$0xff] }
 0x7b2   :  { %v3364_v56 = vpop.f32.mrf.mxu0 }
 0x7b3   :  { %v4159_v5 = vmax.f32 %v3691_v42, 0.0 }
 0x7b5   :  { %3403 = vmatmul.bf16.gmra.mxu0 %v12519_v54  ;;  %7341 = vmatmul.msk.bf16.gmra.mxu2 %vm930_vm1, %v12520_v30  ;;  %v10534_v28 = vpack.c.bf16 %v4159_v5, %v4155_v60 }
 0x7b6   :  { %v3042_v11 = vpop.f32.mrf.mxu3 }
 0x7b7   :  { %12526 = vst [vmem:[#allocation118_spill] sm:$0xff] %v10534_v28  ;;  %v3043_v14 = vadd.f32 %v3042_v11, %v2713_v9 }
 0x7b8   :  { %v3693_v36 = vpop.f32.mrf.mxu2  ;;  %v2716_v29 = vpop.f32.mrf.mxu1 }
 0x7b9   :  { %v4174_v59 = vmax.f32 %v3043_v14, 0.0  ;;  %v3694_v55 = vadd.f32 %v3693_v36, %v3364_v56 }
 0x7ba   :  { %v3366_v2 = vpop.f32.mrf.mxu0 }
 0x7bb   :  { %2755 = vmatmul.bf16.gmra.mxu1 %v12527_v44  ;;  %7279 = vmatmul.msk.bf16.gmra.mxu3 %vm930_vm1, %v12528_v32  ;;  %v10539_v27 = vpack.c.bf16 %v4174_v59, %v4170_v62  ;;  %v4163_v53 = vmax.f32 %v3694_v55, 0.0 }
 0x7bd   :  { %12529 = vst [vmem:[#allocation114_spill] sm:$0xff] %v10539_v27  ;;  %v12531_v27 = vld [vmem:[#allocation160_spill] sm:$0xff] }
 0x7be   :  { %v3045_v54 = vpop.f32.mrf.mxu3 }
 0x7bf   :  { %v3046_v18 = vadd.f32 %v3045_v54, %v2716_v29 }
 0x7c0   :  { %v3695_v30 = vpop.f32.mrf.mxu2  ;;  %v2718_v42 = vpop.f32.mrf.mxu1 }
 0x7c1   :  { %v3696_v60 = vadd.f32 %v3695_v30, %v3366_v2  ;;  %v4178_v14 = vmax.f32 %v3046_v18, 0.0  ;;  %v12532_v2 = vld [vmem:[#allocation156_spill] sm:$0xff] }
 0x7c2   :  { %v3369_v5 = vpop.f32.mrf.mxu0 }
 0x7c3   :  { %v4167_v9 = vmax.f32 %v3696_v60, 0.0 }
 0x7c5   :  { %3408 = vmatmul.bf16.gmra.mxu0 %v12523_v52  ;;  %7342 = vmatmul.msk.bf16.gmra.mxu2 %vm930_vm1, %v12524_v31  ;;  %v10544_v56 = vpack.c.bf16 %v4167_v9, %v4163_v53 }
 0x7c6   :  { %v3047_v11 = vpop.f32.mrf.mxu3 }
 0x7c7   :  { %12530 = vst [vmem:[#allocation121_spill] sm:$0xff] %v10544_v56  ;;  %v3048_v36 = vadd.f32 %v3047_v11, %v2718_v42 }
 0x7c8   :  { %v3698_v59 = vpop.f32.mrf.mxu2  ;;  %v2721_v62 = vpop.f32.mrf.mxu1 }
 0x7c9   :  { %v4182_v28 = vmax.f32 %v3048_v36, 0.0  ;;  %v3699_v29 = vadd.f32 %v3698_v59, %v3369_v5 }
 0x7ca   :  { %v3371_v54 = vpop.f32.mrf.mxu0 }
 0x7cb   :  { %2760 = vmatmul.bf16.gmra.mxu1 %v12531_v27  ;;  %7280 = vmatmul.msk.bf16.gmra.mxu3 %vm930_vm1, %v12532_v2  ;;  %v10549_v55 = vpack.c.bf16 %v4182_v28, %v4178_v14  ;;  %v4171_v18 = vmax.f32 %v3699_v29, 0.0 }
 0x7cd   :  { %12533 = vst [vmem:[#allocation117_spill] sm:$0xff] %v10549_v55  ;;  %v12535_v55 = vld [vmem:[#allocation163_spill] sm:$0xff] }
 0x7ce   :  { %v3050_v52 = vpop.f32.mrf.mxu3 }
 0x7cf   :  { %v3051_v30 = vadd.f32 %v3050_v52, %v2721_v62 }
 0x7d0   :  { %v3700_v31 = vpop.f32.mrf.mxu2  ;;  %v2723_v60 = vpop.f32.mrf.mxu1 }
 0x7d1   :  { %v3701_v53 = vadd.f32 %v3700_v31, %v3371_v54  ;;  %v4186_v36 = vmax.f32 %v3051_v30, 0.0  ;;  %v12536_v54 = vld [vmem:[#allocation159_spill] sm:$0xff] }
 0x7d2   :  { %v3374_v9 = vpop.f32.mrf.mxu0 }
 0x7d3   :  { %v4175_v42 = vmax.f32 %v3701_v53, 0.0 }
 0x7d5   :  { %3413 = vmatmul.bf16.gmra.mxu0 %v12527_v44  ;;  %7343 = vmatmul.msk.bf16.gmra.mxu2 %vm930_vm1, %v12528_v32  ;;  %v10554_v5 = vpack.c.bf16 %v4175_v42, %v4171_v18 }
 0x7d6   :  { %v3052_v11 = vpop.f32.mrf.mxu3 }
 0x7d7   :  { %12534 = vst [vmem:[#allocation124_spill] sm:$0xff] %v10554_v5  ;;  %v3053_v59 = vadd.f32 %v3052_v11, %v2723_v60 }
 0x7d8   :  { %v3703_v28 = vpop.f32.mrf.mxu2  ;;  %v2726_v14 = vpop.f32.mrf.mxu1 }
 0x7d9   :  { %v4190_v56 = vmax.f32 %v3053_v59, 0.0  ;;  %v3704_v62 = vadd.f32 %v3703_v28, %v3374_v9 }
 0x7da   :  { %v3376_v52 = vpop.f32.mrf.mxu0 }
 0x7db   :  { %2765 = vmatmul.bf16.gmra.mxu1 %v12535_v55  ;;  %7281 = vmatmul.msk.bf16.gmra.mxu3 %vm930_vm1, %v12536_v54  ;;  %v10559_v29 = vpack.c.bf16 %v4190_v56, %v4186_v36  ;;  %v4179_v30 = vmax.f32 %v3704_v62, 0.0 }
 0x7dd   :  { %12537 = vst [vmem:[#allocation120_spill] sm:$0xff] %v10559_v29 }
 0x7de   :  { %v3055_v44 = vpop.f32.mrf.mxu3 }
 0x7df   :  { %v3056_v31 = vadd.f32 %v3055_v44, %v2726_v14 }
 0x7e0   :  { %v3705_v32 = vpop.f32.mrf.mxu2  ;;  %v2728_v53 = vpop.f32.mrf.mxu1 }
 0x7e1   :  { %v3706_v18 = vadd.f32 %v3705_v32, %v3376_v52  ;;  %v4194_v59 = vmax.f32 %v3056_v31, 0.0  ;;  %v12539_v52 = vld [vmem:[#allocation162_spill] sm:$0xff] }
 0x7e2   :  { %v3379_v42 = vpop.f32.mrf.mxu0 }
 0x7e3   :  { %v4183_v60 = vmax.f32 %v3706_v18, 0.0 }
 0x7e5   :  { %3418 = vmatmul.bf16.gmra.mxu0 %v12531_v27  ;;  %7344 = vmatmul.msk.bf16.gmra.mxu2 %vm930_vm1, %v12532_v2  ;;  %v10564_v9 = vpack.c.bf16 %v4183_v60, %v4179_v30 }
 0x7e6   :  { %v3057_v11 = vpop.f32.mrf.mxu3 }
 0x7e7   :  { %12538 = vst [vmem:[#allocation127_spill] sm:$0xff] %v10564_v9  ;;  %v3058_v28 = vadd.f32 %v3057_v11, %v2728_v53 }
 0x7e8   :  { %v3708_v56 = vpop.f32.mrf.mxu2  ;;  %v2731_v36 = vpop.f32.mrf.mxu1 }
 0x7e9   :  { %v4198_v5 = vmax.f32 %v3058_v28, 0.0  ;;  %v3709_v14 = vadd.f32 %v3708_v56, %v3379_v42 }
 0x7ea   :  { %v3381_v44 = vpop.f32.mrf.mxu0 }
 0x7eb   :  { %2770 = vmatmul.bf16.gmra.mxu1 %v9891_v51  ;;  %7282 = vmatmul.msk.bf16.gmra.mxu3 %vm930_vm1, %v12539_v52  ;;  %v10569_v62 = vpack.c.bf16 %v4198_v5, %v4194_v59  ;;  %v4187_v31 = vmax.f32 %v3709_v14, 0.0 }
 0x7ed   :  { %12540 = vst [vmem:[#allocation123_spill] sm:$0xff] %v10569_v62 }
 0x7ee   :  { %v3060_v27 = vpop.f32.mrf.mxu3 }
 0x7ef   :  { %v3061_v32 = vadd.f32 %v3060_v27, %v2731_v36 }
 0x7f0   :  { %v3710_v2 = vpop.f32.mrf.mxu2  ;;  %v2733_v18 = vpop.f32.mrf.mxu1 }
 0x7f1   :  { %v3711_v30 = vadd.f32 %v3710_v2, %v3381_v44  ;;  %v4202_v28 = vmax.f32 %v3061_v32, 0.0  ;;  %v12542_v44 = vld [vmem:[#allocation165_spill] sm:$0xff] }
 0x7f2   :  { %v3384_v60 = vpop.f32.mrf.mxu0 }
 0x7f3   :  { %v4191_v53 = vmax.f32 %v3711_v30, 0.0 }
 0x7f5   :  { %3423 = vmatmul.bf16.gmra.mxu0 %v12535_v55  ;;  %7345 = vmatmul.msk.bf16.gmra.mxu2 %vm930_vm1, %v12536_v54  ;;  %v10574_v42 = vpack.c.bf16 %v4191_v53, %v4187_v31 }
 0x7f6   :  { %v3062_v11 = vpop.f32.mrf.mxu3 }
 0x7f7   :  { %12541 = vst [vmem:[#allocation130_spill] sm:$0xff] %v10574_v42  ;;  %v3063_v56 = vadd.f32 %v3062_v11, %v2733_v18  ;;  %v7620_v11 = vld [vmem:[%s11947_s2 + $0x1c] sm:$0xf0] }
 0x7f8   :  { %v3713_v5 = vpop.f32.mrf.mxu2  ;;  %v2736_v59 = vpop.f32.mrf.mxu1 }
 0x7f9   :  { %v4206_v9 = vmax.f32 %v3063_v56, 0.0  ;;  %v3714_v36 = vadd.f32 %v3713_v5, %v3384_v60  ;;  %v7350_v60 = vld [vmem:[%s11947_s2] sm:$0xf] }
 0x7fa   :  { %v3386_v27 = vpop.f32.mrf.mxu0 }
 0x7fb   :  { %2775 = vmatmul.bf16.gmra.mxu1 %v9910_v22  ;;  %7283 = vmatmul.msk.bf16.gmra.mxu3 %vm930_vm1, %v12542_v44  ;;  %v10579_v14 = vpack.c.bf16 %v4206_v9, %v4202_v28  ;;  %v4195_v32 = vmax.f32 %v3714_v36, 0.0  ;;  %v7616_v9 = vld [vmem:[%s11947_s2 + $0x4] sm:$0xf] }
 0x7fc   :  { %v7352_v28 = vld [vmem:[%s11947_s2 + $0x20] sm:$0xf0] }
 0x7fd   :  { %12543 = vst [vmem:[#allocation126_spill] sm:$0xff] %v10579_v14 }
 0x7fe   :  { %v3065_v55 = vpop.f32.mrf.mxu3 }
 0x7ff   :  { %v3066_v2 = vadd.f32 %v3065_v55, %v2736_v59  ;;  %v10600_v55 = vor.u32 %v7616_v9, %v7352_v28 }
 0x800   :  { %v3715_v54 = vpop.f32.mrf.mxu2  ;;  %v2738_v30 = vpop.f32.mrf.mxu1 }
 0x801   :  { %v3716_v31 = vadd.f32 %v3715_v54, %v3386_v27  ;;  %v4210_v59 = vmax.f32 %v3066_v2, 0.0  ;;  %v10598_v27 = vor.u32 %v7620_v11, %v7350_v60  ;;  %v12549_v60 = vld [vmem:[#allocation50_spill] sm:$0xff] }
 0x802   :  { %v3389_v53 = vpop.f32.mrf.mxu0 }
 0x803   :  { %v4199_v18 = vmax.f32 %v3716_v31, 0.0 }
 0x805   :  { %3428 = vmatmul.bf16.gmra.mxu0 %v9891_v51  ;;  %7346 = vmatmul.msk.bf16.gmra.mxu2 %vm930_vm1, %v12539_v52  ;;  %v10596_v56 = vpack.c.bf16 %v4199_v18, %v4195_v32  ;;  %v12546_v51 = vld [vmem:[#allocation29_spill] sm:$0xff]  ;;  %v12548_v18 = vld [vmem:[#allocation26_spill] sm:$0xff] }
 0x806   :  { %v3067_v5 = vpop.f32.mrf.mxu3  ;;  %v12547_v52 = vld [vmem:[#allocation53_spill] sm:$0xff] }
 0x807   :  { %12544 = vst [vmem:[#allocation133_spill] sm:$0xff] %v10596_v56  ;;  %v3068_v36 = vadd.f32 %v3067_v5, %v2738_v30  ;;  %v7382_v5 = vld [vmem:[%s11947_s2 + $0x40] sm:$0xf] }
 0x808   :  { %v3718_v54 = vpop.f32.mrf.mxu2  ;;  %v2741_v31 = vpop.f32.mrf.mxu1 }
 0x809   :  { %v4214_v42 = vmax.f32 %v3068_v36, 0.0  ;;  %v3719_v29 = vadd.f32 %v3718_v54, %v3389_v53  ;;  %v12551_v36 = vld [vmem:[#allocation47_spill] sm:$0xff] }
 0x80a   :  { %v3391_v62 = vpop.f32.mrf.mxu0  ;;  %v7628_v54 = vld [vmem:[%s11947_s2 + $0x5c] sm:$0xf0] }
 0x80b   :  { %v10602_v14 = vpack.c.bf16 %v4214_v42, %v4210_v59  ;;  %4724 = vmatmul.bf16.vlgmr.msra.gmra.mxu1 %v10598_v27  ;;  %4748 = vmatmul.bf16.vlgmr.msra.gmra.mxu3 %v10600_v55  ;;  %v4203_v42 = vmax.f32 %v3719_v29, 0.0  ;;  %v12550_v59 = vld [vmem:[#allocation23_spill] sm:$0xff] }
 0x80c   :  { %4908 = vmatpush.bf16.msra.mxu1 %v12546_v51  ;;  %4932 = vmatpush.bf16.msra.mxu3 %v12547_v52  ;;  %v7384_v29 = vld [vmem:[%s11947_s2 + $0x60] sm:$0xf0] }
 0x80d   :  { %12545 = vst [vmem:[#allocation129_spill] sm:$0xff] %v10602_v14 }
 0x80e   :  { %v3070_v2 = vpop.f32.mrf.mxu3 }
 0x80f   :  { %v3071_v30 = vadd.f32 %v3070_v2, %v2741_v31  ;;  %v7624_v31 = vld [vmem:[%s11947_s2 + $0x44] sm:$0xf] }
 0x810   :  { %v3720_v32 = vpop.f32.mrf.mxu2  ;;  %4909 = vmatpush.bf16.msra.mxu1 %v12548_v18  ;;  %4933 = vmatpush.bf16.msra.mxu3 %v12549_v60  ;;  %v2743_v11 = vpop.f32.mrf.mxu1  ;;  %v10631_v18 = vor.u32 %v7624_v31, %v7384_v29  ;;  %v12558_v29 = vld [vmem:[#allocation14_spill] sm:$0xff] }
 0x811   :  { %v3721_v53 = vadd.f32 %v3720_v32, %v3391_v62  ;;  %v4218_v52 = vmax.f32 %v3071_v30, 0.0  ;;  %v10629_v32 = vor.u32 %v7628_v54, %v7382_v5  ;;  %v12556_v30 = vld [vmem:[#allocation17_spill] sm:$0xff]  ;;  %v7617_v5 = vld [vmem:[%s11947_s2 + $0xc] sm:$0xf] }
 0x812   :  { %v3394_v9 = vpop.f32.mrf.mxu0 }
 0x813   :  { %v4207_v28 = vmax.f32 %v3721_v53, 0.0  ;;  %v12553_v53 = vld [vmem:[#allocation20_spill] sm:$0xff] }
 0x814   :  { %4910 = vmatpush.bf16.msra.mxu1 %v12550_v59  ;;  %4934 = vmatpush.bf16.msra.mxu3 %v12551_v36  ;;  %v12554_v59 = vld [vmem:[#allocation44_spill] sm:$0xff] }
 0x815   :  { %3433 = vmatmul.bf16.gmra.mxu0 %v9910_v22  ;;  %7347 = vmatmul.msk.bf16.gmra.mxu2 %vm930_vm1, %v12542_v44  ;;  %v10627_v62 = vpack.c.bf16 %v4207_v28, %v4203_v42  ;;  %v7358_v42 = vld [vmem:[%s11947_s2 + $0x8] sm:$0xf] }
 0x816   :  { %v3072_v51 = vpop.f32.mrf.mxu3 }
 0x817   :  { %12552 = vst [vmem:[#allocation136_spill] sm:$0xff] %v10627_v62  ;;  %v3073_v2 = vadd.f32 %v3072_v51, %v2743_v11  ;;  %v12557_v11 = vld [vmem:[#allocation41_spill] sm:$0xff]  ;;  %v12559_v51 = vld [vmem:[#allocation38_spill] sm:$0xff]  ;;  %v7414_v62 = vld [vmem:[%s11947_s2 + $0x80] sm:$0xf] }
 0x818   :  { %v3723_v60 = vpop.f32.mrf.mxu2  ;;  %4911 = vmatpush.bf16.msra.mxu1 %v12553_v53  ;;  %4935 = vmatpush.bf16.msra.mxu3 %v12554_v59  ;;  %v2746_v36 = vpop.f32.mrf.mxu1 }
 0x819   :  { %v4222_v56 = vmax.f32 %v3073_v2, 0.0  ;;  %v3724_v22 = vadd.f32 %v3723_v60, %v3394_v9  ;;  %v7621_v9 = vld [vmem:[%s11947_s2 + $0x24] sm:$0xf0] }
 0x81a   :  { %v3396_v14 = vpop.f32.mrf.mxu0  ;;  %v10655_v60 = vor.u32 %v7621_v9, %v7358_v42  ;;  %v12564_v9 = vld [vmem:[#allocation101_spill] sm:$0xff] }
 0x81b   :  { %4729 = vmatmul.bf16.gmra.mxu1 %v10629_v32  ;;  %4753 = vmatmul.bf16.gmra.mxu3 %v10631_v18  ;;  %v10637_v44 = vpack.c.bf16 %v4222_v56, %v4218_v52  ;;  %v7360_v56 = vld [vmem:[%s11947_s2 + $0x28] sm:$0xf0] }
 0x81c   :  { %4912 = vmatpush.bf16.msra.mxu1 %v12556_v30  ;;  %4936 = vmatpush.bf16.msra.mxu3 %v12557_v11  ;;  %v10657_v53 = vor.u32 %v7617_v5, %v7360_v56  ;;  %v4211_v30 = vmax.f32 %v3724_v22, 0.0  ;;  %v7416_v22 = vld [vmem:[%s11947_s2 + $0xa0] sm:$0xf0] }
 0x81d   :  { %12555 = vst [vmem:[#allocation132_spill] sm:$0xff] %v10637_v44  ;;  %v12560_v44 = vld [vmem:[#allocation11_spill] sm:$0xff] }
 0x81e   :  { %v3075_v28 = vpop.f32.mrf.mxu3 }
 0x81f   :  { %v3076_v54 = vadd.f32 %v3075_v28, %v2746_v36  ;;  %v12561_v36 = vld [vmem:[#allocation35_spill] sm:$0xff] }
 0x820   :  { %v3725_v31 = vpop.f32.mrf.mxu2  ;;  %4913 = vmatpush.bf16.msra.mxu1 %v12558_v29  ;;  %4937 = vmatpush.bf16.msra.mxu3 %v12559_v51  ;;  %v2748_v52 = vpop.f32.mrf.mxu1  ;;  %v7636_v28 = vld [vmem:[%s11947_s2 + $0x9c] sm:$0xf0] }
 0x821   :  { %v3726_v2 = vadd.f32 %v3725_v31, %v3396_v14  ;;  %v7632_v14 = vld [vmem:[%s11947_s2 + $0x84] sm:$0xf]  ;;  %v4226_v56 = vmax.f32 %v3076_v54, 0.0  ;;  %v10679_v29 = vor.u32 %v7636_v28, %v7414_v62  ;;  %v12567_v62 = vld [vmem:[#allocation74_spill] sm:$0xff] }
 0x822   :  { %v3399_v59 = vpop.f32.mrf.mxu0  ;;  %v10681_v51 = vor.u32 %v7632_v14, %v7416_v22  ;;  %v7390_v22 = vld [vmem:[%s11947_s2 + $0x48] sm:$0xf] }
 0x823   :  { %v4215_v11 = vmax.f32 %v3726_v2, 0.0  ;;  %v7911_v2 = vmov 0  }
 0x824   :  { %4914 = vmatpush.bf16.msra.mxu1 %v12560_v44  ;;  %4938 = vmatpush.bf16.msra.mxu3 %v12561_v36  ;;  %v12563_v44 = vld [vmem:[#allocation77_spill] sm:$0xff]  ;;  %v12566_v36 = vld [vmem:[#allocation32_spill] sm:$0xff] }
 0x825   :  { %v10673_v42 = vpack.c.bf16 %v4215_v11, %v4211_v30  ;;  %4772 = vmatmul.bf16.vlgmr.msra.gmra.mxu0 %v10655_v60  ;;  %4796 = vmatmul.bf16.vlgmr.msra.gmra.mxu2 %v10657_v53  ;;  %v12565_v11 = vld [vmem:[#allocation8_spill] sm:$0xff] }
 0x826   :  { %4956 = vmatpush.bf16.msra.mxu0 %v12563_v44  ;;  %4980 = vmatpush.bf16.msra.mxu2 %v12564_v9  ;;  %v3077_v5 = vpop.f32.mrf.mxu3  ;;  %v4564_v44 = vld [vmem:[%s11948_s3 + $0x20] sm:$0xff] }
 0x827   :  { %12562 = vst [vmem:[#allocation139_spill] sm:$0xff] %v10673_v42  ;;  %v3078_v31 = vadd.f32 %v3077_v5, %v2748_v52  ;;  %7646 = vset.pattern.permute.xlu0 %v7911_v2  ;;  %7648 = vset.pattern.permute.xlu2 %v7911_v2  ;;  %v12568_v52 = vld [vmem:[#allocation98_spill] sm:$0xff]  ;;  %v12570_v5 = vld [vmem:[#allocation71_spill] sm:$0xff] }
 0x828   :  { %v3728_v30 = vpop.f32.mrf.mxu2  ;;  %4915 = vmatpush.bf16.msra.mxu1 %v12565_v11  ;;  %4939 = vmatpush.bf16.msra.mxu3 %v12566_v36  ;;  %v2751_v42 = vpop.f32.mrf.mxu1 }
 0x829   :  { %v4230_v9 = vmax.f32 %v3078_v31, 0.0  ;;  %v3729_v54 = vadd.f32 %v3728_v30, %v3399_v59  ;;  %4588 = vperm.xlu0 %7646, %v4564_v44   ;;  %7647 = vset.pattern.permute.xlu1 %v7911_v2  ;;  %v12571_v59 = vld [vmem:[#allocation95_spill] sm:$0xff]  ;;  %v7629_v2 = vld [vmem:[%s11947_s2 + $0x64] sm:$0xf0]  ;;  %v7625_v30 = vld [vmem:[%s11947_s2 + $0x4c] sm:$0xf] }
 0x82a   :  { %4957 = vmatpush.bf16.msra.mxu0 %v12567_v62  ;;  %4981 = vmatpush.bf16.msra.mxu2 %v12568_v52  ;;  %v3401_v28 = vpop.f32.mrf.mxu0  ;;  %v10711_v52 = vor.u32 %v7629_v2, %v7390_v22  ;;  %v7618_v22 = vld [vmem:[%s11947_s2 + $0x14] sm:$0xf] }
 0x82b   :  { %4734 = vmatmul.bf16.gmra.mxu1 %v10679_v29  ;;  %4758 = vmatmul.bf16.gmra.mxu3 %v10681_v51  ;;  %v10692_v14 = vpack.c.bf16 %v4230_v9, %v4226_v56  ;;  %v7392_v56 = vld [vmem:[%s11947_s2 + $0x68] sm:$0xf0]  ;;  %v4219_v10 = vmax.f32 %v3729_v54, 0.0  ;;  %v12578_v2 = vld [vmem:[#allocation89_spill] sm:$0xff] }
 0x82c   :  { %v4565_v9 = vld [vmem:[%s11948_s3 + $0x28] sm:$0xff]  ;;  %12572 = vst [vmem:[#allocation142_spill] sm:$0xff] %v10711_v52 }
 0x82d   :  { %12569 = vst [vmem:[#allocation135_spill] sm:$0xff] %v10692_v14  ;;  %v12575_v14 = vld [vmem:[#allocation92_spill] sm:$0xff] }
 0x82e   :  { %4958 = vmatpush.bf16.msra.mxu0 %v12570_v5  ;;  %4982 = vmatpush.bf16.msra.mxu2 %v12571_v59  ;;  %v3080_v31 = vpop.f32.mrf.mxu3  ;;  %v10713_v5 = vor.u32 %v7625_v30, %v7392_v56  ;;  %v12574_v59 = vld [vmem:[#allocation68_spill] sm:$0xff] }
 0x82f   :  { %v3081_v11 = vadd.f32 %v3080_v31, %v2751_v42  ;;  %v7366_v42 = vld [vmem:[%s11947_s2 + $0x10] sm:$0xf]  ;;  %v7368_v31 = vld [vmem:[%s11947_s2 + $0x30] sm:$0xf0] }
 0x830   :  { %v3730_v36 = vpop.f32.mrf.mxu2  ;;  %v2753_v44 = vpop.f32.mrf.mxu1  ;;  %12573 = vst [vmem:[#allocation138_spill] sm:$0xff] %v10713_v5 }
 0x831   :  { %v3731_v62 = vadd.f32 %v3730_v36, %v3401_v28  ;;  %4593 = vperm.xlu0 %7646, %v4565_v9   ;;  %v7622_v28 = vld [vmem:[%s11947_s2 + $0x2c] sm:$0xf0]  ;;  %v4234_v56 = vmax.f32 %v3081_v11, 0.0 }
 0x832   :  { %4959 = vmatpush.bf16.msra.mxu0 %v12574_v59  ;;  %4983 = vmatpush.bf16.msra.mxu2 %v12575_v14  ;;  %v3404_v15 = vpop.f32.mrf.mxu0  ;;  %v12577_v14 = vld [vmem:[#allocation65_spill] sm:$0xff]  ;;  %v10735_v9 = vor.u32 %v7622_v28, %v7366_v42  ;;  %v7422_v42 = vld [vmem:[%s11947_s2 + $0x88] sm:$0xf] }
 0x833   :  { %v4223_v33 = vmax.f32 %v3731_v62, 0.0  ;;  %v10737_v62 = vor.u32 %v7618_v22, %v7368_v31  ;;  %v12584_v11 = vld [vmem:[#allocation125_spill] sm:$0xff]  ;;  %v7637_v28 = vld [vmem:[%s11947_s2 + $0xa4] sm:$0xf0]  ;;  %v7424_v22 = vld [vmem:[%s11947_s2 + $0xa8] sm:$0xf0] }
 0x834   :  { %12579 = vst [vmem:[#allocation141_spill] sm:$0xff] %v10735_v9 }
 0x835   :  { %4777 = vmatmul.bf16.gmra.mxu0 %v10711_v52  ;;  %4801 = vmatmul.bf16.gmra.mxu2 %v10713_v5  ;;  %v10731_v54 = vpack.c.bf16 %v4223_v33, %v4219_v10  ;;  %12580 = vst [vmem:[#allocation148_spill] sm:$0xff] %v10737_v62  ;;  %v12581_v52 = vld [vmem:[#allocation62_spill] sm:$0xff] }
 0x836   :  { %4960 = vmatpush.bf16.msra.mxu0 %v12577_v14  ;;  %4984 = vmatpush.bf16.msra.mxu2 %v12578_v2  ;;  %v3082_v30 = vpop.f32.mrf.mxu3  ;;  %v12582_v5 = vld [vmem:[#allocation86_spill] sm:$0xff] }
 0x837   :  { %12576 = vst [vmem:[#allocation145_spill] sm:$0xff] %v10731_v54  ;;  %v3083_v36 = vadd.f32 %v3082_v30, %v2753_v44  ;;  %v12585_v44 = vld [vmem:[#allocation149_spill] sm:$0xff]  ;;  %v12588_v2 = vld [vmem:[#allocation122_spill] sm:$0xff] }
 0x838   :  { %v3733_v59 = vpop.f32.mrf.mxu2  ;;  %v2756_v1 = vpop.f32.mrf.mxu1  ;;  %v12589_v30 = vld [vmem:[#allocation146_spill] sm:$0xff] }
 0x839   :  { %v4238_v45 = vmax.f32 %v3083_v36, 0.0  ;;  %v3734_v49 = vadd.f32 %v3733_v59, %v3404_v15  ;;  %v12586_v15 = vld [vmem:[#allocation59_spill] sm:$0xff]  ;;  %v10763_v59 = vor.u32 %v7637_v28, %v7422_v42  ;;  %v7626_v42 = vld [vmem:[%s11947_s2 + $0x54] sm:$0xf] }
 0x83a   :  { %4961 = vmatpush.bf16.msra.mxu0 %v12581_v52  ;;  %4985 = vmatpush.bf16.msra.mxu2 %v12582_v5  ;;  %v3406_v10 = vpop.f32.mrf.mxu0  ;;  %v12587_v52 = vld [vmem:[#allocation83_spill] sm:$0xff] }
 0x83b   :  { %4820 = vmatmul.bf16.vlgmr.msrb.gmra.mxu1 %v10735_v9  ;;  %4844 = vmatmul.bf16.vlgmr.msrb.gmra.mxu3 %v10737_v62  ;;  %v10743_v33 = vpack.c.bf16 %v4238_v45, %v4234_v56  ;;  %v7633_v45 = vld [vmem:[%s11947_s2 + $0x8c] sm:$0xf]  ;;  %12590 = vst [vmem:[#allocation151_spill] sm:$0xff] %v10763_v59  ;;  %v4227_v54 = vmax.f32 %v3734_v49, 0.0  ;;  %v7400_v49 = vld [vmem:[%s11947_s2 + $0x70] sm:$0xf0] }
 0x83c   :  { %5004 = vmatpush.bf16.msrb.mxu1 %v12584_v11  ;;  %5028 = vmatpush.bf16.msrb.mxu3 %v12585_v44  ;;  %v10765_v11 = vor.u32 %v7633_v45, %v7424_v22  ;;  %v12591_v44 = vld [vmem:[#allocation56_spill] sm:$0xff] }
 0x83d   :  { %12583 = vst [vmem:[#allocation144_spill] sm:$0xff] %v10743_v33 }
 0x83e   :  { %4962 = vmatpush.bf16.msra.mxu0 %v12586_v15  ;;  %4986 = vmatpush.bf16.msra.mxu2 %v12587_v52  ;;  %v3085_v5 = vpop.f32.mrf.mxu3  ;;  %v12592_v15 = vld [vmem:[#allocation80_spill] sm:$0xff] }
 0x83f   :  { %v3086_v31 = vadd.f32 %v3085_v5, %v2756_v1  ;;  %v7398_v1 = vld [vmem:[%s11947_s2 + $0x50] sm:$0xf]  ;;  %v12593_v5 = vld [vmem:[#allocation119_spill] sm:$0xff] }
 0x840   :  { %v3735_v14 = vpop.f32.mrf.mxu2  ;;  %5005 = vmatpush.bf16.msrb.mxu1 %v12588_v2  ;;  %5029 = vmatpush.bf16.msrb.mxu3 %v12589_v30  ;;  %v2758_v56 = vpop.f32.mrf.mxu1  ;;  %v12594_v2 = vld [vmem:[#allocation143_spill] sm:$0xff] }
 0x841   :  { %v3736_v36 = vadd.f32 %v3735_v14, %v3406_v10  ;;  %v7630_v10 = vld [vmem:[%s11947_s2 + $0x6c] sm:$0xf0]  ;;  %v4242_v22 = vmax.f32 %v3086_v31, 0.0 }
 0x842   :  { %4963 = vmatpush.bf16.msra.mxu0 %v12591_v44  ;;  %4987 = vmatpush.bf16.msra.mxu2 %v12592_v15  ;;  %v3409_v52 = vpop.f32.mrf.mxu0  ;;  %v10787_v30 = vor.u32 %v7630_v10, %v7398_v1  ;;  %v12597_v15 = vld [vmem:[#allocation116_spill] sm:$0xff]  ;;  %v12601_v31 = vld [vmem:[#allocation137_spill] sm:$0xff]  ;;  %v7619_v10 = vld [vmem:[%s11947_s2 + $0x1c] sm:$0xf] }
 0x843   :  { %v4231_v33 = vmax.f32 %v3736_v36, 0.0  ;;  %v10789_v36 = vor.u32 %v7626_v42, %v7400_v49 }
 0x844   :  { %5006 = vmatpush.bf16.msrb.mxu1 %v12593_v5  ;;  %5030 = vmatpush.bf16.msrb.mxu3 %v12594_v2  ;;  %v12598_v5 = vld [vmem:[#allocation140_spill] sm:$0xff] }
 0x845   :  { %4782 = vmatmul.bf16.gmra.mxu0 %v10763_v59  ;;  %4806 = vmatmul.bf16.gmra.mxu2 %v10765_v11  ;;  %v10785_v28 = vpack.c.bf16 %v4231_v33, %v4227_v54  ;;  %12596 = vst [vmem:[#allocation154_spill] sm:$0xff] %v10789_v36  ;;  %v12600_v33 = vld [vmem:[#allocation113_spill] sm:$0xff] }
 0x846   :  { %v3087_v45 = vpop.f32.mrf.mxu3 }
 0x847   :  { %12595 = vst [vmem:[#allocation147_spill] sm:$0xff] %v10785_v28  ;;  %v3088_v14 = vadd.f32 %v3087_v45, %v2758_v56  ;;  %v7374_v56 = vld [vmem:[%s11947_s2 + $0x18] sm:$0xf] }
 0x848   :  { %v3738_v44 = vpop.f32.mrf.mxu2  ;;  %5007 = vmatpush.bf16.msrb.mxu1 %v12597_v15  ;;  %5031 = vmatpush.bf16.msrb.mxu3 %v12598_v5  ;;  %v2761_v2 = vpop.f32.mrf.mxu1  ;;  %v12602_v45 = vld [vmem:[#allocation110_spill] sm:$0xff] }
 0x849   :  { %v4246_v62 = vmax.f32 %v3088_v14, 0.0  ;;  %v3739_v9 = vadd.f32 %v3738_v44, %v3409_v52  ;;  %v7623_v52 = vld [vmem:[%s11947_s2 + $0x34] sm:$0xf0] }
 0x84a   :  { %v3411_v59 = vpop.f32.mrf.mxu0  ;;  %v10813_v15 = vor.u32 %v7623_v52, %v7374_v56 }
 0x84b   :  { %4825 = vmatmul.bf16.gmra.mxu1 %v10787_v30  ;;  %4849 = vmatmul.bf16.gmra.mxu3 %v10789_v36  ;;  %v10795_v54 = vpack.c.bf16 %v4246_v62, %v4242_v22  ;;  %v7376_v62 = vld [vmem:[%s11947_s2 + $0x38] sm:$0xf0]  ;;  %v12605_v36 = vld [vmem:[#allocation107_spill] sm:$0xff] }
 0x84c   :  { %5008 = vmatpush.bf16.msrb.mxu1 %v12600_v33  ;;  %5032 = vmatpush.bf16.msrb.mxu3 %v12601_v31  ;;  %v12603_v22 = vld [vmem:[#allocation134_spill] sm:$0xff]  ;;  %v10815_v5 = vor.u32 %v7619_v10, %v7376_v62  ;;  %v4235_v31 = vmax.f32 %v3739_v9, 0.0  ;;  %v7432_v9 = vld [vmem:[%s11947_s2 + $0xb0] sm:$0xf0] }
 0x84d   :  { %12599 = vst [vmem:[#allocation150_spill] sm:$0xff] %v10795_v54  ;;  %v7430_v54 = vld [vmem:[%s11947_s2 + $0x90] sm:$0xf] }
 0x84e   :  { %v3090_v1 = vpop.f32.mrf.mxu3  ;;  %12604 = vst [vmem:[#allocation157_spill] sm:$0xff] %v10815_v5 }
 0x84f   :  { %v3091_v42 = vadd.f32 %v3090_v1, %v2761_v2  ;;  %v12606_v2 = vld [vmem:[#allocation131_spill] sm:$0xff]  ;;  %v7638_v1 = vld [vmem:[%s11947_s2 + $0xac] sm:$0xf0] }
 0x850   :  { %v3740_v49 = vpop.f32.mrf.mxu2  ;;  %5009 = vmatpush.bf16.msrb.mxu1 %v12602_v45  ;;  %5033 = vmatpush.bf16.msrb.mxu3 %v12603_v22  ;;  %v2763_v14 = vpop.f32.mrf.mxu1  ;;  %v10837_v62 = vor.u32 %v7638_v1, %v7430_v54  ;;  %v12607_v22 = vld [vmem:[#allocation104_spill] sm:$0xff]  ;;  %v7406_v54 = vld [vmem:[%s11947_s2 + $0x58] sm:$0xf] }
 0x851   :  { %v3741_v44 = vadd.f32 %v3740_v49, %v3411_v59  ;;  %v7634_v59 = vld [vmem:[%s11947_s2 + $0x94] sm:$0xf]  ;;  %v4250_v52 = vmax.f32 %v3091_v42, 0.0 }
 0x852   :  { %v3414_v33 = vpop.f32.mrf.mxu0  ;;  %v10839_v49 = vor.u32 %v7634_v59, %v7432_v9  ;;  %v12609_v59 = vld [vmem:[#allocation164_spill] sm:$0xff] }
 0x853   :  { %v4239_v28 = vmax.f32 %v3741_v44, 0.0  ;;  %v12608_v44 = vld [vmem:[#allocation128_spill] sm:$0xff] }
 0x854   :  { %5010 = vmatpush.bf16.msrb.mxu1 %v12605_v36  ;;  %5034 = vmatpush.bf16.msrb.mxu3 %v12606_v2 }
 0x855   :  { %4868 = vmatmul.bf16.vlgmr.msrb.gmra.mxu0 %v10813_v15  ;;  %4892 = vmatmul.bf16.vlgmr.msrb.gmra.mxu2 %v10815_v5  ;;  %v10833_v56 = vpack.c.bf16 %v4239_v28, %v4235_v31 }
 0x856   :  { %5052 = vmatpush.bf16.msrb.mxu0 %v9931_v7  ;;  %5076 = vmatpush.bf16.msrb.mxu2 %v10036_v39  ;;  %v3092_v36 = vpop.f32.mrf.mxu3 }
 0x857   :  { %v3093_v10 = vadd.f32 %v3092_v36, %v2763_v14  ;;  %v7408_v14 = vld [vmem:[%s11947_s2 + $0x78] sm:$0xf0] }
 0x858   :  { %v3743_v45 = vpop.f32.mrf.mxu2  ;;  %5011 = vmatpush.bf16.msrb.mxu1 %v12607_v22  ;;  %5035 = vmatpush.bf16.msrb.mxu3 %v12608_v44  ;;  %v2766_v2 = vpop.f32.mrf.mxu1 }
 0x859   :  { %v4254_v5 = vmax.f32 %v3093_v10, 0.0  ;;  %v3744_v28 = vadd.f32 %v3743_v45, %v3414_v33  ;;  %v12610_v45 = vld [vmem:[#allocation161_spill] sm:$0xff] }
 0x85a   :  { %5053 = vmatpush.bf16.msrb.mxu0 %v9914_v3  ;;  %5077 = vmatpush.bf16.msrb.mxu2 %v10020_v41  ;;  %v3416_v7 = vpop.f32.mrf.mxu0  ;;  %v7631_v3 = vld [vmem:[%s11947_s2 + $0x74] sm:$0xf0]  ;;  %v7627_v41 = vld [vmem:[%s11947_s2 + $0x5c] sm:$0xf] }
 0x85b   :  { %4830 = vmatmul.bf16.gmra.mxu1 %v10837_v62  ;;  %4854 = vmatmul.bf16.gmra.mxu3 %v10839_v49  ;;  %v10847_v39 = vpack.c.bf16 %v4254_v5, %v4250_v52  ;;  %v10869_v1 = vor.u32 %v7627_v41, %v7408_v14  ;;  %v4243_v36 = vmax.f32 %v3744_v28, 0.0 }
 0x85e   :  { %5054 = vmatpush.bf16.msrb.mxu0 %v9895_v58  ;;  %5078 = vmatpush.bf16.msrb.mxu2 %v10012_v4  ;;  %v3095_v42 = vpop.f32.mrf.mxu3  ;;  %v10867_v4 = vor.u32 %v7631_v3, %v7406_v54  ;;  %v12612_v54 = vld [vmem:[#allocation155_spill] sm:$0xff] }
 0x85f   :  { %v10863_v5 = vadd.f32 %v3095_v42, %v2766_v2 }
 0x860   :  { %v3745_v33 = vpop.f32.mrf.mxu2  ;;  %v10865_v31 = vpop.f32.mrf.mxu1 }
 0x861   :  { %v3746_v58 = vadd.f32 %v3745_v33, %v3416_v7 }
 0x862   :  { %5055 = vmatpush.bf16.msrb.mxu0 %v12609_v59  ;;  %5079 = vmatpush.bf16.msrb.mxu2 %v10004_v13  ;;  %v3419_v9 = vpop.f32.mrf.mxu0  ;;  %v12611_v13 = vld [vmem:[#allocation158_spill] sm:$0xff] }
 0x863   :  { %v4247_v52 = vmax.f32 %v3746_v58, 0.0  ;;  %v12613_v58 = vld [vmem:[#allocation152_spill] sm:$0xff] }
 0x865   :  { %4873 = vmatmul.bf16.gmra.mxu0 %v10867_v4  ;;  %4897 = vmatmul.bf16.gmra.mxu2 %v10869_v1  ;;  %v10875_v10 = vpack.c.bf16 %v4247_v52, %v4243_v36 }
 0x866   :  { %5056 = vmatpush.bf16.msrb.mxu0 %v12610_v45  ;;  %5080 = vmatpush.bf16.msrb.mxu2 %v9990_v61  ;;  %v10879_v22 = vpop.f32.mrf.mxu3  ;;  %v7438_v61 = vld [vmem:[%s11947_s2 + $0x98] sm:$0xf] }
 0x868   :  { %v3748_v44 = vpop.f32.mrf.mxu2  ;;  %v10881_v2 = vpop.f32.mrf.mxu1 }
 0x869   :  { %v3749_v7 = vadd.f32 %v3748_v44, %v3419_v9 }
 0x86a   :  { %5057 = vmatpush.bf16.msrb.mxu0 %v12611_v13  ;;  %5081 = vmatpush.bf16.msrb.mxu2 %v9974_v48  ;;  %v3421_v28 = vpop.f32.mrf.mxu0  ;;  %v7639_v48 = vld [vmem:[%s11947_s2 + $0xb4] sm:$0xf0] }
 0x86b   :  { %4916 = vmatmul.bf16.vlgmr.msra.gmra.mxu1 %v10598_v27  ;;  %4940 = vmatmul.bf16.vlgmr.msra.gmra.mxu3 %v10600_v55  ;;  %v10909_v14 = vor.u32 %v7639_v48, %v7438_v61  ;;  %v4251_v9 = vmax.f32 %v3749_v7, 0.0  ;;  %v12614_v61 = vld [vmem:[#allocation33_spill] sm:$0xff] }
 0x86c   :  { %5100 = vmatpush.bf16.msra.mxu1 %v10106_v25  ;;  %5124 = vmatpush.bf16.msra.mxu3 %v10186_v24  ;;  %v7635_v25 = vld [vmem:[%s11947_s2 + $0x9c] sm:$0xf] }
 0x86d   :  { %v7440_v24 = vld [vmem:[%s11947_s2 + $0xb8] sm:$0xf0] }
 0x86e   :  { %5058 = vmatpush.bf16.msrb.mxu0 %v12612_v54  ;;  %5082 = vmatpush.bf16.msrb.mxu2 %v9962_v6  ;;  %v10894_v42 = vpop.f32.mrf.mxu3  ;;  %v10911_v33 = vor.u32 %v7635_v25, %v7440_v24  ;;  %v12616_v25 = vld [vmem:[#allocation142_spill] sm:$0xff] }
 0x86f   :  { %v12617_v24 = vld [vmem:[#allocation138_spill] sm:$0xff] }
 0x870   :  { %v3750_v3 = vpop.f32.mrf.mxu2  ;;  %5101 = vmatpush.bf16.msra.mxu1 %v10099_v38  ;;  %5125 = vmatpush.bf16.msra.mxu3 %v10179_v57  ;;  %v10907_v6 = vpop.f32.mrf.mxu1 }
 0x871   :  { %v3751_v41 = vadd.f32 %v3750_v3, %v3421_v28  ;;  %v12619_v3 = vld [vmem:[#allocation55_spill] sm:$0xff] }
 0x872   :  { %5059 = vmatpush.bf16.msrb.mxu0 %v12613_v58  ;;  %5083 = vmatpush.bf16.msrb.mxu2 %v9948_v0  ;;  %v3424_v59 = vpop.f32.mrf.mxu0 }
 0x873   :  { %v4255_v36 = vmax.f32 %v3751_v41, 0.0 }
 0x874   :  { %5102 = vmatpush.bf16.msra.mxu1 %v10089_v35  ;;  %5126 = vmatpush.bf16.msra.mxu3 %v10169_v50 }
 0x875   :  { %4878 = vmatmul.bf16.gmra.mxu0 %v10909_v14  ;;  %4902 = vmatmul.bf16.gmra.mxu2 %v10911_v33  ;;  %v10919_v38 = vpack.c.bf16 %v4255_v36, %v4251_v9  ;;  %v12620_v36 = vld [vmem:[#allocation27_spill] sm:$0xff] }
 0x876   :  { %v10921_v57 = vpop.f32.mrf.mxu3 }
 0x878   :  { %v3753_v52 = vpop.f32.mrf.mxu2  ;;  %5103 = vmatpush.bf16.msra.mxu1 %v10079_v20  ;;  %5127 = vmatpush.bf16.msra.mxu3 %v10159_v34  ;;  %v10925_v0 = vpop.f32.mrf.mxu1 }
 0x879   :  { %v3754_v45 = vadd.f32 %v3753_v52, %v3424_v59  ;;  %v12621_v52 = vld [vmem:[#allocation52_spill] sm:$0xff] }
 0x87a   :  { %v3426_v44 = vpop.f32.mrf.mxu0 }
 0x87b   :  { %4921 = vmatmul.bf16.gmra.mxu1 %v10629_v32  ;;  %4945 = vmatmul.bf16.gmra.mxu3 %v10631_v18  ;;  %v4259_v13 = vmax.f32 %v3754_v45, 0.0 }
 0x87c   :  { %5104 = vmatpush.bf16.msra.mxu1 %v10069_v26  ;;  %5128 = vmatpush.bf16.msra.mxu3 %v10149_v47 }
 0x87e   :  { %v10931_v35 = vpop.f32.mrf.mxu3 }
 0x880   :  { %v3755_v50 = vpop.f32.mrf.mxu2  ;;  %5105 = vmatpush.bf16.msra.mxu1 %v10058_v17  ;;  %5129 = vmatpush.bf16.msra.mxu3 %v10139_v23  ;;  %v10935_v20 = vpop.f32.mrf.mxu1 }
 0x881   :  { %v3756_v34 = vadd.f32 %v3755_v50, %v3426_v44  ;;  %v12622_v44 = vld [vmem:[#allocation141_spill] sm:$0xff]  ;;  %v12623_v50 = vld [vmem:[#allocation148_spill] sm:$0xff] }
 0x882   :  { %v3429_v7 = vpop.f32.mrf.mxu0 }
 0x883   :  { %v4263_v28 = vmax.f32 %v3756_v34, 0.0  ;;  %v12624_v34 = vld [vmem:[#allocation81_spill] sm:$0xff] }
 0x884   :  { %5106 = vmatpush.bf16.msra.mxu1 %v10045_v19  ;;  %5130 = vmatpush.bf16.msra.mxu3 %v10129_v37 }
 0x885   :  { %4964 = vmatmul.bf16.vlgmr.msra.gmra.mxu0 %v10655_v60  ;;  %4988 = vmatmul.bf16.vlgmr.msra.gmra.mxu2 %v10657_v53  ;;  %v10941_v26 = vpack.c.bf16 %v4263_v28, %v4259_v13  ;;  %v12626_v13 = vld [vmem:[#allocation24_spill] sm:$0xff]  ;;  %v12627_v28 = vld [vmem:[#allocation49_spill] sm:$0xff] }
 0x886   :  { %5148 = vmatpush.bf16.msra.mxu0 %v10266_v43  ;;  %5172 = vmatpush.bf16.msra.mxu2 %v10346_v40  ;;  %v10945_v17 = vpop.f32.mrf.mxu3 }
 0x888   :  { %v3758_v23 = vpop.f32.mrf.mxu2  ;;  %5107 = vmatpush.bf16.msra.mxu1 %v10028_v8  ;;  %5131 = vmatpush.bf16.msra.mxu3 %v10119_v46  ;;  %v10949_v19 = vpop.f32.mrf.mxu1 }
 0x889   :  { %v3759_v37 = vadd.f32 %v3758_v23, %v3429_v7  ;;  %v12625_v7 = vld [vmem:[#allocation105_spill] sm:$0xff] }
 0x88a   :  { %5149 = vmatpush.bf16.msra.mxu0 %v10259_v12  ;;  %5173 = vmatpush.bf16.msra.mxu2 %v10339_v16  ;;  %v3431_v47 = vpop.f32.mrf.mxu0  ;;  %v12615_v12 = vld [vmem:[#allocation58_spill] sm:$0xff] }
 0x88b   :  { %4926 = vmatmul.bf16.gmra.mxu1 %v10679_v29  ;;  %4950 = vmatmul.bf16.gmra.mxu3 %v10681_v51  ;;  %v4267_v54 = vmax.f32 %v3759_v37, 0.0 }
 0x88e   :  { %5150 = vmatpush.bf16.msra.mxu0 %v10249_v21  ;;  %5174 = vmatpush.bf16.msra.mxu2 %v10329_v63  ;;  %v10957_v43 = vpop.f32.mrf.mxu3  ;;  %v12618_v63 = vld [vmem:[#allocation30_spill] sm:$0xff] }
 0x890   :  { %v3760_v8 = vpop.f32.mrf.mxu2  ;;  %v10959_v46 = vpop.f32.mrf.mxu1 }
 0x891   :  { %v3761_v40 = vadd.f32 %v3760_v8, %v3431_v47  ;;  %v12629_v47 = vld [vmem:[#allocation78_spill] sm:$0xff] }
 0x892   :  { %5151 = vmatpush.bf16.msra.mxu0 %v12614_v61  ;;  %5175 = vmatpush.bf16.msra.mxu2 %v12615_v12  ;;  %v3434_v16 = vpop.f32.mrf.mxu0  ;;  %v12630_v8 = vld [vmem:[#allocation102_spill] sm:$0xff]  ;;  %v12632_v12 = vld [vmem:[#allocation21_spill] sm:$0xff] }
 0x893   :  { %v4271_v48 = vmax.f32 %v3761_v40, 0.0 }
 0x895   :  { %4969 = vmatmul.bf16.gmra.mxu0 %v12616_v25  ;;  %4993 = vmatmul.bf16.gmra.mxu2 %v12617_v24  ;;  %v10965_v21 = vpack.c.bf16 %v4271_v48, %v4267_v54 }
 0x896   :  { %5152 = vmatpush.bf16.msra.mxu0 %v12618_v63  ;;  %5176 = vmatpush.bf16.msra.mxu2 %v12619_v3  ;;  %v10969_v41 = vpop.f32.mrf.mxu3  ;;  %v12634_v3 = vld [vmem:[#allocation75_spill] sm:$0xff] }
 0x898   :  { %v3763_v58 = vpop.f32.mrf.mxu2  ;;  %v10971_v59 = vpop.f32.mrf.mxu1 }
 0x899   :  { %v3764_v9 = vadd.f32 %v3763_v58, %v3434_v16  ;;  %v12633_v16 = vld [vmem:[#allocation46_spill] sm:$0xff]  ;;  %v12635_v58 = vld [vmem:[#allocation99_spill] sm:$0xff] }
 0x89a   :  { %5153 = vmatpush.bf16.msra.mxu0 %v12620_v36  ;;  %5177 = vmatpush.bf16.msra.mxu2 %v12621_v52  ;;  %v3436_v45 = vpop.f32.mrf.mxu0  ;;  %v12636_v52 = vld [vmem:[#allocation151_spill] sm:$0xff] }
 0x89b   :  { %5012 = vmatmul.bf16.vlgmr.msrb.gmra.mxu1 %v12622_v44  ;;  %5036 = vmatmul.bf16.vlgmr.msrb.gmra.mxu3 %v12623_v50  ;;  %v4275_v48 = vmax.f32 %v3764_v9, 0.0  ;;  %v12639_v9 = vld [vmem:[#allocation96_spill] sm:$0xff] }
 0x89c   :  { %5196 = vmatpush.bf16.msrb.mxu1 %v12624_v34  ;;  %5220 = vmatpush.bf16.msrb.mxu3 %v12625_v7  ;;  %v10997_v34 = vpop.permute.xlu0 %4588 }
 0x89e   :  { %5154 = vmatpush.bf16.msra.mxu0 %v12626_v13  ;;  %5178 = vmatpush.bf16.msra.mxu2 %v12627_v28  ;;  %v10981_v23 = vpop.f32.mrf.mxu3  ;;  %v12638_v13 = vld [vmem:[#allocation72_spill] sm:$0xff] }
 0x89f   :  { %12628 = vst [vmem:[#allocation153_spill] sm:$0xff] %v10981_v23  ;;  %v12730_v23 = vld [vmem:[#allocation97_spill] sm:$0xff] }
 0x8a0   :  { %v3765_v37 = vpop.f32.mrf.mxu2  ;;  %5197 = vmatpush.bf16.msrb.mxu1 %v12629_v47  ;;  %5221 = vmatpush.bf16.msrb.mxu3 %v12630_v8  ;;  %v10985_v40 = vpop.f32.mrf.mxu1  ;;  %v12640_v47 = vld [vmem:[#allocation154_spill] sm:$0xff] }
 0x8a1   :  { %12631 = vst [vmem:[#allocation160_spill] sm:$0xff] %v10985_v40  ;;  %v3766_v61 = vadd.f32 %v3765_v37, %v3436_v45 }
 0x8a2   :  { %5155 = vmatpush.bf16.msra.mxu0 %v12632_v12  ;;  %5179 = vmatpush.bf16.msra.mxu2 %v12633_v16  ;;  %v10989_v54 = vpop.f32.mrf.mxu0  ;;  %v3108_v12 = vadd.f32 %v10945_v17, %v10935_v20  ;;  %v12641_v16 = vld [vmem:[#allocation69_spill] sm:$0xff]  ;;  %v12644_v20 = vld [vmem:[#allocation90_spill] sm:$0xff] }
 0x8a3   :  { %v4279_v63 = vmax.f32 %v3766_v61, 0.0  ;;  %v3106_v61 = vadd.f32 %v10931_v35, %v10925_v0  ;;  %v12643_v35 = vld [vmem:[#allocation66_spill] sm:$0xff] }
 0x8a4   :  { %5198 = vmatpush.bf16.msrb.mxu1 %v12634_v3  ;;  %5222 = vmatpush.bf16.msrb.mxu3 %v12635_v58  ;;  %v11016_v3 = vpop.permute.xlu0 %4593 }
 0x8a5   :  { %v10993_v36 = vpack.c.bf16 %v4279_v63, %v4275_v48  ;;  %4974 = vmatmul.bf16.gmra.mxu0 %v12636_v52  ;;  %4998 = vmatmul.bf16.gmra.mxu2 %v10765_v11  ;;  %v12642_v48 = vld [vmem:[#allocation93_spill] sm:$0xff] }
 0x8a6   :  { %v10999_v45 = vpop.f32.mrf.mxu3 }
 0x8a7   :  { %12637 = vst [vmem:[#allocation156_spill] sm:$0xff] %v10999_v45  ;;  %v4278_v45 = vmax.f32 %v3108_v12, 0.0  ;;  %v12649_v12 = vld [vmem:[#allocation129_spill] sm:$0xff] }
 0x8a8   :  { %v11001_v7 = vpop.f32.mrf.mxu2  ;;  %5199 = vmatpush.bf16.msrb.mxu1 %v12638_v13  ;;  %5223 = vmatpush.bf16.msrb.mxu3 %v12639_v9  ;;  %v4735_v28 = vpop.f32.mrf.mxu1  ;;  %v3101_v13 = vadd.f32 %v10894_v42, %v10881_v2  ;;  %v3103_v9 = vadd.f32 %v10921_v57, %v10907_v6  ;;  %v12646_v6 = vld [vmem:[#allocation63_spill] sm:$0xff] }
 0x8a9   :  { %v4736_v8 = vadd.f32 %v4735_v28, %v10997_v34  ;;  %v4274_v28 = vmax.f32 %v3106_v61, 0.0  ;;  %v12647_v57 = vld [vmem:[#allocation87_spill] sm:$0xff]  ;;  %v12648_v61 = vld [vmem:[#allocation157_spill] sm:$0xff] }
 0x8aa   :  { %v11005_v37 = vpop.f32.mrf.mxu0  ;;  %v4266_v2 = vmax.f32 %v3101_v13, 0.0  ;;  %v4270_v42 = vmax.f32 %v3103_v9, 0.0 }
 0x8ab   :  { %5017 = vmatmul.bf16.gmra.mxu1 %v10787_v30  ;;  %5041 = vmatmul.bf16.gmra.mxu3 %v12640_v47 }
 0x8ac   :  { %5200 = vmatpush.bf16.msrb.mxu1 %v12641_v16  ;;  %5224 = vmatpush.bf16.msrb.mxu3 %v12642_v48  ;;  %v4530_v9 = vpack.c.bf16 %v4270_v42, %v4266_v2  ;;  %v12658_v2 = vld [vmem:[#allocation120_spill] sm:$0xff] }
 0x8ae   :  { %v4759_v63 = vpop.f32.mrf.mxu3 }
 0x8af   :  { %v4760_v58 = vadd.f32 %v4759_v63, %v4736_v8  ;;  %v3098_v8 = vadd.f32 %v10879_v22, %v10865_v31  ;;  %v4534_v63 = vpack.c.bf16 %v4278_v45, %v4274_v28  ;;  %v12651_v22 = vld [vmem:[#allocation60_spill] sm:$0xff]  ;;  %v12653_v28 = vld [vmem:[#allocation126_spill] sm:$0xff] }
 0x8b0   :  { %v11022_v0 = vpop.f32.mrf.mxu2  ;;  %5201 = vmatpush.bf16.msrb.mxu1 %v12643_v35  ;;  %5225 = vmatpush.bf16.msrb.mxu3 %v12644_v20  ;;  %v4737_v17 = vpop.f32.mrf.mxu1  ;;  %v12652_v45 = vld [vmem:[#allocation84_spill] sm:$0xff] }
 0x8b1   :  { %v4738_v48 = vadd.f32 %v4737_v17, %v11016_v3  ;;  %v4258_v17 = vmax.f32 %v10863_v5, 0.0  ;;  %v4262_v40 = vmax.f32 %v3098_v8, 0.0 }
 0x8b2   :  { %v11026_v16 = vpop.f32.mrf.mxu0 }
 0x8b3   :  { %12645 = vst [vmem:[#allocation163_spill] sm:$0xff] %v11026_v16  ;;  %v4526_v5 = vpack.c.bf16 %v4262_v40, %v4258_v17  ;;  %v12659_v40 = vld [vmem:[#allocation117_spill] sm:$0xff]  ;;  %v12716_v16 = vld [vmem:[#allocation31_spill] sm:$0xff] }
 0x8b4   :  { %5202 = vmatpush.bf16.msrb.mxu1 %v12646_v6  ;;  %5226 = vmatpush.bf16.msrb.mxu3 %v12647_v57 }
 0x8b5   :  { %5060 = vmatmul.bf16.vlgmr.msrb.gmra.mxu0 %v10813_v15  ;;  %5084 = vmatmul.bf16.vlgmr.msrb.gmra.mxu2 %v12648_v61 }
 0x8b6   :  { %5244 = vmatpush.bf16.msrb.mxu0 %v12649_v12  ;;  %5268 = vmatpush.bf16.msrb.mxu2 %v4534_v63  ;;  %v4761_v35 = vpop.f32.mrf.mxu3 }
 0x8b7   :  { %v4762_v20 = vadd.f32 %v4761_v35, %v4738_v48  ;;  %v12655_v48 = vld [vmem:[#allocation123_spill] sm:$0xff]  ;;  %v12660_v35 = vld [vmem:[#allocation150_spill] sm:$0xff] }
 0x8b8   :  { %v11037_v31 = vpop.f32.mrf.mxu2  ;;  %5203 = vmatpush.bf16.msrb.mxu1 %v12651_v22  ;;  %5227 = vmatpush.bf16.msrb.mxu3 %v12652_v45  ;;  %v11041_v13 = vpop.f32.mrf.mxu1 }
 0x8b9   :  { %12650 = vst [vmem:[#allocation159_spill] sm:$0xff] %v11037_v31 }
 0x8ba   :  { %5245 = vmatpush.bf16.msrb.mxu0 %v12653_v28  ;;  %5269 = vmatpush.bf16.msrb.mxu2 %v4530_v9  ;;  %v11044_v6 = vpop.f32.mrf.mxu0  ;;  %v12663_v28 = vld [vmem:[#allocation114_spill] sm:$0xff] }
 0x8bb   :  { %12654 = vst [vmem:[#allocation162_spill] sm:$0xff] %v11044_v6  ;;  %5022 = vmatmul.bf16.gmra.mxu1 %v10837_v62  ;;  %5046 = vmatmul.bf16.gmra.mxu3 %v10839_v49  ;;  %v12689_v6 = vld [vmem:[#allocation3_spill] sm:$0xff] }
 0x8be   :  { %5246 = vmatpush.bf16.msrb.mxu0 %v12655_v48  ;;  %5270 = vmatpush.bf16.msrb.mxu2 %v4526_v5  ;;  %v11049_v8 = vpop.f32.mrf.mxu3  ;;  %v12664_v5 = vld [vmem:[#allocation144_spill] sm:$0xff]  ;;  %v12665_v48 = vld [vmem:[#allocation9_spill] sm:$0xff] }
 0x8c0   :  { %v11051_v63 = vpop.f32.mrf.mxu2  ;;  %v11053_v57 = vpop.f32.mrf.mxu1 }
 0x8c1   :  { %12656 = vst [vmem:[#allocation165_spill] sm:$0xff] %v11051_v63  ;;  %v12674_v63 = vld [vmem:[#allocation132_spill] sm:$0xff] }
 0x8c2   :  { %12657 = vst [vmem:[#allocation29_spill] sm:$0xff] %v11053_v57  ;;  %5247 = vmatpush.bf16.msrb.mxu0 %v12658_v2  ;;  %5271 = vmatpush.bf16.msrb.mxu2 %v10847_v39  ;;  %v4783_v42 = vpop.f32.mrf.mxu0  ;;  %v12666_v2 = vld [vmem:[#allocation28_spill] sm:$0xff] }
 0x8c3   :  { %v4784_v12 = vadd.f32 %v4783_v42, %v4760_v58  ;;  %v12667_v42 = vld [vmem:[#allocation111_spill] sm:$0xff]  ;;  %v12726_v57 = vld [vmem:[#allocation76_spill] sm:$0xff] }
 0x8c5   :  { %5065 = vmatmul.bf16.gmra.mxu0 %v10867_v4  ;;  %5089 = vmatmul.bf16.gmra.mxu2 %v10869_v1 }
 0x8c6   :  { %5248 = vmatpush.bf16.msrb.mxu0 %v12659_v40  ;;  %5272 = vmatpush.bf16.msrb.mxu2 %v12660_v35  ;;  %v11061_v17 = vpop.f32.mrf.mxu3  ;;  %v12668_v40 = vld [vmem:[#allocation135_spill] sm:$0xff] }
 0x8c7   :  { %12661 = vst [vmem:[#allocation53_spill] sm:$0xff] %v11061_v17  ;;  %v12710_v17 = vld [vmem:[#allocation34_spill] sm:$0xff] }
 0x8c8   :  { %v4807_v22 = vpop.f32.mrf.mxu2  ;;  %v11063_v45 = vpop.f32.mrf.mxu1 }
 0x8c9   :  { %12662 = vst [vmem:[#allocation26_spill] sm:$0xff] %v11063_v45  ;;  %v4808_v9 = vadd.f32 %v4807_v22, %v4784_v12  ;;  %v12670_v22 = vld [vmem:[#allocation13_spill] sm:$0xff]  ;;  %v12686_v45 = vld [vmem:[#allocation7_spill] sm:$0xff] }
 0x8ca   :  { %5249 = vmatpush.bf16.msrb.mxu0 %v12663_v28  ;;  %5273 = vmatpush.bf16.msrb.mxu2 %v12664_v5  ;;  %v4785_v39 = vpop.f32.mrf.mxu0  ;;  %v12671_v28 = vld [vmem:[#allocation25_spill] sm:$0xff] }
 0x8cb   :  { %v4786_v58 = vadd.f32 %v4785_v39, %v4762_v20  ;;  %5108 = vmatmul.bf16.vlgmr.msra.gmra.mxu1 %v10598_v27  ;;  %5132 = vmatmul.bf16.vlgmr.msra.gmra.mxu3 %v10600_v55  ;;  %v12673_v39 = vld [vmem:[#allocation108_spill] sm:$0xff] }
 0x8cc   :  { %5292 = vmatpush.bf16.msra.mxu1 %v12665_v48  ;;  %5316 = vmatpush.bf16.msra.mxu3 %v12666_v2  ;;  %v12676_v2 = vld [vmem:[#allocation6_spill] sm:$0xff] }
 0x8ce   :  { %5250 = vmatpush.bf16.msrb.mxu0 %v12667_v42  ;;  %5274 = vmatpush.bf16.msrb.mxu2 %v12668_v40  ;;  %v11073_v35 = vpop.f32.mrf.mxu3  ;;  %v12677_v42 = vld [vmem:[#allocation18_spill] sm:$0xff] }
 0x8cf   :  { %12669 = vst [vmem:[#allocation50_spill] sm:$0xff] %v11073_v35 }
 0x8d0   :  { %v4809_v12 = vpop.f32.mrf.mxu2  ;;  %5293 = vmatpush.bf16.msra.mxu1 %v12670_v22  ;;  %5317 = vmatpush.bf16.msra.mxu3 %v12671_v28  ;;  %v11077_v20 = vpop.f32.mrf.mxu1  ;;  %v12680_v28 = vld [vmem:[#allocation10_spill] sm:$0xff] }
 0x8d1   :  { %12672 = vst [vmem:[#allocation23_spill] sm:$0xff] %v11077_v20  ;;  %v4810_v5 = vadd.f32 %v4809_v12, %v4786_v58  ;;  %v12681_v58 = vld [vmem:[#allocation22_spill] sm:$0xff] }
 0x8d2   :  { %5251 = vmatpush.bf16.msrb.mxu0 %v12673_v39  ;;  %5275 = vmatpush.bf16.msrb.mxu2 %v12674_v63  ;;  %v11081_v48 = vpop.f32.mrf.mxu0 }
 0x8d3   :  { %12675 = vst [vmem:[#allocation47_spill] sm:$0xff] %v11081_v48 }
 0x8d4   :  { %5294 = vmatpush.bf16.msra.mxu1 %v12676_v2  ;;  %5318 = vmatpush.bf16.msra.mxu3 %v12677_v42  ;;  %v12683_v2 = vld [vmem:[#allocation4_spill] sm:$0xff]  ;;  %v12684_v42 = vld [vmem:[#allocation15_spill] sm:$0xff] }
 0x8d5   :  { %5070 = vmatmul.bf16.gmra.mxu0 %v10909_v14  ;;  %5094 = vmatmul.bf16.gmra.mxu2 %v10911_v33 }
 0x8d6   :  { %v11087_v40 = vpop.f32.mrf.mxu3 }
 0x8d7   :  { %12678 = vst [vmem:[#allocation20_spill] sm:$0xff] %v11087_v40 }
 0x8d8   :  { %v11089_v22 = vpop.f32.mrf.mxu2  ;;  %5295 = vmatpush.bf16.msra.mxu1 %v12680_v28  ;;  %5319 = vmatpush.bf16.msra.mxu3 %v12681_v58  ;;  %v4831_v12 = vpop.f32.mrf.mxu1  ;;  %v12687_v28 = vld [vmem:[#allocation19_spill] sm:$0xff] }
 0x8d9   :  { %12679 = vst [vmem:[#allocation44_spill] sm:$0xff] %v11089_v22  ;;  %v4832_v63 = vadd.f32 %v4831_v12, %v4808_v9  ;;  %v12711_v22 = vld [vmem:[#allocation48_spill] sm:$0xff] }
 0x8da   :  { %v11093_v39 = vpop.f32.mrf.mxu0 }
 0x8db   :  { %12682 = vst [vmem:[#allocation17_spill] sm:$0xff] %v11093_v39  ;;  %5113 = vmatmul.bf16.gmra.mxu1 %v10629_v32  ;;  %5137 = vmatmul.bf16.gmra.mxu3 %v10631_v18  ;;  %v12690_v39 = vld [vmem:[#allocation12_spill] sm:$0xff] }
 0x8dc   :  { %5296 = vmatpush.bf16.msra.mxu1 %v12683_v2  ;;  %5320 = vmatpush.bf16.msra.mxu3 %v12684_v42  ;;  %v12691_v2 = vld [vmem:[#allocation42_spill] sm:$0xff] }
 0x8de   :  { %v4855_v20 = vpop.f32.mrf.mxu3 }
 0x8df   :  { %v4856_v40 = vadd.f32 %v4855_v20, %v4832_v63  ;;  %v12692_v20 = vld [vmem:[#allocation67_spill] sm:$0xff] }
 0x8e0   :  { %v11099_v35 = vpop.f32.mrf.mxu2  ;;  %5297 = vmatpush.bf16.msra.mxu1 %v12686_v45  ;;  %5321 = vmatpush.bf16.msra.mxu3 %v12687_v28  ;;  %v4833_v58 = vpop.f32.mrf.mxu1  ;;  %v12694_v28 = vld [vmem:[#allocation5_spill] sm:$0xff] }
 0x8e1   :  { %12685 = vst [vmem:[#allocation41_spill] sm:$0xff] %v11099_v35  ;;  %v4834_v9 = vadd.f32 %v4833_v58, %v4810_v5  ;;  %v12695_v5 = vld [vmem:[#allocation16_spill] sm:$0xff] }
 0x8e2   :  { %v11103_v12 = vpop.f32.mrf.mxu0 }
 0x8e3   :  { %12688 = vst [vmem:[#allocation14_spill] sm:$0xff] %v11103_v12 }
 0x8e4   :  { %5298 = vmatpush.bf16.msra.mxu1 %v12689_v6  ;;  %5322 = vmatpush.bf16.msra.mxu3 %v12690_v39  ;;  %v12696_v6 = vld [vmem:[#allocation39_spill] sm:$0xff]  ;;  %v12697_v39 = vld [vmem:[#allocation64_spill] sm:$0xff] }
 0x8e5   :  { %5156 = vmatmul.bf16.vlgmr.msra.gmra.mxu0 %v10655_v60  ;;  %5180 = vmatmul.bf16.vlgmr.msra.gmra.mxu2 %v10657_v53 }
 0x8e6   :  { %5340 = vmatpush.bf16.msra.mxu0 %v12691_v2  ;;  %5364 = vmatpush.bf16.msra.mxu2 %v12692_v20  ;;  %v4857_v63 = vpop.f32.mrf.mxu3  ;;  %v12699_v2 = vld [vmem:[#allocation43_spill] sm:$0xff] }
 0x8e7   :  { %v4858_v45 = vadd.f32 %v4857_v63, %v4834_v9  ;;  %v12700_v9 = vld [vmem:[#allocation57_spill] sm:$0xff] }
 0x8e8   :  { %v11111_v42 = vpop.f32.mrf.mxu2  ;;  %5299 = vmatpush.bf16.msra.mxu1 %v12694_v28  ;;  %5323 = vmatpush.bf16.msra.mxu3 %v12695_v5  ;;  %v11115_v58 = vpop.f32.mrf.mxu1  ;;  %v12702_v5 = vld [vmem:[#allocation36_spill] sm:$0xff] }
 0x8e9   :  { %12693 = vst [vmem:[#allocation38_spill] sm:$0xff] %v11111_v42  ;;  %v12704_v42 = vld [vmem:[#allocation40_spill] sm:$0xff] }
 0x8ea   :  { %5341 = vmatpush.bf16.msra.mxu0 %v12696_v6  ;;  %5365 = vmatpush.bf16.msra.mxu2 %v12697_v39  ;;  %v11119_v12 = vpop.f32.mrf.mxu0  ;;  %v12703_v6 = vld [vmem:[#allocation61_spill] sm:$0xff] }
 0x8eb   :  { %12698 = vst [vmem:[#allocation11_spill] sm:$0xff] %v11119_v12  ;;  %5118 = vmatmul.bf16.gmra.mxu1 %v10679_v29  ;;  %5142 = vmatmul.bf16.gmra.mxu3 %v10681_v51 }
 0x8ee   :  { %5342 = vmatpush.bf16.msra.mxu0 %v12699_v2  ;;  %5366 = vmatpush.bf16.msra.mxu2 %v12700_v9  ;;  %v11125_v20 = vpop.f32.mrf.mxu3  ;;  %v12705_v2 = vld [vmem:[#allocation54_spill] sm:$0xff] }
 0x8f0   :  { %v11127_v63 = vpop.f32.mrf.mxu2  ;;  %v11129_v28 = vpop.f32.mrf.mxu1 }
 0x8f1   :  { %12701 = vst [vmem:[#allocation35_spill] sm:$0xff] %v11127_v63 }
 0x8f2   :  { %5343 = vmatpush.bf16.msra.mxu0 %v12702_v5  ;;  %5367 = vmatpush.bf16.msra.mxu2 %v12703_v6  ;;  %v4879_v39 = vpop.f32.mrf.mxu0  ;;  %v12706_v5 = vld [vmem:[#allocation37_spill] sm:$0xff]  ;;  %v12707_v6 = vld [vmem:[#allocation51_spill] sm:$0xff] }
 0x8f3   :  { %v4880_v12 = vadd.f32 %v4879_v39, %v4856_v40 }
 0x8f5   :  { %5161 = vmatmul.bf16.gmra.mxu0 %v12616_v25  ;;  %5185 = vmatmul.bf16.gmra.mxu2 %v12617_v24 }
 0x8f6   :  { %5344 = vmatpush.bf16.msra.mxu0 %v12704_v42  ;;  %5368 = vmatpush.bf16.msra.mxu2 %v12705_v2  ;;  %v11137_v9 = vpop.f32.mrf.mxu3  ;;  %v12708_v42 = vld [vmem:[#allocation91_spill] sm:$0xff] }
 0x8f7   :  { %v12709_v2 = vld [vmem:[#allocation115_spill] sm:$0xff] }
 0x8f8   :  { %v4903_v35 = vpop.f32.mrf.mxu2  ;;  %v11139_v63 = vpop.f32.mrf.mxu1 }
 0x8f9   :  { %v11141_v31 = vadd.f32 %v4903_v35, %v4880_v12 }
 0x8fa   :  { %5345 = vmatpush.bf16.msra.mxu0 %v12706_v5  ;;  %5369 = vmatpush.bf16.msra.mxu2 %v12707_v6  ;;  %v4881_v40 = vpop.f32.mrf.mxu0  ;;  %v12713_v5 = vld [vmem:[#allocation88_spill] sm:$0xff] }
 0x8fb   :  { %v4882_v39 = vadd.f32 %v4881_v40, %v4858_v45  ;;  %5204 = vmatmul.bf16.vlgmr.msrb.gmra.mxu1 %v12622_v44  ;;  %5228 = vmatmul.bf16.vlgmr.msrb.gmra.mxu3 %v12623_v50  ;;  %v12714_v6 = vld [vmem:[#allocation112_spill] sm:$0xff] }
 0x8fc   :  { %5388 = vmatpush.bf16.msrb.mxu1 %v12708_v42  ;;  %5412 = vmatpush.bf16.msrb.mxu3 %v12709_v2  ;;  %v12717_v42 = vld [vmem:[#allocation45_spill] sm:$0xff] }
 0x8fe   :  { %5346 = vmatpush.bf16.msra.mxu0 %v12710_v17  ;;  %5370 = vmatpush.bf16.msra.mxu2 %v12711_v22  ;;  %v11151_v35 = vpop.f32.mrf.mxu3  ;;  %v12718_v17 = vld [vmem:[#allocation85_spill] sm:$0xff] }
 0x8ff   :  { %12712 = vst [vmem:[#allocation77_spill] sm:$0xff] %v11151_v35  ;;  %v12719_v22 = vld [vmem:[#allocation109_spill] sm:$0xff] }
 0x900   :  { %v4905_v12 = vpop.f32.mrf.mxu2  ;;  %5389 = vmatpush.bf16.msrb.mxu1 %v12713_v5  ;;  %5413 = vmatpush.bf16.msrb.mxu3 %v12714_v6  ;;  %v11155_v45 = vpop.f32.mrf.mxu1  ;;  %v12729_v35 = vld [vmem:[#allocation73_spill] sm:$0xff] }
 0x901   :  { %12715 = vst [vmem:[#allocation101_spill] sm:$0xff] %v11155_v45  ;;  %v11157_v40 = vadd.f32 %v4905_v12, %v4882_v39  ;;  %v12721_v39 = vld [vmem:[#allocation82_spill] sm:$0xff] }
 0x902   :  { %5347 = vmatpush.bf16.msra.mxu0 %v12716_v16  ;;  %5371 = vmatpush.bf16.msra.mxu2 %v12717_v42  ;;  %v11161_v2 = vpop.f32.mrf.mxu0  ;;  %v12722_v12 = vld [vmem:[#allocation106_spill] sm:$0xff] }
 0x904   :  { %5390 = vmatpush.bf16.msrb.mxu1 %v12718_v17  ;;  %5414 = vmatpush.bf16.msrb.mxu3 %v12719_v22  ;;  %v12723_v17 = vld [vmem:[#allocation79_spill] sm:$0xff] }
 0x905   :  { %5166 = vmatmul.bf16.gmra.mxu0 %v12636_v52  ;;  %5190 = vmatmul.bf16.gmra.mxu2 %v10765_v11  ;;  %v12724_v22 = vld [vmem:[#allocation103_spill] sm:$0xff] }
 0x906   :  { %v11167_v5 = vpop.f32.mrf.mxu3 }
 0x907   :  { %12720 = vst [vmem:[#allocation8_spill] sm:$0xff] %v11167_v5 }
 0x908   :  { %v11169_v6 = vpop.f32.mrf.mxu2  ;;  %5391 = vmatpush.bf16.msrb.mxu1 %v12721_v39  ;;  %5415 = vmatpush.bf16.msrb.mxu3 %v12722_v12  ;;  %v11173_v16 = vpop.f32.mrf.mxu1  ;;  %v12727_v39 = vld [vmem:[#allocation100_spill] sm:$0xff] }
 0x90a   :  { %v11175_v42 = vpop.f32.mrf.mxu0 }
 0x90b   :  { %5209 = vmatmul.bf16.gmra.mxu1 %v10787_v30  ;;  %5233 = vmatmul.bf16.gmra.mxu3 %v12640_v47 }
 0x90c   :  { %5392 = vmatpush.bf16.msrb.mxu1 %v12723_v17  ;;  %5416 = vmatpush.bf16.msrb.mxu3 %v12724_v22  ;;  %v12731_v17 = vld [vmem:[#allocation139_spill] sm:$0xff] }
 0x90e   :  { %v11181_v45 = vpop.f32.mrf.mxu3 }
 0x910   :  { %v11183_v5 = vpop.f32.mrf.mxu2  ;;  %5393 = vmatpush.bf16.msrb.mxu1 %v12726_v57  ;;  %5417 = vmatpush.bf16.msrb.mxu3 %v12727_v39  ;;  %v11187_v12 = vpop.f32.mrf.mxu1  ;;  %v12733_v39 = vld [vmem:[#allocation70_spill] sm:$0xff] }
 0x911   :  { %12725 = vst [vmem:[#allocation32_spill] sm:$0xff] %v11183_v5  ;;  %v12734_v5 = vld [vmem:[#allocation94_spill] sm:$0xff] }
 0x912   :  { %v11189_v48 = vpop.f32.mrf.mxu0 }
 0x913   :  { %12728 = vst [vmem:[#allocation74_spill] sm:$0xff] %v11189_v48 }
 0x914   :  { %5394 = vmatpush.bf16.msrb.mxu1 %v12729_v35  ;;  %5418 = vmatpush.bf16.msrb.mxu3 %v12730_v23  ;;  %v12735_v35 = vld [vmem:[#allocation136_spill] sm:$0xff] }
 0x915   :  { %5252 = vmatmul.bf16.vlgmr.msrb.gmra.mxu0 %v10813_v15  ;;  %5276 = vmatmul.bf16.vlgmr.msrb.gmra.mxu2 %v12648_v61 }
 0x916   :  { %5436 = vmatpush.bf16.msrb.mxu0 %v12731_v17  ;;  %5460 = vmatpush.bf16.msrb.mxu2 %v10993_v36  ;;  %v11197_v22 = vpop.f32.mrf.mxu3  ;;  %v12737_v36 = vld [vmem:[#allocation133_spill] sm:$0xff] }
 0x918   :  { %v11199_v57 = vpop.f32.mrf.mxu2  ;;  %5395 = vmatpush.bf16.msrb.mxu1 %v12733_v39  ;;  %5419 = vmatpush.bf16.msrb.mxu3 %v12734_v5  ;;  %v11203_v48 = vpop.f32.mrf.mxu1 }
 0x919   :  { %12732 = vst [vmem:[#allocation98_spill] sm:$0xff] %v11199_v57  ;;  %v12741_v57 = vld [vmem:[#allocation130_spill] sm:$0xff] }
 0x91a   :  { %5437 = vmatpush.bf16.msrb.mxu0 %v12735_v35  ;;  %5461 = vmatpush.bf16.msrb.mxu2 %v10965_v21  ;;  %v11207_v23 = vpop.f32.mrf.mxu0  ;;  %v12742_v35 = vld [vmem:[#allocation127_spill] sm:$0xff] }
 0x91b   :  { %12736 = vst [vmem:[#allocation71_spill] sm:$0xff] %v11207_v23  ;;  %5214 = vmatmul.bf16.gmra.mxu1 %v10837_v62  ;;  %5238 = vmatmul.bf16.gmra.mxu3 %v10839_v49 }
 0x91e   :  { %5438 = vmatpush.bf16.msrb.mxu0 %v12737_v36  ;;  %5462 = vmatpush.bf16.msrb.mxu2 %v10941_v26  ;;  %v11213_v17 = vpop.f32.mrf.mxu3 }
 0x91f   :  { %12738 = vst [vmem:[#allocation95_spill] sm:$0xff] %v11213_v17  ;;  %v12750_v17 = vld [vmem:[#allocation118_spill] sm:$0xff] }
 0x920   :  { %v11215_v39 = vpop.f32.mrf.mxu2  ;;  %v11217_v5 = vpop.f32.mrf.mxu1 }
 0x921   :  { %12739 = vst [vmem:[#allocation68_spill] sm:$0xff] %v11215_v39  ;;  %v12745_v39 = vld [vmem:[#allocation124_spill] sm:$0xff] }
 0x922   :  { %12740 = vst [vmem:[#allocation92_spill] sm:$0xff] %v11217_v5  ;;  %5439 = vmatpush.bf16.msrb.mxu0 %v12741_v57  ;;  %5463 = vmatpush.bf16.msrb.mxu2 %v10919_v38  ;;  %v4975_v21 = vpop.f32.mrf.mxu0  ;;  %v12746_v38 = vld [vmem:[#allocation121_spill] sm:$0xff]  ;;  %v12747_v5 = vld [vmem:[#allocation147_spill] sm:$0xff] }
 0x925   :  { %5257 = vmatmul.bf16.gmra.mxu0 %v10867_v4  ;;  %5281 = vmatmul.bf16.gmra.mxu2 %v10869_v1 }
 0x926   :  { %5440 = vmatpush.bf16.msrb.mxu0 %v12742_v35  ;;  %5464 = vmatpush.bf16.msrb.mxu2 %v10875_v10  ;;  %v11225_v26 = vpop.f32.mrf.mxu3 }
 0x927   :  { %12743 = vst [vmem:[#allocation65_spill] sm:$0xff] %v11225_v26 }
 0x928   :  { %v4999_v36 = vpop.f32.mrf.mxu2  ;;  %v11227_v23 = vpop.f32.mrf.mxu1 }
 0x929   :  { %12744 = vst [vmem:[#allocation89_spill] sm:$0xff] %v11227_v23  ;;  %v12751_v23 = vld [vmem:[#allocation145_spill] sm:$0xff] }
 0x92a   :  { %5441 = vmatpush.bf16.msrb.mxu0 %v12745_v39  ;;  %5465 = vmatpush.bf16.msrb.mxu2 %v10833_v56  ;;  %v4977_v57 = vpop.f32.mrf.mxu0 }
 0x92b   :  { %5300 = vmatmul.bf16.vlgmr.msra.gmra.mxu1 %v10598_v27  ;;  %5324 = vmatmul.bf16.vlgmr.msra.gmra.mxu3 %v10600_v55 }
 0x92e   :  { %5442 = vmatpush.bf16.msrb.mxu0 %v12746_v38  ;;  %5466 = vmatpush.bf16.msrb.mxu2 %v12747_v5  ;;  %v11235_v35 = vpop.f32.mrf.mxu3 }
 0x92f   :  { %12748 = vst [vmem:[#allocation62_spill] sm:$0xff] %v11235_v35  ;;  %v4928_v35 = vadd.f32 %v11173_v16, %v10997_v34 }
 0x930   :  { %v5001_v10 = vpop.f32.mrf.mxu2  ;;  %v11237_v26 = vpop.f32.mrf.mxu1 }
 0x931   :  { %12749 = vst [vmem:[#allocation86_spill] sm:$0xff] %v11237_v26 }
 0x932   :  { %5443 = vmatpush.bf16.msrb.mxu0 %v12750_v17  ;;  %5467 = vmatpush.bf16.msrb.mxu2 %v12751_v23  ;;  %v11241_v39 = vpop.f32.mrf.mxu0 }
 0x933   :  { %12752 = vst [vmem:[#allocation125_spill] sm:$0xff] %v11241_v39 }
 0x935   :  { %5262 = vmatmul.bf16.gmra.mxu0 %v10909_v14  ;;  %5286 = vmatmul.bf16.gmra.mxu2 %v10911_v33 }
 0x936   :  { %v11245_v27 = vpop.f32.mrf.mxu3 }
 0x937   :  { %12753 = vst [vmem:[#allocation149_spill] sm:$0xff] %v11245_v27 }
 0x938   :  { %v11247_v55 = vpop.f32.mrf.mxu2  ;;  %v5023_v56 = vpop.f32.mrf.mxu1 }
 0x939   :  { %12754 = vst [vmem:[#allocation59_spill] sm:$0xff] %v11247_v55 }
 0x93a   :  { %v11249_v5 = vpop.f32.mrf.mxu0 }
 0x93b   :  { %12755 = vst [vmem:[#allocation83_spill] sm:$0xff] %v11249_v5  ;;  %5305 = vmatmul.bf16.gmra.mxu1 %v10629_v32  ;;  %5329 = vmatmul.bf16.gmra.mxu3 %v10631_v18  ;;  %v4952_v32 = vadd.f32 %v11181_v45, %v4928_v35 }
 0x93e   :  { %v5047_v17 = vpop.f32.mrf.mxu3 }
 0x940   :  { %v11253_v38 = vpop.f32.mrf.mxu2  ;;  %v5025_v23 = vpop.f32.mrf.mxu1 }
 0x941   :  { %12756 = vst [vmem:[#allocation122_spill] sm:$0xff] %v11253_v38 }
 0x942   :  { %v11255_v26 = vpop.f32.mrf.mxu0 }
 0x943   :  { %12757 = vst [vmem:[#allocation146_spill] sm:$0xff] %v11255_v26  ;;  %v4976_v26 = vadd.f32 %v4975_v21, %v4952_v32 }
 0x945   :  { %5348 = vmatmul.bf16.vlgmr.msra.gmra.mxu0 %v10655_v60  ;;  %5372 = vmatmul.bf16.vlgmr.msra.gmra.mxu2 %v10657_v53  ;;  %v4930_v53 = vadd.f32 %v11187_v12, %v11016_v3 }
 0x946   :  { %v5049_v27 = vpop.f32.mrf.mxu3 }
 0x947   :  { %v4954_v45 = vadd.f32 %v11197_v22, %v4930_v53 }
 0x948   :  { %v11261_v55 = vpop.f32.mrf.mxu2  ;;  %v11263_v5 = vpop.f32.mrf.mxu1 }
 0x949   :  { %12758 = vst [vmem:[#allocation56_spill] sm:$0xff] %v11261_v55  ;;  %v5000_v55 = vadd.f32 %v4999_v36, %v4976_v26 }
 0x94a   :  { %12759 = vst [vmem:[#allocation80_spill] sm:$0xff] %v11263_v5  ;;  %v11266_v18 = vpop.f32.mrf.mxu0 }
 0x94b   :  { %5310 = vmatmul.bf16.gmra.mxu1 %v10679_v29  ;;  %5334 = vmatmul.bf16.gmra.mxu3 %v10681_v51  ;;  %v5024_v39 = vadd.f32 %v5023_v56, %v5000_v55  ;;  %v4978_v51 = vadd.f32 %v4977_v57, %v4954_v45 }
 0x94d   :  { %v5048_v35 = vadd.f32 %v5047_v17, %v5024_v39 }
 0x94e   :  { %v11270_v38 = vpop.f32.mrf.mxu3 }
 0x94f   :  { %12760 = vst [vmem:[#allocation119_spill] sm:$0xff] %v11270_v38 }
 0x950   :  { %v11272_v16 = vpop.f32.mrf.mxu2  ;;  %v11274_v60 = vpop.f32.mrf.mxu1 }
 0x951   :  { %12761 = vst [vmem:[#allocation143_spill] sm:$0xff] %v11272_v16 }
 0x952   :  { %12762 = vst [vmem:[#allocation116_spill] sm:$0xff] %v11274_v60  ;;  %v5071_v5 = vpop.f32.mrf.mxu0  ;;  %v5002_v60 = vadd.f32 %v5001_v10, %v4978_v51 }
 0x953   :  { %v5072_v21 = vadd.f32 %v5071_v5, %v5048_v35 }
 0x954   :  { %v5026_v26 = vadd.f32 %v5025_v23, %v5002_v60 }
 0x955   :  { %5353 = vmatmul.bf16.gmra.mxu0 %v12616_v25  ;;  %5377 = vmatmul.bf16.gmra.mxu2 %v12617_v24 }
 0x956   :  { %v11281_v29 = vpop.f32.mrf.mxu3  ;;  %v5050_v24 = vadd.f32 %v5049_v27, %v5026_v26 }
 0x957   :  { %12763 = vst [vmem:[#allocation140_spill] sm:$0xff] %v11281_v29 }
 0x958   :  { %v5095_v32 = vpop.f32.mrf.mxu2  ;;  %v11283_v38 = vpop.f32.mrf.mxu1 }
 0x959   :  { %12764 = vst [vmem:[#allocation113_spill] sm:$0xff] %v11283_v38  ;;  %v11285_v16 = vadd.f32 %v5095_v32, %v5072_v21 }
 0x95a   :  { %v5073_v12 = vpop.f32.mrf.mxu0 }
 0x95b   :  { %5396 = vmatmul.bf16.vlgmr.msrb.gmra.mxu1 %v12622_v44  ;;  %5420 = vmatmul.bf16.vlgmr.msrb.gmra.mxu3 %v12623_v50  ;;  %v5489_v25 = vmax.f32 %v11141_v31, %v11285_v16  ;;  %v5074_v36 = vadd.f32 %v5073_v12, %v5050_v24 }
 0x95d   :  { %5490 = vmax.xlane.f32.xlu1 %v5489_v25 }
 0x95e   :  { %v11291_v22 = vpop.f32.mrf.mxu3 }
 0x95f   :  { %12765 = vst [vmem:[#allocation137_spill] sm:$0xff] %v11291_v22 }
 0x960   :  { %v5097_v57 = vpop.f32.mrf.mxu2  ;;  %v11293_v39 = vpop.f32.mrf.mxu1 }
 0x961   :  { %v11295_v10 = vadd.f32 %v5097_v57, %v5074_v36 }
 0x962   :  { %v11297_v55 = vpop.f32.mrf.mxu0 }
 0x963   :  { %12766 = vst [vmem:[#allocation110_spill] sm:$0xff] %v11297_v55  ;;  %v5492_v44 = vmax.f32 %v11157_v40, %v11295_v10 }
 0x965   :  { %5358 = vmatmul.bf16.gmra.mxu0 %v12636_v52  ;;  %5382 = vmatmul.bf16.gmra.mxu2 %v10765_v11 }
 0x966   :  { %5493 = vmax.xlane.f32.xlu1 %v5492_v44  ;;  %v11303_v50 = vpop.f32.mrf.mxu3 }
 0x967   :  { %12767 = vst [vmem:[#allocation134_spill] sm:$0xff] %v11303_v50 }
 0x968   :  { %v11305_v27 = vpop.f32.mrf.mxu2  ;;  %v5119_v56 = vpop.f32.mrf.mxu1 }
 0x969   :  { %12768 = vst [vmem:[#allocation107_spill] sm:$0xff] %v11305_v27 }
 0x96a   :  { %v11307_v5 = vpop.f32.mrf.mxu0 }
 0x96b   :  { %12769 = vst [vmem:[#allocation131_spill] sm:$0xff] %v11307_v5  ;;  %5401 = vmatmul.bf16.gmra.mxu1 %v10787_v30  ;;  %5425 = vmatmul.bf16.gmra.mxu3 %v12640_v47  ;;  %v5120_v47 = vadd.f32 %v5119_v56, %v10997_v34 }
 0x96e   :  { %v5143_v17 = vpop.f32.mrf.mxu3 }
 0x970   :  { %v11311_v23 = vpop.f32.mrf.mxu2  ;;  %v5121_v60 = vpop.f32.mrf.mxu1 }
 0x971   :  { %12770 = vst [vmem:[#allocation104_spill] sm:$0xff] %v11311_v23  ;;  %v5122_v11 = vadd.f32 %v5121_v60, %v11016_v3 }
 0x972   :  { %v11313_v53 = vpop.f32.mrf.mxu0 }
 0x973   :  { %12771 = vst [vmem:[#allocation128_spill] sm:$0xff] %v11313_v53 }
 0x975   :  { %5444 = vmatmul.bf16.vlgmr.msrb.gmra.mxu0 %v10813_v15  ;;  %5468 = vmatmul.bf16.vlgmr.msrb.gmra.mxu2 %v12648_v61  ;;  %v5144_v61 = vadd.f32 %v5143_v17, %v5120_v47 }
 0x976   :  { %v5145_v52 = vpop.f32.mrf.mxu3 }
 0x977   :  { %v5146_v45 = vadd.f32 %v5145_v52, %v5122_v11 }
 0x978   :  { %v11318_v35 = vpop.f32.mrf.mxu2  ;;  %v11320_v51 = vpop.f32.mrf.mxu1 }
 0x979   :  { %12772 = vst [vmem:[#allocation164_spill] sm:$0xff] %v11318_v35 }
 0x97a   :  { %12773 = vst [vmem:[#allocation161_spill] sm:$0xff] %v11320_v51  ;;  %v11322_v30 = vpop.f32.mrf.mxu0 }
 0x97b   :  { %12774 = vst [vmem:[#allocation158_spill] sm:$0xff] %v11322_v30  ;;  %5406 = vmatmul.bf16.gmra.mxu1 %v10837_v62  ;;  %5430 = vmatmul.bf16.gmra.mxu3 %v10839_v49 }
 0x97e   :  { %v11327_v21 = vpop.f32.mrf.mxu3 }
 0x97f   :  { %12775 = vst [vmem:[#allocation155_spill] sm:$0xff] %v11327_v21 }
 0x980   :  { %v11329_v32 = vpop.f32.mrf.mxu2  ;;  %v11331_v15 = vpop.f32.mrf.mxu1 }
 0x981   :  { %12776 = vst [vmem:[#allocation152_spill] sm:$0xff] %v11329_v32 }
 0x982   :  { %12777 = vst [vmem:[#allocation33_spill] sm:$0xff] %v11331_v15  ;;  %v5167_v12 = vpop.f32.mrf.mxu0 }
 0x983   :  { %v5168_v26 = vadd.f32 %v5167_v12, %v5144_v61 }
 0x985   :  { %5449 = vmatmul.bf16.gmra.mxu0 %v10867_v4  ;;  %5473 = vmatmul.bf16.gmra.mxu2 %v10869_v1 }
 0x986   :  { %v11335_v25 = vpop.f32.mrf.mxu3 }
 0x987   :  { %12778 = vst [vmem:[#allocation58_spill] sm:$0xff] %v11335_v25 }
 0x988   :  { %v5191_v62 = vpop.f32.mrf.mxu2  ;;  %v11337_v24 = vpop.f32.mrf.mxu1 }
 0x989   :  { %12779 = vst [vmem:[#allocation142_spill] sm:$0xff] %v11337_v24  ;;  %v5192_v49 = vadd.f32 %v5191_v62, %v5168_v26 }
 0x98a   :  { %v5169_v36 = vpop.f32.mrf.mxu0 }
 0x98b   :  { %v5170_v57 = vadd.f32 %v5169_v36, %v5146_v45 }
 0x98e   :  { %v11339_v44 = vpop.f32.mrf.mxu3 }
 0x98f   :  { %12780 = vst [vmem:[#allocation138_spill] sm:$0xff] %v11339_v44 }
 0x990   :  { %v5193_v56 = vpop.f32.mrf.mxu2  ;;  %v11341_v60 = vpop.f32.mrf.mxu1 }
 0x991   :  { %12781 = vst [vmem:[#allocation30_spill] sm:$0xff] %v11341_v60  ;;  %v5194_v17 = vadd.f32 %v5193_v56, %v5170_v57 }
 0x992   :  { %v11343_v11 = vpop.f32.mrf.mxu0 }
 0x993   :  { %12782 = vst [vmem:[#allocation55_spill] sm:$0xff] %v11343_v11 }
 0x995   :  { %5454 = vmatmul.bf16.gmra.mxu0 %v10909_v14  ;;  %5478 = vmatmul.bf16.gmra.mxu2 %v10911_v33 }
 0x996   :  { %v11347_v4 = vpop.f32.mrf.mxu3 }
 0x997   :  { %12783 = vst [vmem:[#allocation27_spill] sm:$0xff] %v11347_v4 }
 0x998   :  { %v11349_v1 = vpop.f32.mrf.mxu2  ;;  %v5215_v52 = vpop.f32.mrf.mxu1 }
 0x999   :  { %12784 = vst [vmem:[#allocation52_spill] sm:$0xff] %v11349_v1  ;;  %v5216_v47 = vadd.f32 %v5215_v52, %v5192_v49 }
 0x99a   :  { %v11351_v61 = vpop.f32.mrf.mxu0 }
 0x99b   :  { %12785 = vst [vmem:[#allocation141_spill] sm:$0xff] %v11351_v61 }
 0x99e   :  { %v5239_v45 = vpop.f32.mrf.mxu3 }
 0x99f   :  { %v5240_v12 = vadd.f32 %v5239_v45, %v5216_v47 }
 0x9a0   :  { %v11353_v26 = vpop.f32.mrf.mxu2  ;;  %v5217_v62 = vpop.f32.mrf.mxu1 }
 0x9a1   :  { %12786 = vst [vmem:[#allocation148_spill] sm:$0xff] %v11353_v26  ;;  %v5218_v36 = vadd.f32 %v5217_v62, %v5194_v17 }
 0x9a2   :  { %v11355_v57 = vpop.f32.mrf.mxu0 }
 0x9a3   :  { %12787 = vst [vmem:[#allocation81_spill] sm:$0xff] %v11355_v57 }
 0x9a6   :  { %v5241_v56 = vpop.f32.mrf.mxu3 }
 0x9a7   :  { %v5242_v14 = vadd.f32 %v5241_v56, %v5218_v36 }
 0x9a8   :  { %v11357_v44 = vpop.f32.mrf.mxu2  ;;  %v11359_v33 = vpop.f32.mrf.mxu1 }
 0x9a9   :  { %12788 = vst [vmem:[#allocation105_spill] sm:$0xff] %v11357_v44 }
 0x9aa   :  { %v11361_v24 = vpop.f32.mrf.mxu0 }
 0x9ab   :  { %12789 = vst [vmem:[#allocation24_spill] sm:$0xff] %v11361_v24 }
 0x9ae   :  { %v11363_v1 = vpop.f32.mrf.mxu3 }
 0x9af   :  { %12790 = vst [vmem:[#allocation49_spill] sm:$0xff] %v11363_v1 }
 0x9b0   :  { %v11365_v49 = vpop.f32.mrf.mxu2  ;;  %v11367_v45 = vpop.f32.mrf.mxu1 }
 0x9b1   :  { %12791 = vst [vmem:[#allocation78_spill] sm:$0xff] %v11365_v49 }
 0x9b2   :  { %v5263_v52 = vpop.f32.mrf.mxu0  ;;  %12792 = vst [vmem:[#allocation102_spill] sm:$0xff] %v11367_v45 }
 0x9b3   :  { %v5264_v47 = vadd.f32 %v5263_v52, %v5240_v12 }
 0x9b6   :  { %v11369_v26 = vpop.f32.mrf.mxu3 }
 0x9b7   :  { %12793 = vst [vmem:[#allocation21_spill] sm:$0xff] %v11369_v26 }
 0x9b8   :  { %v5287_v17 = vpop.f32.mrf.mxu2  ;;  %v11373_v44 = vpop.f32.mrf.mxu1 }
 0x9b9   :  { %v11371_v62 = vadd.f32 %v5287_v17, %v5264_v47  ;;  %12794 = vst [vmem:[#allocation46_spill] sm:$0xff] %v11373_v44 }
 0x9ba   :  { %v5265_v36 = vpop.f32.mrf.mxu0 }
 0x9bb   :  { %v5266_v56 = vadd.f32 %v5265_v36, %v5242_v14 }
 0x9be   :  { %v11375_v57 = vpop.f32.mrf.mxu3 }
 0x9bf   :  { %12795 = vst [vmem:[#allocation75_spill] sm:$0xff] %v11375_v57 }
 0x9c0   :  { %v5289_v61 = vpop.f32.mrf.mxu2  ;;  %v11381_v49 = vpop.f32.mrf.mxu1 }
 0x9c1   :  { %v11377_v35 = vadd.f32 %v5289_v61, %v5266_v56 }
 0x9c2   :  { %v11379_v25 = vpop.f32.mrf.mxu0 }
 0x9c3   :  { %12796 = vst [vmem:[#allocation99_spill] sm:$0xff] %v11379_v25 }
 0x9c6   :  { %v11385_v52 = vpop.f32.mrf.mxu3 }
 0x9c7   :  { %12798 = vst [vmem:[#allocation72_spill] sm:$0xff] %v11385_v52 }
 0x9c8   :  { %v11383_v12 = vpop.f32.mrf.mxu2  ;;  %v5311_v36 = vpop.f32.mrf.mxu1 }
 0x9c9   :  { %12797 = vst [vmem:[#allocation151_spill] sm:$0xff] %v11383_v12 }
 0x9ca   :  { %v11387_v24 = vpop.f32.mrf.mxu0 }
 0x9cb   :  { %12799 = vst [vmem:[#allocation96_spill] sm:$0xff] %v11387_v24 }
 0x9ce   :  { %v5335_v15 = vpop.f32.mrf.mxu3 }
 0x9d0   :  { %v11389_v47 = vpop.f32.mrf.mxu2  ;;  %v11391_v14 = vpop.xlane.xlu1 %5490 }
 0x9d1   :  { %12800 = vst [vmem:[#allocation154_spill] sm:$0xff] %v11389_v47  ;;  %v5495_v17 = vsub.f32 %v11141_v31, %v11391_v14  ;;  %v5496_v61 = vsub.f32 %v11285_v16, %v11391_v14 }
 0x9d2   :  { %v11397_v56 = vpop.f32.mrf.mxu0 }
 0x9d3   :  { %12801 = vst [vmem:[#allocation69_spill] sm:$0xff] %v11397_v56  ;;  %v5499_v11 = vmul.f32 1.442695, %v5495_v17  ;;  %v5501_v53 = vmul.f32 1.442695, %v5496_v61  ;;  %v5313_v56 = vpop.f32.mrf.mxu1 }
 0x9d5   :  { %7649 = vpow2.f32 %v5499_v11 }
 0x9d6   :  { %7651 = vpow2.f32 %v5501_v53  ;;  %v5337_v11 = vpop.f32.mrf.mxu3 }
 0x9d8   :  { %v11399_v57 = vpop.f32.mrf.mxu2 }
 0x9d9   :  { %12802 = vst [vmem:[#allocation93_spill] sm:$0xff] %v11399_v57  ;;  %v11401_v4 = vpop.xlane.xlu1 %5493 }
 0x9da   :  { %v5497_v22 = vsub.f32 %v11157_v40, %v11401_v4  ;;  %v5498_v21 = vsub.f32 %v11295_v10, %v11401_v4  ;;  %v11407_v47 = vpop.f32.mrf.mxu0 }
 0x9db   :  { %12803 = vst [vmem:[#allocation66_spill] sm:$0xff] %v11407_v47  ;;  %v7650_v23 = vpop.eup %7649  ;;  %v11411_v24 = vpop.f32.mrf.mxu1 }
 0x9dc   :  { %v7652_v44 = vpop.eup %7651  ;;  %v5503_v17 = vmul.f32 1.442695, %v5497_v22  ;;  %v5505_v61 = vmul.f32 1.442695, %v5498_v21  ;;  %12805 = vst [vmem:[#allocation63_spill] sm:$0xff] %v11411_v24 }
 0x9dd   :  { %v5507_v60 = vadd.f32 %v7652_v44, %v7650_v23 }
 0x9de   :  { %7653 = vpow2.f32 %v5503_v17  ;;  %v11413_v32 = vpop.f32.mrf.mxu3 }
 0x9df   :  { %7655 = vpow2.f32 %v5505_v61  ;;  %5508 = vadd.xlane.f32.xlu0 %v5507_v60  ;;  %12806 = vst [vmem:[#allocation87_spill] sm:$0xff] %v11413_v32 }
 0x9e0   :  { %v11409_v53 = vpop.f32.mrf.mxu2 }
 0x9e1   :  { %12804 = vst [vmem:[#allocation90_spill] sm:$0xff] %v11409_v53 }
 0x9e2   :  { %v5359_v57 = vpop.f32.mrf.mxu0 }
 0x9e3   :  { %v11415_v22 = vpop.f32.mrf.mxu1 }
 0x9e4   :  { %v7654_v38 = vpop.eup %7653  ;;  %12807 = vst [vmem:[#allocation157_spill] sm:$0xff] %v11415_v22 }
 0x9e5   :  { %v7656_v51 = vpop.eup %7655 }
 0x9e6   :  { %v5510_v5 = vadd.f32 %v7656_v51, %v7654_v38  ;;  %v11417_v21 = vpop.f32.mrf.mxu3 }
 0x9e7   :  { %12808 = vst [vmem:[#allocation129_spill] sm:$0xff] %v11417_v21  ;;  %v5312_v21 = vadd.f32 %v5311_v36, %v10997_v34 }
 0x9e8   :  { %5511 = vadd.xlane.f32.xlu1 %v5510_v5  ;;  %v5383_v12 = vpop.f32.mrf.mxu2 }
 0x9ea   :  { %v5361_v27 = vpop.f32.mrf.mxu0 }
 0x9eb   :  { %v11423_v17 = vpop.f32.mrf.mxu1 }
 0x9ec   :  { %12811 = vst [vmem:[#allocation126_spill] sm:$0xff] %v11423_v17 }
 0x9ee   :  { %v11427_v24 = vpop.f32.mrf.mxu3 }
 0x9ef   :  { %12813 = vst [vmem:[#allocation120_spill] sm:$0xff] %v11427_v24  ;;  %v5314_v24 = vadd.f32 %v5313_v56, %v11016_v3 }
 0x9f0   :  { %v5385_v23 = vpop.f32.mrf.mxu2 }
 0x9f2   :  { %v11419_v44 = vpop.f32.mrf.mxu0 }
 0x9f3   :  { %12809 = vst [vmem:[#allocation60_spill] sm:$0xff] %v11419_v44  ;;  %v11433_v51 = vpop.f32.mrf.mxu1 }
 0x9f4   :  { %12816 = vst [vmem:[#allocation114_spill] sm:$0xff] %v11433_v51  ;;  %v5338_v51 = vadd.f32 %v5337_v11, %v5314_v24 }
 0x9f6   :  { %v11435_v22 = vpop.f32.mrf.mxu3 }
 0x9f7   :  { %12817 = vst [vmem:[#allocation144_spill] sm:$0xff] %v11435_v22  ;;  %v5362_v22 = vadd.f32 %v5361_v27, %v5338_v51 }
 0x9f8   :  { %v11421_v60 = vpop.f32.mrf.mxu2 }
 0x9f9   :  { %12810 = vst [vmem:[#allocation84_spill] sm:$0xff] %v11421_v60  ;;  %v5336_v60 = vadd.f32 %v5335_v15, %v5312_v21  ;;  %v5386_v34 = vadd.f32 %v5385_v23, %v5362_v22 }
 0x9fa   :  { %v11425_v61 = vpop.f32.mrf.mxu0 }
 0x9fb   :  { %12812 = vst [vmem:[#allocation123_spill] sm:$0xff] %v11425_v61  ;;  %v5407_v17 = vpop.f32.mrf.mxu1  ;;  %v5360_v53 = vadd.f32 %v5359_v57, %v5336_v60 }
 0x9fe   :  { %v5431_v61 = vpop.f32.mrf.mxu3 }
 0xa00   :  { %v11429_v38 = vpop.f32.mrf.mxu2 }
 0xa01   :  { %12814 = vst [vmem:[#allocation117_spill] sm:$0xff] %v11429_v38  ;;  %v5384_v38 = vadd.f32 %v5383_v12, %v5360_v53 }
 0xa02   :  { %v11431_v5 = vpop.f32.mrf.mxu0 }
 0xa03   :  { %12815 = vst [vmem:[#allocation150_spill] sm:$0xff] %v11431_v5  ;;  %v5408_v29 = vadd.f32 %v5407_v17, %v5384_v38 }
 0xa05   :  { %v5432_v47 = vadd.f32 %v5431_v61, %v5408_v29 }
 0xa06   :  { %v5433_v15 = vpop.f32.mrf.mxu3 }
 0xa08   :  { %v11437_v32 = vpop.f32.mrf.mxu2 }
 0xa09   :  { %12818 = vst [vmem:[#allocation9_spill] sm:$0xff] %v11437_v32  ;;  %v5409_v32 = vpop.f32.mrf.mxu1 }
 0xa0a   :  { %v11440_v44 = vpop.f32.mrf.mxu0  ;;  %v5410_v21 = vadd.f32 %v5409_v32, %v5386_v34  ;;  %v7912_v34 = vmov 2.0  }
 0xa0b   :  { %12819 = vst [vmem:[#allocation28_spill] sm:$0xff] %v11440_v44 }
 0xa10   :  { %v11442_v26 = vpop.f32.mrf.mxu2 }
 0xa11   :  { %12820 = vst [vmem:[#allocation111_spill] sm:$0xff] %v11442_v26  ;;  %v5434_v26 = vadd.f32 %v5433_v15, %v5410_v21 }
 0xa12   :  { %v5455_v5 = vpop.f32.mrf.mxu0 }
 0xa13   :  { %v5456_v30 = vadd.f32 %v5455_v5, %v5432_v47 }
 0xa18   :  { %v5479_v25 = vpop.f32.mrf.mxu2 }
 0xa19   :  { %v11445_v36 = vadd.f32 %v5479_v25, %v5456_v30 }
 0xa1a   :  { %v5457_v60 = vpop.f32.mrf.mxu0 }
 0xa1b   :  { %v5975_v57 = vmax.f32 %v11371_v62, %v11445_v36  ;;  %v5458_v3 = vadd.f32 %v5457_v60, %v5434_v26 }
 0xa1d   :  { %5976 = vmax.xlane.f32.xlu2 %v5975_v57 }
 0xa20   :  { %v5481_v12 = vpop.f32.mrf.mxu2 }
 0xa21   :  { %v11449_v56 = vadd.f32 %v5481_v12, %v5458_v3 }
 0xa23   :  { %v5978_v29 = vmax.f32 %v11377_v35, %v11449_v56 }
 0xa25   :  { %5979 = vmax.xlane.f32.xlu2 %v5978_v29 }
 0xa52   :  { %v5509_v21 = vpop.xlane.xlu0 %5508 }
 0xa5b   :  { %v5512_v15 = vpop.xlane.xlu1 %5511 }
 0xa90   :  { %v11453_v27 = vpop.xlane.xlu2 %5976 }
 0xa91   :  { %v5981_v30 = vsub.f32 %v11371_v62, %v11453_v27  ;;  %v5982_v32 = vsub.f32 %v11445_v36, %v11453_v27 }
 0xa93   :  { %v5985_v25 = vmul.f32 1.442695, %v5981_v30  ;;  %v5987_v24 = vmul.f32 1.442695, %v5982_v32 }
 0xa95   :  { %7657 = vpow2.f32 %v5985_v25 }
 0xa96   :  { %7659 = vpow2.f32 %v5987_v24 }
 0xa98   :  { %v11459_v26 = vpop.xlane.xlu2 %5979 }
 0xa99   :  { %v5983_v47 = vsub.f32 %v11377_v35, %v11459_v26  ;;  %v5984_v11 = vsub.f32 %v11449_v56, %v11459_v26 }
 0xa9b   :  { %v5989_v53 = vmul.f32 1.442695, %v5983_v47  ;;  %v5991_v22 = vmul.f32 1.442695, %v5984_v11  ;;  %v7658_v23 = vpop.eup %7657 }
 0xa9c   :  { %v7660_v17 = vpop.eup %7659 }
 0xa9d   :  { %7661 = vpow2.f32 %v5989_v53  ;;  %v5993_v61 = vadd.f32 %v7660_v17, %v7658_v23 }
 0xa9e   :  { %7663 = vpow2.f32 %v5991_v22 }
 0xa9f   :  { %5994 = vadd.xlane.f32.xlu2 %v5993_v61  ;;  %7665 = vlog2.f32 %v5512_v15 }
 0xaa0   :  { %7667 = vlog2.f32 %v5509_v21 }
 0xaa3   :  { %v7662_v38 = vpop.eup %7661 }
 0xaa4   :  { %v7664_v5 = vpop.eup %7663 }
 0xaa5   :  { %v5996_v51 = vadd.f32 %v7664_v5, %v7662_v38  ;;  %v7666_v57 = vpop.eup %7665 }
 0xaa6   :  { %v7668_v60 = vpop.eup %7667  ;;  %v5516_v3 = vmul.f32 0.6931472, %v7666_v57 }
 0xaa7   :  { %5997 = vadd.xlane.f32.xlu1 %v5996_v51  ;;  %5521 = vadd.xlane.f32.xlu2 %v7912_v34  ;;  %v5514_v12 = vmul.f32 0.6931472, %v7668_v60 }
 0xaa8   :  { %v5518_v29 = vadd.f32 %v5516_v3, %v11401_v4 }
 0xaa9   :  { %v5517_v30 = vadd.f32 %v5514_v12, %v11391_v14 }
 0xaaa   :  { %v5520_v32 = vsub.f32 -5.605802, %v5518_v29 }
 0xaab   :  { %v5519_v25 = vsub.f32 -5.605802, %v5517_v30 }
 0xaac   :  { %v5531_v24 = vadd.f32 %v5520_v32, %v11157_v40  ;;  %v5532_v47 = vadd.f32 %v5520_v32, %v11295_v10 }
 0xaad   :  { %v5529_v11 = vadd.f32 %v5519_v25, %v11141_v31  ;;  %v5530_v53 = vadd.f32 %v5519_v25, %v11285_v16 }
 0xaaf   :  { %v5533_v22 = vmax.f32 %v5529_v11, %v5531_v24  ;;  %v5540_v23 = vmax.f32 %v5530_v53, %v5532_v47 }
 0xab1   :  { %v5534_v17 = vrot.slane %v5533_v22, 4  ;;  %v5541_v61 = vrot.slane %v5540_v23, 4 }
 0xab3   :  { %v5535_v38 = vmax.f32 %v5533_v22, %v5534_v17  ;;  %v5542_v5 = vmax.f32 %v5540_v23, %v5541_v61 }
 0xab5   :  { %v5536_v51 = vrot.slane %v5535_v38, 2  ;;  %v5543_v4 = vrot.slane %v5542_v5, 2 }
 0xab7   :  { %v5537_v34 = vmax.f32 %v5535_v38, %v5536_v51  ;;  %v5544_v14 = vmax.f32 %v5542_v5, %v5543_v4 }
 0xab9   :  { %v5538_v15 = vrot.slane %v5537_v34, 1  ;;  %v5545_v21 = vrot.slane %v5544_v14, 1 }
 0xabb   :  { %v5539_v57 = vmax.f32 %v5537_v34, %v5538_v15  ;;  %v5546_v60 = vmax.f32 %v5544_v14, %v5545_v21 }
 0xabd   :  { %v5547_v3 = vsub.f32 %v5529_v11, %v5539_v57  ;;  %v5548_v12 = vsub.f32 %v5530_v53, %v5546_v60  ;;  %v5549_v29 = vsub.f32 %v5531_v24, %v5539_v57  ;;  %v5550_v30 = vsub.f32 %v5532_v47, %v5546_v60 }
 0xabf   :  { %v5551_v32 = vmul.f32 1.442695, %v5547_v3  ;;  %v5553_v25 = vmul.f32 1.442695, %v5548_v12  ;;  %v5555_v44 = vmul.f32 1.442695, %v5549_v29 }
 0xac0   :  { %v5557_v55 = vmul.f32 1.442695, %v5550_v30 }
 0xac1   :  { %7669 = vpow2.f32 %v5551_v32 }
 0xac2   :  { %7671 = vpow2.f32 %v5553_v25 }
 0xac3   :  { %7673 = vpow2.f32 %v5555_v44 }
 0xac4   :  { %7675 = vpow2.f32 %v5557_v55 }
 0xac7   :  { %v7670_v22 = vpop.eup %7669 }
 0xac8   :  { %v7672_v23 = vpop.eup %7671 }
 0xac9   :  { %v7674_v17 = vpop.eup %7673 }
 0xaca   :  { %v7676_v61 = vpop.eup %7675  ;;  %v5559_v38 = vadd.f32 %v7674_v17, %v7670_v22 }
 0xacb   :  { %v5566_v5 = vadd.f32 %v7676_v61, %v7672_v23 }
 0xacc   :  { %v5560_v51 = vrot.slane %v5559_v38, 4 }
 0xacd   :  { %v5567_v4 = vrot.slane %v5566_v5, 4 }
 0xace   :  { %v5561_v11 = vadd.f32 %v5560_v51, %v5559_v38  ;;  %v11475_v38 = vstv %s11949_s4 }
 0xacf   :  { %v5568_v53 = vadd.f32 %v5567_v4, %v5566_v5 }
 0xad0   :  { %v5562_v24 = vrot.slane %v5561_v11, 2 }
 0xad1   :  { %v5569_v47 = vrot.slane %v5568_v53, 2 }
 0xad2   :  { %v5563_v34 = vadd.f32 %v5562_v24, %v5561_v11 }
 0xad3   :  { %v5570_v14 = vadd.f32 %v5569_v47, %v5568_v53 }
 0xad4   :  { %v5564_v15 = vrot.slane %v5563_v34, 1 }
 0xad5   :  { %v5571_v21 = vrot.slane %v5570_v14, 1 }
 0xad6   :  { %v5565_v44 = vadd.f32 %v5564_v15, %v5563_v34 }
 0xad7   :  { %v5572_v55 = vadd.f32 %v5571_v21, %v5570_v14 }
 0xb12   :  { %v5995_v3 = vpop.xlane.xlu2 %5994 }
 0xb13   :  { %7677 = vlog2.f32 %v5995_v3 }
 0xb14   :  { %7679 = vlog2.f32 %v5565_v44 }
 0xb15   :  { %7681 = vlog2.f32 %v5572_v55 }
 0xb19   :  { %v7678_v12 = vpop.eup %7677 }
 0xb1a   :  { %v5998_v29 = vpop.xlane.xlu1 %5997  ;;  %v5522_v30 = vpop.xlane.xlu2 %5521  ;;  %v6000_v32 = vmul.f32 0.6931472, %v7678_v12 }
 0xb1b   :  { %7683 = vlog2.f32 %v5998_v29  ;;  %v7680_v25 = vpop.eup %7679 }
 0xb1c   :  { %7685 = vlog2.f32 %v5522_v30  ;;  %v7682_v22 = vpop.eup %7681  ;;  %v6003_v23 = vadd.f32 %v6000_v32, %v11453_v27  ;;  %v5574_v53 = vmul.f32 0.6931472, %v7680_v25 }
 0xb1d   :  { %v5576_v24 = vmul.f32 0.6931472, %v7682_v22 }
 0xb1e   :  { %v6005_v4 = vsub.f32 -5.605802, %v6003_v23  ;;  %v5577_v44 = vadd.f32 %v5574_v53, %v5539_v57 }
 0xb1f   :  { %v5578_v55 = vadd.f32 %v5576_v24, %v5546_v60 }
 0xb20   :  { %v6007_v27 = vadd.f32 %v6005_v4, %v11371_v62  ;;  %v6008_v15 = vadd.f32 %v6005_v4, %v11445_v36 }
 0xb21   :  { %v7684_v17 = vpop.eup %7683 }
 0xb22   :  { %v7686_v61 = vpop.eup %7685  ;;  %v6002_v5 = vmul.f32 0.6931472, %v7684_v17 }
 0xb23   :  { %v5524_v51 = vmul.f32 0.6931472, %v7686_v61 }
 0xb24   :  { %v6004_v11 = vadd.f32 %v6002_v5, %v11459_v26 }
 0xb25   :  { %v5527_v47 = vadd.f32 %v11475_v38, %v5524_v51 }
 0xb26   :  { %v6006_v34 = vsub.f32 -5.605802, %v6004_v11 }
 0xb27   :  { %v5528_v14 = vsub.f32 -0.12516314, %v5527_v47 }
 0xb28   :  { %v6009_v21 = vadd.f32 %v6006_v34, %v11377_v35  ;;  %v6010_v3 = vadd.f32 %v6006_v34, %v11449_v56 }
 0xb29   :  { %v11484_v12 = vadd.f32 %v5528_v14, %v11475_v38 }
 0xb2a   :  { %v6011_v26 = vmax.f32 %v6007_v27, %v6009_v21  ;;  %v6018_v29 = vmax.f32 %v6008_v15, %v6010_v3 }
 0xb2b   :  { %v5580_v30 = vmax.f32 %v5577_v44, %v11484_v12  ;;  %v5581_v32 = vmax.f32 %v5578_v55, %v11484_v12 }
 0xb2c   :  { %v6012_v25 = vrot.slane %v6011_v26, 4  ;;  %v6019_v22 = vrot.slane %v6018_v29, 4 }
 0xb2d   :  { %v5582_v23 = vsub.f32 %v5577_v44, %v5580_v30  ;;  %v5583_v17 = vsub.f32 %v5578_v55, %v5581_v32  ;;  %v5588_v61 = vsub.f32 %v11484_v12, %v5580_v30  ;;  %v5589_v5 = vsub.f32 %v11484_v12, %v5581_v32 }
 0xb2e   :  { %v6013_v51 = vmax.f32 %v6011_v26, %v6012_v25  ;;  %v6020_v57 = vmax.f32 %v6018_v29, %v6019_v22 }
 0xb2f   :  { %v5584_v60 = vmul.f32 1.442695, %v5582_v23  ;;  %v5586_v4 = vmul.f32 1.442695, %v5583_v17  ;;  %v5590_v11 = vmul.f32 1.442695, %v5588_v61 }
 0xb30   :  { %v6014_v53 = vrot.slane %v6013_v51, 2  ;;  %v6021_v24 = vrot.slane %v6020_v57, 2  ;;  %v5592_v47 = vmul.f32 1.442695, %v5589_v5 }
 0xb31   :  { %7687 = vpow2.f32 %v5584_v60 }
 0xb32   :  { %v6015_v34 = vmax.f32 %v6013_v51, %v6014_v53  ;;  %v6022_v14 = vmax.f32 %v6020_v57, %v6021_v24  ;;  %7689 = vpow2.f32 %v5586_v4 }
 0xb33   :  { %7691 = vpow2.f32 %v5590_v11 }
 0xb34   :  { %v6016_v45 = vrot.slane %v6015_v34, 1  ;;  %v6023_v44 = vrot.slane %v6022_v14, 1  ;;  %7693 = vpow2.f32 %v5592_v47 }
 0xb36   :  { %v6017_v55 = vmax.f32 %v6015_v34, %v6016_v45  ;;  %v6024_v52 = vmax.f32 %v6022_v14, %v6023_v44 }
 0xb37   :  { %v7688_v50 = vpop.eup %7687 }
 0xb38   :  { %v7690_v1 = vpop.eup %7689  ;;  %v6025_v26 = vsub.f32 %v6007_v27, %v6017_v55  ;;  %v6026_v29 = vsub.f32 %v6008_v15, %v6024_v52  ;;  %v6027_v25 = vsub.f32 %v6009_v21, %v6017_v55  ;;  %v6028_v22 = vsub.f32 %v6010_v3, %v6024_v52 }
 0xb39   :  { %v7692_v23 = vpop.eup %7691 }
 0xb3a   :  { %v7694_v17 = vpop.eup %7693  ;;  %v6029_v61 = vmul.f32 1.442695, %v6025_v26  ;;  %v6031_v5 = vmul.f32 1.442695, %v6026_v29  ;;  %v6033_v60 = vmul.f32 1.442695, %v6027_v25  ;;  %v5594_v57 = vadd.f32 %v7692_v23, %v7688_v50 }
 0xb3b   :  { %v6035_v51 = vmul.f32 1.442695, %v6028_v22  ;;  %v5595_v4 = vadd.f32 %v7694_v17, %v7690_v1 }
 0xb3c   :  { %7695 = vpow2.f32 %v6029_v61 }
 0xb3d   :  { %7697 = vpow2.f32 %v6031_v5 }
 0xb3e   :  { %7699 = vpow2.f32 %v6033_v60 }
 0xb3f   :  { %7701 = vpow2.f32 %v6035_v51 }
 0xb40   :  { %7703 = vlog2.f32 %v5594_v57 }
 0xb41   :  { %7705 = vlog2.f32 %v5595_v4 }
 0xb42   :  { %v7696_v45 = vpop.eup %7695 }
 0xb43   :  { %v7698_v11 = vpop.eup %7697 }
 0xb44   :  { %v7700_v27 = vpop.eup %7699 }
 0xb45   :  { %v7702_v15 = vpop.eup %7701  ;;  %v6037_v21 = vadd.f32 %v7700_v27, %v7696_v45 }
 0xb46   :  { %v7704_v3 = vpop.eup %7703  ;;  %v6044_v53 = vadd.f32 %v7702_v15, %v7698_v11 }
 0xb47   :  { %v7706_v24 = vpop.eup %7705  ;;  %v6038_v47 = vrot.slane %v6037_v21, 4  ;;  %v5597_v34 = vmul.f32 0.6931472, %v7704_v3 }
 0xb48   :  { %v6045_v14 = vrot.slane %v6044_v53, 4  ;;  %v5599_v44 = vmul.f32 0.6931472, %v7706_v24 }
 0xb49   :  { %v6039_v26 = vadd.f32 %v6038_v47, %v6037_v21  ;;  %v5600_v50 = vadd.f32 %v5597_v34, %v5580_v30 }
 0xb4a   :  { %v6046_v29 = vadd.f32 %v6045_v14, %v6044_v53  ;;  %v5601_v1 = vadd.f32 %v5599_v44, %v5581_v32 }
 0xb4b   :  { %v6040_v25 = vrot.slane %v6039_v26, 2  ;;  %v11490_v22 = vsub.f32 -5.605802, %v5600_v50 }
 0xb4c   :  { %v6047_v23 = vrot.slane %v6046_v29, 2  ;;  %v11492_v17 = vsub.f32 -5.605802, %v5601_v1 }
 0xb4d   :  { %v6041_v61 = vadd.f32 %v6040_v25, %v6039_v26  ;;  %v11496_v5 = vadd.f32 %v11490_v22, %v11157_v40  ;;  %v11500_v60 = vadd.f32 %v11490_v22, %v11141_v31 }
 0xb4e   :  { %v6048_v51 = vadd.f32 %v6047_v23, %v6046_v29  ;;  %v11504_v30 = vadd.f32 %v11492_v17, %v11295_v10  ;;  %v11508_v32 = vadd.f32 %v11492_v17, %v11285_v16 }
 0xb4f   :  { %v6042_v57 = vrot.slane %v6041_v61, 1 }
 0xb50   :  { %v6049_v4 = vrot.slane %v6048_v51, 1  ;;  %v5611_v45 = vmax.f32 %v11496_v5, %v11504_v30  ;;  %v5608_v11 = vmax.f32 %v11500_v60, %v11508_v32 }
 0xb51   :  { %v6043_v27 = vadd.f32 %v6042_v57, %v6041_v61 }
 0xb52   :  { %v6050_v15 = vadd.f32 %v6049_v4, %v6048_v51  ;;  %5612 = vmax.xlane.f32.xlu2 %v5611_v45  ;;  %5609 = vmax.xlane.f32.xlu1 %v5608_v11 }
 0xb53   :  { %7707 = vlog2.f32 %v6043_v27 }
 0xb54   :  { %7709 = vlog2.f32 %v6050_v15 }
 0xb59   :  { %v7708_v21 = vpop.eup %7707 }
 0xb5a   :  { %v7710_v3 = vpop.eup %7709  ;;  %v6052_v53 = vmul.f32 0.6931472, %v7708_v21 }
 0xb5b   :  { %v6054_v24 = vmul.f32 0.6931472, %v7710_v3 }
 0xb5c   :  { %v6055_v47 = vadd.f32 %v6052_v53, %v6017_v55 }
 0xb5d   :  { %v6056_v34 = vadd.f32 %v6054_v24, %v6024_v52 }
 0xb5e   :  { %v6057_v14 = vmax.f32 %v6055_v47, %v11484_v12 }
 0xb5f   :  { %v6058_v44 = vmax.f32 %v6056_v34, %v11484_v12 }
 0xb60   :  { %v6059_v26 = vsub.f32 %v6055_v47, %v6057_v14  ;;  %v6065_v50 = vsub.f32 %v11484_v12, %v6057_v14 }
 0xb61   :  { %v6060_v29 = vsub.f32 %v6056_v34, %v6058_v44  ;;  %v6066_v1 = vsub.f32 %v11484_v12, %v6058_v44 }
 0xb62   :  { %v6061_v25 = vmul.f32 1.442695, %v6059_v26  ;;  %v6067_v23 = vmul.f32 1.442695, %v6065_v50 }
 0xb63   :  { %v6063_v61 = vmul.f32 1.442695, %v6060_v29  ;;  %v6069_v51 = vmul.f32 1.442695, %v6066_v1 }
 0xb64   :  { %7711 = vpow2.f32 %v6061_v25 }
 0xb65   :  { %7713 = vpow2.f32 %v6063_v61 }
 0xb66   :  { %7715 = vpow2.f32 %v6067_v23 }
 0xb67   :  { %7717 = vpow2.f32 %v6069_v51 }
 0xb6a   :  { %v7712_v55 = vpop.eup %7711 }
 0xb6b   :  { %v7714_v52 = vpop.eup %7713 }
 0xb6c   :  { %v7716_v57 = vpop.eup %7715 }
 0xb6d   :  { %v7718_v4 = vpop.eup %7717  ;;  %v6071_v45 = vadd.f32 %v7716_v57, %v7712_v55 }
 0xb6e   :  { %v6072_v11 = vadd.f32 %v7718_v4, %v7714_v52 }
 0xb6f   :  { %7719 = vlog2.f32 %v6071_v45 }
 0xb70   :  { %7721 = vlog2.f32 %v6072_v11 }
 0xb75   :  { %v7720_v27 = vpop.eup %7719 }
 0xb76   :  { %v7722_v15 = vpop.eup %7721  ;;  %v6074_v21 = vmul.f32 0.6931472, %v7720_v27 }
 0xb77   :  { %v6076_v12 = vmul.f32 0.6931472, %v7722_v15 }
 0xb78   :  { %v6077_v3 = vadd.f32 %v6074_v21, %v6057_v14  ;;  %v5640_v14 = vmax.f32 %v11490_v22, %v11492_v17 }
 0xb79   :  { %v6078_v53 = vadd.f32 %v6076_v12, %v6058_v44 }
 0xb7a   :  { %v11518_v24 = vsub.f32 -5.605802, %v6077_v3 }
 0xb7b   :  { %v11520_v47 = vsub.f32 -5.605802, %v6078_v53 }
 0xb7c   :  { %v6083_v34 = vadd.f32 %v11518_v24, %v11377_v35  ;;  %v6081_v26 = vadd.f32 %v11518_v24, %v11371_v62 }
 0xb7d   :  { %v6084_v50 = vadd.f32 %v11520_v47, %v11449_v56  ;;  %v6082_v29 = vadd.f32 %v11520_v47, %v11445_v36 }
 0xb7f   :  { %v6088_v1 = vmax.f32 %v6083_v34, %v6084_v50  ;;  %v6085_v25 = vmax.f32 %v6081_v26, %v6082_v29 }
 0xb81   :  { %6089 = vmax.xlane.f32.xlu2 %v6088_v1  ;;  %6086 = vmax.xlane.f32.xlu1 %v6085_v25 }
 0xb89   :  { %5641 = vmax.xlane.f32.xlu1 %v5640_v14 }
 0xbc5   :  { %v11532_v44 = vpop.xlane.xlu2 %5612  ;;  %v11534_v23 = vpop.xlane.xlu1 %5609 }
 0xbc6   :  { %v5616_v61 = vsub.f32 %v11496_v5, %v11532_v44  ;;  %v5617_v51 = vsub.f32 %v11504_v30, %v11532_v44  ;;  %v5614_v55 = vsub.f32 %v11500_v60, %v11534_v23  ;;  %v5615_v52 = vsub.f32 %v11508_v32, %v11534_v23 }
 0xbc7   :  { %v6117_v60 = vmax.f32 %v11518_v24, %v11520_v47 }
 0xbc8   :  { %v5622_v57 = vmul.f32 1.442695, %v5616_v61  ;;  %v5624_v4 = vmul.f32 1.442695, %v5617_v51  ;;  %v5618_v45 = vmul.f32 1.442695, %v5614_v55 }
 0xbc9   :  { %v5620_v11 = vmul.f32 1.442695, %v5615_v52 }
 0xbca   :  { %7723 = vpow2.f32 %v5622_v57 }
 0xbcb   :  { %7725 = vpow2.f32 %v5624_v4 }
 0xbcc   :  { %7727 = vpow2.f32 %v5618_v45 }
 0xbcd   :  { %7729 = vpow2.f32 %v5620_v11 }
 0xbd0   :  { %v7724_v27 = vpop.eup %7723 }
 0xbd1   :  { %v7726_v15 = vpop.eup %7725 }
 0xbd2   :  { %v7728_v5 = vpop.eup %7727  ;;  %v5629_v21 = vadd.f32 %v7726_v15, %v7724_v27 }
 0xbd3   :  { %v7730_v12 = vpop.eup %7729 }
 0xbd4   :  { %5630 = vadd.xlane.f32.xlu1 %v5629_v21  ;;  %v5626_v30 = vadd.f32 %v7730_v12, %v7728_v5 }
 0xbd6   :  { %5627 = vadd.xlane.f32.xlu2 %v5626_v30 }
 0xbde   :  { %6118 = vmax.xlane.f32.xlu2 %v6117_v60 }
 0xbf4   :  { %v11546_v32 = vpop.xlane.xlu2 %6089  ;;  %v11548_v3 = vpop.xlane.xlu1 %6086 }
 0xbf5   :  { %v6093_v53 = vsub.f32 %v6083_v34, %v11546_v32  ;;  %v6094_v1 = vsub.f32 %v6084_v50, %v11546_v32  ;;  %v6091_v25 = vsub.f32 %v6081_v26, %v11548_v3  ;;  %v6092_v14 = vsub.f32 %v6082_v29, %v11548_v3 }
 0xbf7   :  { %v6099_v61 = vmul.f32 1.442695, %v6093_v53  ;;  %v6101_v51 = vmul.f32 1.442695, %v6094_v1  ;;  %v6095_v55 = vmul.f32 1.442695, %v6091_v25 }
 0xbf8   :  { %v6097_v52 = vmul.f32 1.442695, %v6092_v14 }
 0xbf9   :  { %7731 = vpow2.f32 %v6099_v61 }
 0xbfa   :  { %7733 = vpow2.f32 %v6101_v51 }
 0xbfb   :  { %7735 = vpow2.f32 %v6095_v55 }
 0xbfc   :  { %7737 = vpow2.f32 %v6097_v52  ;;  %v11554_v57 = vpop.xlane.xlu1 %5641 }
 0xbfd   :  { %v5643_v4 = vsub.f32 %v11490_v22, %v11554_v57  ;;  %v5644_v34 = vsub.f32 %v11492_v17, %v11554_v57 }
 0xbff   :  { %v7732_v50 = vpop.eup %7731  ;;  %v5645_v26 = vmul.f32 1.442695, %v5643_v4  ;;  %v5647_v45 = vmul.f32 1.442695, %v5644_v34 }
 0xc00   :  { %v7734_v29 = vpop.eup %7733 }
 0xc01   :  { %v7736_v11 = vpop.eup %7735  ;;  %7739 = vpow2.f32 %v5645_v26  ;;  %v6106_v27 = vadd.f32 %v7734_v29, %v7732_v50 }
 0xc02   :  { %v7738_v15 = vpop.eup %7737  ;;  %7741 = vpow2.f32 %v5647_v45 }
 0xc03   :  { %6107 = vadd.xlane.f32.xlu1 %v6106_v27  ;;  %v6103_v5 = vadd.f32 %v7738_v15, %v7736_v11 }
 0xc05   :  { %6104 = vadd.xlane.f32.xlu0 %v6103_v5 }
 0xc07   :  { %v7740_v21 = vpop.eup %7739 }
 0xc08   :  { %v7742_v12 = vpop.eup %7741 }
 0xc09   :  { %v5649_v30 = vadd.f32 %v7742_v12, %v7740_v21 }
 0xc0b   :  { %5650 = vadd.xlane.f32.xlu2 %v5649_v30 }
 0xc47   :  { %v5631_v22 = vpop.xlane.xlu1 %5630 }
 0xc48   :  { %7743 = vlog2.f32 %v5631_v22 }
 0xc49   :  { %v5628_v60 = vpop.xlane.xlu2 %5627 }
 0xc4a   :  { %7745 = vlog2.f32 %v5628_v60 }
 0xc4e   :  { %v7744_v17 = vpop.eup %7743 }
 0xc4f   :  { %v5635_v53 = vmul.f32 0.6931472, %v7744_v17 }
 0xc50   :  { %v7746_v1 = vpop.eup %7745 }
 0xc51   :  { %v5633_v25 = vmul.f32 0.6931472, %v7746_v1  ;;  %v5637_v14 = vadd.f32 %v5635_v53, %v11532_v44  ;;  %v11561_v61 = vpop.xlane.xlu2 %6118 }
 0xc52   :  { %v6120_v51 = vsub.f32 %v11518_v24, %v11561_v61  ;;  %v6121_v55 = vsub.f32 %v11520_v47, %v11561_v61 }
 0xc53   :  { %v5636_v52 = vadd.f32 %v5633_v25, %v11534_v23  ;;  %v5639_v4 = vsub.f32 -5.605802, %v5637_v14 }
 0xc54   :  { %v6122_v34 = vmul.f32 1.442695, %v6120_v51  ;;  %v6124_v50 = vmul.f32 1.442695, %v6121_v55 }
 0xc55   :  { %v5638_v26 = vsub.f32 -5.605802, %v5636_v52  ;;  %v5659_v45 = vadd.f32 %v5639_v4, %v11157_v40  ;;  %v5660_v29 = vadd.f32 %v5639_v4, %v11295_v10 }
 0xc56   :  { %7747 = vpow2.f32 %v6122_v34 }
 0xc57   :  { %v5657_v44 = vadd.f32 %v5638_v26, %v11141_v31  ;;  %v5658_v11 = vadd.f32 %v5638_v26, %v11285_v16  ;;  %7749 = vpow2.f32 %v6124_v50 }
 0xc59   :  { %v5661_v24 = vmax.f32 %v5657_v44, %v5659_v45  ;;  %v5668_v27 = vmax.f32 %v5658_v11, %v5660_v29 }
 0xc5b   :  { %v5662_v15 = vrot.slane %v5661_v24, 4  ;;  %v5669_v47 = vrot.slane %v5668_v27, 4 }
 0xc5c   :  { %v7748_v5 = vpop.eup %7747 }
 0xc5d   :  { %v7750_v23 = vpop.eup %7749  ;;  %v5663_v21 = vmax.f32 %v5661_v24, %v5662_v15  ;;  %v5670_v12 = vmax.f32 %v5668_v27, %v5669_v47 }
 0xc5e   :  { %v6126_v30 = vadd.f32 %v7750_v23, %v7748_v5 }
 0xc5f   :  { %v5664_v22 = vrot.slane %v5663_v21, 2  ;;  %v5671_v60 = vrot.slane %v5670_v12, 2 }
 0xc60   :  { %6127 = vadd.xlane.f32.xlu0 %v6126_v30 }
 0xc61   :  { %v5665_v17 = vmax.f32 %v5663_v21, %v5664_v22  ;;  %v5672_v53 = vmax.f32 %v5670_v12, %v5671_v60 }
 0xc63   :  { %v5666_v1 = vrot.slane %v5665_v17, 1  ;;  %v5673_v25 = vrot.slane %v5672_v53, 1 }
 0xc65   :  { %v11572_v14 = vmax.f32 %v5665_v17, %v5666_v1  ;;  %v11574_v51 = vmax.f32 %v5672_v53, %v5673_v25 }
 0xc67   :  { %v5675_v55 = vsub.f32 %v5657_v44, %v11572_v14  ;;  %v5676_v52 = vsub.f32 %v5658_v11, %v11574_v51  ;;  %v5677_v4 = vsub.f32 %v5659_v45, %v11572_v14  ;;  %v5678_v34 = vsub.f32 %v5660_v29, %v11574_v51 }
 0xc69   :  { %v5679_v50 = vmul.f32 1.442695, %v5675_v55  ;;  %v5681_v26 = vmul.f32 1.442695, %v5676_v52  ;;  %v5683_v24 = vmul.f32 1.442695, %v5677_v4 }
 0xc6a   :  { %v5685_v27 = vmul.f32 1.442695, %v5678_v34 }
 0xc6b   :  { %7751 = vpow2.f32 %v5679_v50 }
 0xc6c   :  { %7753 = vpow2.f32 %v5681_v26 }
 0xc6d   :  { %7755 = vpow2.f32 %v5683_v24 }
 0xc6e   :  { %7757 = vpow2.f32 %v5685_v27 }
 0xc71   :  { %v7752_v15 = vpop.eup %7751 }
 0xc72   :  { %v7754_v47 = vpop.eup %7753 }
 0xc73   :  { %v7756_v5 = vpop.eup %7755 }
 0xc74   :  { %v7758_v23 = vpop.eup %7757  ;;  %v5687_v21 = vadd.f32 %v7756_v5, %v7752_v15 }
 0xc75   :  { %v5694_v44 = vadd.f32 %v7758_v23, %v7754_v47 }
 0xc76   :  { %v5688_v12 = vrot.slane %v5687_v21, 4  ;;  %v6108_v11 = vpop.xlane.xlu1 %6107 }
 0xc77   :  { %v5695_v30 = vrot.slane %v5694_v44, 4  ;;  %7759 = vlog2.f32 %v6108_v11 }
 0xc78   :  { %v5689_v45 = vadd.f32 %v5688_v12, %v5687_v21  ;;  %v6105_v29 = vpop.xlane.xlu0 %6104 }
 0xc79   :  { %v5696_v22 = vadd.f32 %v5695_v30, %v5694_v44  ;;  %7761 = vlog2.f32 %v6105_v29 }
 0xc7a   :  { %v5690_v60 = vrot.slane %v5689_v45, 2 }
 0xc7b   :  { %v5697_v17 = vrot.slane %v5696_v22, 2 }
 0xc7c   :  { %v5691_v53 = vadd.f32 %v5690_v60, %v5689_v45 }
 0xc7d   :  { %v7760_v1 = vpop.eup %7759  ;;  %v5698_v25 = vadd.f32 %v5697_v17, %v5696_v22 }
 0xc7e   :  { %v5692_v55 = vrot.slane %v5691_v53, 1  ;;  %v6112_v52 = vmul.f32 0.6931472, %v7760_v1  ;;  %v5651_v4 = vpop.xlane.xlu2 %5650 }
 0xc7f   :  { %v7762_v34 = vpop.eup %7761  ;;  %v5699_v50 = vrot.slane %v5698_v25, 1  ;;  %7763 = vlog2.f32 %v5651_v4 }
 0xc80   :  { %v5693_v26 = vadd.f32 %v5692_v55, %v5691_v53  ;;  %v6110_v24 = vmul.f32 0.6931472, %v7762_v34  ;;  %v6114_v27 = vadd.f32 %v6112_v52, %v11546_v32 }
 0xc81   :  { %v5700_v15 = vadd.f32 %v5699_v50, %v5698_v25 }
 0xc82   :  { %7765 = vlog2.f32 %v5693_v26  ;;  %v6113_v47 = vadd.f32 %v6110_v24, %v11548_v3  ;;  %v6116_v5 = vsub.f32 -5.605802, %v6114_v27 }
 0xc83   :  { %7767 = vlog2.f32 %v5700_v15 }
 0xc84   :  { %v6115_v23 = vsub.f32 -5.605802, %v6113_v47  ;;  %v6136_v12 = vadd.f32 %v6116_v5, %v11377_v35  ;;  %v6137_v45 = vadd.f32 %v6116_v5, %v11449_v56 }
 0xc85   :  { %v7764_v21 = vpop.eup %7763 }
 0xc86   :  { %v6134_v44 = vadd.f32 %v6115_v23, %v11371_v62  ;;  %v5653_v11 = vmul.f32 0.6931472, %v7764_v21  ;;  %v6135_v30 = vadd.f32 %v6115_v23, %v11445_v36 }
 0xc88   :  { %v7766_v29 = vpop.eup %7765  ;;  %v5654_v32 = vadd.f32 %v5653_v11, %v11554_v57  ;;  %v6138_v3 = vmax.f32 %v6134_v44, %v6136_v12  ;;  %v6145_v1 = vmax.f32 %v6135_v30, %v6137_v45 }
 0xc89   :  { %v7768_v22 = vpop.eup %7767  ;;  %v5702_v60 = vmul.f32 0.6931472, %v7766_v29 }
 0xc8a   :  { %v5704_v17 = vmul.f32 0.6931472, %v7768_v22  ;;  %v5655_v53 = vadd.f32 %v5654_v32, %v11475_v38  ;;  %v6139_v4 = vrot.slane %v6138_v3, 4  ;;  %v6146_v50 = vrot.slane %v6145_v1, 4 }
 0xc8b   :  { %v5705_v55 = vadd.f32 %v5702_v60, %v11572_v14 }
 0xc8c   :  { %v5656_v25 = vsub.f32 -0.12516314, %v5655_v53  ;;  %v5706_v52 = vadd.f32 %v5704_v17, %v11574_v51  ;;  %v6140_v27 = vmax.f32 %v6138_v3, %v6139_v4  ;;  %v6147_v15 = vmax.f32 %v6145_v1, %v6146_v50 }
 0xc8e   :  { %v5707_v34 = vadd.f32 %v5656_v25, %v11475_v38  ;;  %v6141_v11 = vrot.slane %v6140_v27, 2  ;;  %v6148_v32 = vrot.slane %v6147_v15, 2 }
 0xc90   :  { %v5708_v26 = vmax.f32 %v5705_v55, %v5707_v34  ;;  %v5709_v24 = vmax.f32 %v5706_v52, %v5707_v34  ;;  %v6142_v51 = vmax.f32 %v6140_v27, %v6141_v11  ;;  %v6149_v60 = vmax.f32 %v6147_v15, %v6148_v32 }
 0xc92   :  { %v5710_v57 = vsub.f32 %v5705_v55, %v5708_v26  ;;  %v5716_v47 = vsub.f32 %v5707_v34, %v5708_v26  ;;  %v5711_v5 = vsub.f32 %v5706_v52, %v5709_v24  ;;  %v5717_v29 = vsub.f32 %v5707_v34, %v5709_v24 }
 0xc93   :  { %v6143_v53 = vrot.slane %v6142_v51, 1  ;;  %v6150_v25 = vrot.slane %v6149_v60, 1 }
 0xc94   :  { %v5712_v23 = vmul.f32 1.442695, %v5710_v57  ;;  %v5718_v21 = vmul.f32 1.442695, %v5716_v47  ;;  %v5714_v14 = vmul.f32 1.442695, %v5711_v5 }
 0xc95   :  { %v5720_v22 = vmul.f32 1.442695, %v5717_v29  ;;  %v11591_v52 = vmax.f32 %v6142_v51, %v6143_v53  ;;  %v11593_v4 = vmax.f32 %v6149_v60, %v6150_v25 }
 0xc96   :  { %7769 = vpow2.f32 %v5712_v23 }
 0xc97   :  { %7771 = vpow2.f32 %v5718_v21  ;;  %v6152_v57 = vsub.f32 %v6134_v44, %v11591_v52  ;;  %v6153_v27 = vsub.f32 %v6135_v30, %v11593_v4  ;;  %v6154_v47 = vsub.f32 %v6136_v12, %v11591_v52 }
 0xc98   :  { %7773 = vpow2.f32 %v5714_v14  ;;  %v6155_v5 = vsub.f32 %v6137_v45, %v11593_v4 }
 0xc99   :  { %7775 = vpow2.f32 %v5720_v22  ;;  %v6156_v21 = vmul.f32 1.442695, %v6152_v57  ;;  %v6158_v11 = vmul.f32 1.442695, %v6153_v27  ;;  %v6160_v32 = vmul.f32 1.442695, %v6154_v47 }
 0xc9a   :  { %v6162_v51 = vmul.f32 1.442695, %v6155_v5 }
 0xc9c   :  { %v7770_v17 = vpop.eup %7769 }
 0xc9d   :  { %v7772_v3 = vpop.eup %7771 }
 0xc9e   :  { %v5722_v1 = vadd.f32 %v7772_v3, %v7770_v17  ;;  %v7774_v55 = vpop.eup %7773 }
 0xc9f   :  { %v7776_v34 = vpop.eup %7775 }
 0xca0   :  { %7777 = vlog2.f32 %v5722_v1  ;;  %v5723_v50 = vadd.f32 %v7776_v34, %v7774_v55 }
 0xca2   :  { %7779 = vlog2.f32 %v5723_v50 }
 0xca3   :  { %7781 = vpow2.f32 %v6156_v21 }
 0xca4   :  { %7783 = vpow2.f32 %v6158_v11 }
 0xca5   :  { %7785 = vpow2.f32 %v6160_v32 }
 0xca6   :  { %v7778_v15 = vpop.eup %7777  ;;  %7787 = vpow2.f32 %v6162_v51 }
 0xca7   :  { %v5725_v23 = vmul.f32 0.6931472, %v7778_v15 }
 0xca8   :  { %v7780_v14 = vpop.eup %7779 }
 0xca9   :  { %v5728_v29 = vadd.f32 %v5725_v23, %v5708_v26  ;;  %v5727_v22 = vmul.f32 0.6931472, %v7780_v14  ;;  %v7782_v26 = vpop.eup %7781 }
 0xcab   :  { %v11599_v60 = vsub.f32 -5.605802, %v5728_v29  ;;  %v5729_v44 = vadd.f32 %v5727_v22, %v5709_v24  ;;  %v7784_v24 = vpop.eup %7783 }
 0xcac   :  { %v7786_v3 = vpop.eup %7785 }
 0xcad   :  { %v11601_v30 = vsub.f32 -5.605802, %v5729_v44  ;;  %v11605_v12 = vadd.f32 %v11599_v60, %v11157_v40  ;;  %v11609_v45 = vadd.f32 %v11599_v60, %v11141_v31  ;;  %v7788_v55 = vpop.eup %7787  ;;  %v6164_v34 = vadd.f32 %v7786_v3, %v7782_v26 }
 0xcae   :  { %v6171_v50 = vadd.f32 %v7788_v55, %v7784_v24 }
 0xcaf   :  { %v11613_v17 = vadd.f32 %v11601_v30, %v11295_v10  ;;  %v11617_v53 = vadd.f32 %v11601_v30, %v11285_v16  ;;  %v6165_v57 = vrot.slane %v6164_v34, 4  ;;  %v5768_v15 = vmax.f32 %v11599_v60, %v11601_v30 }
 0xcb0   :  { %v6172_v27 = vrot.slane %v6171_v50, 4 }
 0xcb1   :  { %v5739_v25 = vmax.f32 %v11605_v12, %v11613_v17  ;;  %v5736_v1 = vmax.f32 %v11609_v45, %v11617_v53  ;;  %v6166_v47 = vadd.f32 %v6165_v57, %v6164_v34 }
 0xcb2   :  { %v6173_v5 = vadd.f32 %v6172_v27, %v6171_v50 }
 0xcb3   :  { %5740 = vmax.xlane.f32.xlu2 %v5739_v25  ;;  %5737 = vmax.xlane.f32.xlu1 %v5736_v1  ;;  %v6167_v23 = vrot.slane %v6166_v47, 2 }
 0xcb4   :  { %v6174_v21 = vrot.slane %v6173_v5, 2 }
 0xcb5   :  { %v6168_v11 = vadd.f32 %v6167_v23, %v6166_v47 }
 0xcb6   :  { %v6175_v29 = vadd.f32 %v6174_v21, %v6173_v5 }
 0xcb7   :  { %v6169_v32 = vrot.slane %v6168_v11, 1 }
 0xcb8   :  { %v6176_v14 = vrot.slane %v6175_v29, 1 }
 0xcb9   :  { %v6170_v51 = vadd.f32 %v6169_v32, %v6168_v11 }
 0xcba   :  { %v6177_v22 = vadd.f32 %v6176_v14, %v6175_v29 }
 0xcbb   :  { %5769 = vmax.xlane.f32.xlu2 %v5768_v15 }
 0xcd3   :  { %v6128_v44 = vpop.xlane.xlu0 %6127 }
 0xcd4   :  { %7789 = vlog2.f32 %v6128_v44 }
 0xcd5   :  { %7791 = vlog2.f32 %v6170_v51 }
 0xcd6   :  { %7793 = vlog2.f32 %v6177_v22 }
 0xcda   :  { %v7790_v26 = vpop.eup %7789 }
 0xcdb   :  { %v7792_v24 = vpop.eup %7791  ;;  %v6130_v3 = vmul.f32 0.6931472, %v7790_v26 }
 0xcdc   :  { %v7794_v25 = vpop.eup %7793  ;;  %v6179_v34 = vmul.f32 0.6931472, %v7792_v24 }
 0xcdd   :  { %v6131_v1 = vadd.f32 %v6130_v3, %v11561_v61  ;;  %v6181_v50 = vmul.f32 0.6931472, %v7794_v25 }
 0xcde   :  { %v6182_v15 = vadd.f32 %v6179_v34, %v11591_v52 }
 0xcdf   :  { %v6132_v55 = vadd.f32 %v6131_v1, %v11475_v38  ;;  %v6183_v47 = vadd.f32 %v6181_v50, %v11593_v4 }
 0xce1   :  { %v6133_v57 = vsub.f32 -0.12516314, %v6132_v55 }
 0xce3   :  { %v6184_v27 = vadd.f32 %v6133_v57, %v11475_v38 }
 0xce5   :  { %v6185_v5 = vmax.f32 %v6182_v15, %v6184_v27  ;;  %v6186_v23 = vmax.f32 %v6183_v47, %v6184_v27 }
 0xce7   :  { %v6187_v21 = vsub.f32 %v6182_v15, %v6185_v5  ;;  %v6188_v11 = vsub.f32 %v6183_v47, %v6186_v23  ;;  %v6193_v29 = vsub.f32 %v6184_v27, %v6185_v5  ;;  %v6194_v32 = vsub.f32 %v6184_v27, %v6186_v23 }
 0xce9   :  { %v6189_v14 = vmul.f32 1.442695, %v6187_v21  ;;  %v6191_v51 = vmul.f32 1.442695, %v6188_v11  ;;  %v6195_v61 = vmul.f32 1.442695, %v6193_v29 }
 0xcea   :  { %v6197_v22 = vmul.f32 1.442695, %v6194_v32 }
 0xceb   :  { %7795 = vpow2.f32 %v6189_v14 }
 0xcec   :  { %7797 = vpow2.f32 %v6191_v51 }
 0xced   :  { %7799 = vpow2.f32 %v6195_v61 }
 0xcee   :  { %7801 = vpow2.f32 %v6197_v22 }
 0xcf1   :  { %v7796_v44 = vpop.eup %7795 }
 0xcf2   :  { %v7798_v26 = vpop.eup %7797 }
 0xcf3   :  { %v7800_v24 = vpop.eup %7799 }
 0xcf4   :  { %v7802_v52 = vpop.eup %7801  ;;  %v6199_v3 = vadd.f32 %v7800_v24, %v7796_v44 }
 0xcf5   :  { %v6200_v4 = vadd.f32 %v7802_v52, %v7798_v26 }
 0xcf6   :  { %7803 = vlog2.f32 %v6199_v3 }
 0xcf7   :  { %7805 = vlog2.f32 %v6200_v4 }
 0xcfc   :  { %v7804_v25 = vpop.eup %7803 }
 0xcfd   :  { %v7806_v1 = vpop.eup %7805  ;;  %v6202_v55 = vmul.f32 0.6931472, %v7804_v25 }
 0xcfe   :  { %v6204_v34 = vmul.f32 0.6931472, %v7806_v1 }
 0xcff   :  { %v6205_v50 = vadd.f32 %v6202_v55, %v6185_v5 }
 0xd00   :  { %v6206_v57 = vadd.f32 %v6204_v34, %v6186_v23 }
 0xd01   :  { %v6207_v27 = vsub.f32 -5.605802, %v6205_v50 }
 0xd02   :  { %v11630_v15 = vsub.f32 -5.605802, %v6206_v57 }
 0xd03   :  { %v6211_v47 = vadd.f32 %v6207_v27, %v11377_v35  ;;  %v6209_v21 = vadd.f32 %v6207_v27, %v11371_v62 }
 0xd04   :  { %v6245_v11 = vmax.f32 %v6207_v27, %v11630_v15  ;;  %v6212_v29 = vadd.f32 %v11630_v15, %v11449_v56  ;;  %v6210_v32 = vadd.f32 %v11630_v15, %v11445_v36 }
 0xd06   :  { %6246 = vmax.xlane.f32.xlu2 %v6245_v11  ;;  %v6216_v14 = vmax.f32 %v6211_v47, %v6212_v29  ;;  %v6213_v51 = vmax.f32 %v6209_v21, %v6210_v32 }
 0xd08   :  { %6217 = vmax.xlane.f32.xlu1 %v6216_v14  ;;  %6214 = vmax.xlane.f32.xlu0 %v6213_v51 }
 0xd26   :  { %v11639_v5 = vpop.xlane.xlu2 %5740  ;;  %v11641_v23 = vpop.xlane.xlu1 %5737 }
 0xd27   :  { %v5744_v61 = vsub.f32 %v11605_v12, %v11639_v5  ;;  %v5745_v22 = vsub.f32 %v11613_v17, %v11639_v5  ;;  %v5742_v44 = vsub.f32 %v11609_v45, %v11641_v23  ;;  %v5743_v26 = vsub.f32 %v11617_v53, %v11641_v23 }
 0xd29   :  { %v5750_v24 = vmul.f32 1.442695, %v5744_v61  ;;  %v5752_v52 = vmul.f32 1.442695, %v5745_v22  ;;  %v5746_v3 = vmul.f32 1.442695, %v5742_v44 }
 0xd2a   :  { %v5748_v4 = vmul.f32 1.442695, %v5743_v26 }
 0xd2b   :  { %7807 = vpow2.f32 %v5750_v24 }
 0xd2c   :  { %7809 = vpow2.f32 %v5752_v52 }
 0xd2d   :  { %7811 = vpow2.f32 %v5746_v3 }
 0xd2e   :  { %7813 = vpow2.f32 %v5748_v4  ;;  %v11651_v25 = vpop.xlane.xlu2 %5769 }
 0xd2f   :  { %v5771_v12 = vsub.f32 %v11599_v60, %v11651_v25  ;;  %v5772_v17 = vsub.f32 %v11601_v30, %v11651_v25  ;;  %v4561_v60 = vld [vmem:[%s11948_s3 + $0x8] sm:$0xff] }
 0xd31   :  { %v7808_v45 = vpop.eup %7807  ;;  %v5773_v1 = vmul.f32 1.442695, %v5771_v12  ;;  %v5775_v55 = vmul.f32 1.442695, %v5772_v17 }
 0xd32   :  { %v7810_v53 = vpop.eup %7809 }
 0xd33   :  { %v7812_v34 = vpop.eup %7811  ;;  %7815 = vpow2.f32 %v5773_v1  ;;  %v5757_v50 = vadd.f32 %v7810_v53, %v7808_v45 }
 0xd34   :  { %v7814_v57 = vpop.eup %7813  ;;  %7817 = vpow2.f32 %v5775_v55 }
 0xd35   :  { %5758 = vadd.xlane.f32.xlu1 %v5757_v50  ;;  %v5754_v11 = vadd.f32 %v7814_v57, %v7812_v34 }
 0xd37   :  { %5755 = vadd.xlane.f32.xlu0 %v5754_v11 }
 0xd39   :  { %v7816_v14 = vpop.eup %7815 }
 0xd3a   :  { %v7818_v51 = vpop.eup %7817 }
 0xd3b   :  { %v5777_v61 = vadd.f32 %v7818_v51, %v7816_v14  ;;  %v4560_v14 = vld [vmem:[%s11948_s3] sm:$0xff]  ;;  %v4562_v51 = vld [vmem:[%s11948_s3 + $0x10] sm:$0xff] }
 0xd3d   :  { %5778 = vadd.xlane.f32.xlu2 %v5777_v61  ;;  %v4563_v61 = vld [vmem:[%s11948_s3 + $0x18] sm:$0xff] }
 0xd55   :  { %4573 = vperm.xlu2 %7648, %v4561_v60  }
 0xd79   :  { %v11660_v30 = vpop.xlane.xlu2 %6246 }
 0xd7a   :  { %v6248_v4 = vsub.f32 %v6207_v27, %v11660_v30  ;;  %v6249_v45 = vsub.f32 %v11630_v15, %v11660_v30 }
 0xd7b   :  { %v11662_v22 = vpop.xlane.xlu0 %6214  ;;  %v11664_v44 = vpop.xlane.xlu1 %6217 }
 0xd7c   :  { %v6219_v26 = vsub.f32 %v6209_v21, %v11662_v22  ;;  %v6220_v24 = vsub.f32 %v6210_v32, %v11662_v22  ;;  %v6221_v52 = vsub.f32 %v6211_v47, %v11664_v44  ;;  %v6222_v3 = vsub.f32 %v6212_v29, %v11664_v44 }
 0xd7d   :  { %v6250_v53 = vmul.f32 1.442695, %v6248_v4  ;;  %v6252_v21 = vmul.f32 1.442695, %v6249_v45 }
 0xd7e   :  { %v6223_v12 = vmul.f32 1.442695, %v6219_v26  ;;  %v6225_v17 = vmul.f32 1.442695, %v6220_v24  ;;  %v6227_v1 = vmul.f32 1.442695, %v6221_v52 }
 0xd7f   :  { %v6229_v55 = vmul.f32 1.442695, %v6222_v3 }
 0xd80   :  { %7819 = vpow2.f32 %v6223_v12 }
 0xd81   :  { %7821 = vpow2.f32 %v6225_v17 }
 0xd82   :  { %7823 = vpow2.f32 %v6227_v1 }
 0xd83   :  { %7825 = vpow2.f32 %v6229_v55 }
 0xd84   :  { %7827 = vpow2.f32 %v6250_v53 }
 0xd85   :  { %7829 = vpow2.f32 %v6252_v21 }
 0xd86   :  { %v7820_v32 = vpop.eup %7819 }
 0xd87   :  { %v7822_v47 = vpop.eup %7821 }
 0xd88   :  { %v7824_v29 = vpop.eup %7823  ;;  %v6231_v34 = vadd.f32 %v7822_v47, %v7820_v32 }
 0xd89   :  { %v7826_v27 = vpop.eup %7825 }
 0xd8a   :  { %6232 = vadd.xlane.f32.xlu0 %v6231_v34  ;;  %v6234_v50 = vadd.f32 %v7826_v27, %v7824_v29  ;;  %v7828_v57 = vpop.eup %7827 }
 0xd8b   :  { %v7830_v15 = vpop.eup %7829 }
 0xd8c   :  { %6235 = vadd.xlane.f32.xlu1 %v6234_v50  ;;  %v6254_v11 = vadd.f32 %v7830_v15, %v7828_v57 }
 0xd92   :  { %6255 = vadd.xlane.f32.xlu0 %v6254_v11 }
 0xda5   :  { %4568 = vperm.xlu1 %7647, %v4560_v14  }
 0xda6   :  { %4578 = vperm.xlu0 %7646, %v4562_v51  }
 0xda8   :  { %v5759_v60 = vpop.xlane.xlu1 %5758 }
 0xda9   :  { %7831 = vlog2.f32 %v5759_v60 }
 0xdaa   :  { %v5756_v26 = vpop.xlane.xlu0 %5755 }
 0xdab   :  { %7833 = vlog2.f32 %v5756_v26 }
 0xdae   :  { %4583 = vperm.xlu0 %7646, %v4563_v61  }
 0xdaf   :  { %v7832_v24 = vpop.eup %7831 }
 0xdb0   :  { %v5763_v52 = vmul.f32 0.6931472, %v7832_v24 }
 0xdb1   :  { %v7834_v3 = vpop.eup %7833 }
 0xdb2   :  { %v5761_v4 = vmul.f32 0.6931472, %v7834_v3  ;;  %v5765_v12 = vadd.f32 %v5763_v52, %v11639_v5 }
 0xdb4   :  { %v5764_v17 = vadd.f32 %v5761_v4, %v11641_v23  ;;  %v5767_v45 = vsub.f32 -5.605802, %v5765_v12  ;;  %v5779_v4 = vpop.xlane.xlu2 %5778 }
 0xdb6   :  { %v5766_v1 = vsub.f32 -5.605802, %v5764_v17  ;;  %v11685_v55 = vadd.f32 %v5767_v45, %v11157_v40  ;;  %v11688_v53 = vadd.f32 %v5767_v45, %v11295_v10 }
 0xdb8   :  { %v11691_v21 = vadd.f32 %v5766_v1, %v11141_v31  ;;  %v11694_v32 = vadd.f32 %v5766_v1, %v11285_v16 }
 0xdba   :  { %v5789_v47 = vmax.f32 %v11691_v21, %v11685_v55  ;;  %v5796_v5 = vmax.f32 %v11694_v32, %v11688_v53 }
 0xdbc   :  { %v5790_v23 = vrot.slane %v5789_v47, 4  ;;  %v5797_v29 = vrot.slane %v5796_v5, 4 }
 0xdbe   :  { %v5791_v34 = vmax.f32 %v5789_v47, %v5790_v23  ;;  %v5798_v40 = vmax.f32 %v5796_v5, %v5797_v29 }
 0xdc0   :  { %v5792_v27 = vrot.slane %v5791_v34, 2  ;;  %v5799_v50 = vrot.slane %v5798_v40, 2 }
 0xdc2   :  { %v5793_v10 = vmax.f32 %v5791_v34, %v5792_v27  ;;  %v5800_v57 = vmax.f32 %v5798_v40, %v5799_v50 }
 0xdc4   :  { %v5794_v15 = vrot.slane %v5793_v10, 1  ;;  %v5801_v31 = vrot.slane %v5800_v57, 1 }
 0xdc6   :  { %v5795_v11 = vmax.f32 %v5793_v10, %v5794_v15  ;;  %v5802_v14 = vmax.f32 %v5800_v57, %v5801_v31 }
 0xdc8   :  { %v5803_v16 = vsub.f32 %v11691_v21, %v5795_v11  ;;  %v5804_v51 = vsub.f32 %v11694_v32, %v5802_v14  ;;  %v5805_v61 = vsub.f32 %v11685_v55, %v5795_v11  ;;  %v5806_v60 = vsub.f32 %v11688_v53, %v5802_v14 }
 0xdca   :  { %v5807_v26 = vmul.f32 1.442695, %v5803_v16  ;;  %v5809_v24 = vmul.f32 1.442695, %v5804_v51  ;;  %v5811_v52 = vmul.f32 1.442695, %v5805_v61 }
 0xdcb   :  { %v5813_v3 = vmul.f32 1.442695, %v5806_v60 }
 0xdcc   :  { %7835 = vpow2.f32 %v5807_v26 }
 0xdcd   :  { %7837 = vpow2.f32 %v5809_v24 }
 0xdce   :  { %7839 = vpow2.f32 %v5811_v52 }
 0xdcf   :  { %7841 = vpow2.f32 %v5813_v3 }
 0xdd0   :  { %7843 = vlog2.f32 %v5779_v4 }
 0xdd2   :  { %v7836_v12 = vpop.eup %7835 }
 0xdd3   :  { %v7838_v17 = vpop.eup %7837 }
 0xdd4   :  { %v7840_v45 = vpop.eup %7839 }
 0xdd5   :  { %v7842_v1 = vpop.eup %7841  ;;  %v5815_v47 = vadd.f32 %v7840_v45, %v7836_v12 }
 0xdd6   :  { %v5822_v5 = vadd.f32 %v7842_v1, %v7838_v17  ;;  %v7844_v34 = vpop.eup %7843 }
 0xdd7   :  { %v5816_v23 = vrot.slane %v5815_v47, 4  ;;  %v5781_v57 = vmul.f32 0.6931472, %v7844_v34 }
 0xdd8   :  { %v5823_v29 = vrot.slane %v5822_v5, 4 }
 0xdd9   :  { %v5817_v40 = vadd.f32 %v5816_v23, %v5815_v47  ;;  %v5782_v51 = vadd.f32 %v5781_v57, %v11651_v25 }
 0xdda   :  { %v5824_v27 = vadd.f32 %v5823_v29, %v5822_v5 }
 0xddb   :  { %v5818_v50 = vrot.slane %v5817_v40, 2  ;;  %v5783_v24 = vadd.f32 %v5782_v51, %v11475_v38 }
 0xddc   :  { %v5825_v10 = vrot.slane %v5824_v27, 2 }
 0xddd   :  { %v5819_v15 = vadd.f32 %v5818_v50, %v5817_v40  ;;  %v5784_v52 = vsub.f32 -0.12516314, %v5783_v24 }
 0xdde   :  { %v5826_v31 = vadd.f32 %v5825_v10, %v5824_v27 }
 0xddf   :  { %v5820_v16 = vrot.slane %v5819_v15, 1  ;;  %v5835_v1 = vadd.f32 %v5784_v52, %v11475_v38 }
 0xde0   :  { %v5827_v61 = vrot.slane %v5826_v31, 1 }
 0xde1   :  { %v5821_v60 = vadd.f32 %v5820_v16, %v5819_v15 }
 0xde2   :  { %v5828_v26 = vadd.f32 %v5827_v61, %v5826_v31 }
 0xde3   :  { %7845 = vlog2.f32 %v5821_v60 }
 0xde4   :  { %7847 = vlog2.f32 %v5828_v26 }
 0xde9   :  { %v7846_v3 = vpop.eup %7845 }
 0xdea   :  { %v7848_v4 = vpop.eup %7847  ;;  %v5830_v12 = vmul.f32 0.6931472, %v7846_v3 }
 0xdeb   :  { %v5832_v17 = vmul.f32 0.6931472, %v7848_v4 }
 0xdec   :  { %v5833_v45 = vadd.f32 %v5830_v12, %v5795_v11 }
 0xded   :  { %v5834_v47 = vadd.f32 %v5832_v17, %v5802_v14 }
 0xdee   :  { %v5836_v5 = vmax.f32 %v5833_v45, %v5835_v1 }
 0xdef   :  { %v5837_v23 = vmax.f32 %v5834_v47, %v5835_v1 }
 0xdf0   :  { %v5838_v29 = vsub.f32 %v5833_v45, %v5836_v5  ;;  %v5844_v25 = vsub.f32 %v5835_v1, %v5836_v5 }
 0xdf1   :  { %v5839_v34 = vsub.f32 %v5834_v47, %v5837_v23  ;;  %v5845_v40 = vsub.f32 %v5835_v1, %v5837_v23 }
 0xdf2   :  { %v5840_v27 = vmul.f32 1.442695, %v5838_v29  ;;  %v5846_v50 = vmul.f32 1.442695, %v5844_v25 }
 0xdf3   :  { %v5842_v10 = vmul.f32 1.442695, %v5839_v34  ;;  %v5848_v57 = vmul.f32 1.442695, %v5845_v40 }
 0xdf4   :  { %7849 = vpow2.f32 %v5840_v27 }
 0xdf5   :  { %7851 = vpow2.f32 %v5842_v10 }
 0xdf6   :  { %7853 = vpow2.f32 %v5846_v50 }
 0xdf7   :  { %7855 = vpow2.f32 %v5848_v57 }
 0xdfa   :  { %v7850_v11 = vpop.eup %7849 }
 0xdfb   :  { %v7852_v16 = vpop.eup %7851 }
 0xdfc   :  { %v7854_v14 = vpop.eup %7853 }
 0xdfd   :  { %v6233_v15 = vpop.xlane.xlu0 %6232  ;;  %v7856_v51 = vpop.eup %7855  ;;  %v5850_v61 = vadd.f32 %v7854_v14, %v7850_v11 }
 0xdfe   :  { %7857 = vlog2.f32 %v6233_v15  ;;  %v5851_v60 = vadd.f32 %v7856_v51, %v7852_v16  ;;  %v11727_v51 = vpop.permute.xlu2 %4573 }
 0xdff   :  { %v6236_v31 = vpop.xlane.xlu1 %6235 }
 0xe00   :  { %7859 = vlog2.f32 %v6236_v31 }
 0xe01   :  { %7861 = vlog2.f32 %v5850_v61 }
 0xe02   :  { %7863 = vlog2.f32 %v5851_v60 }
 0xe04   :  { %v7858_v26 = vpop.eup %7857 }
 0xe05   :  { %v6238_v24 = vmul.f32 0.6931472, %v7858_v26 }
 0xe06   :  { %v7860_v52 = vpop.eup %7859 }
 0xe07   :  { %v6241_v3 = vadd.f32 %v6238_v24, %v11662_v22  ;;  %v6240_v4 = vmul.f32 0.6931472, %v7860_v52  ;;  %v7862_v45 = vpop.eup %7861 }
 0xe08   :  { %v7864_v1 = vpop.eup %7863  ;;  %v5853_v47 = vmul.f32 0.6931472, %v7862_v45 }
 0xe09   :  { %v6243_v12 = vsub.f32 -5.605802, %v6241_v3  ;;  %v6242_v17 = vadd.f32 %v6240_v4, %v11664_v44  ;;  %v5855_v40 = vmul.f32 0.6931472, %v7864_v1 }
 0xe0a   :  { %v5856_v27 = vadd.f32 %v5853_v47, %v5836_v5  ;;  %v4920_v47 = vadd.f32 %v11129_v28, %v11727_v51 }
 0xe0b   :  { %v11710_v29 = vadd.f32 %v6243_v12, %v11371_v62  ;;  %v11713_v25 = vadd.f32 %v6243_v12, %v11445_v36  ;;  %v6244_v34 = vsub.f32 -5.605802, %v6242_v17  ;;  %v5857_v10 = vadd.f32 %v5855_v40, %v5837_v23  ;;  %v11729_v23 = vpop.xlane.xlu0 %6255 }
 0xe0c   :  { %v5858_v44 = vsub.f32 -5.605802, %v5856_v27 }
 0xe0d   :  { %v11716_v50 = vadd.f32 %v6244_v34, %v11377_v35  ;;  %v11719_v22 = vadd.f32 %v6244_v34, %v11449_v56  ;;  %v5859_v15 = vsub.f32 -5.605802, %v5857_v10 }
 0xe0e   :  { %v5862_v36 = vadd.f32 %v5858_v44, %v11685_v55  ;;  %v4728_v55 = vadd.f32 %v10959_v46, %v11727_v51  ;;  %v5860_v17 = vadd.f32 %v5858_v44, %v11691_v21 }
 0xe0f   :  { %v6266_v57 = vmax.f32 %v11710_v29, %v11716_v50  ;;  %v6273_v62 = vmax.f32 %v11713_v25, %v11719_v22  ;;  %v5863_v5 = vadd.f32 %v5859_v15, %v11688_v53  ;;  %v5861_v40 = vadd.f32 %v5859_v15, %v11694_v32 }
 0xe10   :  { %v7446_v35 = vadd.f32 5.605802, %v5862_v36 }
 0xe11   :  { %v6267_v11 = vrot.slane %v6266_v57, 4  ;;  %v6274_v31 = vrot.slane %v6273_v62, 4  ;;  %v7447_v56 = vadd.f32 5.605802, %v5863_v5  ;;  %v7445_v36 = vadd.f32 5.605802, %v5861_v40 }
 0xe12   :  { %v5872_v61 = vmul.f32 1.442695, %v7446_v35 }
 0xe13   :  { %v6268_v16 = vmax.f32 %v6266_v57, %v6267_v11  ;;  %v6275_v14 = vmax.f32 %v6273_v62, %v6274_v31  ;;  %v5874_v24 = vmul.f32 1.442695, %v7447_v56  ;;  %v7444_v57 = vadd.f32 5.605802, %v5860_v17 }
 0xe14   :  { %7865 = vpow2.f32 %v5872_v61 }
 0xe15   :  { %v6269_v60 = vrot.slane %v6268_v16, 2  ;;  %v6276_v26 = vrot.slane %v6275_v14, 2  ;;  %7867 = vpow2.f32 %v5874_v24  ;;  %v12822_v24 = vld [vmem:[#allocation153_spill] sm:$0xff] }
 0xe17   :  { %v6270_v52 = vmax.f32 %v6268_v16, %v6269_v60  ;;  %v6277_v3 = vmax.f32 %v6275_v14, %v6276_v26  ;;  %v11733_v4 = vpop.permute.xlu1 %4568  ;;  %v5870_v60 = vmul.f32 1.442695, %v7445_v36 }
 0xe18   :  { %v4726_v53 = vadd.f32 %v10949_v19, %v11733_v4  ;;  %v4918_v12 = vadd.f32 %v11115_v58, %v11733_v4  ;;  %v4752_v19 = vadd.f32 %v10969_v41, %v4728_v55  ;;  %v11752_v44 = vpop.permute.xlu0 %4578 }
 0xe19   :  { %v6271_v45 = vrot.slane %v6270_v52, 1  ;;  %v6278_v1 = vrot.slane %v6277_v3, 1  ;;  %v4923_v61 = vadd.f32 %v11139_v63, %v11752_v44 }
 0xe1a   :  { %v4750_v46 = vadd.f32 %v10957_v43, %v4726_v53  ;;  %v4942_v34 = vadd.f32 %v11125_v20, %v4918_v12  ;;  %v7866_v28 = vpop.eup %7865  ;;  %v4776_v35 = vadd.f32 %v11005_v37, %v4752_v19  ;;  %v12825_v12 = vld [vmem:[#allocation47_spill] sm:$0xff]  ;;  %v12829_v19 = vld [vmem:[#allocation160_spill] sm:$0xff] }
 0xe1b   :  { %v11745_v27 = vmax.f32 %v6270_v52, %v6271_v45  ;;  %v11747_v10 = vmax.f32 %v6277_v3, %v6278_v1  ;;  %v7868_v62 = vpop.eup %7867  ;;  %5890 = vmatpush.xpose.msra.mxu1 %v7866_v28  ;;  %v12824_v3 = vld [vmem:[#allocation77_spill] sm:$0xff]  ;;  %v12830_v28 = vld [vmem:[#allocation74_spill] sm:$0xff] }
 0xe1c   :  { %v4774_v58 = vadd.f32 %v10989_v54, %v4750_v46  ;;  %v4966_v21 = vadd.f32 %v11161_v2, %v4942_v34  ;;  %v4944_v54 = vadd.f32 %v11137_v9, %v4920_v47  ;;  %5919 = vmatpush.xpose.msra.mxu3 %v7868_v62  ;;  %v4731_v9 = vadd.f32 %v10971_v59, %v11752_v44  ;;  %v12823_v59 = vld [vmem:[#allocation32_spill] sm:$0xff]  ;;  %v12827_v1 = vld [vmem:[#allocation29_spill] sm:$0xff]  ;;  %v12828_v34 = vld [vmem:[#allocation163_spill] sm:$0xff] }
 0xe1d   :  { %v6280_v43 = vsub.f32 %v11710_v29, %v11745_v27  ;;  %v6281_v20 = vsub.f32 %v11713_v25, %v11747_v10  ;;  %v6282_v32 = vsub.f32 %v11716_v50, %v11745_v27  ;;  %v6283_v41 = vsub.f32 %v11719_v22, %v11747_v10 }
 0xe1e   :  { %v4798_v2 = vadd.f32 %v11001_v7, %v4774_v58  ;;  %v4990_v15 = vadd.f32 %v11169_v6, %v4966_v21  ;;  %v5868_v7 = vmul.f32 1.442695, %v7444_v57  ;;  %v4968_v6 = vadd.f32 %v11175_v42, %v4944_v54 }
 0xe1f   :  { %v6284_v11 = vmul.f32 1.442695, %v6280_v43  ;;  %v6286_v31 = vmul.f32 1.442695, %v6281_v20  ;;  %v6288_v5 = vmul.f32 1.442695, %v6282_v32  ;;  %v4800_v26 = vadd.f32 %v11022_v0, %v4776_v35 }
 0xe20   :  { %v6290_v16 = vmul.f32 1.442695, %v6283_v41  ;;  %v4822_v14 = vadd.f32 %v11041_v13, %v4798_v2  ;;  %v5014_v56 = vadd.f32 %v11203_v48, %v4990_v15  ;;  %v12821_v13 = vld [vmem:[#allocation95_spill] sm:$0xff]  ;;  %v4755_v55 = vadd.f32 %v12822_v24, %v4731_v9  ;;  %v11779_v53 = vpop.permute.xlu0 %4583  ;;  %v12826_v0 = vld [vmem:[#allocation125_spill] sm:$0xff]  ;;  %v12832_v41 = vld [vmem:[#allocation92_spill] sm:$0xff] }
 0xe21   :  { %7869 = vpow2.f32 %v6284_v11  ;;  %v4992_v52 = vadd.f32 %v12823_v59, %v4968_v6  ;;  %v4947_v42 = vadd.f32 %v12824_v3, %v4923_v61  ;;  %v4824_v47 = vadd.f32 %v12827_v1, %v4800_v26  ;;  %v12831_v20 = vld [vmem:[#allocation101_spill] sm:$0xff]  ;;  %v12833_v2 = vld [vmem:[#allocation44_spill] sm:$0xff] }
 0xe22   :  { %7871 = vpow2.f32 %v6286_v31  ;;  %v4846_v37 = vadd.f32 %v11049_v8, %v4822_v14  ;;  %v5038_v48 = vadd.f32 %v12821_v13, %v5014_v56  ;;  %v4779_v40 = vadd.f32 %v12828_v34, %v4755_v55  ;;  %v12834_v31 = vld [vmem:[#allocation59_spill] sm:$0xff]  ;;  %v12835_v35 = vld [vmem:[#allocation53_spill] sm:$0xff]  ;;  %v12839_v13 = vld [vmem:[#allocation8_spill] sm:$0xff] }
 0xe23   :  { %7873 = vpow2.f32 %v6288_v5  ;;  %v4733_v58 = vadd.f32 %v12829_v19, %v11779_v53  ;;  %v4971_v43 = vadd.f32 %v12830_v28, %v4947_v42  ;;  %v4925_v32 = vadd.f32 %v12831_v20, %v11779_v53  ;;  %v12836_v56 = vld [vmem:[#allocation159_spill] sm:$0xff]  ;;  %v12840_v24 = vld [vmem:[#allocation65_spill] sm:$0xff] }
 0xe24   :  { %7875 = vpow2.f32 %v6290_v16  ;;  %v4870_v17 = vadd.f32 %v12825_v12, %v4846_v37  ;;  %v5062_v8 = vadd.f32 %v12826_v0, %v5038_v48  ;;  %v5016_v62 = vadd.f32 %v12832_v41, %v4992_v52  ;;  %v12838_v37 = vld [vmem:[#allocation98_spill] sm:$0xff]  ;;  %v12841_v3 = vld [vmem:[#allocation17_spill] sm:$0xff]  ;;  %v12845_v34 = vld [vmem:[#allocation83_spill] sm:$0xff] }
 0xe25   :  { %7877 = vpow2.f32 %v5868_v7  ;;  %v4848_v16 = vadd.f32 %v12835_v35, %v4824_v47  ;;  %v4803_v9 = vadd.f32 %v12836_v56, %v4779_v40  ;;  %v12837_v7 = vld [vmem:[#allocation156_spill] sm:$0xff]  ;;  %v4995_v26 = vadd.f32 %v12838_v37, %v4971_v43  ;;  %v12843_v0 = vld [vmem:[#allocation26_spill] sm:$0xff]  ;;  %v12844_v47 = vld [vmem:[#allocation71_spill] sm:$0xff] }
 0xe26   :  { %7879 = vpow2.f32 %v5870_v60  ;;  %v4894_v15 = vadd.f32 %v12833_v2, %v4870_v17  ;;  %v5086_v5 = vadd.f32 %v12834_v31, %v5062_v8  ;;  %v4757_v6 = vadd.f32 %v12837_v7, %v4733_v58  ;;  %v12842_v17 = vld [vmem:[#allocation162_spill] sm:$0xff]  ;;  %v12846_v19 = vld [vmem:[#allocation89_spill] sm:$0xff] }
 0xe27   :  { %v7870_v63 = vpop.eup %7869  ;;  %7881 = vlog2.f32 %v11729_v23  ;;  %v4949_v48 = vadd.f32 %v12839_v13, %v4925_v32  ;;  %v5040_v55 = vadd.f32 %v12840_v24, %v5016_v62  ;;  %v4872_v42 = vadd.f32 %v12841_v3, %v4848_v16  ;;  %v12847_v28 = vld [vmem:[#allocation41_spill] sm:$0xff]  ;;  %v12857_v13 = vld [vmem:[#allocation38_spill] sm:$0xff]  ;;  %v12858_v24 = vld [vmem:[#allocation20_spill] sm:$0xff] }
 0xe28   :  { %v7872_v45 = vpop.eup %7871  ;;  %v4827_v8 = vadd.f32 %v12843_v0, %v4803_v9  ;;  %v5019_v58 = vadd.f32 %v12846_v19, %v4995_v26  ;;  %v12848_v41 = vld [vmem:[#allocation165_spill] sm:$0xff]  ;;  %v12854_v9 = vld [vmem:[#allocation23_spill] sm:$0xff] }
 0xe29   :  { %v7874_v46 = vpop.eup %7873  ;;  %v5064_v40 = vadd.f32 %v12845_v34, %v5040_v55  ;;  %v4896_v43 = vadd.f32 %v12847_v28, %v4872_v42  ;;  %v12860_v42 = vld [vmem:[#allocation149_spill] sm:$0xff] }
 0xe2a   :  { %v7876_v21 = vpop.eup %7875  ;;  %v6292_v57 = vadd.f32 %v7874_v46, %v7870_v63  ;;  %v4973_v46 = vadd.f32 %v12844_v47, %v4949_v48 }
 0xe2b   :  { %v7878_v23 = vpop.eup %7877  ;;  %v6299_v54 = vadd.f32 %v7876_v21, %v7872_v45  ;;  %v4781_v45 = vadd.f32 %v12842_v17, %v4757_v6  ;;  %v12855_v6 = vld [vmem:[#allocation146_spill] sm:$0xff] }
 0xe2c   :  { %v7880_v36 = vpop.eup %7879  ;;  %v6293_v11 = vrot.slane %v6292_v57, 4  ;;  %5891 = vmatpush.xpose.msra.mxu1 %v7878_v23  ;;  %v12849_v23 = vld [vmem:[#allocation50_spill] sm:$0xff] }
 0xe2d   :  { %v6300_v14 = vrot.slane %v6299_v54, 4  ;;  %5920 = vmatpush.xpose.msra.mxu3 %v7880_v36  ;;  %v7882_v61 = vpop.eup %7881  ;;  %v4805_v62 = vadd.f32 %v12848_v41, %v4781_v45 }
 0xe2e   :  { %v6294_v60 = vadd.f32 %v6293_v11, %v6292_v57  ;;  %v6258_v12 = vmul.f32 0.6931472, %v7882_v61  ;;  %v12851_v11 = vld [vmem:[#allocation122_spill] sm:$0xff] }
 0xe2f   :  { %v6301_v59 = vadd.f32 %v6300_v14, %v6299_v54  ;;  %5892 = vmatmul.f32.vlgmr.msra.gmra.mxu1 %v4894_v15  ;;  %v4851_v54 = vadd.f32 %v12849_v23, %v4827_v8  ;;  %v12850_v15 = vld [vmem:[#allocation68_spill] sm:$0xff]  ;;  %v5088_v31 = vadd.f32 %v12851_v11, %v5064_v40  ;;  %v4829_v7 = vadd.f32 %v12854_v9, %v4805_v62  ;;  %v12866_v9 = vld [vmem:[#allocation49_spill] sm:$0xff] }
 0xe30   :  { %v6295_v52 = vrot.slane %v6294_v60, 2  ;;  %5921 = vmatmul.f32.vlgmr.msra.gmra.mxu3 %v5086_v5  ;;  %v6259_v20 = vadd.f32 %v6258_v12, %v11660_v30  ;;  %v4997_v36 = vadd.f32 %v12850_v15, %v4973_v46  ;;  %v12852_v5 = vld [vmem:[#allocation62_spill] sm:$0xff]  ;;  %v12864_v11 = vld [vmem:[#allocation80_spill] sm:$0xff] }
 0xe31   :  { %v6302_v63 = vrot.slane %v6301_v59, 2  ;;  %v5043_v35 = vadd.f32 %v12852_v5, %v5019_v58  ;;  %v12853_v30 = vld [vmem:[#allocation14_spill] sm:$0xff]  ;;  %v4853_v55 = vadd.f32 %v12858_v24, %v4829_v7  ;;  %v5302_v5 = vadd.f32 %v11359_v33, %v11733_v4  ;;  %v12869_v33 = vld [vmem:[#allocation116_spill] sm:$0xff] }
 0xe32   :  { %v6296_v1 = vadd.f32 %v6295_v52, %v6294_v60  ;;  %v6260_v14 = vadd.f32 %v6259_v20, %v11475_v38  ;;  %v4875_v56 = vadd.f32 %v12853_v30, %v4851_v54  ;;  %v12856_v60 = vld [vmem:[#allocation86_spill] sm:$0xff]  ;;  %v12859_v52 = vld [vmem:[#allocation56_spill] sm:$0xff]  ;;  %v12865_v30 = vld [vmem:[#allocation119_spill] sm:$0xff] }
 0xe33   :  { %v6303_v21 = vadd.f32 %v6302_v63, %v6301_v59  ;;  %v5067_v61 = vadd.f32 %v12855_v6, %v5043_v35  ;;  %v5021_v37 = vadd.f32 %v12856_v60, %v4997_v36  ;;  %v5117_v35 = vadd.f32 %v11293_v39, %v11779_v53  ;;  %v12867_v60 = vld [vmem:[#allocation134_spill] sm:$0xff] }
 0xe34   :  { %v6297_v57 = vrot.slane %v6296_v1, 1  ;;  %v6261_v26 = vsub.f32 -0.12516314, %v6260_v14  ;;  %v4899_v48 = vadd.f32 %v12857_v13, %v4875_v56  ;;  %v5326_v7 = vadd.f32 %v12866_v9, %v5302_v5  ;;  %v12868_v13 = vld [vmem:[#allocation72_spill] sm:$0xff]  ;;  %v12870_v39 = vld [vmem:[#allocation102_spill] sm:$0xff] }
 0xe35   :  { %v6304_v32 = vrot.slane %v6303_v21, 1  ;;  %v5091_v3 = vadd.f32 %v12859_v52, %v5067_v61  ;;  %v5045_v63 = vadd.f32 %v12860_v42, %v5021_v37  ;;  %v5141_v37 = vadd.f32 %v12867_v60, %v5117_v35  ;;  %v12872_v52 = vld [vmem:[#allocation99_spill] sm:$0xff]  ;;  %v12886_v5 = vld [vmem:[#allocation30_spill] sm:$0xff] }
 0xe36   :  { %v6298_v2 = vadd.f32 %v6297_v57, %v6296_v1  ;;  %v6312_v8 = vadd.f32 %v6261_v26, %v11475_v38  ;;  %v12861_v1 = vld [vmem:[#allocation11_spill] sm:$0xff]  ;;  %v5304_v24 = vadd.f32 %v12870_v39, %v11727_v51  ;;  %v12890_v60 = vld [vmem:[#allocation154_spill] sm:$0xff] }
 0xe37   :  { %v6305_v16 = vadd.f32 %v6304_v32, %v6303_v21  ;;  %5895 = vmatmul.f32.gmra.mxu1 %v4896_v43  ;;  %v4877_v47 = vadd.f32 %v12861_v1, %v4853_v55  ;;  %v5069_v34 = vadd.f32 %v11266_v18, %v5045_v63  ;;  %v12862_v57 = vld [vmem:[#allocation35_spill] sm:$0xff]  ;;  %v12873_v63 = vld [vmem:[#allocation158_spill] sm:$0xff] }
 0xe38   :  { %7883 = vlog2.f32 %v6298_v2  ;;  %5924 = vmatmul.f32.gmra.mxu3 %v5088_v31  ;;  %v12863_v32 = vld [vmem:[#allocation143_spill] sm:$0xff]  ;;  %v5110_v31 = vadd.f32 %v12864_v11, %v11733_v4  ;;  %v5112_v4 = vadd.f32 %v12869_v33, %v11727_v51 }
 0xe39   :  { %7885 = vlog2.f32 %v6305_v16  ;;  %v4901_v28 = vadd.f32 %v12862_v57, %v4877_v47  ;;  %v5093_v41 = vadd.f32 %v12863_v32, %v5069_v34  ;;  %v5309_v16 = vadd.f32 %v11381_v49, %v11779_v53  ;;  %v12871_v53 = vld [vmem:[#allocation110_spill] sm:$0xff]  ;;  %v12876_v47 = vld [vmem:[#allocation21_spill] sm:$0xff] }
 0xe3a   :  { %v5134_v56 = vadd.f32 %v12865_v30, %v5110_v31 }
 0xe3e   :  { %v7884_v59 = vpop.eup %7883 }
 0xe3f   :  { %v7886_v12 = vpop.eup %7885  ;;  %v6307_v17 = vmul.f32 0.6931472, %v7884_v59  ;;  %5898 = vmatmul.f32.gmra.mxu1 %v4899_v48  ;;  %v5333_v48 = vadd.f32 %v12868_v13, %v5309_v16  ;;  %v5158_v59 = vadd.f32 %v12871_v53, %v5134_v56  ;;  %v12888_v56 = vld [vmem:[#allocation114_spill] sm:$0xff] }
 0xe40   :  { %v6309_v45 = vmul.f32 0.6931472, %v7886_v12  ;;  %5927 = vmatmul.f32.gmra.mxu3 %v5091_v3  ;;  %v5350_v3 = vadd.f32 %v12872_v52, %v5326_v7  ;;  %v5165_v12 = vadd.f32 %v12873_v63, %v5141_v37 }
 0xe41   :  { %v6310_v0 = vadd.f32 %v6307_v17, %v11745_v27 }
 0xe42   :  { %v6311_v46 = vadd.f32 %v6309_v45, %v11747_v10  ;;  %v12874_v45 = vld [vmem:[#allocation66_spill] sm:$0xff] }
 0xe43   :  { %v6313_v40 = vmax.f32 %v6310_v0, %v6312_v8 }
 0xe44   :  { %v6314_v19 = vmax.f32 %v6311_v46, %v6312_v8 }
 0xe45   :  { %v6315_v58 = vsub.f32 %v6310_v0, %v6313_v40  ;;  %v6321_v21 = vsub.f32 %v6312_v8, %v6313_v40  ;;  %v5357_v0 = vadd.f32 %v12874_v45, %v5333_v48  ;;  %v12892_v48 = vld [vmem:[#allocation137_spill] sm:$0xff]  ;;  %v12899_v45 = vld [vmem:[#allocation55_spill] sm:$0xff] }
 0xe46   :  { %v6316_v43 = vsub.f32 %v6311_v46, %v6314_v19  ;;  %v6322_v20 = vsub.f32 %v6312_v8, %v6314_v19  ;;  %v12875_v8 = vld [vmem:[#allocation140_spill] sm:$0xff]  ;;  %v5328_v46 = vadd.f32 %v12876_v47, %v5304_v24  ;;  %v12894_v24 = vld [vmem:[#allocation87_spill] sm:$0xff]  ;;  %v12901_v47 = vld [vmem:[#allocation69_spill] sm:$0xff] }
 0xe47   :  { %v6317_v62 = vmul.f32 1.442695, %v6315_v58  ;;  %v6323_v27 = vmul.f32 1.442695, %v6321_v21  ;;  %5901 = vmatmul.f32.gmra.mxu1 %v4901_v28  ;;  %v5136_v1 = vadd.f32 %v12875_v8, %v5112_v4  ;;  %v12878_v21 = vld [vmem:[#allocation151_spill] sm:$0xff]  ;;  %v12900_v8 = vld [vmem:[#allocation24_spill] sm:$0xff] }
 0xe48   :  { %v6319_v38 = vmul.f32 1.442695, %v6316_v43  ;;  %v6325_v23 = vmul.f32 1.442695, %v6322_v20  ;;  %5930 = vmatmul.f32.gmra.mxu3 %v5093_v41  ;;  %v5374_v57 = vadd.f32 %v12878_v21, %v5350_v3  ;;  %v12879_v20 = vld [vmem:[#allocation152_spill] sm:$0xff]  ;;  %v12893_v4 = vld [vmem:[#allocation27_spill] sm:$0xff] }
 0xe49   :  { %7887 = vpow2.f32 %v6317_v62  ;;  %v5189_v32 = vadd.f32 %v12879_v20, %v5165_v12  ;;  %v12898_v12 = vld [vmem:[#allocation128_spill] sm:$0xff] }
 0xe4a   :  { %7889 = vpow2.f32 %v6319_v38 }
 0xe4b   :  { %7891 = vpow2.f32 %v6323_v27  ;;  %v12880_v27 = vld [vmem:[#allocation90_spill] sm:$0xff]  ;;  %v5213_v35 = vadd.f32 %v12886_v5, %v5189_v32  ;;  %v12906_v32 = vld [vmem:[#allocation164_spill] sm:$0xff]  ;;  %v12915_v5 = vld [vmem:[#allocation123_spill] sm:$0xff] }
 0xe4c   :  { %7893 = vpow2.f32 %v6325_v23  ;;  %v5381_v38 = vadd.f32 %v12880_v27, %v5357_v0 }
 0xe4d   :  { %v5237_v39 = vadd.f32 %v12893_v4, %v5213_v35  ;;  %v12923_v4 = vld [vmem:[#allocation105_spill] sm:$0xff] }
 0xe4e   :  { %v5405_v9 = vadd.f32 %v12888_v56, %v5381_v38  ;;  %v12908_v38 = vld [vmem:[#allocation78_spill] sm:$0xff] }
 0xe4f   :  { %v7888_v18 = vpop.eup %7887 }
 0xe50   :  { %v7890_v10 = vpop.eup %7889 }
 0xe51   :  { %v7892_v54 = vpop.eup %7891 }
 0xe52   :  { %v7894_v2 = vpop.eup %7893  ;;  %v6327_v15 = vadd.f32 %v7892_v54, %v7888_v18  ;;  %v12881_v18 = vld [vmem:[#allocation131_spill] sm:$0xff] }
 0xe53   :  { %v6328_v36 = vadd.f32 %v7894_v2, %v7890_v10  ;;  %v12883_v2 = vld [vmem:[#allocation161_spill] sm:$0xff] }
 0xe54   :  { %7895 = vlog2.f32 %v6327_v15 }
 0xe55   :  { %7897 = vlog2.f32 %v6328_v36  ;;  %v12884_v36 = vld [vmem:[#allocation63_spill] sm:$0xff] }
 0xe56   :  { %v5398_v11 = vadd.f32 %v12884_v36, %v5374_v57  ;;  %v12913_v36 = vld [vmem:[#allocation141_spill] sm:$0xff] }
 0xe5a   :  { %v7896_v14 = vpop.eup %7895 }
 0xe5b   :  { %v7898_v6 = vpop.eup %7897  ;;  %v6330_v61 = vmul.f32 0.6931472, %v7896_v14  ;;  %v12887_v14 = vld [vmem:[#allocation46_spill] sm:$0xff] }
 0xe5c   :  { %v6332_v26 = vmul.f32 0.6931472, %v7898_v6  ;;  %v5307_v30 = vadd.f32 %v12887_v14, %v11752_v44  ;;  %v12889_v6 = vld [vmem:[#allocation104_spill] sm:$0xff] }
 0xe5d   :  { %v6333_v55 = vadd.f32 %v6330_v61, %v6313_v40 }
 0xe5e   :  { %v6334_v49 = vadd.f32 %v6332_v26, %v6314_v19  ;;  %v12877_v19 = vld [vmem:[#allocation107_spill] sm:$0xff] }
 0xe5f   :  { %v6335_v42 = vsub.f32 -5.605802, %v6333_v55  ;;  %v5182_v58 = vadd.f32 %v12877_v19, %v5158_v59  ;;  %v12891_v26 = vld [vmem:[#allocation155_spill] sm:$0xff]  ;;  %v5422_v55 = vadd.f32 %v12894_v24, %v5398_v11  ;;  %v12896_v59 = vld [vmem:[#allocation144_spill] sm:$0xff]  ;;  %v12924_v24 = vld [vmem:[#allocation9_spill] sm:$0xff] }
 0xe60   :  { %v6336_v17 = vsub.f32 -5.605802, %v6334_v49  ;;  %v12895_v49 = vld [vmem:[#allocation75_spill] sm:$0xff] }
 0xe61   :  { %v6339_v34 = vadd.f32 %v6335_v42, %v11716_v50  ;;  %v6337_v51 = vadd.f32 %v6335_v42, %v11710_v29  ;;  %v5160_v50 = vadd.f32 %v12881_v18, %v5136_v1  ;;  %v12882_v29 = vld [vmem:[#allocation96_spill] sm:$0xff]  ;;  %v5206_v15 = vadd.f32 %v12883_v2, %v5182_v58  ;;  %v12897_v42 = vld [vmem:[#allocation33_spill] sm:$0xff] }
 0xe62   :  { %v6340_v40 = vadd.f32 %v6336_v17, %v11719_v22  ;;  %v6338_v28 = vadd.f32 %v6336_v17, %v11713_v25  ;;  %v5352_v54 = vadd.f32 %v12882_v29, %v5328_v46  ;;  %v12885_v25 = vld [vmem:[#allocation113_spill] sm:$0xff]  ;;  %v5331_v53 = vadd.f32 %v12895_v49, %v5307_v30  ;;  %v12917_v30 = vld [vmem:[#allocation148_spill] sm:$0xff] }
 0xe63   :  { %v7450_v43 = vadd.f32 5.605802, %v6339_v34  ;;  %v7448_v41 = vadd.f32 5.605802, %v6337_v51  ;;  %v5115_v31 = vadd.f32 %v12885_v25, %v11752_v44  ;;  %v5184_v61 = vadd.f32 %v12889_v6, %v5160_v50  ;;  %v12902_v34 = vld [vmem:[#allocation60_spill] sm:$0xff]  ;;  %v12904_v58 = vld [vmem:[#allocation157_spill] sm:$0xff] }
 0xe64   :  { %v7451_v62 = vadd.f32 5.605802, %v6340_v40  ;;  %v7449_v23 = vadd.f32 5.605802, %v6338_v28  ;;  %v5376_v37 = vadd.f32 %v12890_v60, %v5352_v54  ;;  %v5230_v13 = vadd.f32 %v12891_v26, %v5206_v15  ;;  %v12903_v40 = vld [vmem:[#allocation28_spill] sm:$0xff]  ;;  %v12909_v18 = vld [vmem:[#allocation93_spill] sm:$0xff] }
 0xe65   :  { %v6349_v10 = vmul.f32 1.442695, %v7450_v43  ;;  %v6345_v16 = vmul.f32 1.442695, %v7448_v41  ;;  %v5139_v33 = vadd.f32 %v12892_v48, %v5115_v31  ;;  %v5429_v44 = vadd.f32 %v12896_v59, %v5405_v9  ;;  %v12905_v43 = vld [vmem:[#allocation58_spill] sm:$0xff]  ;;  %v12911_v54 = vld [vmem:[#allocation111_spill] sm:$0xff] }
 0xe66   :  { %v6351_v22 = vmul.f32 1.442695, %v7451_v62  ;;  %v6347_v7 = vmul.f32 1.442695, %v7449_v23  ;;  %v5208_v63 = vadd.f32 %v12897_v42, %v5184_v61  ;;  %v5254_v0 = vadd.f32 %v12899_v45, %v5230_v13  ;;  %v12907_v62 = vld [vmem:[#allocation52_spill] sm:$0xff]  ;;  %v12912_v2 = vld [vmem:[#allocation129_spill] sm:$0xff] }
 0xe67   :  { %7899 = vpow2.f32 %v6349_v10  ;;  %v5163_v17 = vadd.f32 %v12898_v12, %v5139_v33  ;;  %v5261_v1 = vadd.f32 %v12900_v8, %v5237_v39  ;;  %v5355_v46 = vadd.f32 %v12901_v47, %v5331_v53  ;;  %v12910_v10 = vld [vmem:[#allocation84_spill] sm:$0xff]  ;;  %v12914_v25 = vld [vmem:[#allocation142_spill] sm:$0xff]  ;;  %v12919_v6 = vld [vmem:[#allocation117_spill] sm:$0xff] }
 0xe68   :  { %7901 = vpow2.f32 %v6351_v22  ;;  %v5446_v51 = vadd.f32 %v12902_v34, %v5422_v55  ;;  %v5453_v19 = vadd.f32 %v12903_v40, %v5429_v44  ;;  %v5400_v21 = vadd.f32 %v12904_v58, %v5376_v37  ;;  %v12918_v9 = vld [vmem:[#allocation138_spill] sm:$0xff]  ;;  %v12920_v60 = vld [vmem:[#allocation120_spill] sm:$0xff]  ;;  %v12921_v26 = vld [vmem:[#allocation81_spill] sm:$0xff] }
 0xe69   :  { %7903 = vpow2.f32 %v6345_v16  ;;  %v5232_v20 = vadd.f32 %v12905_v43, %v5208_v63  ;;  %v5187_v41 = vadd.f32 %v12906_v32, %v5163_v17  ;;  %v5278_v27 = vadd.f32 %v12907_v62, %v5254_v0  ;;  %v12916_v16 = vld [vmem:[#allocation126_spill] sm:$0xff] }
 0xe6a   :  { %7905 = vpow2.f32 %v6347_v7  ;;  %v5285_v23 = vadd.f32 %v12908_v38, %v5261_v1  ;;  %v5379_v50 = vadd.f32 %v12909_v18, %v5355_v46  ;;  %v5470_v29 = vadd.f32 %v12910_v10, %v5446_v51  ;;  %v12922_v48 = vld [vmem:[#allocation150_spill] sm:$0xff] }
 0xe6b   :  { %v5477_v22 = vadd.f32 %v12911_v54, %v5453_v19  ;;  %v5424_v15 = vadd.f32 %v12912_v2, %v5400_v21  ;;  %v5256_v11 = vadd.f32 %v12913_v36, %v5232_v20  ;;  %v5211_v31 = vadd.f32 %v12914_v25, %v5187_v41 }
 0xe6c   :  { %v5403_v14 = vadd.f32 %v12916_v16, %v5379_v50 }
 0xe6d   :  { %v7900_v52 = vpop.eup %7899  ;;  %v5448_v35 = vadd.f32 %v12915_v5, %v5424_v15  ;;  %v5280_v56 = vadd.f32 %v12917_v30, %v5256_v11  ;;  %v5235_v7 = vadd.f32 %v12918_v9, %v5211_v31 }
 0xe6e   :  { %v7902_v3 = vpop.eup %7901  ;;  %6367 = vmatpush.xpose.msra.mxu0 %v7900_v52  ;;  %7640 = vmatpush.xpose.msrb.mxu1 %v7900_v52  ;;  %v5427_v37 = vadd.f32 %v12920_v60, %v5403_v14 }
 0xe6f   :  { %6396 = vmatpush.xpose.msra.mxu2 %v7902_v3  ;;  %7642 = vmatpush.xpose.msrb.mxu3 %v7902_v3  ;;  %v7904_v57 = vpop.eup %7903  ;;  %v5472_v61 = vadd.f32 %v12919_v6, %v5448_v35  ;;  %v5259_v13 = vadd.f32 %v12921_v26, %v5235_v7 }
 0xe70   :  { %v7906_v28 = vpop.eup %7905  ;;  %v5451_v33 = vadd.f32 %v12922_v48, %v5427_v37 }
 0xe71   :  { %v5283_v39 = vadd.f32 %v12923_v4, %v5259_v13 }
 0xe72   :  { %6368 = vmatpush.xpose.msra.mxu0 %v7904_v57  ;;  %7641 = vmatpush.xpose.msrb.mxu1 %v7904_v57  ;;  %v5475_v55 = vadd.f32 %v12924_v24, %v5451_v33 }
 0xe73   :  { %6397 = vmatpush.xpose.msra.mxu2 %v7906_v28  ;;  %7643 = vmatpush.xpose.msrb.mxu3 %v7906_v28 }
 0xe75   :  { %6369 = vmatmul.f32.vlgmr.msra.gmra.mxu0 %v5278_v27  ;;  %6378 = vmatmul.f32.vlgmr.msrb.gmra.mxu1 %v5285_v23 }
 0xe76   :  { %6398 = vmatmul.f32.vlgmr.msra.gmra.mxu2 %v5470_v29  ;;  %6407 = vmatmul.f32.vlgmr.msrb.gmra.mxu3 %v5477_v22 }
 0xe7d   :  { %6372 = vmatmul.f32.gmra.mxu0 %v5280_v56 }
 0xe7e   :  { %6401 = vmatmul.f32.gmra.mxu2 %v5472_v61 }
 0xe85   :  { %6375 = vmatmul.f32.gmra.mxu0 %v5283_v39 }
 0xe86   :  { %6404 = vmatmul.f32.gmra.mxu2 %v5475_v55 }
 0xeac   :  { %v5893_v49 = vpop.f32.mrf.mxu1 }
 0xeb3   :  { %v5922_v53 = vpop.f32.mrf.mxu3 }
 0xeb4   :  { %v5896_v59 = vpop.f32.mrf.mxu1  ;;  %v5923_v63 = vadd.f32 %v5922_v53, %v5893_v49 }
 0xeb6   :  { %v5934_v45 = vmul.f32 %v5923_v63, %v5923_v63 }
 0xeb8   :  { %v5939_v46 = vsel %vm5938_vm2, %v5934_v45, 0.0 }
 0xebb   :  { %v5925_v44 = vpop.f32.mrf.mxu3 }
 0xebc   :  { %v5899_v52 = vpop.f32.mrf.mxu1  ;;  %v5926_v3 = vadd.f32 %v5925_v44, %v5896_v59 }
 0xebe   :  { %v5935_v17 = vmul.f32 %v5926_v3, %v5926_v3 }
 0xec0   :  { %v5940_v8 = vsel %vm5938_vm2, %v5935_v17, 0.0 }
 0xec1   :  { %v5941_v40 = vadd.f32 %v5940_v8, %v5939_v46 }
 0xec3   :  { %v5928_v42 = vpop.f32.mrf.mxu3 }
 0xec4   :  { %v5929_v12 = vadd.f32 %v5928_v42, %v5899_v52  ;;  %v5902_v1 = vpop.f32.mrf.mxu1 }
 0xec6   :  { %v5936_v0 = vmul.f32 %v5929_v12, %v5929_v12 }
 0xec8   :  { %v5942_v34 = vsel %vm5938_vm2, %v5936_v0, 0.0 }
 0xec9   :  { %v5943_v58 = vadd.f32 %v5942_v34, %v5941_v40 }
 0xecb   :  { %v5931_v47 = vpop.f32.mrf.mxu3 }
 0xecc   :  { %v5932_v51 = vadd.f32 %v5931_v47, %v5902_v1 }
 0xece   :  { %v5937_v19 = vmul.f32 %v5932_v51, %v5932_v51 }
 0xed0   :  { %v5944_v21 = vsel %vm5938_vm2, %v5937_v19, 0.0 }
 0xed1   :  { %v5945_v57 = vadd.f32 %v5944_v21, %v5943_v58 }
 0xed3   :  { %v5946_v28 = vrot.slane %v5945_v57, 4 }
 0xed5   :  { %v5947_v43 = vadd.f32 %v5946_v28, %v5945_v57 }
 0xed7   :  { %v5948_v20 = vrot.slane %v5947_v43, 2 }
 0xed9   :  { %v5949_v32 = vadd.f32 %v5948_v20, %v5947_v43 }
 0xedb   :  { %v5950_v41 = vrot.slane %v5949_v32, 1 }
 0xedd   :  { %v5951_v62 = vadd.f32 %v5950_v41, %v5949_v32 }
 0xedf   :  { %v5952_v27 = vmax.f32 %v5951_v62, 1e-24 }
 0xee1   :  { %7907 = vrsqrt.f32 %v5952_v27  ;;  %vm5959_vm4 = vweird.f32 %v5952_v27 }
 0xee7   :  { %v7908_v38 = vpop.eup %7907 }
 0xee8   :  { %v5954_v23 = vmul.f32 %v7908_v38, %v5952_v27  ;;  %vm5960_vm3 = vweird.f32 %v7908_v38 }
 0xee9   :  { %vm5961_vm5 = vmor %vm5959_vm4, %vm5960_vm3 }
 0xeea   :  { %v5955_v18 = vmul.f32 %v7908_v38, %v5954_v23 }
 0xeec   :  { %v5956_v50 = vmul.f32 0.5, %v5955_v18 }
 0xeee   :  { %v5957_v10 = vsub.f32 1.5, %v5956_v50 }
 0xef0   :  { %v5958_v29 = vmul.f32 %v7908_v38, %v5957_v10 }
 0xef2   :  { %v5962_v54 = vsel %vm5961_vm5, %v7908_v38, %v5958_v29  ;;  %v6370_v11 = vpop.f32.mrf.mxu0  ;;  %v6379_v56 = vpop.f32.mrf.mxu1 }
 0xef3   :  { %v5963_v22 = vmul.f32 %v5962_v54, %v5923_v63  ;;  %v5964_v2 = vmul.f32 %v5962_v54, %v5926_v3  ;;  %v5965_v15 = vmul.f32 %v5962_v54, %v5929_v12  ;;  %v5966_v36 = vmul.f32 %v5962_v54, %v5932_v51 }
 0xef5   :  { %5967 = vst.msk [vmem:[%s11950_s5] sm:$0xff] %vm5938_vm2, %v5963_v22 }
 0xef6   :  { %5968 = vst.msk [vmem:[%s11950_s5 + $0x8] sm:$0xff] %vm5938_vm2, %v5964_v2 }
 0xef7   :  { %5969 = vst.msk [vmem:[%s11950_s5 + $0x10] sm:$0xff] %vm5938_vm2, %v5965_v15 }
 0xef8   :  { %5970 = vst.msk [vmem:[%s11950_s5 + $0x18] sm:$0xff] %vm5938_vm2, %v5966_v36 }
 0xef9   :  { %v6399_v25 = vpop.f32.mrf.mxu2  ;;  %v6408_v14 = vpop.f32.mrf.mxu3 }
 0xefa   :  { %v6373_v31 = vpop.f32.mrf.mxu0  ;;  %v6400_v16 = vadd.f32 %v6399_v25, %v6370_v11  ;;  %v6409_v7 = vadd.f32 %v6408_v14, %v6379_v56 }
 0xefc   :  { %v6411_v9 = vmul.f32 %v6400_v16, %v6400_v16  ;;  %v6414_v13 = vmul.f32 %v6409_v7, %v6409_v7 }
 0xefe   :  { %v6415_v26 = vsel %vm5938_vm2, %v6411_v9, 0.0  ;;  %v6420_v24 = vsel %vm5938_vm2, %v6414_v13, 0.0 }
 0xf01   :  { %v6402_v5 = vpop.f32.mrf.mxu2 }
 0xf02   :  { %v6403_v35 = vadd.f32 %v6402_v5, %v6373_v31  ;;  %v6376_v6 = vpop.f32.mrf.mxu0 }
 0xf04   :  { %v6412_v30 = vmul.f32 %v6403_v35, %v6403_v35 }
 0xf06   :  { %v6416_v60 = vsel %vm5938_vm2, %v6412_v30, 0.0 }
 0xf07   :  { %v6417_v33 = vadd.f32 %v6416_v60, %v6415_v26 }
 0xf09   :  { %v6405_v61 = vpop.f32.mrf.mxu2 }
 0xf0a   :  { %v6406_v37 = vadd.f32 %v6405_v61, %v6376_v6 }
 0xf0c   :  { %v6413_v48 = vmul.f32 %v6406_v37, %v6406_v37 }
 0xf0e   :  { %v6418_v4 = vsel %vm5938_vm2, %v6413_v48, 0.0 }
 0xf0f   :  { %v6419_v39 = vadd.f32 %v6418_v4, %v6417_v33 }
 0xf11   :  { %v6421_v55 = vadd.f32 %v6420_v24, %v6419_v39 }
 0xf13   :  { %v6422_v49 = vrot.slane %v6421_v55, 4 }
 0xf15   :  { %v6423_v53 = vadd.f32 %v6422_v49, %v6421_v55 }
 0xf17   :  { %v6424_v59 = vrot.slane %v6423_v53, 2 }
 0xf19   :  { %v6425_v44 = vadd.f32 %v6424_v59, %v6423_v53 }
 0xf1b   :  { %v6426_v52 = vrot.slane %v6425_v44, 1 }
 0xf1d   :  { %v6427_v3 = vadd.f32 %v6426_v52, %v6425_v44 }
 0xf1f   :  { %v6428_v42 = vmax.f32 %v6427_v3, 1e-24 }
 0xf21   :  { %7909 = vrsqrt.f32 %v6428_v42  ;;  %vm6435_vm7 = vweird.f32 %v6428_v42 }
 0xf27   :  { %v7910_v63 = vpop.eup %7909 }
 0xf28   :  { %v6430_v12 = vmul.f32 %v7910_v63, %v6428_v42  ;;  %vm6436_vm6 = vweird.f32 %v7910_v63 }
 0xf29   :  { %vm6437_vm8 = vmor %vm6435_vm7, %vm6436_vm6 }
 0xf2a   :  { %v6431_v17 = vmul.f32 %v7910_v63, %v6430_v12 }
 0xf2c   :  { %v6432_v45 = vmul.f32 0.5, %v6431_v17 }
 0xf2e   :  { %v6433_v0 = vsub.f32 1.5, %v6432_v45 }
 0xf30   :  { %v6434_v8 = vmul.f32 %v7910_v63, %v6433_v0 }
 0xf32   :  { %v6438_v1 = vsel %vm6437_vm8, %v7910_v63, %v6434_v8 }
 0xf33   :  { %v6439_v47 = vmul.f32 %v6438_v1, %v6400_v16  ;;  %v6440_v46 = vmul.f32 %v6438_v1, %v6403_v35  ;;  %v6441_v34 = vmul.f32 %v6438_v1, %v6406_v37  ;;  %v6442_v51 = vmul.f32 %v6438_v1, %v6409_v7 }
 0xf35   :  { %7452 = vst.msk [vmem:[%s11950_s5 + $0x20] sm:$0xff] %vm5938_vm2, %v6439_v47 }
 0xf36   :  { %7453 = vst.msk [vmem:[%s11950_s5 + $0x28] sm:$0xff] %vm5938_vm2, %v6440_v46 }
 0xf37   :  { %7454 = vst.msk [vmem:[%s11950_s5 + $0x30] sm:$0xff] %vm5938_vm2, %v6441_v34 }
 0xf38   :  { %7455 = vst.msk [vmem:[%s11950_s5 + $0x38] sm:$0xff] %vm5938_vm2, %v6442_v51 }

</bundles_post_ra>
